<compile_context>
chip_gen: v7x
topology: tpu7x:2x2x1
jax: 0.10.0
libtpu: 0.0.40
codegen_flags: <defaults>
</compile_context>

<pallas_src>
import jax
import jax.numpy as jnp
from jax.experimental import pallas as pl
from jax.experimental.pallas import tpu as pltpu

BASE = 16              # encoder per-direction hidden size ("base")
H = BASE
D = 2 * BASE           # lstm_dim = base*2 (key/value dim, decoder hidden dim)
VOCAB = 32             # vocab_dim
IN_DIM = 40            # fixed: Encoder.lstm1 = nn.LSTM(40, base)
MAX_LEN = 251          # eval-mode max_len hard-coded in Seq2Seq.forward


# -----------------------------------------------------------------------------
# Kernel 1: fused bidirectional LSTM layer (whole sequence resident in VMEM)
#   gates(t) = x[t] @ Wf + x[T-1-t] @ Wb + [h_f|h_b] @ Whh_blkdiag + b
#   -> one 128-lane gate slab per step covering both directions.
# -----------------------------------------------------------------------------
def _bilstm_kernel(x_ref, wf_ref, wb_ref, whh_ref, b_ref,
                   outf_ref, outb_ref, hfin_ref):
    T, B, _ = x_ref.shape
    nh2 = whh_ref.shape[0]          # 2H  (fwd|bwd concatenated hidden)
    nh = nh2 // 2                   # H   (per-direction hidden)

    wf = wf_ref[...]                # [Din, 8H]  (bwd gate columns are zero)
    wb = wb_ref[...]                # [Din, 8H]  (fwd gate columns are zero)
    whh = whh_ref[...]              # [2H, 8H]   block-diagonal recurrent weight
    b = b_ref[...]                  # [1, 8H]

    def body(s, carry):
        h, c = carry                                        # [B, 2H] each
        xf = x_ref[s]                                       # forward input, time s
        xb = x_ref[T - 1 - s]                               # backward input, time T-1-s
        g = (jnp.dot(xf, wf, preferred_element_type=jnp.float32)
             + jnp.dot(xb, wb, preferred_element_type=jnp.float32)
             + jnp.dot(h, whh, preferred_element_type=jnp.float32)
             + b)                                           # [B, 8H] (i,f,g,o blocks of 2H)
        i = jax.nn.sigmoid(g[:, 0 * nh2:1 * nh2])
        f = jax.nn.sigmoid(g[:, 1 * nh2:2 * nh2])
        gg = jnp.tanh(g[:, 2 * nh2:3 * nh2])
        o = jax.nn.sigmoid(g[:, 3 * nh2:4 * nh2])
        c_new = f * c + i * gg
        h_new = o * jnp.tanh(c_new)                         # [B, 2H] = [h_f | h_b]
        outf_ref[s] = h_new[:, 0:nh]                        # fwd output at time s
        outb_ref[T - 1 - s] = h_new[:, nh:nh2]              # bwd output at time T-1-s
        return h_new, c_new

    z = jnp.zeros((B, nh2), jnp.float32)
    h_fin, _ = jax.lax.fori_loop(0, T, body, (z, z), unroll=True)
    # h_fin = [h_fwd(T-1) | h_bwd(0)] == torch.cat([h_n[0], h_n[1]], dim=1)
    hfin_ref[...] = h_fin


def bilstm_layer(x, wf, wb, whh, bc):
    T, B, Din = x.shape
    nh2 = whh.shape[0]
    nh = nh2 // 2
    flops = T * 2 * B * (2 * Din * 4 * nh2 + nh2 * 4 * nh2)
    transc = T * B * 8 * nh2
    bytes_acc = 4 * (x.size + wf.size + wb.size + whh.size + bc.size
                     + 2 * T * B * nh + B * nh2)
    out_f, out_b, hfin = pl.pallas_call(
        _bilstm_kernel,
        out_shape=(jax.ShapeDtypeStruct((T, B, nh), jnp.float32),
                   jax.ShapeDtypeStruct((T, B, nh), jnp.float32),
                   jax.ShapeDtypeStruct((B, nh2), jnp.float32)),
        cost_estimate=pl.CostEstimate(flops=flops, transcendentals=transc,
                                      bytes_accessed=bytes_acc),
    )(x, wf, wb, whh, bc)
    return jnp.concatenate([out_f, out_b], axis=-1), hfin


# -----------------------------------------------------------------------------
# Kernel 2: fused key/value projections (fc1|fc2 concatenated) + SELU
# -----------------------------------------------------------------------------
def _kv_proj_kernel(x_ref, w_ref, b_ref, o_ref):
    y = jnp.dot(x_ref[...], w_ref[...], preferred_element_type=jnp.float32) + b_ref[...]
    alpha = 1.6732632423543772
    scale = 1.0507009873554805
    o_ref[...] = scale * jnp.where(y > 0, y, alpha * (jnp.exp(y) - 1.0))


def kv_proj(x2d, w, b):
    return pl.pallas_call(
        _kv_proj_kernel,
        out_shape=jax.ShapeDtypeStruct((x2d.shape[0], w.shape[1]), jnp.float32),
    )(x2d, w, b)


# -----------------------------------------------------------------------------
# Kernel 3: fused decoder — the full 251-step loop in ONE pallas_call
# -----------------------------------------------------------------------------
def _decoder_kernel(key_ref, value_ref, mask_ref, ench_ref,
                    embed_ref, embedT_ref, w1_ref, b1_ref, w2_ref, b2_ref,
                    fcb_ref, gumbel_ref, pred_ref, attn_ref):
    B, S, d = key_ref.shape
    V = embed_ref.shape[0]
    n_steps = gumbel_ref.shape[0]

    key = key_ref[...]              # [B, S, D]  (pre-transposed in the wrapper)
    value = value_ref[...]          # [B, S, D]
    mask = mask_ref[...]            # [B, S]
    embed = embed_ref[...]          # [V, D]
    embedT = embedT_ref[...]        # [D, V]   (tied decoder fc weight)
    w1 = w1_ref[...]                # [3D, 4D] = [wih1; whh1]
    b1 = b1_ref[...]
    w2 = w2_ref[...]                # [2D, 4D] = [wih2; whh2]
    b2 = b2_ref[...]
    fcb = fcb_ref[...]              # [1, V]
    iota_v = jax.lax.broadcasted_iota(jnp.int32, (B, V), 1)
    iota_f = iota_v.astype(jnp.float32)

    def lstm_gates(g, c):
        i = jax.nn.sigmoid(g[:, 0 * d:1 * d])
        f = jax.nn.sigmoid(g[:, 1 * d:2 * d])
        gg = jnp.tanh(g[:, 2 * d:3 * d])
        o = jax.nn.sigmoid(g[:, 3 * d:4 * d])
        c_new = f * c + i * gg
        return o * jnp.tanh(c_new), c_new

    def body(t, carry):
        h1, c1, h2, c2, h2a, onehot = carry

        # ---- Attention.  softmax -> mask -> renorm  ==  exp -> mask -> norm
        scores = jnp.sum(h2a[:, None, :] * key, axis=-1)                 # [B, S]
        scores = scores - jnp.max(scores, axis=1, keepdims=True)
        e = jnp.exp(scores) * mask
        attn = e * pl.reciprocal(jnp.sum(e, axis=1, keepdims=True), approx=True)
        attn_ref[t] = attn
        context = jnp.sum(attn[:, :, None] * value, axis=1)              # [B, D]

        # ---- Embedding (one-hot matmul) + two LSTMCells (fused [x|h] matmuls)
        emb = jnp.dot(onehot, embed, preferred_element_type=jnp.float32)  # [B, D]
        x1 = jnp.concatenate([emb, context, h1], axis=1)                  # [B, 3D]
        h1n, c1n = lstm_gates(
            jnp.dot(x1, w1, preferred_element_type=jnp.float32) + b1, c1)
        x2 = jnp.concatenate([h1n, h2], axis=1)                           # [B, 2D]
        h2n, c2n = lstm_gates(
            jnp.dot(x2, w2, preferred_element_type=jnp.float32) + b2, c2)

        # ---- Tied-weight output FC (decoder Dropout is a no-op in eval mode)
        logits = jnp.dot(h2n, embedT, preferred_element_type=jnp.float32) + fcb
        pred_ref[t] = logits                                              # pre-gumbel logits

        # ---- Gumbel-perturbed argmax -> next-word one-hot (first max wins)
        noisy = logits + gumbel_ref[t]
        m = jnp.max(noisy, axis=1, keepdims=True)
        idx = jnp.min(jnp.where(noisy == m, iota_f, float(V)),
                      axis=1, keepdims=True)
        onehot_n = (iota_f == idx).astype(jnp.float32)

        return h1n, c1n, h2n, c2n, h2n, onehot_n

    # first_step semantics: LSTM1/LSTM2 start from zero states; attention uses
    # the encoder hidden; the initial word is 0.
    z = jnp.zeros((B, d), jnp.float32)
    onehot0 = (iota_v == 0).astype(jnp.float32)
    jax.lax.fori_loop(0, n_steps, body, (z, z, z, z, ench_ref[...], onehot0))


def decoder_loop(key, value, mask, enc_h, embed, w1, b1, w2, b2, fcb, gumbel):
    B, S, d = key.shape
    V = embed.shape[0]
    T = gumbel.shape[0]
    flops = T * 2 * B * (3 * d * 4 * d + 2 * d * 4 * d + 2 * d * V)
    transc = T * B * (8 * d + S + 2)
    bytes_acc = 4 * (key.size + value.size + mask.size + enc_h.size
                     + 2 * embed.size + w1.size + b1.size + w2.size + b2.size
                     + fcb.size + gumbel.size + T * B * V + T * B * S)
    return pl.pallas_call(
        _decoder_kernel,
        out_shape=(jax.ShapeDtypeStruct((T, B, V), jnp.float32),   # prediction
                   jax.ShapeDtypeStruct((T, B, S), jnp.float32)),  # attention weights
        cost_estimate=pl.CostEstimate(flops=flops, transcendentals=transc,
                                      bytes_accessed=bytes_acc),
        compiler_params=pltpu.CompilerParams(vmem_limit_bytes=32 * 1024 * 1024),
    )(key, value, mask, enc_h, embed, embed.T, w1, b1, w2, b2, fcb, gumbel)


# -----------------------------------------------------------------------------
# Weight fusion helpers (one-time layout plumbing, done in the jitted wrapper)
# -----------------------------------------------------------------------------
def _fuse_bilstm_weights(p):
    """Per-direction (i,f,g,o) weights -> fused lane-dense 8H-wide layout."""
    din = p['wih_f'].shape[0]
    hh = p['whh_f'].shape[0]                     # H

    def gates(w):
        return [w[:, g * hh:(g + 1) * hh] for g in range(4)]

    zin = jnp.zeros((din, hh), jnp.float32)
    zh = jnp.zeros((hh, hh), jnp.float32)
    wf_g, wb_g = gates(p['wih_f']), gates(p['wih_b'])
    whf_g, whb_g = gates(p['whh_f']), gates(p['whh_b'])
    bf_g, bb_g = gates(p['b_f']), gates(p['b_b'])

    wf = jnp.concatenate([jnp.concatenate([wf_g[g], zin], 1) for g in range(4)], 1)
    wb = jnp.concatenate([jnp.concatenate([zin, wb_g[g]], 1) for g in range(4)], 1)
    top = jnp.concatenate([jnp.concatenate([whf_g[g], zh], 1) for g in range(4)], 1)
    bot = jnp.concatenate([jnp.concatenate([zh, whb_g[g]], 1) for g in range(4)], 1)
    whh = jnp.concatenate([top, bot], 0)         # [2H, 8H] block-diagonal
    bc = jnp.concatenate([jnp.concatenate([bf_g[g], bb_g[g]], 1) for g in range(4)], 1)
    return wf, wb, whh, bc


# -----------------------------------------------------------------------------
# Parameter init (deterministic, synthetic; biases zero like the module)
# -----------------------------------------------------------------------------
def _w(key, shape, fan_in):
    return (jax.random.normal(key, shape, jnp.float32) / jnp.sqrt(fan_in)).astype(jnp.float32)


def init_params(key):
    keys = jax.random.split(key, 32)
    ki = iter(keys)

    def bilstm_p(din):
        return dict(
            wih_f=_w(next(ki), (din, 4 * H), din),
            whh_f=_w(next(ki), (H, 4 * H), H),
            b_f=jnp.zeros((1, 4 * H), jnp.float32),
            wih_b=_w(next(ki), (din, 4 * H), din),
            whh_b=_w(next(ki), (H, 4 * H), H),
            b_b=jnp.zeros((1, 4 * H), jnp.float32),
        )

    return dict(
        lstm1=bilstm_p(IN_DIM),
        lstm2=bilstm_p(4 * BASE),
        lstm3=bilstm_p(4 * BASE),
        lstm4=bilstm_p(4 * BASE),
        fc1_w=_w(next(ki), (D, D), D), fc1_b=jnp.zeros((1, D), jnp.float32),
        fc2_w=_w(next(ki), (D, D), D), fc2_b=jnp.zeros((1, D), jnp.float32),
        embed=_w(next(ki), (VOCAB, D), D),                 # tied with decoder fc weight
        dec_wih1=_w(next(ki), (2 * D, 4 * D), 2 * D),
        dec_whh1=_w(next(ki), (D, 4 * D), D),
        dec_b1=jnp.zeros((1, 4 * D), jnp.float32),
        dec_wih2=_w(next(ki), (D, 4 * D), D),
        dec_whh2=_w(next(ki), (D, 4 * D), D),
        dec_b2=jnp.zeros((1, 4 * D), jnp.float32),
        fc_b=jnp.zeros((1, VOCAB), jnp.float32),
    )


# -----------------------------------------------------------------------------
# Full Seq2Seq forward (eval mode)
# -----------------------------------------------------------------------------
@jax.jit
def seq2seq_forward(params, inputs, gumbel):
    T, B, _ = inputs.shape

    def stride2(x):                                   # Encoder._stride2, eval mode
        tt = (x.shape[0] // 2) * 2
        x = x[:tt]
        x = jnp.transpose(x, (1, 0, 2))
        x = x.reshape(x.shape[0], x.shape[1] // 2, x.shape[2] * 2)
        return jnp.transpose(x, (1, 0, 2))

    # ---- Encoder (pyramidal BiLSTM), one fused Pallas kernel per layer ----
    x1, _ = bilstm_layer(inputs, *_fuse_bilstm_weights(params['lstm1']))
    x2, _ = bilstm_layer(stride2(x1), *_fuse_bilstm_weights(params['lstm2']))
    x3, _ = bilstm_layer(stride2(x2), *_fuse_bilstm_weights(params['lstm3']))
    x4, enc_hidden = bilstm_layer(stride2(x3), *_fuse_bilstm_weights(params['lstm4']))

    S = x4.shape[0]
    flat = x4.reshape(S * B, D)
    w_kv = jnp.concatenate([params['fc1_w'], params['fc2_w']], axis=1)   # [D, 2D]
    b_kv = jnp.concatenate([params['fc1_b'], params['fc2_b']], axis=1)   # [1, 2D]
    kv = kv_proj(flat, w_kv, b_kv).reshape(S, B, 2 * D)
    key = jnp.transpose(kv[:, :, :D], (1, 0, 2))       # [B, S, D]
    value = jnp.transpose(kv[:, :, D:], (1, 0, 2))     # [B, S, D]

    lens = jnp.full((B,), T // 8, jnp.int32)            # equal-length sequences
    mask = (jnp.arange(S)[None, :] < lens[:, None]).astype(jnp.float32)  # [B, S]

    # ---- Decoder: whole 251-step loop fused into one kernel ----
    w1 = jnp.concatenate([params['dec_wih1'], params['dec_whh1']], axis=0)  # [3D, 4D]
    w2 = jnp.concatenate([params['dec_wih2'], params['dec_whh2']], axis=0)  # [2D, 4D]
    prediction, attn_w = decoder_loop(
        key, value, mask, enc_hidden, params['embed'],
        w1, params['dec_b1'], w2, params['dec_b2'], params['fc_b'], gumbel)
    return prediction, attn_w


if __name__ == "__main__":
    root = jax.random.PRNGKey(0)
    k_param, k_in, k_g = jax.random.split(root, 3)
    params = init_params(k_param)

    B, T = 2, 16                                    # small demo shapes (T divisible by 8)
    inputs = jax.random.normal(k_in, (T, B, IN_DIM), jnp.float32)

    # Gumbel noise (Seq2Seq.sample_gumbel), precomputed deterministically.
    eps = 1e-10
    U = jax.random.uniform(k_g, (MAX_LEN, B, VOCAB), jnp.float32)
    gumbel = -jnp.log(eps - jnp.log(U + eps))

    pred, attn = seq2seq_forward(params, inputs, gumbel)
    jax.block_until_ready((pred, attn))
    assert pred.shape == (MAX_LEN, B, VOCAB)
    assert attn.shape == (MAX_LEN, B, T // 8)
    print("KERNEL_OK")
</pallas_src>

<mosaic_0001>
module attributes {stable_mosaic.version = 11 : i64} {
  func.func @_bilstm_kernel(%arg0: memref<16x2x40xf32, #tpu.memory_space<vmem>>, %arg1: memref<40x128xf32, #tpu.memory_space<vmem>>, %arg2: memref<40x128xf32, #tpu.memory_space<vmem>>, %arg3: memref<32x128xf32, #tpu.memory_space<vmem>>, %arg4: memref<1x128xf32, #tpu.memory_space<vmem>>, %arg5: memref<16x2x16xf32, #tpu.memory_space<vmem>>, %arg6: memref<16x2x16xf32, #tpu.memory_space<vmem>>, %arg7: memref<2x32xf32, #tpu.memory_space<vmem>>) attributes {dimension_semantics = [], scalar_prefetch = 0 : i64, scratch_operands = 0 : i64, tpu.core_type = #tpu.core_type<tc>} {
    %c0 = arith.constant 0 : index
    %c0_0 = arith.constant 0 : index
    %0 = vector.load %arg1[%c0, %c0_0] : memref<40x128xf32, #tpu.memory_space<vmem>>, vector<40x128xf32>
    %c0_1 = arith.constant 0 : index
    %c0_2 = arith.constant 0 : index
    %1 = vector.load %arg2[%c0_1, %c0_2] : memref<40x128xf32, #tpu.memory_space<vmem>>, vector<40x128xf32>
    %c0_3 = arith.constant 0 : index
    %c0_4 = arith.constant 0 : index
    %2 = vector.load %arg3[%c0_3, %c0_4] : memref<32x128xf32, #tpu.memory_space<vmem>>, vector<32x128xf32>
    %c0_5 = arith.constant 0 : index
    %c0_6 = arith.constant 0 : index
    %3 = vector.load %arg4[%c0_5, %c0_6] : memref<1x128xf32, #tpu.memory_space<vmem>>, vector<1x128xf32>
    %cst = arith.constant 0.000000e+00 : f32
    %4 = vector.broadcast %cst : f32 to vector<2x32xf32>
    %c0_i32 = arith.constant 0 : i32
    %5 = arith.index_cast %c0_i32 : i32 to index
    %c0_7 = arith.constant 0 : index
    %c0_8 = arith.constant 0 : index
    %6 = vector.load %arg0[%5, %c0_7, %c0_8] : memref<16x2x40xf32, #tpu.memory_space<vmem>>, vector<1x2x40xf32>
    %7 = vector.shape_cast %6 : vector<1x2x40xf32> to vector<2x40xf32>
    %c15_i32 = arith.constant 15 : i32
    %8 = arith.subi %c15_i32, %c0_i32 : i32
    %9 = arith.index_cast %8 : i32 to index
    %c0_9 = arith.constant 0 : index
    %c0_10 = arith.constant 0 : index
    %10 = vector.load %arg0[%9, %c0_9, %c0_10] : memref<16x2x40xf32, #tpu.memory_space<vmem>>, vector<1x2x40xf32>
    %11 = vector.shape_cast %10 : vector<1x2x40xf32> to vector<2x40xf32>
    %cst_11 = arith.constant dense<0.000000e+00> : vector<2x128xf32>
    %12 = tpu.matmul %7, %0, %cst_11 {dimension_numbers = #tpu.dot_dimension_numbers<[1], [0], [0], [1], [0, 0, 1, 1], [], []>} : vector<2x40xf32>, vector<40x128xf32>, vector<2x128xf32> -> vector<2x128xf32>
    %cst_12 = arith.constant dense<0.000000e+00> : vector<2x128xf32>
    %13 = tpu.matmul %11, %1, %cst_12 {dimension_numbers = #tpu.dot_dimension_numbers<[1], [0], [0], [1], [0, 0, 1, 1], [], []>} : vector<2x40xf32>, vector<40x128xf32>, vector<2x128xf32> -> vector<2x128xf32>
    %14 = arith.addf %12, %13 : vector<2x128xf32>
    %cst_13 = arith.constant dense<0.000000e+00> : vector<2x128xf32>
    %15 = tpu.matmul %4, %2, %cst_13 {dimension_numbers = #tpu.dot_dimension_numbers<[1], [0], [0], [1], [0, 0, 1, 1], [], []>} : vector<2x32xf32>, vector<32x128xf32>, vector<2x128xf32> -> vector<2x128xf32>
    %16 = arith.addf %14, %15 : vector<2x128xf32>
    %17 = vector.broadcast %3 : vector<1x128xf32> to vector<2x128xf32>
    %18 = arith.addf %16, %17 : vector<2x128xf32>
    %19 = vector.extract_strided_slice %18 {offsets = [0, 0], sizes = [2, 32], strides = [1, 1]} : vector<2x128xf32> to vector<2x32xf32>
    %20 = arith.negf %19 : vector<2x32xf32>
    %21 = math.exp %20 : vector<2x32xf32>
    %cst_14 = arith.constant 1.000000e+00 : f32
    %22 = vector.broadcast %cst_14 : f32 to vector<2x32xf32>
    %23 = arith.addf %22, %21 : vector<2x32xf32>
    %24 = arith.divf %22, %23 : vector<2x32xf32>
    %25 = vector.extract_strided_slice %18 {offsets = [0, 32], sizes = [2, 32], strides = [1, 1]} : vector<2x128xf32> to vector<2x32xf32>
    %26 = arith.negf %25 : vector<2x32xf32>
    %27 = math.exp %26 : vector<2x32xf32>
    %cst_15 = arith.constant 1.000000e+00 : f32
    %28 = vector.broadcast %cst_15 : f32 to vector<2x32xf32>
    %29 = arith.addf %28, %27 : vector<2x32xf32>
    %30 = arith.divf %28, %29 : vector<2x32xf32>
    %31 = vector.extract_strided_slice %18 {offsets = [0, 64], sizes = [2, 32], strides = [1, 1]} : vector<2x128xf32> to vector<2x32xf32>
    %32 = math.tanh %31 : vector<2x32xf32>
    %33 = vector.extract_strided_slice %18 {offsets = [0, 96], sizes = [2, 32], strides = [1, 1]} : vector<2x128xf32> to vector<2x32xf32>
    %34 = arith.negf %33 : vector<2x32xf32>
    %35 = math.exp %34 : vector<2x32xf32>
    %cst_16 = arith.constant 1.000000e+00 : f32
    %36 = vector.broadcast %cst_16 : f32 to vector<2x32xf32>
    %37 = arith.addf %36, %35 : vector<2x32xf32>
    %38 = arith.divf %36, %37 : vector<2x32xf32>
    %39 = arith.mulf %30, %4 : vector<2x32xf32>
    %40 = arith.mulf %24, %32 : vector<2x32xf32>
    %41 = arith.addf %39, %40 : vector<2x32xf32>
    %42 = math.tanh %41 : vector<2x32xf32>
    %43 = arith.mulf %38, %42 : vector<2x32xf32>
    %44 = vector.extract_strided_slice %43 {offsets = [0, 0], sizes = [2, 16], strides = [1, 1]} : vector<2x32xf32> to vector<2x16xf32>
    %45 = arith.index_cast %c0_i32 : i32 to index
    %c0_17 = arith.constant 0 : index
    %c0_18 = arith.constant 0 : index
    %46 = vector.load %arg5[%45, %c0_17, %c0_18] : memref<16x2x16xf32, #tpu.memory_space<vmem>>, vector<1x2x16xf32>
    %47 = vector.shape_cast %46 : vector<1x2x16xf32> to vector<2x16xf32>
    %48 = vector.shape_cast %44 : vector<2x16xf32> to vector<1x2x16xf32>
    tpu.vector_store %arg5[%45, %c0_17, %c0_18], %48 {strides = array<i32>} : memref<16x2x16xf32, #tpu.memory_space<vmem>>, vector<1x2x16xf32>,
    %49 = vector.extract_strided_slice %43 {offsets = [0, 16], sizes = [2, 16], strides = [1, 1]} : vector<2x32xf32> to vector<2x16xf32>
    %c15_i32_19 = arith.constant 15 : i32
    %50 = arith.subi %c15_i32_19, %c0_i32 : i32
    %51 = arith.index_cast %50 : i32 to index
    %c0_20 = arith.constant 0 : index
    %c0_21 = arith.constant 0 : index
    %52 = vector.load %arg6[%51, %c0_20, %c0_21] : memref<16x2x16xf32, #tpu.memory_space<vmem>>, vector<1x2x16xf32>
    %53 = vector.shape_cast %52 : vector<1x2x16xf32> to vector<2x16xf32>
    %54 = vector.shape_cast %49 : vector<2x16xf32> to vector<1x2x16xf32>
    tpu.vector_store %arg6[%51, %c0_20, %c0_21], %54 {strides = array<i32>} : memref<16x2x16xf32, #tpu.memory_space<vmem>>, vector<1x2x16xf32>,
    %c1_i32 = arith.constant 1 : i32
    %55 = arith.index_cast %c1_i32 : i32 to index
    %c0_22 = arith.constant 0 : index
    %c0_23 = arith.constant 0 : index
    %56 = vector.load %arg0[%55, %c0_22, %c0_23] : memref<16x2x40xf32, #tpu.memory_space<vmem>>, vector<1x2x40xf32>
    %57 = vector.shape_cast %56 : vector<1x2x40xf32> to vector<2x40xf32>
    %c15_i32_24 = arith.constant 15 : i32
    %58 = arith.subi %c15_i32_24, %c1_i32 : i32
    %59 = arith.index_cast %58 : i32 to index
    %c0_25 = arith.constant 0 : index
    %c0_26 = arith.constant 0 : index
    %60 = vector.load %arg0[%59, %c0_25, %c0_26] : memref<16x2x40xf32, #tpu.memory_space<vmem>>, vector<1x2x40xf32>
    %61 = vector.shape_cast %60 : vector<1x2x40xf32> to vector<2x40xf32>
    %cst_27 = arith.constant dense<0.000000e+00> : vector<2x128xf32>
    %62 = tpu.matmul %57, %0, %cst_27 {dimension_numbers = #tpu.dot_dimension_numbers<[1], [0], [0], [1], [0, 0, 1, 1], [], []>} : vector<2x40xf32>, vector<40x128xf32>, vector<2x128xf32> -> vector<2x128xf32>
    %cst_28 = arith.constant dense<0.000000e+00> : vector<2x128xf32>
    %63 = tpu.matmul %61, %1, %cst_28 {dimension_numbers = #tpu.dot_dimension_numbers<[1], [0], [0], [1], [0, 0, 1, 1], [], []>} : vector<2x40xf32>, vector<40x128xf32>, vector<2x128xf32> -> vector<2x128xf32>
    %64 = arith.addf %62, %63 : vector<2x128xf32>
    %cst_29 = arith.constant dense<0.000000e+00> : vector<2x128xf32>
    %65 = tpu.matmul %43, %2, %cst_29 {dimension_numbers = #tpu.dot_dimension_numbers<[1], [0], [0], [1], [0, 0, 1, 1], [], []>} : vector<2x32xf32>, vector<32x128xf32>, vector<2x128xf32> -> vector<2x128xf32>
    %66 = arith.addf %64, %65 : vector<2x128xf32>
    %67 = vector.broadcast %3 : vector<1x128xf32> to vector<2x128xf32>
    %68 = arith.addf %66, %67 : vector<2x128xf32>
    %69 = vector.extract_strided_slice %68 {offsets = [0, 0], sizes = [2, 32], strides = [1, 1]} : vector<2x128xf32> to vector<2x32xf32>
    %70 = arith.negf %69 : vector<2x32xf32>
    %71 = math.exp %70 : vector<2x32xf32>
    %cst_30 = arith.constant 1.000000e+00 : f32
    %72 = vector.broadcast %cst_30 : f32 to vector<2x32xf32>
    %73 = arith.addf %72, %71 : vector<2x32xf32>
    %74 = arith.divf %72, %73 : vector<2x32xf32>
    %75 = vector.extract_strided_slice %68 {offsets = [0, 32], sizes = [2, 32], strides = [1, 1]} : vector<2x128xf32> to vector<2x32xf32>
    %76 = arith.negf %75 : vector<2x32xf32>
    %77 = math.exp %76 : vector<2x32xf32>
    %cst_31 = arith.constant 1.000000e+00 : f32
    %78 = vector.broadcast %cst_31 : f32 to vector<2x32xf32>
    %79 = arith.addf %78, %77 : vector<2x32xf32>
    %80 = arith.divf %78, %79 : vector<2x32xf32>
    %81 = vector.extract_strided_slice %68 {offsets = [0, 64], sizes = [2, 32], strides = [1, 1]} : vector<2x128xf32> to vector<2x32xf32>
    %82 = math.tanh %81 : vector<2x32xf32>
    %83 = vector.extract_strided_slice %68 {offsets = [0, 96], sizes = [2, 32], strides = [1, 1]} : vector<2x128xf32> to vector<2x32xf32>
    %84 = arith.negf %83 : vector<2x32xf32>
    %85 = math.exp %84 : vector<2x32xf32>
    %cst_32 = arith.constant 1.000000e+00 : f32
    %86 = vector.broadcast %cst_32 : f32 to vector<2x32xf32>
    %87 = arith.addf %86, %85 : vector<2x32xf32>
    %88 = arith.divf %86, %87 : vector<2x32xf32>
    %89 = arith.mulf %80, %41 : vector<2x32xf32>
    %90 = arith.mulf %74, %82 : vector<2x32xf32>
    %91 = arith.addf %89, %90 : vector<2x32xf32>
    %92 = math.tanh %91 : vector<2x32xf32>
    %93 = arith.mulf %88, %92 : vector<2x32xf32>
    %94 = vector.extract_strided_slice %93 {offsets = [0, 0], sizes = [2, 16], strides = [1, 1]} : vector<2x32xf32> to vector<2x16xf32>
    %95 = arith.index_cast %c1_i32 : i32 to index
    %c0_33 = arith.constant 0 : index
    %c0_34 = arith.constant 0 : index
    %96 = vector.load %arg5[%95, %c0_33, %c0_34] : memref<16x2x16xf32, #tpu.memory_space<vmem>>, vector<1x2x16xf32>
    %97 = vector.shape_cast %96 : vector<1x2x16xf32> to vector<2x16xf32>
    %98 = vector.shape_cast %94 : vector<2x16xf32> to vector<1x2x16xf32>
    tpu.vector_store %arg5[%95, %c0_33, %c0_34], %98 {strides = array<i32>} : memref<16x2x16xf32, #tpu.memory_space<vmem>>, vector<1x2x16xf32>,
    %99 = vector.extract_strided_slice %93 {offsets = [0, 16], sizes = [2, 16], strides = [1, 1]} : vector<2x32xf32> to vector<2x16xf32>
    %c15_i32_35 = arith.constant 15 : i32
    %100 = arith.subi %c15_i32_35, %c1_i32 : i32
    %101 = arith.index_cast %100 : i32 to index
    %c0_36 = arith.constant 0 : index
    %c0_37 = arith.constant 0 : index
    %102 = vector.load %arg6[%101, %c0_36, %c0_37] : memref<16x2x16xf32, #tpu.memory_space<vmem>>, vector<1x2x16xf32>
    %103 = vector.shape_cast %102 : vector<1x2x16xf32> to vector<2x16xf32>
    %104 = vector.shape_cast %99 : vector<2x16xf32> to vector<1x2x16xf32>
    tpu.vector_store %arg6[%101, %c0_36, %c0_37], %104 {strides = array<i32>} : memref<16x2x16xf32, #tpu.memory_space<vmem>>, vector<1x2x16xf32>,
    %c2_i32 = arith.constant 2 : i32
    %105 = arith.index_cast %c2_i32 : i32 to index
    %c0_38 = arith.constant 0 : index
    %c0_39 = arith.constant 0 : index
    %106 = vector.load %arg0[%105, %c0_38, %c0_39] : memref<16x2x40xf32, #tpu.memory_space<vmem>>, vector<1x2x40xf32>
    %107 = vector.shape_cast %106 : vector<1x2x40xf32> to vector<2x40xf32>
    %c15_i32_40 = arith.constant 15 : i32
    %108 = arith.subi %c15_i32_40, %c2_i32 : i32
    %109 = arith.index_cast %108 : i32 to index
    %c0_41 = arith.constant 0 : index
    %c0_42 = arith.constant 0 : index
    %110 = vector.load %arg0[%109, %c0_41, %c0_42] : memref<16x2x40xf32, #tpu.memory_space<vmem>>, vector<1x2x40xf32>
    %111 = vector.shape_cast %110 : vector<1x2x40xf32> to vector<2x40xf32>
    %cst_43 = arith.constant dense<0.000000e+00> : vector<2x128xf32>
    %112 = tpu.matmul %107, %0, %cst_43 {dimension_numbers = #tpu.dot_dimension_numbers<[1], [0], [0], [1], [0, 0, 1, 1], [], []>} : vector<2x40xf32>, vector<40x128xf32>, vector<2x128xf32> -> vector<2x128xf32>
    %cst_44 = arith.constant dense<0.000000e+00> : vector<2x128xf32>
    %113 = tpu.matmul %111, %1, %cst_44 {dimension_numbers = #tpu.dot_dimension_numbers<[1], [0], [0], [1], [0, 0, 1, 1], [], []>} : vector<2x40xf32>, vector<40x128xf32>, vector<2x128xf32> -> vector<2x128xf32>
    %114 = arith.addf %112, %113 : vector<2x128xf32>
    %cst_45 = arith.constant dense<0.000000e+00> : vector<2x128xf32>
    %115 = tpu.matmul %93, %2, %cst_45 {dimension_numbers = #tpu.dot_dimension_numbers<[1], [0], [0], [1], [0, 0, 1, 1], [], []>} : vector<2x32xf32>, vector<32x128xf32>, vector<2x128xf32> -> vector<2x128xf32>
    %116 = arith.addf %114, %115 : vector<2x128xf32>
    %117 = vector.broadcast %3 : vector<1x128xf32> to vector<2x128xf32>
    %118 = arith.addf %116, %117 : vector<2x128xf32>
    %119 = vector.extract_strided_slice %118 {offsets = [0, 0], sizes = [2, 32], strides = [1, 1]} : vector<2x128xf32> to vector<2x32xf32>
    %120 = arith.negf %119 : vector<2x32xf32>
    %121 = math.exp %120 : vector<2x32xf32>
    %cst_46 = arith.constant 1.000000e+00 : f32
    %122 = vector.broadcast %cst_46 : f32 to vector<2x32xf32>
    %123 = arith.addf %122, %121 : vector<2x32xf32>
    %124 = arith.divf %122, %123 : vector<2x32xf32>
    %125 = vector.extract_strided_slice %118 {offsets = [0, 32], sizes = [2, 32], strides = [1, 1]} : vector<2x128xf32> to vector<2x32xf32>
    %126 = arith.negf %125 : vector<2x32xf32>
    %127 = math.exp %126 : vector<2x32xf32>
    %cst_47 = arith.constant 1.000000e+00 : f32
    %128 = vector.broadcast %cst_47 : f32 to vector<2x32xf32>
    %129 = arith.addf %128, %127 : vector<2x32xf32>
    %130 = arith.divf %128, %129 : vector<2x32xf32>
    %131 = vector.extract_strided_slice %118 {offsets = [0, 64], sizes = [2, 32], strides = [1, 1]} : vector<2x128xf32> to vector<2x32xf32>
    %132 = math.tanh %131 : vector<2x32xf32>
    %133 = vector.extract_strided_slice %118 {offsets = [0, 96], sizes = [2, 32], strides = [1, 1]} : vector<2x128xf32> to vector<2x32xf32>
    %134 = arith.negf %133 : vector<2x32xf32>
    %135 = math.exp %134 : vector<2x32xf32>
    %cst_48 = arith.constant 1.000000e+00 : f32
    %136 = vector.broadcast %cst_48 : f32 to vector<2x32xf32>
    %137 = arith.addf %136, %135 : vector<2x32xf32>
    %138 = arith.divf %136, %137 : vector<2x32xf32>
    %139 = arith.mulf %130, %91 : vector<2x32xf32>
    %140 = arith.mulf %124, %132 : vector<2x32xf32>
    %141 = arith.addf %139, %140 : vector<2x32xf32>
    %142 = math.tanh %141 : vector<2x32xf32>
    %143 = arith.mulf %138, %142 : vector<2x32xf32>
    %144 = vector.extract_strided_slice %143 {offsets = [0, 0], sizes = [2, 16], strides = [1, 1]} : vector<2x32xf32> to vector<2x16xf32>
    %145 = arith.index_cast %c2_i32 : i32 to index
    %c0_49 = arith.constant 0 : index
    %c0_50 = arith.constant 0 : index
    %146 = vector.load %arg5[%145, %c0_49, %c0_50] : memref<16x2x16xf32, #tpu.memory_space<vmem>>, vector<1x2x16xf32>
    %147 = vector.shape_cast %146 : vector<1x2x16xf32> to vector<2x16xf32>
    %148 = vector.shape_cast %144 : vector<2x16xf32> to vector<1x2x16xf32>
    tpu.vector_store %arg5[%145, %c0_49, %c0_50], %148 {strides = array<i32>} : memref<16x2x16xf32, #tpu.memory_space<vmem>>, vector<1x2x16xf32>,
    %149 = vector.extract_strided_slice %143 {offsets = [0, 16], sizes = [2, 16], strides = [1, 1]} : vector<2x32xf32> to vector<2x16xf32>
    %c15_i32_51 = arith.constant 15 : i32
    %150 = arith.subi %c15_i32_51, %c2_i32 : i32
    %151 = arith.index_cast %150 : i32 to index
    %c0_52 = arith.constant 0 : index
    %c0_53 = arith.constant 0 : index
    %152 = vector.load %arg6[%151, %c0_52, %c0_53] : memref<16x2x16xf32, #tpu.memory_space<vmem>>, vector<1x2x16xf32>
    %153 = vector.shape_cast %152 : vector<1x2x16xf32> to vector<2x16xf32>
    %154 = vector.shape_cast %149 : vector<2x16xf32> to vector<1x2x16xf32>
    tpu.vector_store %arg6[%151, %c0_52, %c0_53], %154 {strides = array<i32>} : memref<16x2x16xf32, #tpu.memory_space<vmem>>, vector<1x2x16xf32>,
    %c3_i32 = arith.constant 3 : i32
    %155 = arith.index_cast %c3_i32 : i32 to index
    %c0_54 = arith.constant 0 : index
    %c0_55 = arith.constant 0 : index
    %156 = vector.load %arg0[%155, %c0_54, %c0_55] : memref<16x2x40xf32, #tpu.memory_space<vmem>>, vector<1x2x40xf32>
    %157 = vector.shape_cast %156 : vector<1x2x40xf32> to vector<2x40xf32>
    %c15_i32_56 = arith.constant 15 : i32
    %158 = arith.subi %c15_i32_56, %c3_i32 : i32
    %159 = arith.index_cast %158 : i32 to index
    %c0_57 = arith.constant 0 : index
    %c0_58 = arith.constant 0 : index
    %160 = vector.load %arg0[%159, %c0_57, %c0_58] : memref<16x2x40xf32, #tpu.memory_space<vmem>>, vector<1x2x40xf32>
    %161 = vector.shape_cast %160 : vector<1x2x40xf32> to vector<2x40xf32>
    %cst_59 = arith.constant dense<0.000000e+00> : vector<2x128xf32>
    %162 = tpu.matmul %157, %0, %cst_59 {dimension_numbers = #tpu.dot_dimension_numbers<[1], [0], [0], [1], [0, 0, 1, 1], [], []>} : vector<2x40xf32>, vector<40x128xf32>, vector<2x128xf32> -> vector<2x128xf32>
    %cst_60 = arith.constant dense<0.000000e+00> : vector<2x128xf32>
    %163 = tpu.matmul %161, %1, %cst_60 {dimension_numbers = #tpu.dot_dimension_numbers<[1], [0], [0], [1], [0, 0, 1, 1], [], []>} : vector<2x40xf32>, vector<40x128xf32>, vector<2x128xf32> -> vector<2x128xf32>
    %164 = arith.addf %162, %163 : vector<2x128xf32>
    %cst_61 = arith.constant dense<0.000000e+00> : vector<2x128xf32>
    %165 = tpu.matmul %143, %2, %cst_61 {dimension_numbers = #tpu.dot_dimension_numbers<[1], [0], [0], [1], [0, 0, 1, 1], [], []>} : vector<2x32xf32>, vector<32x128xf32>, vector<2x128xf32> -> vector<2x128xf32>
    %166 = arith.addf %164, %165 : vector<2x128xf32>
    %167 = vector.broadcast %3 : vector<1x128xf32> to vector<2x128xf32>
    %168 = arith.addf %166, %167 : vector<2x128xf32>
    %169 = vector.extract_strided_slice %168 {offsets = [0, 0], sizes = [2, 32], strides = [1, 1]} : vector<2x128xf32> to vector<2x32xf32>
    %170 = arith.negf %169 : vector<2x32xf32>
    %171 = math.exp %170 : vector<2x32xf32>
    %cst_62 = arith.constant 1.000000e+00 : f32
    %172 = vector.broadcast %cst_62 : f32 to vector<2x32xf32>
    %173 = arith.addf %172, %171 : vector<2x32xf32>
    %174 = arith.divf %172, %173 : vector<2x32xf32>
    %175 = vector.extract_strided_slice %168 {offsets = [0, 32], sizes = [2, 32], strides = [1, 1]} : vector<2x128xf32> to vector<2x32xf32>
    %176 = arith.negf %175 : vector<2x32xf32>
    %177 = math.exp %176 : vector<2x32xf32>
    %cst_63 = arith.constant 1.000000e+00 : f32
    %178 = vector.broadcast %cst_63 : f32 to vector<2x32xf32>
    %179 = arith.addf %178, %177 : vector<2x32xf32>
    %180 = arith.divf %178, %179 : vector<2x32xf32>
    %181 = vector.extract_strided_slice %168 {offsets = [0, 64], sizes = [2, 32], strides = [1, 1]} : vector<2x128xf32> to vector<2x32xf32>
    %182 = math.tanh %181 : vector<2x32xf32>
    %183 = vector.extract_strided_slice %168 {offsets = [0, 96], sizes = [2, 32], strides = [1, 1]} : vector<2x128xf32> to vector<2x32xf32>
    %184 = arith.negf %183 : vector<2x32xf32>
    %185 = math.exp %184 : vector<2x32xf32>
    %cst_64 = arith.constant 1.000000e+00 : f32
    %186 = vector.broadcast %cst_64 : f32 to vector<2x32xf32>
    %187 = arith.addf %186, %185 : vector<2x32xf32>
    %188 = arith.divf %186, %187 : vector<2x32xf32>
    %189 = arith.mulf %180, %141 : vector<2x32xf32>
    %190 = arith.mulf %174, %182 : vector<2x32xf32>
    %191 = arith.addf %189, %190 : vector<2x32xf32>
    %192 = math.tanh %191 : vector<2x32xf32>
    %193 = arith.mulf %188, %192 : vector<2x32xf32>
    %194 = vector.extract_strided_slice %193 {offsets = [0, 0], sizes = [2, 16], strides = [1, 1]} : vector<2x32xf32> to vector<2x16xf32>
    %195 = arith.index_cast %c3_i32 : i32 to index
    %c0_65 = arith.constant 0 : index
    %c0_66 = arith.constant 0 : index
    %196 = vector.load %arg5[%195, %c0_65, %c0_66] : memref<16x2x16xf32, #tpu.memory_space<vmem>>, vector<1x2x16xf32>
    %197 = vector.shape_cast %196 : vector<1x2x16xf32> to vector<2x16xf32>
    %198 = vector.shape_cast %194 : vector<2x16xf32> to vector<1x2x16xf32>
    tpu.vector_store %arg5[%195, %c0_65, %c0_66], %198 {strides = array<i32>} : memref<16x2x16xf32, #tpu.memory_space<vmem>>, vector<1x2x16xf32>,
    %199 = vector.extract_strided_slice %193 {offsets = [0, 16], sizes = [2, 16], strides = [1, 1]} : vector<2x32xf32> to vector<2x16xf32>
    %c15_i32_67 = arith.constant 15 : i32
    %200 = arith.subi %c15_i32_67, %c3_i32 : i32
    %201 = arith.index_cast %200 : i32 to index
    %c0_68 = arith.constant 0 : index
    %c0_69 = arith.constant 0 : index
    %202 = vector.load %arg6[%201, %c0_68, %c0_69] : memref<16x2x16xf32, #tpu.memory_space<vmem>>, vector<1x2x16xf32>
    %203 = vector.shape_cast %202 : vector<1x2x16xf32> to vector<2x16xf32>
    %204 = vector.shape_cast %199 : vector<2x16xf32> to vector<1x2x16xf32>
    tpu.vector_store %arg6[%201, %c0_68, %c0_69], %204 {strides = array<i32>} : memref<16x2x16xf32, #tpu.memory_space<vmem>>, vector<1x2x16xf32>,
    %c4_i32 = arith.constant 4 : i32
    %205 = arith.index_cast %c4_i32 : i32 to index
    %c0_70 = arith.constant 0 : index
    %c0_71 = arith.constant 0 : index
    %206 = vector.load %arg0[%205, %c0_70, %c0_71] : memref<16x2x40xf32, #tpu.memory_space<vmem>>, vector<1x2x40xf32>
    %207 = vector.shape_cast %206 : vector<1x2x40xf32> to vector<2x40xf32>
    %c15_i32_72 = arith.constant 15 : i32
    %208 = arith.subi %c15_i32_72, %c4_i32 : i32
    %209 = arith.index_cast %208 : i32 to index
    %c0_73 = arith.constant 0 : index
    %c0_74 = arith.constant 0 : index
    %210 = vector.load %arg0[%209, %c0_73, %c0_74] : memref<16x2x40xf32, #tpu.memory_space<vmem>>, vector<1x2x40xf32>
    %211 = vector.shape_cast %210 : vector<1x2x40xf32> to vector<2x40xf32>
    %cst_75 = arith.constant dense<0.000000e+00> : vector<2x128xf32>
    %212 = tpu.matmul %207, %0, %cst_75 {dimension_numbers = #tpu.dot_dimension_numbers<[1], [0], [0], [1], [0, 0, 1, 1], [], []>} : vector<2x40xf32>, vector<40x128xf32>, vector<2x128xf32> -> vector<2x128xf32>
    %cst_76 = arith.constant dense<0.000000e+00> : vector<2x128xf32>
    %213 = tpu.matmul %211, %1, %cst_76 {dimension_numbers = #tpu.dot_dimension_numbers<[1], [0], [0], [1], [0, 0, 1, 1], [], []>} : vector<2x40xf32>, vector<40x128xf32>, vector<2x128xf32> -> vector<2x128xf32>
    %214 = arith.addf %212, %213 : vector<2x128xf32>
    %cst_77 = arith.constant dense<0.000000e+00> : vector<2x128xf32>
    %215 = tpu.matmul %193, %2, %cst_77 {dimension_numbers = #tpu.dot_dimension_numbers<[1], [0], [0], [1], [0, 0, 1, 1], [], []>} : vector<2x32xf32>, vector<32x128xf32>, vector<2x128xf32> -> vector<2x128xf32>
    %216 = arith.addf %214, %215 : vector<2x128xf32>
    %217 = vector.broadcast %3 : vector<1x128xf32> to vector<2x128xf32>
    %218 = arith.addf %216, %217 : vector<2x128xf32>
    %219 = vector.extract_strided_slice %218 {offsets = [0, 0], sizes = [2, 32], strides = [1, 1]} : vector<2x128xf32> to vector<2x32xf32>
    %220 = arith.negf %219 : vector<2x32xf32>
    %221 = math.exp %220 : vector<2x32xf32>
    %cst_78 = arith.constant 1.000000e+00 : f32
    %222 = vector.broadcast %cst_78 : f32 to vector<2x32xf32>
    %223 = arith.addf %222, %221 : vector<2x32xf32>
    %224 = arith.divf %222, %223 : vector<2x32xf32>
    %225 = vector.extract_strided_slice %218 {offsets = [0, 32], sizes = [2, 32], strides = [1, 1]} : vector<2x128xf32> to vector<2x32xf32>
    %226 = arith.negf %225 : vector<2x32xf32>
    %227 = math.exp %226 : vector<2x32xf32>
    %cst_79 = arith.constant 1.000000e+00 : f32
    %228 = vector.broadcast %cst_79 : f32 to vector<2x32xf32>
    %229 = arith.addf %228, %227 : vector<2x32xf32>
    %230 = arith.divf %228, %229 : vector<2x32xf32>
    %231 = vector.extract_strided_slice %218 {offsets = [0, 64], sizes = [2, 32], strides = [1, 1]} : vector<2x128xf32> to vector<2x32xf32>
    %232 = math.tanh %231 : vector<2x32xf32>
    %233 = vector.extract_strided_slice %218 {offsets = [0, 96], sizes = [2, 32], strides = [1, 1]} : vector<2x128xf32> to vector<2x32xf32>
    %234 = arith.negf %233 : vector<2x32xf32>
    %235 = math.exp %234 : vector<2x32xf32>
    %cst_80 = arith.constant 1.000000e+00 : f32
    %236 = vector.broadcast %cst_80 : f32 to vector<2x32xf32>
    %237 = arith.addf %236, %235 : vector<2x32xf32>
    %238 = arith.divf %236, %237 : vector<2x32xf32>
    %239 = arith.mulf %230, %191 : vector<2x32xf32>
    %240 = arith.mulf %224, %232 : vector<2x32xf32>
    %241 = arith.addf %239, %240 : vector<2x32xf32>
    %242 = math.tanh %241 : vector<2x32xf32>
    %243 = arith.mulf %238, %242 : vector<2x32xf32>
    %244 = vector.extract_strided_slice %243 {offsets = [0, 0], sizes = [2, 16], strides = [1, 1]} : vector<2x32xf32> to vector<2x16xf32>
    %245 = arith.index_cast %c4_i32 : i32 to index
    %c0_81 = arith.constant 0 : index
    %c0_82 = arith.constant 0 : index
    %246 = vector.load %arg5[%245, %c0_81, %c0_82] : memref<16x2x16xf32, #tpu.memory_space<vmem>>, vector<1x2x16xf32>
    %247 = vector.shape_cast %246 : vector<1x2x16xf32> to vector<2x16xf32>
    %248 = vector.shape_cast %244 : vector<2x16xf32> to vector<1x2x16xf32>
    tpu.vector_store %arg5[%245, %c0_81, %c0_82], %248 {strides = array<i32>} : memref<16x2x16xf32, #tpu.memory_space<vmem>>, vector<1x2x16xf32>,
    %249 = vector.extract_strided_slice %243 {offsets = [0, 16], sizes = [2, 16], strides = [1, 1]} : vector<2x32xf32> to vector<2x16xf32>
    %c15_i32_83 = arith.constant 15 : i32
    %250 = arith.subi %c15_i32_83, %c4_i32 : i32
    %251 = arith.index_cast %250 : i32 to index
    %c0_84 = arith.constant 0 : index
    %c0_85 = arith.constant 0 : index
    %252 = vector.load %arg6[%251, %c0_84, %c0_85] : memref<16x2x16xf32, #tpu.memory_space<vmem>>, vector<1x2x16xf32>
    %253 = vector.shape_cast %252 : vector<1x2x16xf32> to vector<2x16xf32>
    %254 = vector.shape_cast %249 : vector<2x16xf32> to vector<1x2x16xf32>
    tpu.vector_store %arg6[%251, %c0_84, %c0_85], %254 {strides = array<i32>} : memref<16x2x16xf32, #tpu.memory_space<vmem>>, vector<1x2x16xf32>,
    %c5_i32 = arith.constant 5 : i32
    %255 = arith.index_cast %c5_i32 : i32 to index
    %c0_86 = arith.constant 0 : index
    %c0_87 = arith.constant 0 : index
    %256 = vector.load %arg0[%255, %c0_86, %c0_87] : memref<16x2x40xf32, #tpu.memory_space<vmem>>, vector<1x2x40xf32>
    %257 = vector.shape_cast %256 : vector<1x2x40xf32> to vector<2x40xf32>
    %c15_i32_88 = arith.constant 15 : i32
    %258 = arith.subi %c15_i32_88, %c5_i32 : i32
    %259 = arith.index_cast %258 : i32 to index
    %c0_89 = arith.constant 0 : index
    %c0_90 = arith.constant 0 : index
    %260 = vector.load %arg0[%259, %c0_89, %c0_90] : memref<16x2x40xf32, #tpu.memory_space<vmem>>, vector<1x2x40xf32>
    %261 = vector.shape_cast %260 : vector<1x2x40xf32> to vector<2x40xf32>
    %cst_91 = arith.constant dense<0.000000e+00> : vector<2x128xf32>
    %262 = tpu.matmul %257, %0, %cst_91 {dimension_numbers = #tpu.dot_dimension_numbers<[1], [0], [0], [1], [0, 0, 1, 1], [], []>} : vector<2x40xf32>, vector<40x128xf32>, vector<2x128xf32> -> vector<2x128xf32>
    %cst_92 = arith.constant dense<0.000000e+00> : vector<2x128xf32>
    %263 = tpu.matmul %261, %1, %cst_92 {dimension_numbers = #tpu.dot_dimension_numbers<[1], [0], [0], [1], [0, 0, 1, 1], [], []>} : vector<2x40xf32>, vector<40x128xf32>, vector<2x128xf32> -> vector<2x128xf32>
    %264 = arith.addf %262, %263 : vector<2x128xf32>
    %cst_93 = arith.constant dense<0.000000e+00> : vector<2x128xf32>
    %265 = tpu.matmul %243, %2, %cst_93 {dimension_numbers = #tpu.dot_dimension_numbers<[1], [0], [0], [1], [0, 0, 1, 1], [], []>} : vector<2x32xf32>, vector<32x128xf32>, vector<2x128xf32> -> vector<2x128xf32>
    %266 = arith.addf %264, %265 : vector<2x128xf32>
    %267 = vector.broadcast %3 : vector<1x128xf32> to vector<2x128xf32>
    %268 = arith.addf %266, %267 : vector<2x128xf32>
    %269 = vector.extract_strided_slice %268 {offsets = [0, 0], sizes = [2, 32], strides = [1, 1]} : vector<2x128xf32> to vector<2x32xf32>
    %270 = arith.negf %269 : vector<2x32xf32>
    %271 = math.exp %270 : vector<2x32xf32>
    %cst_94 = arith.constant 1.000000e+00 : f32
    %272 = vector.broadcast %cst_94 : f32 to vector<2x32xf32>
    %273 = arith.addf %272, %271 : vector<2x32xf32>
    %274 = arith.divf %272, %273 : vector<2x32xf32>
    %275 = vector.extract_strided_slice %268 {offsets = [0, 32], sizes = [2, 32], strides = [1, 1]} : vector<2x128xf32> to vector<2x32xf32>
    %276 = arith.negf %275 : vector<2x32xf32>
    %277 = math.exp %276 : vector<2x32xf32>
    %cst_95 = arith.constant 1.000000e+00 : f32
    %278 = vector.broadcast %cst_95 : f32 to vector<2x32xf32>
    %279 = arith.addf %278, %277 : vector<2x32xf32>
    %280 = arith.divf %278, %279 : vector<2x32xf32>
    %281 = vector.extract_strided_slice %268 {offsets = [0, 64], sizes = [2, 32], strides = [1, 1]} : vector<2x128xf32> to vector<2x32xf32>
    %282 = math.tanh %281 : vector<2x32xf32>
    %283 = vector.extract_strided_slice %268 {offsets = [0, 96], sizes = [2, 32], strides = [1, 1]} : vector<2x128xf32> to vector<2x32xf32>
    %284 = arith.negf %283 : vector<2x32xf32>
    %285 = math.exp %284 : vector<2x32xf32>
    %cst_96 = arith.constant 1.000000e+00 : f32
    %286 = vector.broadcast %cst_96 : f32 to vector<2x32xf32>
    %287 = arith.addf %286, %285 : vector<2x32xf32>
    %288 = arith.divf %286, %287 : vector<2x32xf32>
    %289 = arith.mulf %280, %241 : vector<2x32xf32>
    %290 = arith.mulf %274, %282 : vector<2x32xf32>
    %291 = arith.addf %289, %290 : vector<2x32xf32>
    %292 = math.tanh %291 : vector<2x32xf32>
    %293 = arith.mulf %288, %292 : vector<2x32xf32>
    %294 = vector.extract_strided_slice %293 {offsets = [0, 0], sizes = [2, 16], strides = [1, 1]} : vector<2x32xf32> to vector<2x16xf32>
    %295 = arith.index_cast %c5_i32 : i32 to index
    %c0_97 = arith.constant 0 : index
    %c0_98 = arith.constant 0 : index
    %296 = vector.load %arg5[%295, %c0_97, %c0_98] : memref<16x2x16xf32, #tpu.memory_space<vmem>>, vector<1x2x16xf32>
    %297 = vector.shape_cast %296 : vector<1x2x16xf32> to vector<2x16xf32>
    %298 = vector.shape_cast %294 : vector<2x16xf32> to vector<1x2x16xf32>
    tpu.vector_store %arg5[%295, %c0_97, %c0_98], %298 {strides = array<i32>} : memref<16x2x16xf32, #tpu.memory_space<vmem>>, vector<1x2x16xf32>,
    %299 = vector.extract_strided_slice %293 {offsets = [0, 16], sizes = [2, 16], strides = [1, 1]} : vector<2x32xf32> to vector<2x16xf32>
    %c15_i32_99 = arith.constant 15 : i32
    %300 = arith.subi %c15_i32_99, %c5_i32 : i32
    %301 = arith.index_cast %300 : i32 to index
    %c0_100 = arith.constant 0 : index
    %c0_101 = arith.constant 0 : index
    %302 = vector.load %arg6[%301, %c0_100, %c0_101] : memref<16x2x16xf32, #tpu.memory_space<vmem>>, vector<1x2x16xf32>
    %303 = vector.shape_cast %302 : vector<1x2x16xf32> to vector<2x16xf32>
    %304 = vector.shape_cast %299 : vector<2x16xf32> to vector<1x2x16xf32>
    tpu.vector_store %arg6[%301, %c0_100, %c0_101], %304 {strides = array<i32>} : memref<16x2x16xf32, #tpu.memory_space<vmem>>, vector<1x2x16xf32>,
    %c6_i32 = arith.constant 6 : i32
    %305 = arith.index_cast %c6_i32 : i32 to index
    %c0_102 = arith.constant 0 : index
    %c0_103 = arith.constant 0 : index
    %306 = vector.load %arg0[%305, %c0_102, %c0_103] : memref<16x2x40xf32, #tpu.memory_space<vmem>>, vector<1x2x40xf32>
    %307 = vector.shape_cast %306 : vector<1x2x40xf32> to vector<2x40xf32>
    %c15_i32_104 = arith.constant 15 : i32
    %308 = arith.subi %c15_i32_104, %c6_i32 : i32
    %309 = arith.index_cast %308 : i32 to index
    %c0_105 = arith.constant 0 : index
    %c0_106 = arith.constant 0 : index
    %310 = vector.load %arg0[%309, %c0_105, %c0_106] : memref<16x2x40xf32, #tpu.memory_space<vmem>>, vector<1x2x40xf32>
    %311 = vector.shape_cast %310 : vector<1x2x40xf32> to vector<2x40xf32>
    %cst_107 = arith.constant dense<0.000000e+00> : vector<2x128xf32>
    %312 = tpu.matmul %307, %0, %cst_107 {dimension_numbers = #tpu.dot_dimension_numbers<[1], [0], [0], [1], [0, 0, 1, 1], [], []>} : vector<2x40xf32>, vector<40x128xf32>, vector<2x128xf32> -> vector<2x128xf32>
    %cst_108 = arith.constant dense<0.000000e+00> : vector<2x128xf32>
    %313 = tpu.matmul %311, %1, %cst_108 {dimension_numbers = #tpu.dot_dimension_numbers<[1], [0], [0], [1], [0, 0, 1, 1], [], []>} : vector<2x40xf32>, vector<40x128xf32>, vector<2x128xf32> -> vector<2x128xf32>
    %314 = arith.addf %312, %313 : vector<2x128xf32>
    %cst_109 = arith.constant dense<0.000000e+00> : vector<2x128xf32>
    %315 = tpu.matmul %293, %2, %cst_109 {dimension_numbers = #tpu.dot_dimension_numbers<[1], [0], [0], [1], [0, 0, 1, 1], [], []>} : vector<2x32xf32>, vector<32x128xf32>, vector<2x128xf32> -> vector<2x128xf32>
    %316 = arith.addf %314, %315 : vector<2x128xf32>
    %317 = vector.broadcast %3 : vector<1x128xf32> to vector<2x128xf32>
    %318 = arith.addf %316, %317 : vector<2x128xf32>
    %319 = vector.extract_strided_slice %318 {offsets = [0, 0], sizes = [2, 32], strides = [1, 1]} : vector<2x128xf32> to vector<2x32xf32>
    %320 = arith.negf %319 : vector<2x32xf32>
    %321 = math.exp %320 : vector<2x32xf32>
    %cst_110 = arith.constant 1.000000e+00 : f32
    %322 = vector.broadcast %cst_110 : f32 to vector<2x32xf32>
    %323 = arith.addf %322, %321 : vector<2x32xf32>
    %324 = arith.divf %322, %323 : vector<2x32xf32>
    %325 = vector.extract_strided_slice %318 {offsets = [0, 32], sizes = [2, 32], strides = [1, 1]} : vector<2x128xf32> to vector<2x32xf32>
    %326 = arith.negf %325 : vector<2x32xf32>
    %327 = math.exp %326 : vector<2x32xf32>
    %cst_111 = arith.constant 1.000000e+00 : f32
    %328 = vector.broadcast %cst_111 : f32 to vector<2x32xf32>
    %329 = arith.addf %328, %327 : vector<2x32xf32>
    %330 = arith.divf %328, %329 : vector<2x32xf32>
    %331 = vector.extract_strided_slice %318 {offsets = [0, 64], sizes = [2, 32], strides = [1, 1]} : vector<2x128xf32> to vector<2x32xf32>
    %332 = math.tanh %331 : vector<2x32xf32>
    %333 = vector.extract_strided_slice %318 {offsets = [0, 96], sizes = [2, 32], strides = [1, 1]} : vector<2x128xf32> to vector<2x32xf32>
    %334 = arith.negf %333 : vector<2x32xf32>
    %335 = math.exp %334 : vector<2x32xf32>
    %cst_112 = arith.constant 1.000000e+00 : f32
    %336 = vector.broadcast %cst_112 : f32 to vector<2x32xf32>
    %337 = arith.addf %336, %335 : vector<2x32xf32>
    %338 = arith.divf %336, %337 : vector<2x32xf32>
    %339 = arith.mulf %330, %291 : vector<2x32xf32>
    %340 = arith.mulf %324, %332 : vector<2x32xf32>
    %341 = arith.addf %339, %340 : vector<2x32xf32>
    %342 = math.tanh %341 : vector<2x32xf32>
    %343 = arith.mulf %338, %342 : vector<2x32xf32>
    %344 = vector.extract_strided_slice %343 {offsets = [0, 0], sizes = [2, 16], strides = [1, 1]} : vector<2x32xf32> to vector<2x16xf32>
    %345 = arith.index_cast %c6_i32 : i32 to index
    %c0_113 = arith.constant 0 : index
    %c0_114 = arith.constant 0 : index
    %346 = vector.load %arg5[%345, %c0_113, %c0_114] : memref<16x2x16xf32, #tpu.memory_space<vmem>>, vector<1x2x16xf32>
    %347 = vector.shape_cast %346 : vector<1x2x16xf32> to vector<2x16xf32>
    %348 = vector.shape_cast %344 : vector<2x16xf32> to vector<1x2x16xf32>
    tpu.vector_store %arg5[%345, %c0_113, %c0_114], %348 {strides = array<i32>} : memref<16x2x16xf32, #tpu.memory_space<vmem>>, vector<1x2x16xf32>,
    %349 = vector.extract_strided_slice %343 {offsets = [0, 16], sizes = [2, 16], strides = [1, 1]} : vector<2x32xf32> to vector<2x16xf32>
    %c15_i32_115 = arith.constant 15 : i32
    %350 = arith.subi %c15_i32_115, %c6_i32 : i32
    %351 = arith.index_cast %350 : i32 to index
    %c0_116 = arith.constant 0 : index
    %c0_117 = arith.constant 0 : index
    %352 = vector.load %arg6[%351, %c0_116, %c0_117] : memref<16x2x16xf32, #tpu.memory_space<vmem>>, vector<1x2x16xf32>
    %353 = vector.shape_cast %352 : vector<1x2x16xf32> to vector<2x16xf32>
    %354 = vector.shape_cast %349 : vector<2x16xf32> to vector<1x2x16xf32>
    tpu.vector_store %arg6[%351, %c0_116, %c0_117], %354 {strides = array<i32>} : memref<16x2x16xf32, #tpu.memory_space<vmem>>, vector<1x2x16xf32>,
    %c7_i32 = arith.constant 7 : i32
    %355 = arith.index_cast %c7_i32 : i32 to index
    %c0_118 = arith.constant 0 : index
    %c0_119 = arith.constant 0 : index
    %356 = vector.load %arg0[%355, %c0_118, %c0_119] : memref<16x2x40xf32, #tpu.memory_space<vmem>>, vector<1x2x40xf32>
    %357 = vector.shape_cast %356 : vector<1x2x40xf32> to vector<2x40xf32>
    %c15_i32_120 = arith.constant 15 : i32
    %358 = arith.subi %c15_i32_120, %c7_i32 : i32
    %359 = arith.index_cast %358 : i32 to index
    %c0_121 = arith.constant 0 : index
    %c0_122 = arith.constant 0 : index
    %360 = vector.load %arg0[%359, %c0_121, %c0_122] : memref<16x2x40xf32, #tpu.memory_space<vmem>>, vector<1x2x40xf32>
    %361 = vector.shape_cast %360 : vector<1x2x40xf32> to vector<2x40xf32>
    %cst_123 = arith.constant dense<0.000000e+00> : vector<2x128xf32>
    %362 = tpu.matmul %357, %0, %cst_123 {dimension_numbers = #tpu.dot_dimension_numbers<[1], [0], [0], [1], [0, 0, 1, 1], [], []>} : vector<2x40xf32>, vector<40x128xf32>, vector<2x128xf32> -> vector<2x128xf32>
    %cst_124 = arith.constant dense<0.000000e+00> : vector<2x128xf32>
    %363 = tpu.matmul %361, %1, %cst_124 {dimension_numbers = #tpu.dot_dimension_numbers<[1], [0], [0], [1], [0, 0, 1, 1], [], []>} : vector<2x40xf32>, vector<40x128xf32>, vector<2x128xf32> -> vector<2x128xf32>
    %364 = arith.addf %362, %363 : vector<2x128xf32>
    %cst_125 = arith.constant dense<0.000000e+00> : vector<2x128xf32>
    %365 = tpu.matmul %343, %2, %cst_125 {dimension_numbers = #tpu.dot_dimension_numbers<[1], [0], [0], [1], [0, 0, 1, 1], [], []>} : vector<2x32xf32>, vector<32x128xf32>, vector<2x128xf32> -> vector<2x128xf32>
    %366 = arith.addf %364, %365 : vector<2x128xf32>
    %367 = vector.broadcast %3 : vector<1x128xf32> to vector<2x128xf32>
    %368 = arith.addf %366, %367 : vector<2x128xf32>
    %369 = vector.extract_strided_slice %368 {offsets = [0, 0], sizes = [2, 32], strides = [1, 1]} : vector<2x128xf32> to vector<2x32xf32>
    %370 = arith.negf %369 : vector<2x32xf32>
    %371 = math.exp %370 : vector<2x32xf32>
    %cst_126 = arith.constant 1.000000e+00 : f32
    %372 = vector.broadcast %cst_126 : f32 to vector<2x32xf32>
    %373 = arith.addf %372, %371 : vector<2x32xf32>
    %374 = arith.divf %372, %373 : vector<2x32xf32>
    %375 = vector.extract_strided_slice %368 {offsets = [0, 32], sizes = [2, 32], strides = [1, 1]} : vector<2x128xf32> to vector<2x32xf32>
    %376 = arith.negf %375 : vector<2x32xf32>
    %377 = math.exp %376 : vector<2x32xf32>
    %cst_127 = arith.constant 1.000000e+00 : f32
    %378 = vector.broadcast %cst_127 : f32 to vector<2x32xf32>
    %379 = arith.addf %378, %377 : vector<2x32xf32>
    %380 = arith.divf %378, %379 : vector<2x32xf32>
    %381 = vector.extract_strided_slice %368 {offsets = [0, 64], sizes = [2, 32], strides = [1, 1]} : vector<2x128xf32> to vector<2x32xf32>
    %382 = math.tanh %381 : vector<2x32xf32>
    %383 = vector.extract_strided_slice %368 {offsets = [0, 96], sizes = [2, 32], strides = [1, 1]} : vector<2x128xf32> to vector<2x32xf32>
    %384 = arith.negf %383 : vector<2x32xf32>
    %385 = math.exp %384 : vector<2x32xf32>
    %cst_128 = arith.constant 1.000000e+00 : f32
    %386 = vector.broadcast %cst_128 : f32 to vector<2x32xf32>
    %387 = arith.addf %386, %385 : vector<2x32xf32>
    %388 = arith.divf %386, %387 : vector<2x32xf32>
    %389 = arith.mulf %380, %341 : vector<2x32xf32>
    %390 = arith.mulf %374, %382 : vector<2x32xf32>
    %391 = arith.addf %389, %390 : vector<2x32xf32>
    %392 = math.tanh %391 : vector<2x32xf32>
    %393 = arith.mulf %388, %392 : vector<2x32xf32>
    %394 = vector.extract_strided_slice %393 {offsets = [0, 0], sizes = [2, 16], strides = [1, 1]} : vector<2x32xf32> to vector<2x16xf32>
    %395 = arith.index_cast %c7_i32 : i32 to index
    %c0_129 = arith.constant 0 : index
    %c0_130 = arith.constant 0 : index
    %396 = vector.load %arg5[%395, %c0_129, %c0_130] : memref<16x2x16xf32, #tpu.memory_space<vmem>>, vector<1x2x16xf32>
    %397 = vector.shape_cast %396 : vector<1x2x16xf32> to vector<2x16xf32>
    %398 = vector.shape_cast %394 : vector<2x16xf32> to vector<1x2x16xf32>
    tpu.vector_store %arg5[%395, %c0_129, %c0_130], %398 {strides = array<i32>} : memref<16x2x16xf32, #tpu.memory_space<vmem>>, vector<1x2x16xf32>,
    %399 = vector.extract_strided_slice %393 {offsets = [0, 16], sizes = [2, 16], strides = [1, 1]} : vector<2x32xf32> to vector<2x16xf32>
    %c15_i32_131 = arith.constant 15 : i32
    %400 = arith.subi %c15_i32_131, %c7_i32 : i32
    %401 = arith.index_cast %400 : i32 to index
    %c0_132 = arith.constant 0 : index
    %c0_133 = arith.constant 0 : index
    %402 = vector.load %arg6[%401, %c0_132, %c0_133] : memref<16x2x16xf32, #tpu.memory_space<vmem>>, vector<1x2x16xf32>
    %403 = vector.shape_cast %402 : vector<1x2x16xf32> to vector<2x16xf32>
    %404 = vector.shape_cast %399 : vector<2x16xf32> to vector<1x2x16xf32>
    tpu.vector_store %arg6[%401, %c0_132, %c0_133], %404 {strides = array<i32>} : memref<16x2x16xf32, #tpu.memory_space<vmem>>, vector<1x2x16xf32>,
    %c8_i32 = arith.constant 8 : i32
    %405 = arith.index_cast %c8_i32 : i32 to index
    %c0_134 = arith.constant 0 : index
    %c0_135 = arith.constant 0 : index
    %406 = vector.load %arg0[%405, %c0_134, %c0_135] : memref<16x2x40xf32, #tpu.memory_space<vmem>>, vector<1x2x40xf32>
    %407 = vector.shape_cast %406 : vector<1x2x40xf32> to vector<2x40xf32>
    %c15_i32_136 = arith.constant 15 : i32
    %408 = arith.subi %c15_i32_136, %c8_i32 : i32
    %409 = arith.index_cast %408 : i32 to index
    %c0_137 = arith.constant 0 : index
    %c0_138 = arith.constant 0 : index
    %410 = vector.load %arg0[%409, %c0_137, %c0_138] : memref<16x2x40xf32, #tpu.memory_space<vmem>>, vector<1x2x40xf32>
    %411 = vector.shape_cast %410 : vector<1x2x40xf32> to vector<2x40xf32>
    %cst_139 = arith.constant dense<0.000000e+00> : vector<2x128xf32>
    %412 = tpu.matmul %407, %0, %cst_139 {dimension_numbers = #tpu.dot_dimension_numbers<[1], [0], [0], [1], [0, 0, 1, 1], [], []>} : vector<2x40xf32>, vector<40x128xf32>, vector<2x128xf32> -> vector<2x128xf32>
    %cst_140 = arith.constant dense<0.000000e+00> : vector<2x128xf32>
    %413 = tpu.matmul %411, %1, %cst_140 {dimension_numbers = #tpu.dot_dimension_numbers<[1], [0], [0], [1], [0, 0, 1, 1], [], []>} : vector<2x40xf32>, vector<40x128xf32>, vector<2x128xf32> -> vector<2x128xf32>
    %414 = arith.addf %412, %413 : vector<2x128xf32>
    %cst_141 = arith.constant dense<0.000000e+00> : vector<2x128xf32>
    %415 = tpu.matmul %393, %2, %cst_141 {dimension_numbers = #tpu.dot_dimension_numbers<[1], [0], [0], [1], [0, 0, 1, 1], [], []>} : vector<2x32xf32>, vector<32x128xf32>, vector<2x128xf32> -> vector<2x128xf32>
    %416 = arith.addf %414, %415 : vector<2x128xf32>
    %417 = vector.broadcast %3 : vector<1x128xf32> to vector<2x128xf32>
    %418 = arith.addf %416, %417 : vector<2x128xf32>
    %419 = vector.extract_strided_slice %418 {offsets = [0, 0], sizes = [2, 32], strides = [1, 1]} : vector<2x128xf32> to vector<2x32xf32>
    %420 = arith.negf %419 : vector<2x32xf32>
    %421 = math.exp %420 : vector<2x32xf32>
    %cst_142 = arith.constant 1.000000e+00 : f32
    %422 = vector.broadcast %cst_142 : f32 to vector<2x32xf32>
    %423 = arith.addf %422, %421 : vector<2x32xf32>
    %424 = arith.divf %422, %423 : vector<2x32xf32>
    %425 = vector.extract_strided_slice %418 {offsets = [0, 32], sizes = [2, 32], strides = [1, 1]} : vector<2x128xf32> to vector<2x32xf32>
    %426 = arith.negf %425 : vector<2x32xf32>
    %427 = math.exp %426 : vector<2x32xf32>
    %cst_143 = arith.constant 1.000000e+00 : f32
    %428 = vector.broadcast %cst_143 : f32 to vector<2x32xf32>
    %429 = arith.addf %428, %427 : vector<2x32xf32>
    %430 = arith.divf %428, %429 : vector<2x32xf32>
    %431 = vector.extract_strided_slice %418 {offsets = [0, 64], sizes = [2, 32], strides = [1, 1]} : vector<2x128xf32> to vector<2x32xf32>
    %432 = math.tanh %431 : vector<2x32xf32>
    %433 = vector.extract_strided_slice %418 {offsets = [0, 96], sizes = [2, 32], strides = [1, 1]} : vector<2x128xf32> to vector<2x32xf32>
    %434 = arith.negf %433 : vector<2x32xf32>
    %435 = math.exp %434 : vector<2x32xf32>
    %cst_144 = arith.constant 1.000000e+00 : f32
    %436 = vector.broadcast %cst_144 : f32 to vector<2x32xf32>
    %437 = arith.addf %436, %435 : vector<2x32xf32>
    %438 = arith.divf %436, %437 : vector<2x32xf32>
    %439 = arith.mulf %430, %391 : vector<2x32xf32>
    %440 = arith.mulf %424, %432 : vector<2x32xf32>
    %441 = arith.addf %439, %440 : vector<2x32xf32>
    %442 = math.tanh %441 : vector<2x32xf32>
    %443 = arith.mulf %438, %442 : vector<2x32xf32>
    %444 = vector.extract_strided_slice %443 {offsets = [0, 0], sizes = [2, 16], strides = [1, 1]} : vector<2x32xf32> to vector<2x16xf32>
    %445 = arith.index_cast %c8_i32 : i32 to index
    %c0_145 = arith.constant 0 : index
    %c0_146 = arith.constant 0 : index
    %446 = vector.load %arg5[%445, %c0_145, %c0_146] : memref<16x2x16xf32, #tpu.memory_space<vmem>>, vector<1x2x16xf32>
    %447 = vector.shape_cast %446 : vector<1x2x16xf32> to vector<2x16xf32>
    %448 = vector.shape_cast %444 : vector<2x16xf32> to vector<1x2x16xf32>
    tpu.vector_store %arg5[%445, %c0_145, %c0_146], %448 {strides = array<i32>} : memref<16x2x16xf32, #tpu.memory_space<vmem>>, vector<1x2x16xf32>,
    %449 = vector.extract_strided_slice %443 {offsets = [0, 16], sizes = [2, 16], strides = [1, 1]} : vector<2x32xf32> to vector<2x16xf32>
    %c15_i32_147 = arith.constant 15 : i32
    %450 = arith.subi %c15_i32_147, %c8_i32 : i32
    %451 = arith.index_cast %450 : i32 to index
    %c0_148 = arith.constant 0 : index
    %c0_149 = arith.constant 0 : index
    %452 = vector.load %arg6[%451, %c0_148, %c0_149] : memref<16x2x16xf32, #tpu.memory_space<vmem>>, vector<1x2x16xf32>
    %453 = vector.shape_cast %452 : vector<1x2x16xf32> to vector<2x16xf32>
    %454 = vector.shape_cast %449 : vector<2x16xf32> to vector<1x2x16xf32>
    tpu.vector_store %arg6[%451, %c0_148, %c0_149], %454 {strides = array<i32>} : memref<16x2x16xf32, #tpu.memory_space<vmem>>, vector<1x2x16xf32>,
    %c9_i32 = arith.constant 9 : i32
    %455 = arith.index_cast %c9_i32 : i32 to index
    %c0_150 = arith.constant 0 : index
    %c0_151 = arith.constant 0 : index
    %456 = vector.load %arg0[%455, %c0_150, %c0_151] : memref<16x2x40xf32, #tpu.memory_space<vmem>>, vector<1x2x40xf32>
    %457 = vector.shape_cast %456 : vector<1x2x40xf32> to vector<2x40xf32>
    %c15_i32_152 = arith.constant 15 : i32
    %458 = arith.subi %c15_i32_152, %c9_i32 : i32
    %459 = arith.index_cast %458 : i32 to index
    %c0_153 = arith.constant 0 : index
    %c0_154 = arith.constant 0 : index
    %460 = vector.load %arg0[%459, %c0_153, %c0_154] : memref<16x2x40xf32, #tpu.memory_space<vmem>>, vector<1x2x40xf32>
    %461 = vector.shape_cast %460 : vector<1x2x40xf32> to vector<2x40xf32>
    %cst_155 = arith.constant dense<0.000000e+00> : vector<2x128xf32>
    %462 = tpu.matmul %457, %0, %cst_155 {dimension_numbers = #tpu.dot_dimension_numbers<[1], [0], [0], [1], [0, 0, 1, 1], [], []>} : vector<2x40xf32>, vector<40x128xf32>, vector<2x128xf32> -> vector<2x128xf32>
    %cst_156 = arith.constant dense<0.000000e+00> : vector<2x128xf32>
    %463 = tpu.matmul %461, %1, %cst_156 {dimension_numbers = #tpu.dot_dimension_numbers<[1], [0], [0], [1], [0, 0, 1, 1], [], []>} : vector<2x40xf32>, vector<40x128xf32>, vector<2x128xf32> -> vector<2x128xf32>
    %464 = arith.addf %462, %463 : vector<2x128xf32>
    %cst_157 = arith.constant dense<0.000000e+00> : vector<2x128xf32>
    %465 = tpu.matmul %443, %2, %cst_157 {dimension_numbers = #tpu.dot_dimension_numbers<[1], [0], [0], [1], [0, 0, 1, 1], [], []>} : vector<2x32xf32>, vector<32x128xf32>, vector<2x128xf32> -> vector<2x128xf32>
    %466 = arith.addf %464, %465 : vector<2x128xf32>
    %467 = vector.broadcast %3 : vector<1x128xf32> to vector<2x128xf32>
    %468 = arith.addf %466, %467 : vector<2x128xf32>
    %469 = vector.extract_strided_slice %468 {offsets = [0, 0], sizes = [2, 32], strides = [1, 1]} : vector<2x128xf32> to vector<2x32xf32>
    %470 = arith.negf %469 : vector<2x32xf32>
    %471 = math.exp %470 : vector<2x32xf32>
    %cst_158 = arith.constant 1.000000e+00 : f32
    %472 = vector.broadcast %cst_158 : f32 to vector<2x32xf32>
    %473 = arith.addf %472, %471 : vector<2x32xf32>
    %474 = arith.divf %472, %473 : vector<2x32xf32>
    %475 = vector.extract_strided_slice %468 {offsets = [0, 32], sizes = [2, 32], strides = [1, 1]} : vector<2x128xf32> to vector<2x32xf32>
    %476 = arith.negf %475 : vector<2x32xf32>
    %477 = math.exp %476 : vector<2x32xf32>
    %cst_159 = arith.constant 1.000000e+00 : f32
    %478 = vector.broadcast %cst_159 : f32 to vector<2x32xf32>
    %479 = arith.addf %478, %477 : vector<2x32xf32>
    %480 = arith.divf %478, %479 : vector<2x32xf32>
    %481 = vector.extract_strided_slice %468 {offsets = [0, 64], sizes = [2, 32], strides = [1, 1]} : vector<2x128xf32> to vector<2x32xf32>
    %482 = math.tanh %481 : vector<2x32xf32>
    %483 = vector.extract_strided_slice %468 {offsets = [0, 96], sizes = [2, 32], strides = [1, 1]} : vector<2x128xf32> to vector<2x32xf32>
    %484 = arith.negf %483 : vector<2x32xf32>
    %485 = math.exp %484 : vector<2x32xf32>
    %cst_160 = arith.constant 1.000000e+00 : f32
    %486 = vector.broadcast %cst_160 : f32 to vector<2x32xf32>
    %487 = arith.addf %486, %485 : vector<2x32xf32>
    %488 = arith.divf %486, %487 : vector<2x32xf32>
    %489 = arith.mulf %480, %441 : vector<2x32xf32>
    %490 = arith.mulf %474, %482 : vector<2x32xf32>
    %491 = arith.addf %489, %490 : vector<2x32xf32>
    %492 = math.tanh %491 : vector<2x32xf32>
    %493 = arith.mulf %488, %492 : vector<2x32xf32>
    %494 = vector.extract_strided_slice %493 {offsets = [0, 0], sizes = [2, 16], strides = [1, 1]} : vector<2x32xf32> to vector<2x16xf32>
    %495 = arith.index_cast %c9_i32 : i32 to index
    %c0_161 = arith.constant 0 : index
    %c0_162 = arith.constant 0 : index
    %496 = vector.load %arg5[%495, %c0_161, %c0_162] : memref<16x2x16xf32, #tpu.memory_space<vmem>>, vector<1x2x16xf32>
    %497 = vector.shape_cast %496 : vector<1x2x16xf32> to vector<2x16xf32>
    %498 = vector.shape_cast %494 : vector<2x16xf32> to vector<1x2x16xf32>
    tpu.vector_store %arg5[%495, %c0_161, %c0_162], %498 {strides = array<i32>} : memref<16x2x16xf32, #tpu.memory_space<vmem>>, vector<1x2x16xf32>,
    %499 = vector.extract_strided_slice %493 {offsets = [0, 16], sizes = [2, 16], strides = [1, 1]} : vector<2x32xf32> to vector<2x16xf32>
    %c15_i32_163 = arith.constant 15 : i32
    %500 = arith.subi %c15_i32_163, %c9_i32 : i32
    %501 = arith.index_cast %500 : i32 to index
    %c0_164 = arith.constant 0 : index
    %c0_165 = arith.constant 0 : index
    %502 = vector.load %arg6[%501, %c0_164, %c0_165] : memref<16x2x16xf32, #tpu.memory_space<vmem>>, vector<1x2x16xf32>
    %503 = vector.shape_cast %502 : vector<1x2x16xf32> to vector<2x16xf32>
    %504 = vector.shape_cast %499 : vector<2x16xf32> to vector<1x2x16xf32>
    tpu.vector_store %arg6[%501, %c0_164, %c0_165], %504 {strides = array<i32>} : memref<16x2x16xf32, #tpu.memory_space<vmem>>, vector<1x2x16xf32>,
    %c10_i32 = arith.constant 10 : i32
    %505 = arith.index_cast %c10_i32 : i32 to index
    %c0_166 = arith.constant 0 : index
    %c0_167 = arith.constant 0 : index
    %506 = vector.load %arg0[%505, %c0_166, %c0_167] : memref<16x2x40xf32, #tpu.memory_space<vmem>>, vector<1x2x40xf32>
    %507 = vector.shape_cast %506 : vector<1x2x40xf32> to vector<2x40xf32>
    %c15_i32_168 = arith.constant 15 : i32
    %508 = arith.subi %c15_i32_168, %c10_i32 : i32
    %509 = arith.index_cast %508 : i32 to index
    %c0_169 = arith.constant 0 : index
    %c0_170 = arith.constant 0 : index
    %510 = vector.load %arg0[%509, %c0_169, %c0_170] : memref<16x2x40xf32, #tpu.memory_space<vmem>>, vector<1x2x40xf32>
    %511 = vector.shape_cast %510 : vector<1x2x40xf32> to vector<2x40xf32>
    %cst_171 = arith.constant dense<0.000000e+00> : vector<2x128xf32>
    %512 = tpu.matmul %507, %0, %cst_171 {dimension_numbers = #tpu.dot_dimension_numbers<[1], [0], [0], [1], [0, 0, 1, 1], [], []>} : vector<2x40xf32>, vector<40x128xf32>, vector<2x128xf32> -> vector<2x128xf32>
    %cst_172 = arith.constant dense<0.000000e+00> : vector<2x128xf32>
    %513 = tpu.matmul %511, %1, %cst_172 {dimension_numbers = #tpu.dot_dimension_numbers<[1], [0], [0], [1], [0, 0, 1, 1], [], []>} : vector<2x40xf32>, vector<40x128xf32>, vector<2x128xf32> -> vector<2x128xf32>
    %514 = arith.addf %512, %513 : vector<2x128xf32>
    %cst_173 = arith.constant dense<0.000000e+00> : vector<2x128xf32>
    %515 = tpu.matmul %493, %2, %cst_173 {dimension_numbers = #tpu.dot_dimension_numbers<[1], [0], [0], [1], [0, 0, 1, 1], [], []>} : vector<2x32xf32>, vector<32x128xf32>, vector<2x128xf32> -> vector<2x128xf32>
    %516 = arith.addf %514, %515 : vector<2x128xf32>
    %517 = vector.broadcast %3 : vector<1x128xf32> to vector<2x128xf32>
    %518 = arith.addf %516, %517 : vector<2x128xf32>
    %519 = vector.extract_strided_slice %518 {offsets = [0, 0], sizes = [2, 32], strides = [1, 1]} : vector<2x128xf32> to vector<2x32xf32>
    %520 = arith.negf %519 : vector<2x32xf32>
    %521 = math.exp %520 : vector<2x32xf32>
    %cst_174 = arith.constant 1.000000e+00 : f32
    %522 = vector.broadcast %cst_174 : f32 to vector<2x32xf32>
    %523 = arith.addf %522, %521 : vector<2x32xf32>
    %524 = arith.divf %522, %523 : vector<2x32xf32>
    %525 = vector.extract_strided_slice %518 {offsets = [0, 32], sizes = [2, 32], strides = [1, 1]} : vector<2x128xf32> to vector<2x32xf32>
    %526 = arith.negf %525 : vector<2x32xf32>
    %527 = math.exp %526 : vector<2x32xf32>
    %cst_175 = arith.constant 1.000000e+00 : f32
    %528 = vector.broadcast %cst_175 : f32 to vector<2x32xf32>
    %529 = arith.addf %528, %527 : vector<2x32xf32>
    %530 = arith.divf %528, %529 : vector<2x32xf32>
    %531 = vector.extract_strided_slice %518 {offsets = [0, 64], sizes = [2, 32], strides = [1, 1]} : vector<2x128xf32> to vector<2x32xf32>
    %532 = math.tanh %531 : vector<2x32xf32>
    %533 = vector.extract_strided_slice %518 {offsets = [0, 96], sizes = [2, 32], strides = [1, 1]} : vector<2x128xf32> to vector<2x32xf32>
    %534 = arith.negf %533 : vector<2x32xf32>
    %535 = math.exp %534 : vector<2x32xf32>
    %cst_176 = arith.constant 1.000000e+00 : f32
    %536 = vector.broadcast %cst_176 : f32 to vector<2x32xf32>
    %537 = arith.addf %536, %535 : vector<2x32xf32>
    %538 = arith.divf %536, %537 : vector<2x32xf32>
    %539 = arith.mulf %530, %491 : vector<2x32xf32>
    %540 = arith.mulf %524, %532 : vector<2x32xf32>
    %541 = arith.addf %539, %540 : vector<2x32xf32>
    %542 = math.tanh %541 : vector<2x32xf32>
    %543 = arith.mulf %538, %542 : vector<2x32xf32>
    %544 = vector.extract_strided_slice %543 {offsets = [0, 0], sizes = [2, 16], strides = [1, 1]} : vector<2x32xf32> to vector<2x16xf32>
    %545 = arith.index_cast %c10_i32 : i32 to index
    %c0_177 = arith.constant 0 : index
    %c0_178 = arith.constant 0 : index
    %546 = vector.load %arg5[%545, %c0_177, %c0_178] : memref<16x2x16xf32, #tpu.memory_space<vmem>>, vector<1x2x16xf32>
    %547 = vector.shape_cast %546 : vector<1x2x16xf32> to vector<2x16xf32>
    %548 = vector.shape_cast %544 : vector<2x16xf32> to vector<1x2x16xf32>
    tpu.vector_store %arg5[%545, %c0_177, %c0_178], %548 {strides = array<i32>} : memref<16x2x16xf32, #tpu.memory_space<vmem>>, vector<1x2x16xf32>,
    %549 = vector.extract_strided_slice %543 {offsets = [0, 16], sizes = [2, 16], strides = [1, 1]} : vector<2x32xf32> to vector<2x16xf32>
    %c15_i32_179 = arith.constant 15 : i32
    %550 = arith.subi %c15_i32_179, %c10_i32 : i32
    %551 = arith.index_cast %550 : i32 to index
    %c0_180 = arith.constant 0 : index
    %c0_181 = arith.constant 0 : index
    %552 = vector.load %arg6[%551, %c0_180, %c0_181] : memref<16x2x16xf32, #tpu.memory_space<vmem>>, vector<1x2x16xf32>
    %553 = vector.shape_cast %552 : vector<1x2x16xf32> to vector<2x16xf32>
    %554 = vector.shape_cast %549 : vector<2x16xf32> to vector<1x2x16xf32>
    tpu.vector_store %arg6[%551, %c0_180, %c0_181], %554 {strides = array<i32>} : memref<16x2x16xf32, #tpu.memory_space<vmem>>, vector<1x2x16xf32>,
    %c11_i32 = arith.constant 11 : i32
    %555 = arith.index_cast %c11_i32 : i32 to index
    %c0_182 = arith.constant 0 : index
    %c0_183 = arith.constant 0 : index
    %556 = vector.load %arg0[%555, %c0_182, %c0_183] : memref<16x2x40xf32, #tpu.memory_space<vmem>>, vector<1x2x40xf32>
    %557 = vector.shape_cast %556 : vector<1x2x40xf32> to vector<2x40xf32>
    %c15_i32_184 = arith.constant 15 : i32
    %558 = arith.subi %c15_i32_184, %c11_i32 : i32
    %559 = arith.index_cast %558 : i32 to index
    %c0_185 = arith.constant 0 : index
    %c0_186 = arith.constant 0 : index
    %560 = vector.load %arg0[%559, %c0_185, %c0_186] : memref<16x2x40xf32, #tpu.memory_space<vmem>>, vector<1x2x40xf32>
    %561 = vector.shape_cast %560 : vector<1x2x40xf32> to vector<2x40xf32>
    %cst_187 = arith.constant dense<0.000000e+00> : vector<2x128xf32>
    %562 = tpu.matmul %557, %0, %cst_187 {dimension_numbers = #tpu.dot_dimension_numbers<[1], [0], [0], [1], [0, 0, 1, 1], [], []>} : vector<2x40xf32>, vector<40x128xf32>, vector<2x128xf32> -> vector<2x128xf32>
    %cst_188 = arith.constant dense<0.000000e+00> : vector<2x128xf32>
    %563 = tpu.matmul %561, %1, %cst_188 {dimension_numbers = #tpu.dot_dimension_numbers<[1], [0], [0], [1], [0, 0, 1, 1], [], []>} : vector<2x40xf32>, vector<40x128xf32>, vector<2x128xf32> -> vector<2x128xf32>
    %564 = arith.addf %562, %563 : vector<2x128xf32>
    %cst_189 = arith.constant dense<0.000000e+00> : vector<2x128xf32>
    %565 = tpu.matmul %543, %2, %cst_189 {dimension_numbers = #tpu.dot_dimension_numbers<[1], [0], [0], [1], [0, 0, 1, 1], [], []>} : vector<2x32xf32>, vector<32x128xf32>, vector<2x128xf32> -> vector<2x128xf32>
    %566 = arith.addf %564, %565 : vector<2x128xf32>
    %567 = vector.broadcast %3 : vector<1x128xf32> to vector<2x128xf32>
    %568 = arith.addf %566, %567 : vector<2x128xf32>
    %569 = vector.extract_strided_slice %568 {offsets = [0, 0], sizes = [2, 32], strides = [1, 1]} : vector<2x128xf32> to vector<2x32xf32>
    %570 = arith.negf %569 : vector<2x32xf32>
    %571 = math.exp %570 : vector<2x32xf32>
    %cst_190 = arith.constant 1.000000e+00 : f32
    %572 = vector.broadcast %cst_190 : f32 to vector<2x32xf32>
    %573 = arith.addf %572, %571 : vector<2x32xf32>
    %574 = arith.divf %572, %573 : vector<2x32xf32>
    %575 = vector.extract_strided_slice %568 {offsets = [0, 32], sizes = [2, 32], strides = [1, 1]} : vector<2x128xf32> to vector<2x32xf32>
    %576 = arith.negf %575 : vector<2x32xf32>
    %577 = math.exp %576 : vector<2x32xf32>
    %cst_191 = arith.constant 1.000000e+00 : f32
    %578 = vector.broadcast %cst_191 : f32 to vector<2x32xf32>
    %579 = arith.addf %578, %577 : vector<2x32xf32>
    %580 = arith.divf %578, %579 : vector<2x32xf32>
    %581 = vector.extract_strided_slice %568 {offsets = [0, 64], sizes = [2, 32], strides = [1, 1]} : vector<2x128xf32> to vector<2x32xf32>
    %582 = math.tanh %581 : vector<2x32xf32>
    %583 = vector.extract_strided_slice %568 {offsets = [0, 96], sizes = [2, 32], strides = [1, 1]} : vector<2x128xf32> to vector<2x32xf32>
    %584 = arith.negf %583 : vector<2x32xf32>
    %585 = math.exp %584 : vector<2x32xf32>
    %cst_192 = arith.constant 1.000000e+00 : f32
    %586 = vector.broadcast %cst_192 : f32 to vector<2x32xf32>
    %587 = arith.addf %586, %585 : vector<2x32xf32>
    %588 = arith.divf %586, %587 : vector<2x32xf32>
    %589 = arith.mulf %580, %541 : vector<2x32xf32>
    %590 = arith.mulf %574, %582 : vector<2x32xf32>
    %591 = arith.addf %589, %590 : vector<2x32xf32>
    %592 = math.tanh %591 : vector<2x32xf32>
    %593 = arith.mulf %588, %592 : vector<2x32xf32>
    %594 = vector.extract_strided_slice %593 {offsets = [0, 0], sizes = [2, 16], strides = [1, 1]} : vector<2x32xf32> to vector<2x16xf32>
    %595 = arith.index_cast %c11_i32 : i32 to index
    %c0_193 = arith.constant 0 : index
    %c0_194 = arith.constant 0 : index
    %596 = vector.load %arg5[%595, %c0_193, %c0_194] : memref<16x2x16xf32, #tpu.memory_space<vmem>>, vector<1x2x16xf32>
    %597 = vector.shape_cast %596 : vector<1x2x16xf32> to vector<2x16xf32>
    %598 = vector.shape_cast %594 : vector<2x16xf32> to vector<1x2x16xf32>
    tpu.vector_store %arg5[%595, %c0_193, %c0_194], %598 {strides = array<i32>} : memref<16x2x16xf32, #tpu.memory_space<vmem>>, vector<1x2x16xf32>,
    %599 = vector.extract_strided_slice %593 {offsets = [0, 16], sizes = [2, 16], strides = [1, 1]} : vector<2x32xf32> to vector<2x16xf32>
    %c15_i32_195 = arith.constant 15 : i32
    %600 = arith.subi %c15_i32_195, %c11_i32 : i32
    %601 = arith.index_cast %600 : i32 to index
    %c0_196 = arith.constant 0 : index
    %c0_197 = arith.constant 0 : index
    %602 = vector.load %arg6[%601, %c0_196, %c0_197] : memref<16x2x16xf32, #tpu.memory_space<vmem>>, vector<1x2x16xf32>
    %603 = vector.shape_cast %602 : vector<1x2x16xf32> to vector<2x16xf32>
    %604 = vector.shape_cast %599 : vector<2x16xf32> to vector<1x2x16xf32>
    tpu.vector_store %arg6[%601, %c0_196, %c0_197], %604 {strides = array<i32>} : memref<16x2x16xf32, #tpu.memory_space<vmem>>, vector<1x2x16xf32>,
    %c12_i32 = arith.constant 12 : i32
    %605 = arith.index_cast %c12_i32 : i32 to index
    %c0_198 = arith.constant 0 : index
    %c0_199 = arith.constant 0 : index
    %606 = vector.load %arg0[%605, %c0_198, %c0_199] : memref<16x2x40xf32, #tpu.memory_space<vmem>>, vector<1x2x40xf32>
    %607 = vector.shape_cast %606 : vector<1x2x40xf32> to vector<2x40xf32>
    %c15_i32_200 = arith.constant 15 : i32
    %608 = arith.subi %c15_i32_200, %c12_i32 : i32
    %609 = arith.index_cast %608 : i32 to index
    %c0_201 = arith.constant 0 : index
    %c0_202 = arith.constant 0 : index
    %610 = vector.load %arg0[%609, %c0_201, %c0_202] : memref<16x2x40xf32, #tpu.memory_space<vmem>>, vector<1x2x40xf32>
    %611 = vector.shape_cast %610 : vector<1x2x40xf32> to vector<2x40xf32>
    %cst_203 = arith.constant dense<0.000000e+00> : vector<2x128xf32>
    %612 = tpu.matmul %607, %0, %cst_203 {dimension_numbers = #tpu.dot_dimension_numbers<[1], [0], [0], [1], [0, 0, 1, 1], [], []>} : vector<2x40xf32>, vector<40x128xf32>, vector<2x128xf32> -> vector<2x128xf32>
    %cst_204 = arith.constant dense<0.000000e+00> : vector<2x128xf32>
    %613 = tpu.matmul %611, %1, %cst_204 {dimension_numbers = #tpu.dot_dimension_numbers<[1], [0], [0], [1], [0, 0, 1, 1], [], []>} : vector<2x40xf32>, vector<40x128xf32>, vector<2x128xf32> -> vector<2x128xf32>
    %614 = arith.addf %612, %613 : vector<2x128xf32>
    %cst_205 = arith.constant dense<0.000000e+00> : vector<2x128xf32>
    %615 = tpu.matmul %593, %2, %cst_205 {dimension_numbers = #tpu.dot_dimension_numbers<[1], [0], [0], [1], [0, 0, 1, 1], [], []>} : vector<2x32xf32>, vector<32x128xf32>, vector<2x128xf32> -> vector<2x128xf32>
    %616 = arith.addf %614, %615 : vector<2x128xf32>
    %617 = vector.broadcast %3 : vector<1x128xf32> to vector<2x128xf32>
    %618 = arith.addf %616, %617 : vector<2x128xf32>
    %619 = vector.extract_strided_slice %618 {offsets = [0, 0], sizes = [2, 32], strides = [1, 1]} : vector<2x128xf32> to vector<2x32xf32>
    %620 = arith.negf %619 : vector<2x32xf32>
    %621 = math.exp %620 : vector<2x32xf32>
    %cst_206 = arith.constant 1.000000e+00 : f32
    %622 = vector.broadcast %cst_206 : f32 to vector<2x32xf32>
    %623 = arith.addf %622, %621 : vector<2x32xf32>
    %624 = arith.divf %622, %623 : vector<2x32xf32>
    %625 = vector.extract_strided_slice %618 {offsets = [0, 32], sizes = [2, 32], strides = [1, 1]} : vector<2x128xf32> to vector<2x32xf32>
    %626 = arith.negf %625 : vector<2x32xf32>
    %627 = math.exp %626 : vector<2x32xf32>
    %cst_207 = arith.constant 1.000000e+00 : f32
    %628 = vector.broadcast %cst_207 : f32 to vector<2x32xf32>
    %629 = arith.addf %628, %627 : vector<2x32xf32>
    %630 = arith.divf %628, %629 : vector<2x32xf32>
    %631 = vector.extract_strided_slice %618 {offsets = [0, 64], sizes = [2, 32], strides = [1, 1]} : vector<2x128xf32> to vector<2x32xf32>
    %632 = math.tanh %631 : vector<2x32xf32>
    %633 = vector.extract_strided_slice %618 {offsets = [0, 96], sizes = [2, 32], strides = [1, 1]} : vector<2x128xf32> to vector<2x32xf32>
    %634 = arith.negf %633 : vector<2x32xf32>
    %635 = math.exp %634 : vector<2x32xf32>
    %cst_208 = arith.constant 1.000000e+00 : f32
    %636 = vector.broadcast %cst_208 : f32 to vector<2x32xf32>
    %637 = arith.addf %636, %635 : vector<2x32xf32>
    %638 = arith.divf %636, %637 : vector<2x32xf32>
    %639 = arith.mulf %630, %591 : vector<2x32xf32>
    %640 = arith.mulf %624, %632 : vector<2x32xf32>
    %641 = arith.addf %639, %640 : vector<2x32xf32>
    %642 = math.tanh %641 : vector<2x32xf32>
    %643 = arith.mulf %638, %642 : vector<2x32xf32>
    %644 = vector.extract_strided_slice %643 {offsets = [0, 0], sizes = [2, 16], strides = [1, 1]} : vector<2x32xf32> to vector<2x16xf32>
    %645 = arith.index_cast %c12_i32 : i32 to index
    %c0_209 = arith.constant 0 : index
    %c0_210 = arith.constant 0 : index
    %646 = vector.load %arg5[%645, %c0_209, %c0_210] : memref<16x2x16xf32, #tpu.memory_space<vmem>>, vector<1x2x16xf32>
    %647 = vector.shape_cast %646 : vector<1x2x16xf32> to vector<2x16xf32>
    %648 = vector.shape_cast %644 : vector<2x16xf32> to vector<1x2x16xf32>
    tpu.vector_store %arg5[%645, %c0_209, %c0_210], %648 {strides = array<i32>} : memref<16x2x16xf32, #tpu.memory_space<vmem>>, vector<1x2x16xf32>,
    %649 = vector.extract_strided_slice %643 {offsets = [0, 16], sizes = [2, 16], strides = [1, 1]} : vector<2x32xf32> to vector<2x16xf32>
    %c15_i32_211 = arith.constant 15 : i32
    %650 = arith.subi %c15_i32_211, %c12_i32 : i32
    %651 = arith.index_cast %650 : i32 to index
    %c0_212 = arith.constant 0 : index
    %c0_213 = arith.constant 0 : index
    %652 = vector.load %arg6[%651, %c0_212, %c0_213] : memref<16x2x16xf32, #tpu.memory_space<vmem>>, vector<1x2x16xf32>
    %653 = vector.shape_cast %652 : vector<1x2x16xf32> to vector<2x16xf32>
    %654 = vector.shape_cast %649 : vector<2x16xf32> to vector<1x2x16xf32>
    tpu.vector_store %arg6[%651, %c0_212, %c0_213], %654 {strides = array<i32>} : memref<16x2x16xf32, #tpu.memory_space<vmem>>, vector<1x2x16xf32>,
    %c13_i32 = arith.constant 13 : i32
    %655 = arith.index_cast %c13_i32 : i32 to index
    %c0_214 = arith.constant 0 : index
    %c0_215 = arith.constant 0 : index
    %656 = vector.load %arg0[%655, %c0_214, %c0_215] : memref<16x2x40xf32, #tpu.memory_space<vmem>>, vector<1x2x40xf32>
    %657 = vector.shape_cast %656 : vector<1x2x40xf32> to vector<2x40xf32>
    %c15_i32_216 = arith.constant 15 : i32
    %658 = arith.subi %c15_i32_216, %c13_i32 : i32
    %659 = arith.index_cast %658 : i32 to index
    %c0_217 = arith.constant 0 : index
    %c0_218 = arith.constant 0 : index
    %660 = vector.load %arg0[%659, %c0_217, %c0_218] : memref<16x2x40xf32, #tpu.memory_space<vmem>>, vector<1x2x40xf32>
    %661 = vector.shape_cast %660 : vector<1x2x40xf32> to vector<2x40xf32>
    %cst_219 = arith.constant dense<0.000000e+00> : vector<2x128xf32>
    %662 = tpu.matmul %657, %0, %cst_219 {dimension_numbers = #tpu.dot_dimension_numbers<[1], [0], [0], [1], [0, 0, 1, 1], [], []>} : vector<2x40xf32>, vector<40x128xf32>, vector<2x128xf32> -> vector<2x128xf32>
    %cst_220 = arith.constant dense<0.000000e+00> : vector<2x128xf32>
    %663 = tpu.matmul %661, %1, %cst_220 {dimension_numbers = #tpu.dot_dimension_numbers<[1], [0], [0], [1], [0, 0, 1, 1], [], []>} : vector<2x40xf32>, vector<40x128xf32>, vector<2x128xf32> -> vector<2x128xf32>
    %664 = arith.addf %662, %663 : vector<2x128xf32>
    %cst_221 = arith.constant dense<0.000000e+00> : vector<2x128xf32>
    %665 = tpu.matmul %643, %2, %cst_221 {dimension_numbers = #tpu.dot_dimension_numbers<[1], [0], [0], [1], [0, 0, 1, 1], [], []>} : vector<2x32xf32>, vector<32x128xf32>, vector<2x128xf32> -> vector<2x128xf32>
    %666 = arith.addf %664, %665 : vector<2x128xf32>
    %667 = vector.broadcast %3 : vector<1x128xf32> to vector<2x128xf32>
    %668 = arith.addf %666, %667 : vector<2x128xf32>
    %669 = vector.extract_strided_slice %668 {offsets = [0, 0], sizes = [2, 32], strides = [1, 1]} : vector<2x128xf32> to vector<2x32xf32>
    %670 = arith.negf %669 : vector<2x32xf32>
    %671 = math.exp %670 : vector<2x32xf32>
    %cst_222 = arith.constant 1.000000e+00 : f32
    %672 = vector.broadcast %cst_222 : f32 to vector<2x32xf32>
    %673 = arith.addf %672, %671 : vector<2x32xf32>
    %674 = arith.divf %672, %673 : vector<2x32xf32>
    %675 = vector.extract_strided_slice %668 {offsets = [0, 32], sizes = [2, 32], strides = [1, 1]} : vector<2x128xf32> to vector<2x32xf32>
    %676 = arith.negf %675 : vector<2x32xf32>
    %677 = math.exp %676 : vector<2x32xf32>
    %cst_223 = arith.constant 1.000000e+00 : f32
    %678 = vector.broadcast %cst_223 : f32 to vector<2x32xf32>
    %679 = arith.addf %678, %677 : vector<2x32xf32>
    %680 = arith.divf %678, %679 : vector<2x32xf32>
    %681 = vector.extract_strided_slice %668 {offsets = [0, 64], sizes = [2, 32], strides = [1, 1]} : vector<2x128xf32> to vector<2x32xf32>
    %682 = math.tanh %681 : vector<2x32xf32>
    %683 = vector.extract_strided_slice %668 {offsets = [0, 96], sizes = [2, 32], strides = [1, 1]} : vector<2x128xf32> to vector<2x32xf32>
    %684 = arith.negf %683 : vector<2x32xf32>
    %685 = math.exp %684 : vector<2x32xf32>
    %cst_224 = arith.constant 1.000000e+00 : f32
    %686 = vector.broadcast %cst_224 : f32 to vector<2x32xf32>
    %687 = arith.addf %686, %685 : vector<2x32xf32>
    %688 = arith.divf %686, %687 : vector<2x32xf32>
    %689 = arith.mulf %680, %641 : vector<2x32xf32>
    %690 = arith.mulf %674, %682 : vector<2x32xf32>
    %691 = arith.addf %689, %690 : vector<2x32xf32>
    %692 = math.tanh %691 : vector<2x32xf32>
    %693 = arith.mulf %688, %692 : vector<2x32xf32>
    %694 = vector.extract_strided_slice %693 {offsets = [0, 0], sizes = [2, 16], strides = [1, 1]} : vector<2x32xf32> to vector<2x16xf32>
    %695 = arith.index_cast %c13_i32 : i32 to index
    %c0_225 = arith.constant 0 : index
    %c0_226 = arith.constant 0 : index
    %696 = vector.load %arg5[%695, %c0_225, %c0_226] : memref<16x2x16xf32, #tpu.memory_space<vmem>>, vector<1x2x16xf32>
    %697 = vector.shape_cast %696 : vector<1x2x16xf32> to vector<2x16xf32>
    %698 = vector.shape_cast %694 : vector<2x16xf32> to vector<1x2x16xf32>
    tpu.vector_store %arg5[%695, %c0_225, %c0_226], %698 {strides = array<i32>} : memref<16x2x16xf32, #tpu.memory_space<vmem>>, vector<1x2x16xf32>,
    %699 = vector.extract_strided_slice %693 {offsets = [0, 16], sizes = [2, 16], strides = [1, 1]} : vector<2x32xf32> to vector<2x16xf32>
    %c15_i32_227 = arith.constant 15 : i32
    %700 = arith.subi %c15_i32_227, %c13_i32 : i32
    %701 = arith.index_cast %700 : i32 to index
    %c0_228 = arith.constant 0 : index
    %c0_229 = arith.constant 0 : index
    %702 = vector.load %arg6[%701, %c0_228, %c0_229] : memref<16x2x16xf32, #tpu.memory_space<vmem>>, vector<1x2x16xf32>
    %703 = vector.shape_cast %702 : vector<1x2x16xf32> to vector<2x16xf32>
    %704 = vector.shape_cast %699 : vector<2x16xf32> to vector<1x2x16xf32>
    tpu.vector_store %arg6[%701, %c0_228, %c0_229], %704 {strides = array<i32>} : memref<16x2x16xf32, #tpu.memory_space<vmem>>, vector<1x2x16xf32>,
    %c14_i32 = arith.constant 14 : i32
    %705 = arith.index_cast %c14_i32 : i32 to index
    %c0_230 = arith.constant 0 : index
    %c0_231 = arith.constant 0 : index
    %706 = vector.load %arg0[%705, %c0_230, %c0_231] : memref<16x2x40xf32, #tpu.memory_space<vmem>>, vector<1x2x40xf32>
    %707 = vector.shape_cast %706 : vector<1x2x40xf32> to vector<2x40xf32>
    %c15_i32_232 = arith.constant 15 : i32
    %708 = arith.subi %c15_i32_232, %c14_i32 : i32
    %709 = arith.index_cast %708 : i32 to index
    %c0_233 = arith.constant 0 : index
    %c0_234 = arith.constant 0 : index
    %710 = vector.load %arg0[%709, %c0_233, %c0_234] : memref<16x2x40xf32, #tpu.memory_space<vmem>>, vector<1x2x40xf32>
    %711 = vector.shape_cast %710 : vector<1x2x40xf32> to vector<2x40xf32>
    %cst_235 = arith.constant dense<0.000000e+00> : vector<2x128xf32>
    %712 = tpu.matmul %707, %0, %cst_235 {dimension_numbers = #tpu.dot_dimension_numbers<[1], [0], [0], [1], [0, 0, 1, 1], [], []>} : vector<2x40xf32>, vector<40x128xf32>, vector<2x128xf32> -> vector<2x128xf32>
    %cst_236 = arith.constant dense<0.000000e+00> : vector<2x128xf32>
    %713 = tpu.matmul %711, %1, %cst_236 {dimension_numbers = #tpu.dot_dimension_numbers<[1], [0], [0], [1], [0, 0, 1, 1], [], []>} : vector<2x40xf32>, vector<40x128xf32>, vector<2x128xf32> -> vector<2x128xf32>
    %714 = arith.addf %712, %713 : vector<2x128xf32>
    %cst_237 = arith.constant dense<0.000000e+00> : vector<2x128xf32>
    %715 = tpu.matmul %693, %2, %cst_237 {dimension_numbers = #tpu.dot_dimension_numbers<[1], [0], [0], [1], [0, 0, 1, 1], [], []>} : vector<2x32xf32>, vector<32x128xf32>, vector<2x128xf32> -> vector<2x128xf32>
    %716 = arith.addf %714, %715 : vector<2x128xf32>
    %717 = vector.broadcast %3 : vector<1x128xf32> to vector<2x128xf32>
    %718 = arith.addf %716, %717 : vector<2x128xf32>
    %719 = vector.extract_strided_slice %718 {offsets = [0, 0], sizes = [2, 32], strides = [1, 1]} : vector<2x128xf32> to vector<2x32xf32>
    %720 = arith.negf %719 : vector<2x32xf32>
    %721 = math.exp %720 : vector<2x32xf32>
    %cst_238 = arith.constant 1.000000e+00 : f32
    %722 = vector.broadcast %cst_238 : f32 to vector<2x32xf32>
    %723 = arith.addf %722, %721 : vector<2x32xf32>
    %724 = arith.divf %722, %723 : vector<2x32xf32>
    %725 = vector.extract_strided_slice %718 {offsets = [0, 32], sizes = [2, 32], strides = [1, 1]} : vector<2x128xf32> to vector<2x32xf32>
    %726 = arith.negf %725 : vector<2x32xf32>
    %727 = math.exp %726 : vector<2x32xf32>
    %cst_239 = arith.constant 1.000000e+00 : f32
    %728 = vector.broadcast %cst_239 : f32 to vector<2x32xf32>
    %729 = arith.addf %728, %727 : vector<2x32xf32>
    %730 = arith.divf %728, %729 : vector<2x32xf32>
    %731 = vector.extract_strided_slice %718 {offsets = [0, 64], sizes = [2, 32], strides = [1, 1]} : vector<2x128xf32> to vector<2x32xf32>
    %732 = math.tanh %731 : vector<2x32xf32>
    %733 = vector.extract_strided_slice %718 {offsets = [0, 96], sizes = [2, 32], strides = [1, 1]} : vector<2x128xf32> to vector<2x32xf32>
    %734 = arith.negf %733 : vector<2x32xf32>
    %735 = math.exp %734 : vector<2x32xf32>
    %cst_240 = arith.constant 1.000000e+00 : f32
    %736 = vector.broadcast %cst_240 : f32 to vector<2x32xf32>
    %737 = arith.addf %736, %735 : vector<2x32xf32>
    %738 = arith.divf %736, %737 : vector<2x32xf32>
    %739 = arith.mulf %730, %691 : vector<2x32xf32>
    %740 = arith.mulf %724, %732 : vector<2x32xf32>
    %741 = arith.addf %739, %740 : vector<2x32xf32>
    %742 = math.tanh %741 : vector<2x32xf32>
    %743 = arith.mulf %738, %742 : vector<2x32xf32>
    %744 = vector.extract_strided_slice %743 {offsets = [0, 0], sizes = [2, 16], strides = [1, 1]} : vector<2x32xf32> to vector<2x16xf32>
    %745 = arith.index_cast %c14_i32 : i32 to index
    %c0_241 = arith.constant 0 : index
    %c0_242 = arith.constant 0 : index
    %746 = vector.load %arg5[%745, %c0_241, %c0_242] : memref<16x2x16xf32, #tpu.memory_space<vmem>>, vector<1x2x16xf32>
    %747 = vector.shape_cast %746 : vector<1x2x16xf32> to vector<2x16xf32>
    %748 = vector.shape_cast %744 : vector<2x16xf32> to vector<1x2x16xf32>
    tpu.vector_store %arg5[%745, %c0_241, %c0_242], %748 {strides = array<i32>} : memref<16x2x16xf32, #tpu.memory_space<vmem>>, vector<1x2x16xf32>,
    %749 = vector.extract_strided_slice %743 {offsets = [0, 16], sizes = [2, 16], strides = [1, 1]} : vector<2x32xf32> to vector<2x16xf32>
    %c15_i32_243 = arith.constant 15 : i32
    %750 = arith.subi %c15_i32_243, %c14_i32 : i32
    %751 = arith.index_cast %750 : i32 to index
    %c0_244 = arith.constant 0 : index
    %c0_245 = arith.constant 0 : index
    %752 = vector.load %arg6[%751, %c0_244, %c0_245] : memref<16x2x16xf32, #tpu.memory_space<vmem>>, vector<1x2x16xf32>
    %753 = vector.shape_cast %752 : vector<1x2x16xf32> to vector<2x16xf32>
    %754 = vector.shape_cast %749 : vector<2x16xf32> to vector<1x2x16xf32>
    tpu.vector_store %arg6[%751, %c0_244, %c0_245], %754 {strides = array<i32>} : memref<16x2x16xf32, #tpu.memory_space<vmem>>, vector<1x2x16xf32>,
    %c15_i32_246 = arith.constant 15 : i32
    %755 = arith.index_cast %c15_i32_246 : i32 to index
    %c0_247 = arith.constant 0 : index
    %c0_248 = arith.constant 0 : index
    %756 = vector.load %arg0[%755, %c0_247, %c0_248] : memref<16x2x40xf32, #tpu.memory_space<vmem>>, vector<1x2x40xf32>
    %757 = vector.shape_cast %756 : vector<1x2x40xf32> to vector<2x40xf32>
    %c15_i32_249 = arith.constant 15 : i32
    %758 = arith.subi %c15_i32_249, %c15_i32_246 : i32
    %759 = arith.index_cast %758 : i32 to index
    %c0_250 = arith.constant 0 : index
    %c0_251 = arith.constant 0 : index
    %760 = vector.load %arg0[%759, %c0_250, %c0_251] : memref<16x2x40xf32, #tpu.memory_space<vmem>>, vector<1x2x40xf32>
    %761 = vector.shape_cast %760 : vector<1x2x40xf32> to vector<2x40xf32>
    %cst_252 = arith.constant dense<0.000000e+00> : vector<2x128xf32>
    %762 = tpu.matmul %757, %0, %cst_252 {dimension_numbers = #tpu.dot_dimension_numbers<[1], [0], [0], [1], [0, 0, 1, 1], [], []>} : vector<2x40xf32>, vector<40x128xf32>, vector<2x128xf32> -> vector<2x128xf32>
    %cst_253 = arith.constant dense<0.000000e+00> : vector<2x128xf32>
    %763 = tpu.matmul %761, %1, %cst_253 {dimension_numbers = #tpu.dot_dimension_numbers<[1], [0], [0], [1], [0, 0, 1, 1], [], []>} : vector<2x40xf32>, vector<40x128xf32>, vector<2x128xf32> -> vector<2x128xf32>
    %764 = arith.addf %762, %763 : vector<2x128xf32>
    %cst_254 = arith.constant dense<0.000000e+00> : vector<2x128xf32>
    %765 = tpu.matmul %743, %2, %cst_254 {dimension_numbers = #tpu.dot_dimension_numbers<[1], [0], [0], [1], [0, 0, 1, 1], [], []>} : vector<2x32xf32>, vector<32x128xf32>, vector<2x128xf32> -> vector<2x128xf32>
    %766 = arith.addf %764, %765 : vector<2x128xf32>
    %767 = vector.broadcast %3 : vector<1x128xf32> to vector<2x128xf32>
    %768 = arith.addf %766, %767 : vector<2x128xf32>
    %769 = vector.extract_strided_slice %768 {offsets = [0, 0], sizes = [2, 32], strides = [1, 1]} : vector<2x128xf32> to vector<2x32xf32>
    %770 = arith.negf %769 : vector<2x32xf32>
    %771 = math.exp %770 : vector<2x32xf32>
    %cst_255 = arith.constant 1.000000e+00 : f32
    %772 = vector.broadcast %cst_255 : f32 to vector<2x32xf32>
    %773 = arith.addf %772, %771 : vector<2x32xf32>
    %774 = arith.divf %772, %773 : vector<2x32xf32>
    %775 = vector.extract_strided_slice %768 {offsets = [0, 32], sizes = [2, 32], strides = [1, 1]} : vector<2x128xf32> to vector<2x32xf32>
    %776 = arith.negf %775 : vector<2x32xf32>
    %777 = math.exp %776 : vector<2x32xf32>
    %cst_256 = arith.constant 1.000000e+00 : f32
    %778 = vector.broadcast %cst_256 : f32 to vector<2x32xf32>
    %779 = arith.addf %778, %777 : vector<2x32xf32>
    %780 = arith.divf %778, %779 : vector<2x32xf32>
    %781 = vector.extract_strided_slice %768 {offsets = [0, 64], sizes = [2, 32], strides = [1, 1]} : vector<2x128xf32> to vector<2x32xf32>
    %782 = math.tanh %781 : vector<2x32xf32>
    %783 = vector.extract_strided_slice %768 {offsets = [0, 96], sizes = [2, 32], strides = [1, 1]} : vector<2x128xf32> to vector<2x32xf32>
    %784 = arith.negf %783 : vector<2x32xf32>
    %785 = math.exp %784 : vector<2x32xf32>
    %cst_257 = arith.constant 1.000000e+00 : f32
    %786 = vector.broadcast %cst_257 : f32 to vector<2x32xf32>
    %787 = arith.addf %786, %785 : vector<2x32xf32>
    %788 = arith.divf %786, %787 : vector<2x32xf32>
    %789 = arith.mulf %780, %741 : vector<2x32xf32>
    %790 = arith.mulf %774, %782 : vector<2x32xf32>
    %791 = arith.addf %789, %790 : vector<2x32xf32>
    %792 = math.tanh %791 : vector<2x32xf32>
    %793 = arith.mulf %788, %792 : vector<2x32xf32>
    %794 = vector.extract_strided_slice %793 {offsets = [0, 0], sizes = [2, 16], strides = [1, 1]} : vector<2x32xf32> to vector<2x16xf32>
    %795 = arith.index_cast %c15_i32_246 : i32 to index
    %c0_258 = arith.constant 0 : index
    %c0_259 = arith.constant 0 : index
    %796 = vector.load %arg5[%795, %c0_258, %c0_259] : memref<16x2x16xf32, #tpu.memory_space<vmem>>, vector<1x2x16xf32>
    %797 = vector.shape_cast %796 : vector<1x2x16xf32> to vector<2x16xf32>
    %798 = vector.shape_cast %794 : vector<2x16xf32> to vector<1x2x16xf32>
    tpu.vector_store %arg5[%795, %c0_258, %c0_259], %798 {strides = array<i32>} : memref<16x2x16xf32, #tpu.memory_space<vmem>>, vector<1x2x16xf32>,
    %799 = vector.extract_strided_slice %793 {offsets = [0, 16], sizes = [2, 16], strides = [1, 1]} : vector<2x32xf32> to vector<2x16xf32>
    %c15_i32_260 = arith.constant 15 : i32
    %800 = arith.subi %c15_i32_260, %c15_i32_246 : i32
    %801 = arith.index_cast %800 : i32 to index
    %c0_261 = arith.constant 0 : index
    %c0_262 = arith.constant 0 : index
    %802 = vector.load %arg6[%801, %c0_261, %c0_262] : memref<16x2x16xf32, #tpu.memory_space<vmem>>, vector<1x2x16xf32>
    %803 = vector.shape_cast %802 : vector<1x2x16xf32> to vector<2x16xf32>
    %804 = vector.shape_cast %799 : vector<2x16xf32> to vector<1x2x16xf32>
    tpu.vector_store %arg6[%801, %c0_261, %c0_262], %804 {strides = array<i32>} : memref<16x2x16xf32, #tpu.memory_space<vmem>>, vector<1x2x16xf32>,
    %c16_i32 = arith.constant 16 : i32
    %c0_263 = arith.constant 0 : index
    %c0_264 = arith.constant 0 : index
    %805 = vector.load %arg7[%c0_263, %c0_264] : memref<2x32xf32, #tpu.memory_space<vmem>>, vector<2x32xf32>
    tpu.vector_store %arg7[%c0_263, %c0_264], %793 {strides = array<i32>} : memref<2x32xf32, #tpu.memory_space<vmem>>, vector<2x32xf32>,
    return
  }
}

module attributes {stable_mosaic.version = 11 : i64} {
  func.func @_bilstm_kernel(%arg0: memref<8x2x64xf32, #tpu.memory_space<vmem>>, %arg1: memref<64x128xf32, #tpu.memory_space<vmem>>, %arg2: memref<64x128xf32, #tpu.memory_space<vmem>>, %arg3: memref<32x128xf32, #tpu.memory_space<vmem>>, %arg4: memref<1x128xf32, #tpu.memory_space<vmem>>, %arg5: memref<8x2x16xf32, #tpu.memory_space<vmem>>, %arg6: memref<8x2x16xf32, #tpu.memory_space<vmem>>, %arg7: memref<2x32xf32, #tpu.memory_space<vmem>>) attributes {dimension_semantics = [], scalar_prefetch = 0 : i64, scratch_operands = 0 : i64, tpu.core_type = #tpu.core_type<tc>} {
    %c0 = arith.constant 0 : index
    %c0_0 = arith.constant 0 : index
    %0 = vector.load %arg1[%c0, %c0_0] : memref<64x128xf32, #tpu.memory_space<vmem>>, vector<64x128xf32>
    %c0_1 = arith.constant 0 : index
    %c0_2 = arith.constant 0 : index
    %1 = vector.load %arg2[%c0_1, %c0_2] : memref<64x128xf32, #tpu.memory_space<vmem>>, vector<64x128xf32>
    %c0_3 = arith.constant 0 : index
    %c0_4 = arith.constant 0 : index
    %2 = vector.load %arg3[%c0_3, %c0_4] : memref<32x128xf32, #tpu.memory_space<vmem>>, vector<32x128xf32>
    %c0_5 = arith.constant 0 : index
    %c0_6 = arith.constant 0 : index
    %3 = vector.load %arg4[%c0_5, %c0_6] : memref<1x128xf32, #tpu.memory_space<vmem>>, vector<1x128xf32>
    %cst = arith.constant 0.000000e+00 : f32
    %4 = vector.broadcast %cst : f32 to vector<2x32xf32>
    %c0_i32 = arith.constant 0 : i32
    %5 = arith.index_cast %c0_i32 : i32 to index
    %c0_7 = arith.constant 0 : index
    %c0_8 = arith.constant 0 : index
    %6 = vector.load %arg0[%5, %c0_7, %c0_8] : memref<8x2x64xf32, #tpu.memory_space<vmem>>, vector<1x2x64xf32>
    %7 = vector.shape_cast %6 : vector<1x2x64xf32> to vector<2x64xf32>
    %c7_i32 = arith.constant 7 : i32
    %8 = arith.subi %c7_i32, %c0_i32 : i32
    %9 = arith.index_cast %8 : i32 to index
    %c0_9 = arith.constant 0 : index
    %c0_10 = arith.constant 0 : index
    %10 = vector.load %arg0[%9, %c0_9, %c0_10] : memref<8x2x64xf32, #tpu.memory_space<vmem>>, vector<1x2x64xf32>
    %11 = vector.shape_cast %10 : vector<1x2x64xf32> to vector<2x64xf32>
    %cst_11 = arith.constant dense<0.000000e+00> : vector<2x128xf32>
    %12 = tpu.matmul %7, %0, %cst_11 {dimension_numbers = #tpu.dot_dimension_numbers<[1], [0], [0], [1], [0, 0, 1, 1], [], []>} : vector<2x64xf32>, vector<64x128xf32>, vector<2x128xf32> -> vector<2x128xf32>
    %cst_12 = arith.constant dense<0.000000e+00> : vector<2x128xf32>
    %13 = tpu.matmul %11, %1, %cst_12 {dimension_numbers = #tpu.dot_dimension_numbers<[1], [0], [0], [1], [0, 0, 1, 1], [], []>} : vector<2x64xf32>, vector<64x128xf32>, vector<2x128xf32> -> vector<2x128xf32>
    %14 = arith.addf %12, %13 : vector<2x128xf32>
    %cst_13 = arith.constant dense<0.000000e+00> : vector<2x128xf32>
    %15 = tpu.matmul %4, %2, %cst_13 {dimension_numbers = #tpu.dot_dimension_numbers<[1], [0], [0], [1], [0, 0, 1, 1], [], []>} : vector<2x32xf32>, vector<32x128xf32>, vector<2x128xf32> -> vector<2x128xf32>
    %16 = arith.addf %14, %15 : vector<2x128xf32>
    %17 = vector.broadcast %3 : vector<1x128xf32> to vector<2x128xf32>
    %18 = arith.addf %16, %17 : vector<2x128xf32>
    %19 = vector.extract_strided_slice %18 {offsets = [0, 0], sizes = [2, 32], strides = [1, 1]} : vector<2x128xf32> to vector<2x32xf32>
    %20 = arith.negf %19 : vector<2x32xf32>
    %21 = math.exp %20 : vector<2x32xf32>
    %cst_14 = arith.constant 1.000000e+00 : f32
    %22 = vector.broadcast %cst_14 : f32 to vector<2x32xf32>
    %23 = arith.addf %22, %21 : vector<2x32xf32>
    %24 = arith.divf %22, %23 : vector<2x32xf32>
    %25 = vector.extract_strided_slice %18 {offsets = [0, 32], sizes = [2, 32], strides = [1, 1]} : vector<2x128xf32> to vector<2x32xf32>
    %26 = arith.negf %25 : vector<2x32xf32>
    %27 = math.exp %26 : vector<2x32xf32>
    %cst_15 = arith.constant 1.000000e+00 : f32
    %28 = vector.broadcast %cst_15 : f32 to vector<2x32xf32>
    %29 = arith.addf %28, %27 : vector<2x32xf32>
    %30 = arith.divf %28, %29 : vector<2x32xf32>
    %31 = vector.extract_strided_slice %18 {offsets = [0, 64], sizes = [2, 32], strides = [1, 1]} : vector<2x128xf32> to vector<2x32xf32>
    %32 = math.tanh %31 : vector<2x32xf32>
    %33 = vector.extract_strided_slice %18 {offsets = [0, 96], sizes = [2, 32], strides = [1, 1]} : vector<2x128xf32> to vector<2x32xf32>
    %34 = arith.negf %33 : vector<2x32xf32>
    %35 = math.exp %34 : vector<2x32xf32>
    %cst_16 = arith.constant 1.000000e+00 : f32
    %36 = vector.broadcast %cst_16 : f32 to vector<2x32xf32>
    %37 = arith.addf %36, %35 : vector<2x32xf32>
    %38 = arith.divf %36, %37 : vector<2x32xf32>
    %39 = arith.mulf %30, %4 : vector<2x32xf32>
    %40 = arith.mulf %24, %32 : vector<2x32xf32>
    %41 = arith.addf %39, %40 : vector<2x32xf32>
    %42 = math.tanh %41 : vector<2x32xf32>
    %43 = arith.mulf %38, %42 : vector<2x32xf32>
    %44 = vector.extract_strided_slice %43 {offsets = [0, 0], sizes = [2, 16], strides = [1, 1]} : vector<2x32xf32> to vector<2x16xf32>
    %45 = arith.index_cast %c0_i32 : i32 to index
    %c0_17 = arith.constant 0 : index
    %c0_18 = arith.constant 0 : index
    %46 = vector.load %arg5[%45, %c0_17, %c0_18] : memref<8x2x16xf32, #tpu.memory_space<vmem>>, vector<1x2x16xf32>
    %47 = vector.shape_cast %46 : vector<1x2x16xf32> to vector<2x16xf32>
    %48 = vector.shape_cast %44 : vector<2x16xf32> to vector<1x2x16xf32>
    tpu.vector_store %arg5[%45, %c0_17, %c0_18], %48 {strides = array<i32>} : memref<8x2x16xf32, #tpu.memory_space<vmem>>, vector<1x2x16xf32>,
    %49 = vector.extract_strided_slice %43 {offsets = [0, 16], sizes = [2, 16], strides = [1, 1]} : vector<2x32xf32> to vector<2x16xf32>
    %c7_i32_19 = arith.constant 7 : i32
    %50 = arith.subi %c7_i32_19, %c0_i32 : i32
    %51 = arith.index_cast %50 : i32 to index
    %c0_20 = arith.constant 0 : index
    %c0_21 = arith.constant 0 : index
    %52 = vector.load %arg6[%51, %c0_20, %c0_21] : memref<8x2x16xf32, #tpu.memory_space<vmem>>, vector<1x2x16xf32>
    %53 = vector.shape_cast %52 : vector<1x2x16xf32> to vector<2x16xf32>
    %54 = vector.shape_cast %49 : vector<2x16xf32> to vector<1x2x16xf32>
    tpu.vector_store %arg6[%51, %c0_20, %c0_21], %54 {strides = array<i32>} : memref<8x2x16xf32, #tpu.memory_space<vmem>>, vector<1x2x16xf32>,
    %c1_i32 = arith.constant 1 : i32
    %55 = arith.index_cast %c1_i32 : i32 to index
    %c0_22 = arith.constant 0 : index
    %c0_23 = arith.constant 0 : index
    %56 = vector.load %arg0[%55, %c0_22, %c0_23] : memref<8x2x64xf32, #tpu.memory_space<vmem>>, vector<1x2x64xf32>
    %57 = vector.shape_cast %56 : vector<1x2x64xf32> to vector<2x64xf32>
    %c7_i32_24 = arith.constant 7 : i32
    %58 = arith.subi %c7_i32_24, %c1_i32 : i32
    %59 = arith.index_cast %58 : i32 to index
    %c0_25 = arith.constant 0 : index
    %c0_26 = arith.constant 0 : index
    %60 = vector.load %arg0[%59, %c0_25, %c0_26] : memref<8x2x64xf32, #tpu.memory_space<vmem>>, vector<1x2x64xf32>
    %61 = vector.shape_cast %60 : vector<1x2x64xf32> to vector<2x64xf32>
    %cst_27 = arith.constant dense<0.000000e+00> : vector<2x128xf32>
    %62 = tpu.matmul %57, %0, %cst_27 {dimension_numbers = #tpu.dot_dimension_numbers<[1], [0], [0], [1], [0, 0, 1, 1], [], []>} : vector<2x64xf32>, vector<64x128xf32>, vector<2x128xf32> -> vector<2x128xf32>
    %cst_28 = arith.constant dense<0.000000e+00> : vector<2x128xf32>
    %63 = tpu.matmul %61, %1, %cst_28 {dimension_numbers = #tpu.dot_dimension_numbers<[1], [0], [0], [1], [0, 0, 1, 1], [], []>} : vector<2x64xf32>, vector<64x128xf32>, vector<2x128xf32> -> vector<2x128xf32>
    %64 = arith.addf %62, %63 : vector<2x128xf32>
    %cst_29 = arith.constant dense<0.000000e+00> : vector<2x128xf32>
    %65 = tpu.matmul %43, %2, %cst_29 {dimension_numbers = #tpu.dot_dimension_numbers<[1], [0], [0], [1], [0, 0, 1, 1], [], []>} : vector<2x32xf32>, vector<32x128xf32>, vector<2x128xf32> -> vector<2x128xf32>
    %66 = arith.addf %64, %65 : vector<2x128xf32>
    %67 = vector.broadcast %3 : vector<1x128xf32> to vector<2x128xf32>
    %68 = arith.addf %66, %67 : vector<2x128xf32>
    %69 = vector.extract_strided_slice %68 {offsets = [0, 0], sizes = [2, 32], strides = [1, 1]} : vector<2x128xf32> to vector<2x32xf32>
    %70 = arith.negf %69 : vector<2x32xf32>
    %71 = math.exp %70 : vector<2x32xf32>
    %cst_30 = arith.constant 1.000000e+00 : f32
    %72 = vector.broadcast %cst_30 : f32 to vector<2x32xf32>
    %73 = arith.addf %72, %71 : vector<2x32xf32>
    %74 = arith.divf %72, %73 : vector<2x32xf32>
    %75 = vector.extract_strided_slice %68 {offsets = [0, 32], sizes = [2, 32], strides = [1, 1]} : vector<2x128xf32> to vector<2x32xf32>
    %76 = arith.negf %75 : vector<2x32xf32>
    %77 = math.exp %76 : vector<2x32xf32>
    %cst_31 = arith.constant 1.000000e+00 : f32
    %78 = vector.broadcast %cst_31 : f32 to vector<2x32xf32>
    %79 = arith.addf %78, %77 : vector<2x32xf32>
    %80 = arith.divf %78, %79 : vector<2x32xf32>
    %81 = vector.extract_strided_slice %68 {offsets = [0, 64], sizes = [2, 32], strides = [1, 1]} : vector<2x128xf32> to vector<2x32xf32>
    %82 = math.tanh %81 : vector<2x32xf32>
    %83 = vector.extract_strided_slice %68 {offsets = [0, 96], sizes = [2, 32], strides = [1, 1]} : vector<2x128xf32> to vector<2x32xf32>
    %84 = arith.negf %83 : vector<2x32xf32>
    %85 = math.exp %84 : vector<2x32xf32>
    %cst_32 = arith.constant 1.000000e+00 : f32
    %86 = vector.broadcast %cst_32 : f32 to vector<2x32xf32>
    %87 = arith.addf %86, %85 : vector<2x32xf32>
    %88 = arith.divf %86, %87 : vector<2x32xf32>
    %89 = arith.mulf %80, %41 : vector<2x32xf32>
    %90 = arith.mulf %74, %82 : vector<2x32xf32>
    %91 = arith.addf %89, %90 : vector<2x32xf32>
    %92 = math.tanh %91 : vector<2x32xf32>
    %93 = arith.mulf %88, %92 : vector<2x32xf32>
    %94 = vector.extract_strided_slice %93 {offsets = [0, 0], sizes = [2, 16], strides = [1, 1]} : vector<2x32xf32> to vector<2x16xf32>
    %95 = arith.index_cast %c1_i32 : i32 to index
    %c0_33 = arith.constant 0 : index
    %c0_34 = arith.constant 0 : index
    %96 = vector.load %arg5[%95, %c0_33, %c0_34] : memref<8x2x16xf32, #tpu.memory_space<vmem>>, vector<1x2x16xf32>
    %97 = vector.shape_cast %96 : vector<1x2x16xf32> to vector<2x16xf32>
    %98 = vector.shape_cast %94 : vector<2x16xf32> to vector<1x2x16xf32>
    tpu.vector_store %arg5[%95, %c0_33, %c0_34], %98 {strides = array<i32>} : memref<8x2x16xf32, #tpu.memory_space<vmem>>, vector<1x2x16xf32>,
    %99 = vector.extract_strided_slice %93 {offsets = [0, 16], sizes = [2, 16], strides = [1, 1]} : vector<2x32xf32> to vector<2x16xf32>
    %c7_i32_35 = arith.constant 7 : i32
    %100 = arith.subi %c7_i32_35, %c1_i32 : i32
    %101 = arith.index_cast %100 : i32 to index
    %c0_36 = arith.constant 0 : index
    %c0_37 = arith.constant 0 : index
    %102 = vector.load %arg6[%101, %c0_36, %c0_37] : memref<8x2x16xf32, #tpu.memory_space<vmem>>, vector<1x2x16xf32>
    %103 = vector.shape_cast %102 : vector<1x2x16xf32> to vector<2x16xf32>
    %104 = vector.shape_cast %99 : vector<2x16xf32> to vector<1x2x16xf32>
    tpu.vector_store %arg6[%101, %c0_36, %c0_37], %104 {strides = array<i32>} : memref<8x2x16xf32, #tpu.memory_space<vmem>>, vector<1x2x16xf32>,
    %c2_i32 = arith.constant 2 : i32
    %105 = arith.index_cast %c2_i32 : i32 to index
    %c0_38 = arith.constant 0 : index
    %c0_39 = arith.constant 0 : index
    %106 = vector.load %arg0[%105, %c0_38, %c0_39] : memref<8x2x64xf32, #tpu.memory_space<vmem>>, vector<1x2x64xf32>
    %107 = vector.shape_cast %106 : vector<1x2x64xf32> to vector<2x64xf32>
    %c7_i32_40 = arith.constant 7 : i32
    %108 = arith.subi %c7_i32_40, %c2_i32 : i32
    %109 = arith.index_cast %108 : i32 to index
    %c0_41 = arith.constant 0 : index
    %c0_42 = arith.constant 0 : index
    %110 = vector.load %arg0[%109, %c0_41, %c0_42] : memref<8x2x64xf32, #tpu.memory_space<vmem>>, vector<1x2x64xf32>
    %111 = vector.shape_cast %110 : vector<1x2x64xf32> to vector<2x64xf32>
    %cst_43 = arith.constant dense<0.000000e+00> : vector<2x128xf32>
    %112 = tpu.matmul %107, %0, %cst_43 {dimension_numbers = #tpu.dot_dimension_numbers<[1], [0], [0], [1], [0, 0, 1, 1], [], []>} : vector<2x64xf32>, vector<64x128xf32>, vector<2x128xf32> -> vector<2x128xf32>
    %cst_44 = arith.constant dense<0.000000e+00> : vector<2x128xf32>
    %113 = tpu.matmul %111, %1, %cst_44 {dimension_numbers = #tpu.dot_dimension_numbers<[1], [0], [0], [1], [0, 0, 1, 1], [], []>} : vector<2x64xf32>, vector<64x128xf32>, vector<2x128xf32> -> vector<2x128xf32>
    %114 = arith.addf %112, %113 : vector<2x128xf32>
    %cst_45 = arith.constant dense<0.000000e+00> : vector<2x128xf32>
    %115 = tpu.matmul %93, %2, %cst_45 {dimension_numbers = #tpu.dot_dimension_numbers<[1], [0], [0], [1], [0, 0, 1, 1], [], []>} : vector<2x32xf32>, vector<32x128xf32>, vector<2x128xf32> -> vector<2x128xf32>
    %116 = arith.addf %114, %115 : vector<2x128xf32>
    %117 = vector.broadcast %3 : vector<1x128xf32> to vector<2x128xf32>
    %118 = arith.addf %116, %117 : vector<2x128xf32>
    %119 = vector.extract_strided_slice %118 {offsets = [0, 0], sizes = [2, 32], strides = [1, 1]} : vector<2x128xf32> to vector<2x32xf32>
    %120 = arith.negf %119 : vector<2x32xf32>
    %121 = math.exp %120 : vector<2x32xf32>
    %cst_46 = arith.constant 1.000000e+00 : f32
    %122 = vector.broadcast %cst_46 : f32 to vector<2x32xf32>
    %123 = arith.addf %122, %121 : vector<2x32xf32>
    %124 = arith.divf %122, %123 : vector<2x32xf32>
    %125 = vector.extract_strided_slice %118 {offsets = [0, 32], sizes = [2, 32], strides = [1, 1]} : vector<2x128xf32> to vector<2x32xf32>
    %126 = arith.negf %125 : vector<2x32xf32>
    %127 = math.exp %126 : vector<2x32xf32>
    %cst_47 = arith.constant 1.000000e+00 : f32
    %128 = vector.broadcast %cst_47 : f32 to vector<2x32xf32>
    %129 = arith.addf %128, %127 : vector<2x32xf32>
    %130 = arith.divf %128, %129 : vector<2x32xf32>
    %131 = vector.extract_strided_slice %118 {offsets = [0, 64], sizes = [2, 32], strides = [1, 1]} : vector<2x128xf32> to vector<2x32xf32>
    %132 = math.tanh %131 : vector<2x32xf32>
    %133 = vector.extract_strided_slice %118 {offsets = [0, 96], sizes = [2, 32], strides = [1, 1]} : vector<2x128xf32> to vector<2x32xf32>
    %134 = arith.negf %133 : vector<2x32xf32>
    %135 = math.exp %134 : vector<2x32xf32>
    %cst_48 = arith.constant 1.000000e+00 : f32
    %136 = vector.broadcast %cst_48 : f32 to vector<2x32xf32>
    %137 = arith.addf %136, %135 : vector<2x32xf32>
    %138 = arith.divf %136, %137 : vector<2x32xf32>
    %139 = arith.mulf %130, %91 : vector<2x32xf32>
    %140 = arith.mulf %124, %132 : vector<2x32xf32>
    %141 = arith.addf %139, %140 : vector<2x32xf32>
    %142 = math.tanh %141 : vector<2x32xf32>
    %143 = arith.mulf %138, %142 : vector<2x32xf32>
    %144 = vector.extract_strided_slice %143 {offsets = [0, 0], sizes = [2, 16], strides = [1, 1]} : vector<2x32xf32> to vector<2x16xf32>
    %145 = arith.index_cast %c2_i32 : i32 to index
    %c0_49 = arith.constant 0 : index
    %c0_50 = arith.constant 0 : index
    %146 = vector.load %arg5[%145, %c0_49, %c0_50] : memref<8x2x16xf32, #tpu.memory_space<vmem>>, vector<1x2x16xf32>
    %147 = vector.shape_cast %146 : vector<1x2x16xf32> to vector<2x16xf32>
    %148 = vector.shape_cast %144 : vector<2x16xf32> to vector<1x2x16xf32>
    tpu.vector_store %arg5[%145, %c0_49, %c0_50], %148 {strides = array<i32>} : memref<8x2x16xf32, #tpu.memory_space<vmem>>, vector<1x2x16xf32>,
    %149 = vector.extract_strided_slice %143 {offsets = [0, 16], sizes = [2, 16], strides = [1, 1]} : vector<2x32xf32> to vector<2x16xf32>
    %c7_i32_51 = arith.constant 7 : i32
    %150 = arith.subi %c7_i32_51, %c2_i32 : i32
    %151 = arith.index_cast %150 : i32 to index
    %c0_52 = arith.constant 0 : index
    %c0_53 = arith.constant 0 : index
    %152 = vector.load %arg6[%151, %c0_52, %c0_53] : memref<8x2x16xf32, #tpu.memory_space<vmem>>, vector<1x2x16xf32>
    %153 = vector.shape_cast %152 : vector<1x2x16xf32> to vector<2x16xf32>
    %154 = vector.shape_cast %149 : vector<2x16xf32> to vector<1x2x16xf32>
    tpu.vector_store %arg6[%151, %c0_52, %c0_53], %154 {strides = array<i32>} : memref<8x2x16xf32, #tpu.memory_space<vmem>>, vector<1x2x16xf32>,
    %c3_i32 = arith.constant 3 : i32
    %155 = arith.index_cast %c3_i32 : i32 to index
    %c0_54 = arith.constant 0 : index
    %c0_55 = arith.constant 0 : index
    %156 = vector.load %arg0[%155, %c0_54, %c0_55] : memref<8x2x64xf32, #tpu.memory_space<vmem>>, vector<1x2x64xf32>
    %157 = vector.shape_cast %156 : vector<1x2x64xf32> to vector<2x64xf32>
    %c7_i32_56 = arith.constant 7 : i32
    %158 = arith.subi %c7_i32_56, %c3_i32 : i32
    %159 = arith.index_cast %158 : i32 to index
    %c0_57 = arith.constant 0 : index
    %c0_58 = arith.constant 0 : index
    %160 = vector.load %arg0[%159, %c0_57, %c0_58] : memref<8x2x64xf32, #tpu.memory_space<vmem>>, vector<1x2x64xf32>
    %161 = vector.shape_cast %160 : vector<1x2x64xf32> to vector<2x64xf32>
    %cst_59 = arith.constant dense<0.000000e+00> : vector<2x128xf32>
    %162 = tpu.matmul %157, %0, %cst_59 {dimension_numbers = #tpu.dot_dimension_numbers<[1], [0], [0], [1], [0, 0, 1, 1], [], []>} : vector<2x64xf32>, vector<64x128xf32>, vector<2x128xf32> -> vector<2x128xf32>
    %cst_60 = arith.constant dense<0.000000e+00> : vector<2x128xf32>
    %163 = tpu.matmul %161, %1, %cst_60 {dimension_numbers = #tpu.dot_dimension_numbers<[1], [0], [0], [1], [0, 0, 1, 1], [], []>} : vector<2x64xf32>, vector<64x128xf32>, vector<2x128xf32> -> vector<2x128xf32>
    %164 = arith.addf %162, %163 : vector<2x128xf32>
    %cst_61 = arith.constant dense<0.000000e+00> : vector<2x128xf32>
    %165 = tpu.matmul %143, %2, %cst_61 {dimension_numbers = #tpu.dot_dimension_numbers<[1], [0], [0], [1], [0, 0, 1, 1], [], []>} : vector<2x32xf32>, vector<32x128xf32>, vector<2x128xf32> -> vector<2x128xf32>
    %166 = arith.addf %164, %165 : vector<2x128xf32>
    %167 = vector.broadcast %3 : vector<1x128xf32> to vector<2x128xf32>
    %168 = arith.addf %166, %167 : vector<2x128xf32>
    %169 = vector.extract_strided_slice %168 {offsets = [0, 0], sizes = [2, 32], strides = [1, 1]} : vector<2x128xf32> to vector<2x32xf32>
    %170 = arith.negf %169 : vector<2x32xf32>
    %171 = math.exp %170 : vector<2x32xf32>
    %cst_62 = arith.constant 1.000000e+00 : f32
    %172 = vector.broadcast %cst_62 : f32 to vector<2x32xf32>
    %173 = arith.addf %172, %171 : vector<2x32xf32>
    %174 = arith.divf %172, %173 : vector<2x32xf32>
    %175 = vector.extract_strided_slice %168 {offsets = [0, 32], sizes = [2, 32], strides = [1, 1]} : vector<2x128xf32> to vector<2x32xf32>
    %176 = arith.negf %175 : vector<2x32xf32>
    %177 = math.exp %176 : vector<2x32xf32>
    %cst_63 = arith.constant 1.000000e+00 : f32
    %178 = vector.broadcast %cst_63 : f32 to vector<2x32xf32>
    %179 = arith.addf %178, %177 : vector<2x32xf32>
    %180 = arith.divf %178, %179 : vector<2x32xf32>
    %181 = vector.extract_strided_slice %168 {offsets = [0, 64], sizes = [2, 32], strides = [1, 1]} : vector<2x128xf32> to vector<2x32xf32>
    %182 = math.tanh %181 : vector<2x32xf32>
    %183 = vector.extract_strided_slice %168 {offsets = [0, 96], sizes = [2, 32], strides = [1, 1]} : vector<2x128xf32> to vector<2x32xf32>
    %184 = arith.negf %183 : vector<2x32xf32>
    %185 = math.exp %184 : vector<2x32xf32>
    %cst_64 = arith.constant 1.000000e+00 : f32
    %186 = vector.broadcast %cst_64 : f32 to vector<2x32xf32>
    %187 = arith.addf %186, %185 : vector<2x32xf32>
    %188 = arith.divf %186, %187 : vector<2x32xf32>
    %189 = arith.mulf %180, %141 : vector<2x32xf32>
    %190 = arith.mulf %174, %182 : vector<2x32xf32>
    %191 = arith.addf %189, %190 : vector<2x32xf32>
    %192 = math.tanh %191 : vector<2x32xf32>
    %193 = arith.mulf %188, %192 : vector<2x32xf32>
    %194 = vector.extract_strided_slice %193 {offsets = [0, 0], sizes = [2, 16], strides = [1, 1]} : vector<2x32xf32> to vector<2x16xf32>
    %195 = arith.index_cast %c3_i32 : i32 to index
    %c0_65 = arith.constant 0 : index
    %c0_66 = arith.constant 0 : index
    %196 = vector.load %arg5[%195, %c0_65, %c0_66] : memref<8x2x16xf32, #tpu.memory_space<vmem>>, vector<1x2x16xf32>
    %197 = vector.shape_cast %196 : vector<1x2x16xf32> to vector<2x16xf32>
    %198 = vector.shape_cast %194 : vector<2x16xf32> to vector<1x2x16xf32>
    tpu.vector_store %arg5[%195, %c0_65, %c0_66], %198 {strides = array<i32>} : memref<8x2x16xf32, #tpu.memory_space<vmem>>, vector<1x2x16xf32>,
    %199 = vector.extract_strided_slice %193 {offsets = [0, 16], sizes = [2, 16], strides = [1, 1]} : vector<2x32xf32> to vector<2x16xf32>
    %c7_i32_67 = arith.constant 7 : i32
    %200 = arith.subi %c7_i32_67, %c3_i32 : i32
    %201 = arith.index_cast %200 : i32 to index
    %c0_68 = arith.constant 0 : index
    %c0_69 = arith.constant 0 : index
    %202 = vector.load %arg6[%201, %c0_68, %c0_69] : memref<8x2x16xf32, #tpu.memory_space<vmem>>, vector<1x2x16xf32>
    %203 = vector.shape_cast %202 : vector<1x2x16xf32> to vector<2x16xf32>
    %204 = vector.shape_cast %199 : vector<2x16xf32> to vector<1x2x16xf32>
    tpu.vector_store %arg6[%201, %c0_68, %c0_69], %204 {strides = array<i32>} : memref<8x2x16xf32, #tpu.memory_space<vmem>>, vector<1x2x16xf32>,
    %c4_i32 = arith.constant 4 : i32
    %205 = arith.index_cast %c4_i32 : i32 to index
    %c0_70 = arith.constant 0 : index
    %c0_71 = arith.constant 0 : index
    %206 = vector.load %arg0[%205, %c0_70, %c0_71] : memref<8x2x64xf32, #tpu.memory_space<vmem>>, vector<1x2x64xf32>
    %207 = vector.shape_cast %206 : vector<1x2x64xf32> to vector<2x64xf32>
    %c7_i32_72 = arith.constant 7 : i32
    %208 = arith.subi %c7_i32_72, %c4_i32 : i32
    %209 = arith.index_cast %208 : i32 to index
    %c0_73 = arith.constant 0 : index
    %c0_74 = arith.constant 0 : index
    %210 = vector.load %arg0[%209, %c0_73, %c0_74] : memref<8x2x64xf32, #tpu.memory_space<vmem>>, vector<1x2x64xf32>
    %211 = vector.shape_cast %210 : vector<1x2x64xf32> to vector<2x64xf32>
    %cst_75 = arith.constant dense<0.000000e+00> : vector<2x128xf32>
    %212 = tpu.matmul %207, %0, %cst_75 {dimension_numbers = #tpu.dot_dimension_numbers<[1], [0], [0], [1], [0, 0, 1, 1], [], []>} : vector<2x64xf32>, vector<64x128xf32>, vector<2x128xf32> -> vector<2x128xf32>
    %cst_76 = arith.constant dense<0.000000e+00> : vector<2x128xf32>
    %213 = tpu.matmul %211, %1, %cst_76 {dimension_numbers = #tpu.dot_dimension_numbers<[1], [0], [0], [1], [0, 0, 1, 1], [], []>} : vector<2x64xf32>, vector<64x128xf32>, vector<2x128xf32> -> vector<2x128xf32>
    %214 = arith.addf %212, %213 : vector<2x128xf32>
    %cst_77 = arith.constant dense<0.000000e+00> : vector<2x128xf32>
    %215 = tpu.matmul %193, %2, %cst_77 {dimension_numbers = #tpu.dot_dimension_numbers<[1], [0], [0], [1], [0, 0, 1, 1], [], []>} : vector<2x32xf32>, vector<32x128xf32>, vector<2x128xf32> -> vector<2x128xf32>
    %216 = arith.addf %214, %215 : vector<2x128xf32>
    %217 = vector.broadcast %3 : vector<1x128xf32> to vector<2x128xf32>
    %218 = arith.addf %216, %217 : vector<2x128xf32>
    %219 = vector.extract_strided_slice %218 {offsets = [0, 0], sizes = [2, 32], strides = [1, 1]} : vector<2x128xf32> to vector<2x32xf32>
    %220 = arith.negf %219 : vector<2x32xf32>
    %221 = math.exp %220 : vector<2x32xf32>
    %cst_78 = arith.constant 1.000000e+00 : f32
    %222 = vector.broadcast %cst_78 : f32 to vector<2x32xf32>
    %223 = arith.addf %222, %221 : vector<2x32xf32>
    %224 = arith.divf %222, %223 : vector<2x32xf32>
    %225 = vector.extract_strided_slice %218 {offsets = [0, 32], sizes = [2, 32], strides = [1, 1]} : vector<2x128xf32> to vector<2x32xf32>
    %226 = arith.negf %225 : vector<2x32xf32>
    %227 = math.exp %226 : vector<2x32xf32>
    %cst_79 = arith.constant 1.000000e+00 : f32
    %228 = vector.broadcast %cst_79 : f32 to vector<2x32xf32>
    %229 = arith.addf %228, %227 : vector<2x32xf32>
    %230 = arith.divf %228, %229 : vector<2x32xf32>
    %231 = vector.extract_strided_slice %218 {offsets = [0, 64], sizes = [2, 32], strides = [1, 1]} : vector<2x128xf32> to vector<2x32xf32>
    %232 = math.tanh %231 : vector<2x32xf32>
    %233 = vector.extract_strided_slice %218 {offsets = [0, 96], sizes = [2, 32], strides = [1, 1]} : vector<2x128xf32> to vector<2x32xf32>
    %234 = arith.negf %233 : vector<2x32xf32>
    %235 = math.exp %234 : vector<2x32xf32>
    %cst_80 = arith.constant 1.000000e+00 : f32
    %236 = vector.broadcast %cst_80 : f32 to vector<2x32xf32>
    %237 = arith.addf %236, %235 : vector<2x32xf32>
    %238 = arith.divf %236, %237 : vector<2x32xf32>
    %239 = arith.mulf %230, %191 : vector<2x32xf32>
    %240 = arith.mulf %224, %232 : vector<2x32xf32>
    %241 = arith.addf %239, %240 : vector<2x32xf32>
    %242 = math.tanh %241 : vector<2x32xf32>
    %243 = arith.mulf %238, %242 : vector<2x32xf32>
    %244 = vector.extract_strided_slice %243 {offsets = [0, 0], sizes = [2, 16], strides = [1, 1]} : vector<2x32xf32> to vector<2x16xf32>
    %245 = arith.index_cast %c4_i32 : i32 to index
    %c0_81 = arith.constant 0 : index
    %c0_82 = arith.constant 0 : index
    %246 = vector.load %arg5[%245, %c0_81, %c0_82] : memref<8x2x16xf32, #tpu.memory_space<vmem>>, vector<1x2x16xf32>
    %247 = vector.shape_cast %246 : vector<1x2x16xf32> to vector<2x16xf32>
    %248 = vector.shape_cast %244 : vector<2x16xf32> to vector<1x2x16xf32>
    tpu.vector_store %arg5[%245, %c0_81, %c0_82], %248 {strides = array<i32>} : memref<8x2x16xf32, #tpu.memory_space<vmem>>, vector<1x2x16xf32>,
    %249 = vector.extract_strided_slice %243 {offsets = [0, 16], sizes = [2, 16], strides = [1, 1]} : vector<2x32xf32> to vector<2x16xf32>
    %c7_i32_83 = arith.constant 7 : i32
    %250 = arith.subi %c7_i32_83, %c4_i32 : i32
    %251 = arith.index_cast %250 : i32 to index
    %c0_84 = arith.constant 0 : index
    %c0_85 = arith.constant 0 : index
    %252 = vector.load %arg6[%251, %c0_84, %c0_85] : memref<8x2x16xf32, #tpu.memory_space<vmem>>, vector<1x2x16xf32>
    %253 = vector.shape_cast %252 : vector<1x2x16xf32> to vector<2x16xf32>
    %254 = vector.shape_cast %249 : vector<2x16xf32> to vector<1x2x16xf32>
    tpu.vector_store %arg6[%251, %c0_84, %c0_85], %254 {strides = array<i32>} : memref<8x2x16xf32, #tpu.memory_space<vmem>>, vector<1x2x16xf32>,
    %c5_i32 = arith.constant 5 : i32
    %255 = arith.index_cast %c5_i32 : i32 to index
    %c0_86 = arith.constant 0 : index
    %c0_87 = arith.constant 0 : index
    %256 = vector.load %arg0[%255, %c0_86, %c0_87] : memref<8x2x64xf32, #tpu.memory_space<vmem>>, vector<1x2x64xf32>
    %257 = vector.shape_cast %256 : vector<1x2x64xf32> to vector<2x64xf32>
    %c7_i32_88 = arith.constant 7 : i32
    %258 = arith.subi %c7_i32_88, %c5_i32 : i32
    %259 = arith.index_cast %258 : i32 to index
    %c0_89 = arith.constant 0 : index
    %c0_90 = arith.constant 0 : index
    %260 = vector.load %arg0[%259, %c0_89, %c0_90] : memref<8x2x64xf32, #tpu.memory_space<vmem>>, vector<1x2x64xf32>
    %261 = vector.shape_cast %260 : vector<1x2x64xf32> to vector<2x64xf32>
    %cst_91 = arith.constant dense<0.000000e+00> : vector<2x128xf32>
    %262 = tpu.matmul %257, %0, %cst_91 {dimension_numbers = #tpu.dot_dimension_numbers<[1], [0], [0], [1], [0, 0, 1, 1], [], []>} : vector<2x64xf32>, vector<64x128xf32>, vector<2x128xf32> -> vector<2x128xf32>
    %cst_92 = arith.constant dense<0.000000e+00> : vector<2x128xf32>
    %263 = tpu.matmul %261, %1, %cst_92 {dimension_numbers = #tpu.dot_dimension_numbers<[1], [0], [0], [1], [0, 0, 1, 1], [], []>} : vector<2x64xf32>, vector<64x128xf32>, vector<2x128xf32> -> vector<2x128xf32>
    %264 = arith.addf %262, %263 : vector<2x128xf32>
    %cst_93 = arith.constant dense<0.000000e+00> : vector<2x128xf32>
    %265 = tpu.matmul %243, %2, %cst_93 {dimension_numbers = #tpu.dot_dimension_numbers<[1], [0], [0], [1], [0, 0, 1, 1], [], []>} : vector<2x32xf32>, vector<32x128xf32>, vector<2x128xf32> -> vector<2x128xf32>
    %266 = arith.addf %264, %265 : vector<2x128xf32>
    %267 = vector.broadcast %3 : vector<1x128xf32> to vector<2x128xf32>
    %268 = arith.addf %266, %267 : vector<2x128xf32>
    %269 = vector.extract_strided_slice %268 {offsets = [0, 0], sizes = [2, 32], strides = [1, 1]} : vector<2x128xf32> to vector<2x32xf32>
    %270 = arith.negf %269 : vector<2x32xf32>
    %271 = math.exp %270 : vector<2x32xf32>
    %cst_94 = arith.constant 1.000000e+00 : f32
    %272 = vector.broadcast %cst_94 : f32 to vector<2x32xf32>
    %273 = arith.addf %272, %271 : vector<2x32xf32>
    %274 = arith.divf %272, %273 : vector<2x32xf32>
    %275 = vector.extract_strided_slice %268 {offsets = [0, 32], sizes = [2, 32], strides = [1, 1]} : vector<2x128xf32> to vector<2x32xf32>
    %276 = arith.negf %275 : vector<2x32xf32>
    %277 = math.exp %276 : vector<2x32xf32>
    %cst_95 = arith.constant 1.000000e+00 : f32
    %278 = vector.broadcast %cst_95 : f32 to vector<2x32xf32>
    %279 = arith.addf %278, %277 : vector<2x32xf32>
    %280 = arith.divf %278, %279 : vector<2x32xf32>
    %281 = vector.extract_strided_slice %268 {offsets = [0, 64], sizes = [2, 32], strides = [1, 1]} : vector<2x128xf32> to vector<2x32xf32>
    %282 = math.tanh %281 : vector<2x32xf32>
    %283 = vector.extract_strided_slice %268 {offsets = [0, 96], sizes = [2, 32], strides = [1, 1]} : vector<2x128xf32> to vector<2x32xf32>
    %284 = arith.negf %283 : vector<2x32xf32>
    %285 = math.exp %284 : vector<2x32xf32>
    %cst_96 = arith.constant 1.000000e+00 : f32
    %286 = vector.broadcast %cst_96 : f32 to vector<2x32xf32>
    %287 = arith.addf %286, %285 : vector<2x32xf32>
    %288 = arith.divf %286, %287 : vector<2x32xf32>
    %289 = arith.mulf %280, %241 : vector<2x32xf32>
    %290 = arith.mulf %274, %282 : vector<2x32xf32>
    %291 = arith.addf %289, %290 : vector<2x32xf32>
    %292 = math.tanh %291 : vector<2x32xf32>
    %293 = arith.mulf %288, %292 : vector<2x32xf32>
    %294 = vector.extract_strided_slice %293 {offsets = [0, 0], sizes = [2, 16], strides = [1, 1]} : vector<2x32xf32> to vector<2x16xf32>
    %295 = arith.index_cast %c5_i32 : i32 to index
    %c0_97 = arith.constant 0 : index
    %c0_98 = arith.constant 0 : index
    %296 = vector.load %arg5[%295, %c0_97, %c0_98] : memref<8x2x16xf32, #tpu.memory_space<vmem>>, vector<1x2x16xf32>
    %297 = vector.shape_cast %296 : vector<1x2x16xf32> to vector<2x16xf32>
    %298 = vector.shape_cast %294 : vector<2x16xf32> to vector<1x2x16xf32>
    tpu.vector_store %arg5[%295, %c0_97, %c0_98], %298 {strides = array<i32>} : memref<8x2x16xf32, #tpu.memory_space<vmem>>, vector<1x2x16xf32>,
    %299 = vector.extract_strided_slice %293 {offsets = [0, 16], sizes = [2, 16], strides = [1, 1]} : vector<2x32xf32> to vector<2x16xf32>
    %c7_i32_99 = arith.constant 7 : i32
    %300 = arith.subi %c7_i32_99, %c5_i32 : i32
    %301 = arith.index_cast %300 : i32 to index
    %c0_100 = arith.constant 0 : index
    %c0_101 = arith.constant 0 : index
    %302 = vector.load %arg6[%301, %c0_100, %c0_101] : memref<8x2x16xf32, #tpu.memory_space<vmem>>, vector<1x2x16xf32>
    %303 = vector.shape_cast %302 : vector<1x2x16xf32> to vector<2x16xf32>
    %304 = vector.shape_cast %299 : vector<2x16xf32> to vector<1x2x16xf32>
    tpu.vector_store %arg6[%301, %c0_100, %c0_101], %304 {strides = array<i32>} : memref<8x2x16xf32, #tpu.memory_space<vmem>>, vector<1x2x16xf32>,
    %c6_i32 = arith.constant 6 : i32
    %305 = arith.index_cast %c6_i32 : i32 to index
    %c0_102 = arith.constant 0 : index
    %c0_103 = arith.constant 0 : index
    %306 = vector.load %arg0[%305, %c0_102, %c0_103] : memref<8x2x64xf32, #tpu.memory_space<vmem>>, vector<1x2x64xf32>
    %307 = vector.shape_cast %306 : vector<1x2x64xf32> to vector<2x64xf32>
    %c7_i32_104 = arith.constant 7 : i32
    %308 = arith.subi %c7_i32_104, %c6_i32 : i32
    %309 = arith.index_cast %308 : i32 to index
    %c0_105 = arith.constant 0 : index
    %c0_106 = arith.constant 0 : index
    %310 = vector.load %arg0[%309, %c0_105, %c0_106] : memref<8x2x64xf32, #tpu.memory_space<vmem>>, vector<1x2x64xf32>
    %311 = vector.shape_cast %310 : vector<1x2x64xf32> to vector<2x64xf32>
    %cst_107 = arith.constant dense<0.000000e+00> : vector<2x128xf32>
    %312 = tpu.matmul %307, %0, %cst_107 {dimension_numbers = #tpu.dot_dimension_numbers<[1], [0], [0], [1], [0, 0, 1, 1], [], []>} : vector<2x64xf32>, vector<64x128xf32>, vector<2x128xf32> -> vector<2x128xf32>
    %cst_108 = arith.constant dense<0.000000e+00> : vector<2x128xf32>
    %313 = tpu.matmul %311, %1, %cst_108 {dimension_numbers = #tpu.dot_dimension_numbers<[1], [0], [0], [1], [0, 0, 1, 1], [], []>} : vector<2x64xf32>, vector<64x128xf32>, vector<2x128xf32> -> vector<2x128xf32>
    %314 = arith.addf %312, %313 : vector<2x128xf32>
    %cst_109 = arith.constant dense<0.000000e+00> : vector<2x128xf32>
    %315 = tpu.matmul %293, %2, %cst_109 {dimension_numbers = #tpu.dot_dimension_numbers<[1], [0], [0], [1], [0, 0, 1, 1], [], []>} : vector<2x32xf32>, vector<32x128xf32>, vector<2x128xf32> -> vector<2x128xf32>
    %316 = arith.addf %314, %315 : vector<2x128xf32>
    %317 = vector.broadcast %3 : vector<1x128xf32> to vector<2x128xf32>
    %318 = arith.addf %316, %317 : vector<2x128xf32>
    %319 = vector.extract_strided_slice %318 {offsets = [0, 0], sizes = [2, 32], strides = [1, 1]} : vector<2x128xf32> to vector<2x32xf32>
    %320 = arith.negf %319 : vector<2x32xf32>
    %321 = math.exp %320 : vector<2x32xf32>
    %cst_110 = arith.constant 1.000000e+00 : f32
    %322 = vector.broadcast %cst_110 : f32 to vector<2x32xf32>
    %323 = arith.addf %322, %321 : vector<2x32xf32>
    %324 = arith.divf %322, %323 : vector<2x32xf32>
    %325 = vector.extract_strided_slice %318 {offsets = [0, 32], sizes = [2, 32], strides = [1, 1]} : vector<2x128xf32> to vector<2x32xf32>
    %326 = arith.negf %325 : vector<2x32xf32>
    %327 = math.exp %326 : vector<2x32xf32>
    %cst_111 = arith.constant 1.000000e+00 : f32
    %328 = vector.broadcast %cst_111 : f32 to vector<2x32xf32>
    %329 = arith.addf %328, %327 : vector<2x32xf32>
    %330 = arith.divf %328, %329 : vector<2x32xf32>
    %331 = vector.extract_strided_slice %318 {offsets = [0, 64], sizes = [2, 32], strides = [1, 1]} : vector<2x128xf32> to vector<2x32xf32>
    %332 = math.tanh %331 : vector<2x32xf32>
    %333 = vector.extract_strided_slice %318 {offsets = [0, 96], sizes = [2, 32], strides = [1, 1]} : vector<2x128xf32> to vector<2x32xf32>
    %334 = arith.negf %333 : vector<2x32xf32>
    %335 = math.exp %334 : vector<2x32xf32>
    %cst_112 = arith.constant 1.000000e+00 : f32
    %336 = vector.broadcast %cst_112 : f32 to vector<2x32xf32>
    %337 = arith.addf %336, %335 : vector<2x32xf32>
    %338 = arith.divf %336, %337 : vector<2x32xf32>
    %339 = arith.mulf %330, %291 : vector<2x32xf32>
    %340 = arith.mulf %324, %332 : vector<2x32xf32>
    %341 = arith.addf %339, %340 : vector<2x32xf32>
    %342 = math.tanh %341 : vector<2x32xf32>
    %343 = arith.mulf %338, %342 : vector<2x32xf32>
    %344 = vector.extract_strided_slice %343 {offsets = [0, 0], sizes = [2, 16], strides = [1, 1]} : vector<2x32xf32> to vector<2x16xf32>
    %345 = arith.index_cast %c6_i32 : i32 to index
    %c0_113 = arith.constant 0 : index
    %c0_114 = arith.constant 0 : index
    %346 = vector.load %arg5[%345, %c0_113, %c0_114] : memref<8x2x16xf32, #tpu.memory_space<vmem>>, vector<1x2x16xf32>
    %347 = vector.shape_cast %346 : vector<1x2x16xf32> to vector<2x16xf32>
    %348 = vector.shape_cast %344 : vector<2x16xf32> to vector<1x2x16xf32>
    tpu.vector_store %arg5[%345, %c0_113, %c0_114], %348 {strides = array<i32>} : memref<8x2x16xf32, #tpu.memory_space<vmem>>, vector<1x2x16xf32>,
    %349 = vector.extract_strided_slice %343 {offsets = [0, 16], sizes = [2, 16], strides = [1, 1]} : vector<2x32xf32> to vector<2x16xf32>
    %c7_i32_115 = arith.constant 7 : i32
    %350 = arith.subi %c7_i32_115, %c6_i32 : i32
    %351 = arith.index_cast %350 : i32 to index
    %c0_116 = arith.constant 0 : index
    %c0_117 = arith.constant 0 : index
    %352 = vector.load %arg6[%351, %c0_116, %c0_117] : memref<8x2x16xf32, #tpu.memory_space<vmem>>, vector<1x2x16xf32>
    %353 = vector.shape_cast %352 : vector<1x2x16xf32> to vector<2x16xf32>
    %354 = vector.shape_cast %349 : vector<2x16xf32> to vector<1x2x16xf32>
    tpu.vector_store %arg6[%351, %c0_116, %c0_117], %354 {strides = array<i32>} : memref<8x2x16xf32, #tpu.memory_space<vmem>>, vector<1x2x16xf32>,
    %c7_i32_118 = arith.constant 7 : i32
    %355 = arith.index_cast %c7_i32_118 : i32 to index
    %c0_119 = arith.constant 0 : index
    %c0_120 = arith.constant 0 : index
    %356 = vector.load %arg0[%355, %c0_119, %c0_120] : memref<8x2x64xf32, #tpu.memory_space<vmem>>, vector<1x2x64xf32>
    %357 = vector.shape_cast %356 : vector<1x2x64xf32> to vector<2x64xf32>
    %c7_i32_121 = arith.constant 7 : i32
    %358 = arith.subi %c7_i32_121, %c7_i32_118 : i32
    %359 = arith.index_cast %358 : i32 to index
    %c0_122 = arith.constant 0 : index
    %c0_123 = arith.constant 0 : index
    %360 = vector.load %arg0[%359, %c0_122, %c0_123] : memref<8x2x64xf32, #tpu.memory_space<vmem>>, vector<1x2x64xf32>
    %361 = vector.shape_cast %360 : vector<1x2x64xf32> to vector<2x64xf32>
    %cst_124 = arith.constant dense<0.000000e+00> : vector<2x128xf32>
    %362 = tpu.matmul %357, %0, %cst_124 {dimension_numbers = #tpu.dot_dimension_numbers<[1], [0], [0], [1], [0, 0, 1, 1], [], []>} : vector<2x64xf32>, vector<64x128xf32>, vector<2x128xf32> -> vector<2x128xf32>
    %cst_125 = arith.constant dense<0.000000e+00> : vector<2x128xf32>
    %363 = tpu.matmul %361, %1, %cst_125 {dimension_numbers = #tpu.dot_dimension_numbers<[1], [0], [0], [1], [0, 0, 1, 1], [], []>} : vector<2x64xf32>, vector<64x128xf32>, vector<2x128xf32> -> vector<2x128xf32>
    %364 = arith.addf %362, %363 : vector<2x128xf32>
    %cst_126 = arith.constant dense<0.000000e+00> : vector<2x128xf32>
    %365 = tpu.matmul %343, %2, %cst_126 {dimension_numbers = #tpu.dot_dimension_numbers<[1], [0], [0], [1], [0, 0, 1, 1], [], []>} : vector<2x32xf32>, vector<32x128xf32>, vector<2x128xf32> -> vector<2x128xf32>
    %366 = arith.addf %364, %365 : vector<2x128xf32>
    %367 = vector.broadcast %3 : vector<1x128xf32> to vector<2x128xf32>
    %368 = arith.addf %366, %367 : vector<2x128xf32>
    %369 = vector.extract_strided_slice %368 {offsets = [0, 0], sizes = [2, 32], strides = [1, 1]} : vector<2x128xf32> to vector<2x32xf32>
    %370 = arith.negf %369 : vector<2x32xf32>
    %371 = math.exp %370 : vector<2x32xf32>
    %cst_127 = arith.constant 1.000000e+00 : f32
    %372 = vector.broadcast %cst_127 : f32 to vector<2x32xf32>
    %373 = arith.addf %372, %371 : vector<2x32xf32>
    %374 = arith.divf %372, %373 : vector<2x32xf32>
    %375 = vector.extract_strided_slice %368 {offsets = [0, 32], sizes = [2, 32], strides = [1, 1]} : vector<2x128xf32> to vector<2x32xf32>
    %376 = arith.negf %375 : vector<2x32xf32>
    %377 = math.exp %376 : vector<2x32xf32>
    %cst_128 = arith.constant 1.000000e+00 : f32
    %378 = vector.broadcast %cst_128 : f32 to vector<2x32xf32>
    %379 = arith.addf %378, %377 : vector<2x32xf32>
    %380 = arith.divf %378, %379 : vector<2x32xf32>
    %381 = vector.extract_strided_slice %368 {offsets = [0, 64], sizes = [2, 32], strides = [1, 1]} : vector<2x128xf32> to vector<2x32xf32>
    %382 = math.tanh %381 : vector<2x32xf32>
    %383 = vector.extract_strided_slice %368 {offsets = [0, 96], sizes = [2, 32], strides = [1, 1]} : vector<2x128xf32> to vector<2x32xf32>
    %384 = arith.negf %383 : vector<2x32xf32>
    %385 = math.exp %384 : vector<2x32xf32>
    %cst_129 = arith.constant 1.000000e+00 : f32
    %386 = vector.broadcast %cst_129 : f32 to vector<2x32xf32>
    %387 = arith.addf %386, %385 : vector<2x32xf32>
    %388 = arith.divf %386, %387 : vector<2x32xf32>
    %389 = arith.mulf %380, %341 : vector<2x32xf32>
    %390 = arith.mulf %374, %382 : vector<2x32xf32>
    %391 = arith.addf %389, %390 : vector<2x32xf32>
    %392 = math.tanh %391 : vector<2x32xf32>
    %393 = arith.mulf %388, %392 : vector<2x32xf32>
    %394 = vector.extract_strided_slice %393 {offsets = [0, 0], sizes = [2, 16], strides = [1, 1]} : vector<2x32xf32> to vector<2x16xf32>
    %395 = arith.index_cast %c7_i32_118 : i32 to index
    %c0_130 = arith.constant 0 : index
    %c0_131 = arith.constant 0 : index
    %396 = vector.load %arg5[%395, %c0_130, %c0_131] : memref<8x2x16xf32, #tpu.memory_space<vmem>>, vector<1x2x16xf32>
    %397 = vector.shape_cast %396 : vector<1x2x16xf32> to vector<2x16xf32>
    %398 = vector.shape_cast %394 : vector<2x16xf32> to vector<1x2x16xf32>
    tpu.vector_store %arg5[%395, %c0_130, %c0_131], %398 {strides = array<i32>} : memref<8x2x16xf32, #tpu.memory_space<vmem>>, vector<1x2x16xf32>,
    %399 = vector.extract_strided_slice %393 {offsets = [0, 16], sizes = [2, 16], strides = [1, 1]} : vector<2x32xf32> to vector<2x16xf32>
    %c7_i32_132 = arith.constant 7 : i32
    %400 = arith.subi %c7_i32_132, %c7_i32_118 : i32
    %401 = arith.index_cast %400 : i32 to index
    %c0_133 = arith.constant 0 : index
    %c0_134 = arith.constant 0 : index
    %402 = vector.load %arg6[%401, %c0_133, %c0_134] : memref<8x2x16xf32, #tpu.memory_space<vmem>>, vector<1x2x16xf32>
    %403 = vector.shape_cast %402 : vector<1x2x16xf32> to vector<2x16xf32>
    %404 = vector.shape_cast %399 : vector<2x16xf32> to vector<1x2x16xf32>
    tpu.vector_store %arg6[%401, %c0_133, %c0_134], %404 {strides = array<i32>} : memref<8x2x16xf32, #tpu.memory_space<vmem>>, vector<1x2x16xf32>,
    %c8_i32 = arith.constant 8 : i32
    %c0_135 = arith.constant 0 : index
    %c0_136 = arith.constant 0 : index
    %405 = vector.load %arg7[%c0_135, %c0_136] : memref<2x32xf32, #tpu.memory_space<vmem>>, vector<2x32xf32>
    tpu.vector_store %arg7[%c0_135, %c0_136], %393 {strides = array<i32>} : memref<2x32xf32, #tpu.memory_space<vmem>>, vector<2x32xf32>,
    return
  }
}

module attributes {stable_mosaic.version = 11 : i64} {
  func.func @_bilstm_kernel(%arg0: memref<4x2x64xf32, #tpu.memory_space<vmem>>, %arg1: memref<64x128xf32, #tpu.memory_space<vmem>>, %arg2: memref<64x128xf32, #tpu.memory_space<vmem>>, %arg3: memref<32x128xf32, #tpu.memory_space<vmem>>, %arg4: memref<1x128xf32, #tpu.memory_space<vmem>>, %arg5: memref<4x2x16xf32, #tpu.memory_space<vmem>>, %arg6: memref<4x2x16xf32, #tpu.memory_space<vmem>>, %arg7: memref<2x32xf32, #tpu.memory_space<vmem>>) attributes {dimension_semantics = [], scalar_prefetch = 0 : i64, scratch_operands = 0 : i64, tpu.core_type = #tpu.core_type<tc>} {
    %c0 = arith.constant 0 : index
    %c0_0 = arith.constant 0 : index
    %0 = vector.load %arg1[%c0, %c0_0] : memref<64x128xf32, #tpu.memory_space<vmem>>, vector<64x128xf32>
    %c0_1 = arith.constant 0 : index
    %c0_2 = arith.constant 0 : index
    %1 = vector.load %arg2[%c0_1, %c0_2] : memref<64x128xf32, #tpu.memory_space<vmem>>, vector<64x128xf32>
    %c0_3 = arith.constant 0 : index
    %c0_4 = arith.constant 0 : index
    %2 = vector.load %arg3[%c0_3, %c0_4] : memref<32x128xf32, #tpu.memory_space<vmem>>, vector<32x128xf32>
    %c0_5 = arith.constant 0 : index
    %c0_6 = arith.constant 0 : index
    %3 = vector.load %arg4[%c0_5, %c0_6] : memref<1x128xf32, #tpu.memory_space<vmem>>, vector<1x128xf32>
    %cst = arith.constant 0.000000e+00 : f32
    %4 = vector.broadcast %cst : f32 to vector<2x32xf32>
    %c0_i32 = arith.constant 0 : i32
    %5 = arith.index_cast %c0_i32 : i32 to index
    %c0_7 = arith.constant 0 : index
    %c0_8 = arith.constant 0 : index
    %6 = vector.load %arg0[%5, %c0_7, %c0_8] : memref<4x2x64xf32, #tpu.memory_space<vmem>>, vector<1x2x64xf32>
    %7 = vector.shape_cast %6 : vector<1x2x64xf32> to vector<2x64xf32>
    %c3_i32 = arith.constant 3 : i32
    %8 = arith.subi %c3_i32, %c0_i32 : i32
    %9 = arith.index_cast %8 : i32 to index
    %c0_9 = arith.constant 0 : index
    %c0_10 = arith.constant 0 : index
    %10 = vector.load %arg0[%9, %c0_9, %c0_10] : memref<4x2x64xf32, #tpu.memory_space<vmem>>, vector<1x2x64xf32>
    %11 = vector.shape_cast %10 : vector<1x2x64xf32> to vector<2x64xf32>
    %cst_11 = arith.constant dense<0.000000e+00> : vector<2x128xf32>
    %12 = tpu.matmul %7, %0, %cst_11 {dimension_numbers = #tpu.dot_dimension_numbers<[1], [0], [0], [1], [0, 0, 1, 1], [], []>} : vector<2x64xf32>, vector<64x128xf32>, vector<2x128xf32> -> vector<2x128xf32>
    %cst_12 = arith.constant dense<0.000000e+00> : vector<2x128xf32>
    %13 = tpu.matmul %11, %1, %cst_12 {dimension_numbers = #tpu.dot_dimension_numbers<[1], [0], [0], [1], [0, 0, 1, 1], [], []>} : vector<2x64xf32>, vector<64x128xf32>, vector<2x128xf32> -> vector<2x128xf32>
    %14 = arith.addf %12, %13 : vector<2x128xf32>
    %cst_13 = arith.constant dense<0.000000e+00> : vector<2x128xf32>
    %15 = tpu.matmul %4, %2, %cst_13 {dimension_numbers = #tpu.dot_dimension_numbers<[1], [0], [0], [1], [0, 0, 1, 1], [], []>} : vector<2x32xf32>, vector<32x128xf32>, vector<2x128xf32> -> vector<2x128xf32>
    %16 = arith.addf %14, %15 : vector<2x128xf32>
    %17 = vector.broadcast %3 : vector<1x128xf32> to vector<2x128xf32>
    %18 = arith.addf %16, %17 : vector<2x128xf32>
    %19 = vector.extract_strided_slice %18 {offsets = [0, 0], sizes = [2, 32], strides = [1, 1]} : vector<2x128xf32> to vector<2x32xf32>
    %20 = arith.negf %19 : vector<2x32xf32>
    %21 = math.exp %20 : vector<2x32xf32>
    %cst_14 = arith.constant 1.000000e+00 : f32
    %22 = vector.broadcast %cst_14 : f32 to vector<2x32xf32>
    %23 = arith.addf %22, %21 : vector<2x32xf32>
    %24 = arith.divf %22, %23 : vector<2x32xf32>
    %25 = vector.extract_strided_slice %18 {offsets = [0, 32], sizes = [2, 32], strides = [1, 1]} : vector<2x128xf32> to vector<2x32xf32>
    %26 = arith.negf %25 : vector<2x32xf32>
    %27 = math.exp %26 : vector<2x32xf32>
    %cst_15 = arith.constant 1.000000e+00 : f32
    %28 = vector.broadcast %cst_15 : f32 to vector<2x32xf32>
    %29 = arith.addf %28, %27 : vector<2x32xf32>
    %30 = arith.divf %28, %29 : vector<2x32xf32>
    %31 = vector.extract_strided_slice %18 {offsets = [0, 64], sizes = [2, 32], strides = [1, 1]} : vector<2x128xf32> to vector<2x32xf32>
    %32 = math.tanh %31 : vector<2x32xf32>
    %33 = vector.extract_strided_slice %18 {offsets = [0, 96], sizes = [2, 32], strides = [1, 1]} : vector<2x128xf32> to vector<2x32xf32>
    %34 = arith.negf %33 : vector<2x32xf32>
    %35 = math.exp %34 : vector<2x32xf32>
    %cst_16 = arith.constant 1.000000e+00 : f32
    %36 = vector.broadcast %cst_16 : f32 to vector<2x32xf32>
    %37 = arith.addf %36, %35 : vector<2x32xf32>
    %38 = arith.divf %36, %37 : vector<2x32xf32>
    %39 = arith.mulf %30, %4 : vector<2x32xf32>
    %40 = arith.mulf %24, %32 : vector<2x32xf32>
    %41 = arith.addf %39, %40 : vector<2x32xf32>
    %42 = math.tanh %41 : vector<2x32xf32>
    %43 = arith.mulf %38, %42 : vector<2x32xf32>
    %44 = vector.extract_strided_slice %43 {offsets = [0, 0], sizes = [2, 16], strides = [1, 1]} : vector<2x32xf32> to vector<2x16xf32>
    %45 = arith.index_cast %c0_i32 : i32 to index
    %c0_17 = arith.constant 0 : index
    %c0_18 = arith.constant 0 : index
    %46 = vector.load %arg5[%45, %c0_17, %c0_18] : memref<4x2x16xf32, #tpu.memory_space<vmem>>, vector<1x2x16xf32>
    %47 = vector.shape_cast %46 : vector<1x2x16xf32> to vector<2x16xf32>
    %48 = vector.shape_cast %44 : vector<2x16xf32> to vector<1x2x16xf32>
    tpu.vector_store %arg5[%45, %c0_17, %c0_18], %48 {strides = array<i32>} : memref<4x2x16xf32, #tpu.memory_space<vmem>>, vector<1x2x16xf32>,
    %49 = vector.extract_strided_slice %43 {offsets = [0, 16], sizes = [2, 16], strides = [1, 1]} : vector<2x32xf32> to vector<2x16xf32>
    %c3_i32_19 = arith.constant 3 : i32
    %50 = arith.subi %c3_i32_19, %c0_i32 : i32
    %51 = arith.index_cast %50 : i32 to index
    %c0_20 = arith.constant 0 : index
    %c0_21 = arith.constant 0 : index
    %52 = vector.load %arg6[%51, %c0_20, %c0_21] : memref<4x2x16xf32, #tpu.memory_space<vmem>>, vector<1x2x16xf32>
    %53 = vector.shape_cast %52 : vector<1x2x16xf32> to vector<2x16xf32>
    %54 = vector.shape_cast %49 : vector<2x16xf32> to vector<1x2x16xf32>
    tpu.vector_store %arg6[%51, %c0_20, %c0_21], %54 {strides = array<i32>} : memref<4x2x16xf32, #tpu.memory_space<vmem>>, vector<1x2x16xf32>,
    %c1_i32 = arith.constant 1 : i32
    %55 = arith.index_cast %c1_i32 : i32 to index
    %c0_22 = arith.constant 0 : index
    %c0_23 = arith.constant 0 : index
    %56 = vector.load %arg0[%55, %c0_22, %c0_23] : memref<4x2x64xf32, #tpu.memory_space<vmem>>, vector<1x2x64xf32>
    %57 = vector.shape_cast %56 : vector<1x2x64xf32> to vector<2x64xf32>
    %c3_i32_24 = arith.constant 3 : i32
    %58 = arith.subi %c3_i32_24, %c1_i32 : i32
    %59 = arith.index_cast %58 : i32 to index
    %c0_25 = arith.constant 0 : index
    %c0_26 = arith.constant 0 : index
    %60 = vector.load %arg0[%59, %c0_25, %c0_26] : memref<4x2x64xf32, #tpu.memory_space<vmem>>, vector<1x2x64xf32>
    %61 = vector.shape_cast %60 : vector<1x2x64xf32> to vector<2x64xf32>
    %cst_27 = arith.constant dense<0.000000e+00> : vector<2x128xf32>
    %62 = tpu.matmul %57, %0, %cst_27 {dimension_numbers = #tpu.dot_dimension_numbers<[1], [0], [0], [1], [0, 0, 1, 1], [], []>} : vector<2x64xf32>, vector<64x128xf32>, vector<2x128xf32> -> vector<2x128xf32>
    %cst_28 = arith.constant dense<0.000000e+00> : vector<2x128xf32>
    %63 = tpu.matmul %61, %1, %cst_28 {dimension_numbers = #tpu.dot_dimension_numbers<[1], [0], [0], [1], [0, 0, 1, 1], [], []>} : vector<2x64xf32>, vector<64x128xf32>, vector<2x128xf32> -> vector<2x128xf32>
    %64 = arith.addf %62, %63 : vector<2x128xf32>
    %cst_29 = arith.constant dense<0.000000e+00> : vector<2x128xf32>
    %65 = tpu.matmul %43, %2, %cst_29 {dimension_numbers = #tpu.dot_dimension_numbers<[1], [0], [0], [1], [0, 0, 1, 1], [], []>} : vector<2x32xf32>, vector<32x128xf32>, vector<2x128xf32> -> vector<2x128xf32>
    %66 = arith.addf %64, %65 : vector<2x128xf32>
    %67 = vector.broadcast %3 : vector<1x128xf32> to vector<2x128xf32>
    %68 = arith.addf %66, %67 : vector<2x128xf32>
    %69 = vector.extract_strided_slice %68 {offsets = [0, 0], sizes = [2, 32], strides = [1, 1]} : vector<2x128xf32> to vector<2x32xf32>
    %70 = arith.negf %69 : vector<2x32xf32>
    %71 = math.exp %70 : vector<2x32xf32>
    %cst_30 = arith.constant 1.000000e+00 : f32
    %72 = vector.broadcast %cst_30 : f32 to vector<2x32xf32>
    %73 = arith.addf %72, %71 : vector<2x32xf32>
    %74 = arith.divf %72, %73 : vector<2x32xf32>
    %75 = vector.extract_strided_slice %68 {offsets = [0, 32], sizes = [2, 32], strides = [1, 1]} : vector<2x128xf32> to vector<2x32xf32>
    %76 = arith.negf %75 : vector<2x32xf32>
    %77 = math.exp %76 : vector<2x32xf32>
    %cst_31 = arith.constant 1.000000e+00 : f32
    %78 = vector.broadcast %cst_31 : f32 to vector<2x32xf32>
    %79 = arith.addf %78, %77 : vector<2x32xf32>
    %80 = arith.divf %78, %79 : vector<2x32xf32>
    %81 = vector.extract_strided_slice %68 {offsets = [0, 64], sizes = [2, 32], strides = [1, 1]} : vector<2x128xf32> to vector<2x32xf32>
    %82 = math.tanh %81 : vector<2x32xf32>
    %83 = vector.extract_strided_slice %68 {offsets = [0, 96], sizes = [2, 32], strides = [1, 1]} : vector<2x128xf32> to vector<2x32xf32>
    %84 = arith.negf %83 : vector<2x32xf32>
    %85 = math.exp %84 : vector<2x32xf32>
    %cst_32 = arith.constant 1.000000e+00 : f32
    %86 = vector.broadcast %cst_32 : f32 to vector<2x32xf32>
    %87 = arith.addf %86, %85 : vector<2x32xf32>
    %88 = arith.divf %86, %87 : vector<2x32xf32>
    %89 = arith.mulf %80, %41 : vector<2x32xf32>
    %90 = arith.mulf %74, %82 : vector<2x32xf32>
    %91 = arith.addf %89, %90 : vector<2x32xf32>
    %92 = math.tanh %91 : vector<2x32xf32>
    %93 = arith.mulf %88, %92 : vector<2x32xf32>
    %94 = vector.extract_strided_slice %93 {offsets = [0, 0], sizes = [2, 16], strides = [1, 1]} : vector<2x32xf32> to vector<2x16xf32>
    %95 = arith.index_cast %c1_i32 : i32 to index
    %c0_33 = arith.constant 0 : index
    %c0_34 = arith.constant 0 : index
    %96 = vector.load %arg5[%95, %c0_33, %c0_34] : memref<4x2x16xf32, #tpu.memory_space<vmem>>, vector<1x2x16xf32>
    %97 = vector.shape_cast %96 : vector<1x2x16xf32> to vector<2x16xf32>
    %98 = vector.shape_cast %94 : vector<2x16xf32> to vector<1x2x16xf32>
    tpu.vector_store %arg5[%95, %c0_33, %c0_34], %98 {strides = array<i32>} : memref<4x2x16xf32, #tpu.memory_space<vmem>>, vector<1x2x16xf32>,
    %99 = vector.extract_strided_slice %93 {offsets = [0, 16], sizes = [2, 16], strides = [1, 1]} : vector<2x32xf32> to vector<2x16xf32>
    %c3_i32_35 = arith.constant 3 : i32
    %100 = arith.subi %c3_i32_35, %c1_i32 : i32
    %101 = arith.index_cast %100 : i32 to index
    %c0_36 = arith.constant 0 : index
    %c0_37 = arith.constant 0 : index
    %102 = vector.load %arg6[%101, %c0_36, %c0_37] : memref<4x2x16xf32, #tpu.memory_space<vmem>>, vector<1x2x16xf32>
    %103 = vector.shape_cast %102 : vector<1x2x16xf32> to vector<2x16xf32>
    %104 = vector.shape_cast %99 : vector<2x16xf32> to vector<1x2x16xf32>
    tpu.vector_store %arg6[%101, %c0_36, %c0_37], %104 {strides = array<i32>} : memref<4x2x16xf32, #tpu.memory_space<vmem>>, vector<1x2x16xf32>,
    %c2_i32 = arith.constant 2 : i32
    %105 = arith.index_cast %c2_i32 : i32 to index
    %c0_38 = arith.constant 0 : index
    %c0_39 = arith.constant 0 : index
    %106 = vector.load %arg0[%105, %c0_38, %c0_39] : memref<4x2x64xf32, #tpu.memory_space<vmem>>, vector<1x2x64xf32>
    %107 = vector.shape_cast %106 : vector<1x2x64xf32> to vector<2x64xf32>
    %c3_i32_40 = arith.constant 3 : i32
    %108 = arith.subi %c3_i32_40, %c2_i32 : i32
    %109 = arith.index_cast %108 : i32 to index
    %c0_41 = arith.constant 0 : index
    %c0_42 = arith.constant 0 : index
    %110 = vector.load %arg0[%109, %c0_41, %c0_42] : memref<4x2x64xf32, #tpu.memory_space<vmem>>, vector<1x2x64xf32>
    %111 = vector.shape_cast %110 : vector<1x2x64xf32> to vector<2x64xf32>
    %cst_43 = arith.constant dense<0.000000e+00> : vector<2x128xf32>
    %112 = tpu.matmul %107, %0, %cst_43 {dimension_numbers = #tpu.dot_dimension_numbers<[1], [0], [0], [1], [0, 0, 1, 1], [], []>} : vector<2x64xf32>, vector<64x128xf32>, vector<2x128xf32> -> vector<2x128xf32>
    %cst_44 = arith.constant dense<0.000000e+00> : vector<2x128xf32>
    %113 = tpu.matmul %111, %1, %cst_44 {dimension_numbers = #tpu.dot_dimension_numbers<[1], [0], [0], [1], [0, 0, 1, 1], [], []>} : vector<2x64xf32>, vector<64x128xf32>, vector<2x128xf32> -> vector<2x128xf32>
    %114 = arith.addf %112, %113 : vector<2x128xf32>
    %cst_45 = arith.constant dense<0.000000e+00> : vector<2x128xf32>
    %115 = tpu.matmul %93, %2, %cst_45 {dimension_numbers = #tpu.dot_dimension_numbers<[1], [0], [0], [1], [0, 0, 1, 1], [], []>} : vector<2x32xf32>, vector<32x128xf32>, vector<2x128xf32> -> vector<2x128xf32>
    %116 = arith.addf %114, %115 : vector<2x128xf32>
    %117 = vector.broadcast %3 : vector<1x128xf32> to vector<2x128xf32>
    %118 = arith.addf %116, %117 : vector<2x128xf32>
    %119 = vector.extract_strided_slice %118 {offsets = [0, 0], sizes = [2, 32], strides = [1, 1]} : vector<2x128xf32> to vector<2x32xf32>
    %120 = arith.negf %119 : vector<2x32xf32>
    %121 = math.exp %120 : vector<2x32xf32>
    %cst_46 = arith.constant 1.000000e+00 : f32
    %122 = vector.broadcast %cst_46 : f32 to vector<2x32xf32>
    %123 = arith.addf %122, %121 : vector<2x32xf32>
    %124 = arith.divf %122, %123 : vector<2x32xf32>
    %125 = vector.extract_strided_slice %118 {offsets = [0, 32], sizes = [2, 32], strides = [1, 1]} : vector<2x128xf32> to vector<2x32xf32>
    %126 = arith.negf %125 : vector<2x32xf32>
    %127 = math.exp %126 : vector<2x32xf32>
    %cst_47 = arith.constant 1.000000e+00 : f32
    %128 = vector.broadcast %cst_47 : f32 to vector<2x32xf32>
    %129 = arith.addf %128, %127 : vector<2x32xf32>
    %130 = arith.divf %128, %129 : vector<2x32xf32>
    %131 = vector.extract_strided_slice %118 {offsets = [0, 64], sizes = [2, 32], strides = [1, 1]} : vector<2x128xf32> to vector<2x32xf32>
    %132 = math.tanh %131 : vector<2x32xf32>
    %133 = vector.extract_strided_slice %118 {offsets = [0, 96], sizes = [2, 32], strides = [1, 1]} : vector<2x128xf32> to vector<2x32xf32>
    %134 = arith.negf %133 : vector<2x32xf32>
    %135 = math.exp %134 : vector<2x32xf32>
    %cst_48 = arith.constant 1.000000e+00 : f32
    %136 = vector.broadcast %cst_48 : f32 to vector<2x32xf32>
    %137 = arith.addf %136, %135 : vector<2x32xf32>
    %138 = arith.divf %136, %137 : vector<2x32xf32>
    %139 = arith.mulf %130, %91 : vector<2x32xf32>
    %140 = arith.mulf %124, %132 : vector<2x32xf32>
    %141 = arith.addf %139, %140 : vector<2x32xf32>
    %142 = math.tanh %141 : vector<2x32xf32>
    %143 = arith.mulf %138, %142 : vector<2x32xf32>
    %144 = vector.extract_strided_slice %143 {offsets = [0, 0], sizes = [2, 16], strides = [1, 1]} : vector<2x32xf32> to vector<2x16xf32>
    %145 = arith.index_cast %c2_i32 : i32 to index
    %c0_49 = arith.constant 0 : index
    %c0_50 = arith.constant 0 : index
    %146 = vector.load %arg5[%145, %c0_49, %c0_50] : memref<4x2x16xf32, #tpu.memory_space<vmem>>, vector<1x2x16xf32>
    %147 = vector.shape_cast %146 : vector<1x2x16xf32> to vector<2x16xf32>
    %148 = vector.shape_cast %144 : vector<2x16xf32> to vector<1x2x16xf32>
    tpu.vector_store %arg5[%145, %c0_49, %c0_50], %148 {strides = array<i32>} : memref<4x2x16xf32, #tpu.memory_space<vmem>>, vector<1x2x16xf32>,
    %149 = vector.extract_strided_slice %143 {offsets = [0, 16], sizes = [2, 16], strides = [1, 1]} : vector<2x32xf32> to vector<2x16xf32>
    %c3_i32_51 = arith.constant 3 : i32
    %150 = arith.subi %c3_i32_51, %c2_i32 : i32
    %151 = arith.index_cast %150 : i32 to index
    %c0_52 = arith.constant 0 : index
    %c0_53 = arith.constant 0 : index
    %152 = vector.load %arg6[%151, %c0_52, %c0_53] : memref<4x2x16xf32, #tpu.memory_space<vmem>>, vector<1x2x16xf32>
    %153 = vector.shape_cast %152 : vector<1x2x16xf32> to vector<2x16xf32>
    %154 = vector.shape_cast %149 : vector<2x16xf32> to vector<1x2x16xf32>
    tpu.vector_store %arg6[%151, %c0_52, %c0_53], %154 {strides = array<i32>} : memref<4x2x16xf32, #tpu.memory_space<vmem>>, vector<1x2x16xf32>,
    %c3_i32_54 = arith.constant 3 : i32
    %155 = arith.index_cast %c3_i32_54 : i32 to index
    %c0_55 = arith.constant 0 : index
    %c0_56 = arith.constant 0 : index
    %156 = vector.load %arg0[%155, %c0_55, %c0_56] : memref<4x2x64xf32, #tpu.memory_space<vmem>>, vector<1x2x64xf32>
    %157 = vector.shape_cast %156 : vector<1x2x64xf32> to vector<2x64xf32>
    %c3_i32_57 = arith.constant 3 : i32
    %158 = arith.subi %c3_i32_57, %c3_i32_54 : i32
    %159 = arith.index_cast %158 : i32 to index
    %c0_58 = arith.constant 0 : index
    %c0_59 = arith.constant 0 : index
    %160 = vector.load %arg0[%159, %c0_58, %c0_59] : memref<4x2x64xf32, #tpu.memory_space<vmem>>, vector<1x2x64xf32>
    %161 = vector.shape_cast %160 : vector<1x2x64xf32> to vector<2x64xf32>
    %cst_60 = arith.constant dense<0.000000e+00> : vector<2x128xf32>
    %162 = tpu.matmul %157, %0, %cst_60 {dimension_numbers = #tpu.dot_dimension_numbers<[1], [0], [0], [1], [0, 0, 1, 1], [], []>} : vector<2x64xf32>, vector<64x128xf32>, vector<2x128xf32> -> vector<2x128xf32>
    %cst_61 = arith.constant dense<0.000000e+00> : vector<2x128xf32>
    %163 = tpu.matmul %161, %1, %cst_61 {dimension_numbers = #tpu.dot_dimension_numbers<[1], [0], [0], [1], [0, 0, 1, 1], [], []>} : vector<2x64xf32>, vector<64x128xf32>, vector<2x128xf32> -> vector<2x128xf32>
    %164 = arith.addf %162, %163 : vector<2x128xf32>
    %cst_62 = arith.constant dense<0.000000e+00> : vector<2x128xf32>
    %165 = tpu.matmul %143, %2, %cst_62 {dimension_numbers = #tpu.dot_dimension_numbers<[1], [0], [0], [1], [0, 0, 1, 1], [], []>} : vector<2x32xf32>, vector<32x128xf32>, vector<2x128xf32> -> vector<2x128xf32>
    %166 = arith.addf %164, %165 : vector<2x128xf32>
    %167 = vector.broadcast %3 : vector<1x128xf32> to vector<2x128xf32>
    %168 = arith.addf %166, %167 : vector<2x128xf32>
    %169 = vector.extract_strided_slice %168 {offsets = [0, 0], sizes = [2, 32], strides = [1, 1]} : vector<2x128xf32> to vector<2x32xf32>
    %170 = arith.negf %169 : vector<2x32xf32>
    %171 = math.exp %170 : vector<2x32xf32>
    %cst_63 = arith.constant 1.000000e+00 : f32
    %172 = vector.broadcast %cst_63 : f32 to vector<2x32xf32>
    %173 = arith.addf %172, %171 : vector<2x32xf32>
    %174 = arith.divf %172, %173 : vector<2x32xf32>
    %175 = vector.extract_strided_slice %168 {offsets = [0, 32], sizes = [2, 32], strides = [1, 1]} : vector<2x128xf32> to vector<2x32xf32>
    %176 = arith.negf %175 : vector<2x32xf32>
    %177 = math.exp %176 : vector<2x32xf32>
    %cst_64 = arith.constant 1.000000e+00 : f32
    %178 = vector.broadcast %cst_64 : f32 to vector<2x32xf32>
    %179 = arith.addf %178, %177 : vector<2x32xf32>
    %180 = arith.divf %178, %179 : vector<2x32xf32>
    %181 = vector.extract_strided_slice %168 {offsets = [0, 64], sizes = [2, 32], strides = [1, 1]} : vector<2x128xf32> to vector<2x32xf32>
    %182 = math.tanh %181 : vector<2x32xf32>
    %183 = vector.extract_strided_slice %168 {offsets = [0, 96], sizes = [2, 32], strides = [1, 1]} : vector<2x128xf32> to vector<2x32xf32>
    %184 = arith.negf %183 : vector<2x32xf32>
    %185 = math.exp %184 : vector<2x32xf32>
    %cst_65 = arith.constant 1.000000e+00 : f32
    %186 = vector.broadcast %cst_65 : f32 to vector<2x32xf32>
    %187 = arith.addf %186, %185 : vector<2x32xf32>
    %188 = arith.divf %186, %187 : vector<2x32xf32>
    %189 = arith.mulf %180, %141 : vector<2x32xf32>
    %190 = arith.mulf %174, %182 : vector<2x32xf32>
    %191 = arith.addf %189, %190 : vector<2x32xf32>
    %192 = math.tanh %191 : vector<2x32xf32>
    %193 = arith.mulf %188, %192 : vector<2x32xf32>
    %194 = vector.extract_strided_slice %193 {offsets = [0, 0], sizes = [2, 16], strides = [1, 1]} : vector<2x32xf32> to vector<2x16xf32>
    %195 = arith.index_cast %c3_i32_54 : i32 to index
    %c0_66 = arith.constant 0 : index
    %c0_67 = arith.constant 0 : index
    %196 = vector.load %arg5[%195, %c0_66, %c0_67] : memref<4x2x16xf32, #tpu.memory_space<vmem>>, vector<1x2x16xf32>
    %197 = vector.shape_cast %196 : vector<1x2x16xf32> to vector<2x16xf32>
    %198 = vector.shape_cast %194 : vector<2x16xf32> to vector<1x2x16xf32>
    tpu.vector_store %arg5[%195, %c0_66, %c0_67], %198 {strides = array<i32>} : memref<4x2x16xf32, #tpu.memory_space<vmem>>, vector<1x2x16xf32>,
    %199 = vector.extract_strided_slice %193 {offsets = [0, 16], sizes = [2, 16], strides = [1, 1]} : vector<2x32xf32> to vector<2x16xf32>
    %c3_i32_68 = arith.constant 3 : i32
    %200 = arith.subi %c3_i32_68, %c3_i32_54 : i32
    %201 = arith.index_cast %200 : i32 to index
    %c0_69 = arith.constant 0 : index
    %c0_70 = arith.constant 0 : index
    %202 = vector.load %arg6[%201, %c0_69, %c0_70] : memref<4x2x16xf32, #tpu.memory_space<vmem>>, vector<1x2x16xf32>
    %203 = vector.shape_cast %202 : vector<1x2x16xf32> to vector<2x16xf32>
    %204 = vector.shape_cast %199 : vector<2x16xf32> to vector<1x2x16xf32>
    tpu.vector_store %arg6[%201, %c0_69, %c0_70], %204 {strides = array<i32>} : memref<4x2x16xf32, #tpu.memory_space<vmem>>, vector<1x2x16xf32>,
    %c4_i32 = arith.constant 4 : i32
    %c0_71 = arith.constant 0 : index
    %c0_72 = arith.constant 0 : index
    %205 = vector.load %arg7[%c0_71, %c0_72] : memref<2x32xf32, #tpu.memory_space<vmem>>, vector<2x32xf32>
    tpu.vector_store %arg7[%c0_71, %c0_72], %193 {strides = array<i32>} : memref<2x32xf32, #tpu.memory_space<vmem>>, vector<2x32xf32>,
    return
  }
}

module attributes {stable_mosaic.version = 11 : i64} {
  func.func @_bilstm_kernel(%arg0: memref<2x2x64xf32, #tpu.memory_space<vmem>>, %arg1: memref<64x128xf32, #tpu.memory_space<vmem>>, %arg2: memref<64x128xf32, #tpu.memory_space<vmem>>, %arg3: memref<32x128xf32, #tpu.memory_space<vmem>>, %arg4: memref<1x128xf32, #tpu.memory_space<vmem>>, %arg5: memref<2x2x16xf32, #tpu.memory_space<vmem>>, %arg6: memref<2x2x16xf32, #tpu.memory_space<vmem>>, %arg7: memref<2x32xf32, #tpu.memory_space<vmem>>) attributes {dimension_semantics = [], scalar_prefetch = 0 : i64, scratch_operands = 0 : i64, tpu.core_type = #tpu.core_type<tc>} {
    %c0 = arith.constant 0 : index
    %c0_0 = arith.constant 0 : index
    %0 = vector.load %arg1[%c0, %c0_0] : memref<64x128xf32, #tpu.memory_space<vmem>>, vector<64x128xf32>
    %c0_1 = arith.constant 0 : index
    %c0_2 = arith.constant 0 : index
    %1 = vector.load %arg2[%c0_1, %c0_2] : memref<64x128xf32, #tpu.memory_space<vmem>>, vector<64x128xf32>
    %c0_3 = arith.constant 0 : index
    %c0_4 = arith.constant 0 : index
    %2 = vector.load %arg3[%c0_3, %c0_4] : memref<32x128xf32, #tpu.memory_space<vmem>>, vector<32x128xf32>
    %c0_5 = arith.constant 0 : index
    %c0_6 = arith.constant 0 : index
    %3 = vector.load %arg4[%c0_5, %c0_6] : memref<1x128xf32, #tpu.memory_space<vmem>>, vector<1x128xf32>
    %cst = arith.constant 0.000000e+00 : f32
    %4 = vector.broadcast %cst : f32 to vector<2x32xf32>
    %c0_i32 = arith.constant 0 : i32
    %5 = arith.index_cast %c0_i32 : i32 to index
    %c0_7 = arith.constant 0 : index
    %c0_8 = arith.constant 0 : index
    %6 = vector.load %arg0[%5, %c0_7, %c0_8] : memref<2x2x64xf32, #tpu.memory_space<vmem>>, vector<1x2x64xf32>
    %7 = vector.shape_cast %6 : vector<1x2x64xf32> to vector<2x64xf32>
    %c1_i32 = arith.constant 1 : i32
    %8 = arith.subi %c1_i32, %c0_i32 : i32
    %9 = arith.index_cast %8 : i32 to index
    %c0_9 = arith.constant 0 : index
    %c0_10 = arith.constant 0 : index
    %10 = vector.load %arg0[%9, %c0_9, %c0_10] : memref<2x2x64xf32, #tpu.memory_space<vmem>>, vector<1x2x64xf32>
    %11 = vector.shape_cast %10 : vector<1x2x64xf32> to vector<2x64xf32>
    %cst_11 = arith.constant dense<0.000000e+00> : vector<2x128xf32>
    %12 = tpu.matmul %7, %0, %cst_11 {dimension_numbers = #tpu.dot_dimension_numbers<[1], [0], [0], [1], [0, 0, 1, 1], [], []>} : vector<2x64xf32>, vector<64x128xf32>, vector<2x128xf32> -> vector<2x128xf32>
    %cst_12 = arith.constant dense<0.000000e+00> : vector<2x128xf32>
    %13 = tpu.matmul %11, %1, %cst_12 {dimension_numbers = #tpu.dot_dimension_numbers<[1], [0], [0], [1], [0, 0, 1, 1], [], []>} : vector<2x64xf32>, vector<64x128xf32>, vector<2x128xf32> -> vector<2x128xf32>
    %14 = arith.addf %12, %13 : vector<2x128xf32>
    %cst_13 = arith.constant dense<0.000000e+00> : vector<2x128xf32>
    %15 = tpu.matmul %4, %2, %cst_13 {dimension_numbers = #tpu.dot_dimension_numbers<[1], [0], [0], [1], [0, 0, 1, 1], [], []>} : vector<2x32xf32>, vector<32x128xf32>, vector<2x128xf32> -> vector<2x128xf32>
    %16 = arith.addf %14, %15 : vector<2x128xf32>
    %17 = vector.broadcast %3 : vector<1x128xf32> to vector<2x128xf32>
    %18 = arith.addf %16, %17 : vector<2x128xf32>
    %19 = vector.extract_strided_slice %18 {offsets = [0, 0], sizes = [2, 32], strides = [1, 1]} : vector<2x128xf32> to vector<2x32xf32>
    %20 = arith.negf %19 : vector<2x32xf32>
    %21 = math.exp %20 : vector<2x32xf32>
    %cst_14 = arith.constant 1.000000e+00 : f32
    %22 = vector.broadcast %cst_14 : f32 to vector<2x32xf32>
    %23 = arith.addf %22, %21 : vector<2x32xf32>
    %24 = arith.divf %22, %23 : vector<2x32xf32>
    %25 = vector.extract_strided_slice %18 {offsets = [0, 32], sizes = [2, 32], strides = [1, 1]} : vector<2x128xf32> to vector<2x32xf32>
    %26 = arith.negf %25 : vector<2x32xf32>
    %27 = math.exp %26 : vector<2x32xf32>
    %cst_15 = arith.constant 1.000000e+00 : f32
    %28 = vector.broadcast %cst_15 : f32 to vector<2x32xf32>
    %29 = arith.addf %28, %27 : vector<2x32xf32>
    %30 = arith.divf %28, %29 : vector<2x32xf32>
    %31 = vector.extract_strided_slice %18 {offsets = [0, 64], sizes = [2, 32], strides = [1, 1]} : vector<2x128xf32> to vector<2x32xf32>
    %32 = math.tanh %31 : vector<2x32xf32>
    %33 = vector.extract_strided_slice %18 {offsets = [0, 96], sizes = [2, 32], strides = [1, 1]} : vector<2x128xf32> to vector<2x32xf32>
    %34 = arith.negf %33 : vector<2x32xf32>
    %35 = math.exp %34 : vector<2x32xf32>
    %cst_16 = arith.constant 1.000000e+00 : f32
    %36 = vector.broadcast %cst_16 : f32 to vector<2x32xf32>
    %37 = arith.addf %36, %35 : vector<2x32xf32>
    %38 = arith.divf %36, %37 : vector<2x32xf32>
    %39 = arith.mulf %30, %4 : vector<2x32xf32>
    %40 = arith.mulf %24, %32 : vector<2x32xf32>
    %41 = arith.addf %39, %40 : vector<2x32xf32>
    %42 = math.tanh %41 : vector<2x32xf32>
    %43 = arith.mulf %38, %42 : vector<2x32xf32>
    %44 = vector.extract_strided_slice %43 {offsets = [0, 0], sizes = [2, 16], strides = [1, 1]} : vector<2x32xf32> to vector<2x16xf32>
    %45 = arith.index_cast %c0_i32 : i32 to index
    %c0_17 = arith.constant 0 : index
    %c0_18 = arith.constant 0 : index
    %46 = vector.load %arg5[%45, %c0_17, %c0_18] : memref<2x2x16xf32, #tpu.memory_space<vmem>>, vector<1x2x16xf32>
    %47 = vector.shape_cast %46 : vector<1x2x16xf32> to vector<2x16xf32>
    %48 = vector.shape_cast %44 : vector<2x16xf32> to vector<1x2x16xf32>
    tpu.vector_store %arg5[%45, %c0_17, %c0_18], %48 {strides = array<i32>} : memref<2x2x16xf32, #tpu.memory_space<vmem>>, vector<1x2x16xf32>,
    %49 = vector.extract_strided_slice %43 {offsets = [0, 16], sizes = [2, 16], strides = [1, 1]} : vector<2x32xf32> to vector<2x16xf32>
    %c1_i32_19 = arith.constant 1 : i32
    %50 = arith.subi %c1_i32_19, %c0_i32 : i32
    %51 = arith.index_cast %50 : i32 to index
    %c0_20 = arith.constant 0 : index
    %c0_21 = arith.constant 0 : index
    %52 = vector.load %arg6[%51, %c0_20, %c0_21] : memref<2x2x16xf32, #tpu.memory_space<vmem>>, vector<1x2x16xf32>
    %53 = vector.shape_cast %52 : vector<1x2x16xf32> to vector<2x16xf32>
    %54 = vector.shape_cast %49 : vector<2x16xf32> to vector<1x2x16xf32>
    tpu.vector_store %arg6[%51, %c0_20, %c0_21], %54 {strides = array<i32>} : memref<2x2x16xf32, #tpu.memory_space<vmem>>, vector<1x2x16xf32>,
    %c1_i32_22 = arith.constant 1 : i32
    %55 = arith.index_cast %c1_i32_22 : i32 to index
    %c0_23 = arith.constant 0 : index
    %c0_24 = arith.constant 0 : index
    %56 = vector.load %arg0[%55, %c0_23, %c0_24] : memref<2x2x64xf32, #tpu.memory_space<vmem>>, vector<1x2x64xf32>
    %57 = vector.shape_cast %56 : vector<1x2x64xf32> to vector<2x64xf32>
    %c1_i32_25 = arith.constant 1 : i32
    %58 = arith.subi %c1_i32_25, %c1_i32_22 : i32
    %59 = arith.index_cast %58 : i32 to index
    %c0_26 = arith.constant 0 : index
    %c0_27 = arith.constant 0 : index
    %60 = vector.load %arg0[%59, %c0_26, %c0_27] : memref<2x2x64xf32, #tpu.memory_space<vmem>>, vector<1x2x64xf32>
    %61 = vector.shape_cast %60 : vector<1x2x64xf32> to vector<2x64xf32>
    %cst_28 = arith.constant dense<0.000000e+00> : vector<2x128xf32>
    %62 = tpu.matmul %57, %0, %cst_28 {dimension_numbers = #tpu.dot_dimension_numbers<[1], [0], [0], [1], [0, 0, 1, 1], [], []>} : vector<2x64xf32>, vector<64x128xf32>, vector<2x128xf32> -> vector<2x128xf32>
    %cst_29 = arith.constant dense<0.000000e+00> : vector<2x128xf32>
    %63 = tpu.matmul %61, %1, %cst_29 {dimension_numbers = #tpu.dot_dimension_numbers<[1], [0], [0], [1], [0, 0, 1, 1], [], []>} : vector<2x64xf32>, vector<64x128xf32>, vector<2x128xf32> -> vector<2x128xf32>
    %64 = arith.addf %62, %63 : vector<2x128xf32>
    %cst_30 = arith.constant dense<0.000000e+00> : vector<2x128xf32>
    %65 = tpu.matmul %43, %2, %cst_30 {dimension_numbers = #tpu.dot_dimension_numbers<[1], [0], [0], [1], [0, 0, 1, 1], [], []>} : vector<2x32xf32>, vector<32x128xf32>, vector<2x128xf32> -> vector<2x128xf32>
    %66 = arith.addf %64, %65 : vector<2x128xf32>
    %67 = vector.broadcast %3 : vector<1x128xf32> to vector<2x128xf32>
    %68 = arith.addf %66, %67 : vector<2x128xf32>
    %69 = vector.extract_strided_slice %68 {offsets = [0, 0], sizes = [2, 32], strides = [1, 1]} : vector<2x128xf32> to vector<2x32xf32>
    %70 = arith.negf %69 : vector<2x32xf32>
    %71 = math.exp %70 : vector<2x32xf32>
    %cst_31 = arith.constant 1.000000e+00 : f32
    %72 = vector.broadcast %cst_31 : f32 to vector<2x32xf32>
    %73 = arith.addf %72, %71 : vector<2x32xf32>
    %74 = arith.divf %72, %73 : vector<2x32xf32>
    %75 = vector.extract_strided_slice %68 {offsets = [0, 32], sizes = [2, 32], strides = [1, 1]} : vector<2x128xf32> to vector<2x32xf32>
    %76 = arith.negf %75 : vector<2x32xf32>
    %77 = math.exp %76 : vector<2x32xf32>
    %cst_32 = arith.constant 1.000000e+00 : f32
    %78 = vector.broadcast %cst_32 : f32 to vector<2x32xf32>
    %79 = arith.addf %78, %77 : vector<2x32xf32>
    %80 = arith.divf %78, %79 : vector<2x32xf32>
    %81 = vector.extract_strided_slice %68 {offsets = [0, 64], sizes = [2, 32], strides = [1, 1]} : vector<2x128xf32> to vector<2x32xf32>
    %82 = math.tanh %81 : vector<2x32xf32>
    %83 = vector.extract_strided_slice %68 {offsets = [0, 96], sizes = [2, 32], strides = [1, 1]} : vector<2x128xf32> to vector<2x32xf32>
    %84 = arith.negf %83 : vector<2x32xf32>
    %85 = math.exp %84 : vector<2x32xf32>
    %cst_33 = arith.constant 1.000000e+00 : f32
    %86 = vector.broadcast %cst_33 : f32 to vector<2x32xf32>
    %87 = arith.addf %86, %85 : vector<2x32xf32>
    %88 = arith.divf %86, %87 : vector<2x32xf32>
    %89 = arith.mulf %80, %41 : vector<2x32xf32>
    %90 = arith.mulf %74, %82 : vector<2x32xf32>
    %91 = arith.addf %89, %90 : vector<2x32xf32>
    %92 = math.tanh %91 : vector<2x32xf32>
    %93 = arith.mulf %88, %92 : vector<2x32xf32>
    %94 = vector.extract_strided_slice %93 {offsets = [0, 0], sizes = [2, 16], strides = [1, 1]} : vector<2x32xf32> to vector<2x16xf32>
    %95 = arith.index_cast %c1_i32_22 : i32 to index
    %c0_34 = arith.constant 0 : index
    %c0_35 = arith.constant 0 : index
    %96 = vector.load %arg5[%95, %c0_34, %c0_35] : memref<2x2x16xf32, #tpu.memory_space<vmem>>, vector<1x2x16xf32>
    %97 = vector.shape_cast %96 : vector<1x2x16xf32> to vector<2x16xf32>
    %98 = vector.shape_cast %94 : vector<2x16xf32> to vector<1x2x16xf32>
    tpu.vector_store %arg5[%95, %c0_34, %c0_35], %98 {strides = array<i32>} : memref<2x2x16xf32, #tpu.memory_space<vmem>>, vector<1x2x16xf32>,
    %99 = vector.extract_strided_slice %93 {offsets = [0, 16], sizes = [2, 16], strides = [1, 1]} : vector<2x32xf32> to vector<2x16xf32>
    %c1_i32_36 = arith.constant 1 : i32
    %100 = arith.subi %c1_i32_36, %c1_i32_22 : i32
    %101 = arith.index_cast %100 : i32 to index
    %c0_37 = arith.constant 0 : index
    %c0_38 = arith.constant 0 : index
    %102 = vector.load %arg6[%101, %c0_37, %c0_38] : memref<2x2x16xf32, #tpu.memory_space<vmem>>, vector<1x2x16xf32>
    %103 = vector.shape_cast %102 : vector<1x2x16xf32> to vector<2x16xf32>
    %104 = vector.shape_cast %99 : vector<2x16xf32> to vector<1x2x16xf32>
    tpu.vector_store %arg6[%101, %c0_37, %c0_38], %104 {strides = array<i32>} : memref<2x2x16xf32, #tpu.memory_space<vmem>>, vector<1x2x16xf32>,
    %c2_i32 = arith.constant 2 : i32
    %c0_39 = arith.constant 0 : index
    %c0_40 = arith.constant 0 : index
    %105 = vector.load %arg7[%c0_39, %c0_40] : memref<2x32xf32, #tpu.memory_space<vmem>>, vector<2x32xf32>
    tpu.vector_store %arg7[%c0_39, %c0_40], %93 {strides = array<i32>} : memref<2x32xf32, #tpu.memory_space<vmem>>, vector<2x32xf32>,
    return
  }
}

module attributes {stable_mosaic.version = 11 : i64} {
  func.func @_kv_proj_kernel(%arg0: memref<4x32xf32, #tpu.memory_space<vmem>>, %arg1: memref<32x64xf32, #tpu.memory_space<vmem>>, %arg2: memref<1x64xf32, #tpu.memory_space<vmem>>, %arg3: memref<4x64xf32, #tpu.memory_space<vmem>>) attributes {dimension_semantics = [], scalar_prefetch = 0 : i64, scratch_operands = 0 : i64, tpu.core_type = #tpu.core_type<tc>} {
    %c0 = arith.constant 0 : index
    %c0_0 = arith.constant 0 : index
    %0 = vector.load %arg0[%c0, %c0_0] : memref<4x32xf32, #tpu.memory_space<vmem>>, vector<4x32xf32>
    %c0_1 = arith.constant 0 : index
    %c0_2 = arith.constant 0 : index
    %1 = vector.load %arg1[%c0_1, %c0_2] : memref<32x64xf32, #tpu.memory_space<vmem>>, vector<32x64xf32>
    %cst = arith.constant dense<0.000000e+00> : vector<4x64xf32>
    %2 = tpu.matmul %0, %1, %cst {dimension_numbers = #tpu.dot_dimension_numbers<[1], [0], [0], [1], [0, 0, 1, 1], [], []>} : vector<4x32xf32>, vector<32x64xf32>, vector<4x64xf32> -> vector<4x64xf32>
    %c0_3 = arith.constant 0 : index
    %c0_4 = arith.constant 0 : index
    %3 = vector.load %arg2[%c0_3, %c0_4] : memref<1x64xf32, #tpu.memory_space<vmem>>, vector<1x64xf32>
    %4 = vector.broadcast %3 : vector<1x64xf32> to vector<4x64xf32>
    %5 = arith.addf %2, %4 : vector<4x64xf32>
    %cst_5 = arith.constant 0.000000e+00 : f32
    %6 = vector.broadcast %cst_5 : f32 to vector<4x64xf32>
    %7 = arith.cmpf ogt, %5, %6 : vector<4x64xf32>
    %8 = math.exp %5 : vector<4x64xf32>
    %cst_6 = arith.constant 1.000000e+00 : f32
    %9 = vector.broadcast %cst_6 : f32 to vector<4x64xf32>
    %10 = arith.subf %8, %9 : vector<4x64xf32>
    %cst_7 = arith.constant 1.67326319 : f32
    %11 = vector.broadcast %cst_7 : f32 to vector<4x64xf32>
    %12 = arith.mulf %11, %10 : vector<4x64xf32>
    %13 = arith.select %7, %5, %12 : vector<4x64xi1>, vector<4x64xf32>
    %cst_8 = arith.constant 1.05070102 : f32
    %14 = vector.broadcast %cst_8 : f32 to vector<4x64xf32>
    %15 = arith.mulf %14, %13 : vector<4x64xf32>
    %c0_9 = arith.constant 0 : index
    %c0_10 = arith.constant 0 : index
    %16 = vector.load %arg3[%c0_9, %c0_10] : memref<4x64xf32, #tpu.memory_space<vmem>>, vector<4x64xf32>
    tpu.vector_store %arg3[%c0_9, %c0_10], %15 {strides = array<i32>} : memref<4x64xf32, #tpu.memory_space<vmem>>, vector<4x64xf32>,
    return
  }
}

module attributes {stable_mosaic.version = 11 : i64} {
  func.func @_decoder_kernel(%arg0: memref<2x2x32xf32, #tpu.memory_space<vmem>>, %arg1: memref<2x2x32xf32, #tpu.memory_space<vmem>>, %arg2: memref<2x2xf32, #tpu.memory_space<vmem>>, %arg3: memref<2x32xf32, #tpu.memory_space<vmem>>, %arg4: memref<32x32xf32, #tpu.memory_space<vmem>>, %arg5: memref<32x32xf32, #tpu.memory_space<vmem>>, %arg6: memref<96x128xf32, #tpu.memory_space<vmem>>, %arg7: memref<1x128xf32, #tpu.memory_space<vmem>>, %arg8: memref<64x128xf32, #tpu.memory_space<vmem>>, %arg9: memref<1x128xf32, #tpu.memory_space<vmem>>, %arg10: memref<1x32xf32, #tpu.memory_space<vmem>>, %arg11: memref<251x2x32xf32, #tpu.memory_space<vmem>>, %arg12: memref<251x2x32xf32, #tpu.memory_space<vmem>>, %arg13: memref<251x2x2xf32, #tpu.memory_space<vmem>>) attributes {dimension_semantics = [], scalar_prefetch = 0 : i64, scratch_operands = 0 : i64, tpu.core_type = #tpu.core_type<tc>} {
    %c0 = arith.constant 0 : index
    %c0_0 = arith.constant 0 : index
    %c0_1 = arith.constant 0 : index
    %0 = vector.load %arg0[%c0, %c0_0, %c0_1] : memref<2x2x32xf32, #tpu.memory_space<vmem>>, vector<2x2x32xf32>
    %c0_2 = arith.constant 0 : index
    %c0_3 = arith.constant 0 : index
    %c0_4 = arith.constant 0 : index
    %1 = vector.load %arg1[%c0_2, %c0_3, %c0_4] : memref<2x2x32xf32, #tpu.memory_space<vmem>>, vector<2x2x32xf32>
    %c0_5 = arith.constant 0 : index
    %c0_6 = arith.constant 0 : index
    %2 = vector.load %arg2[%c0_5, %c0_6] : memref<2x2xf32, #tpu.memory_space<vmem>>, vector<2x2xf32>
    %c0_7 = arith.constant 0 : index
    %c0_8 = arith.constant 0 : index
    %3 = vector.load %arg4[%c0_7, %c0_8] : memref<32x32xf32, #tpu.memory_space<vmem>>, vector<32x32xf32>
    %c0_9 = arith.constant 0 : index
    %c0_10 = arith.constant 0 : index
    %4 = vector.load %arg5[%c0_9, %c0_10] : memref<32x32xf32, #tpu.memory_space<vmem>>, vector<32x32xf32>
    %c0_11 = arith.constant 0 : index
    %c0_12 = arith.constant 0 : index
    %5 = vector.load %arg6[%c0_11, %c0_12] : memref<96x128xf32, #tpu.memory_space<vmem>>, vector<96x128xf32>
    %c0_13 = arith.constant 0 : index
    %c0_14 = arith.constant 0 : index
    %6 = vector.load %arg7[%c0_13, %c0_14] : memref<1x128xf32, #tpu.memory_space<vmem>>, vector<1x128xf32>
    %c0_15 = arith.constant 0 : index
    %c0_16 = arith.constant 0 : index
    %7 = vector.load %arg8[%c0_15, %c0_16] : memref<64x128xf32, #tpu.memory_space<vmem>>, vector<64x128xf32>
    %c0_17 = arith.constant 0 : index
    %c0_18 = arith.constant 0 : index
    %8 = vector.load %arg9[%c0_17, %c0_18] : memref<1x128xf32, #tpu.memory_space<vmem>>, vector<1x128xf32>
    %c0_19 = arith.constant 0 : index
    %c0_20 = arith.constant 0 : index
    %9 = vector.load %arg10[%c0_19, %c0_20] : memref<1x32xf32, #tpu.memory_space<vmem>>, vector<1x32xf32>
    %10 = tpu.iota {dimensions = array<i32: 1>} : vector<2x32xi32>
    %11 = arith.sitofp %10 : vector<2x32xi32> to vector<2x32xf32>
    %cst = arith.constant 0.000000e+00 : f32
    %12 = vector.broadcast %cst : f32 to vector<2x32xf32>
    %c0_i32 = arith.constant 0 : i32
    %13 = vector.broadcast %c0_i32 : i32 to vector<2x32xi32>
    %14 = arith.cmpi eq, %10, %13 : vector<2x32xi32>
    %15 = arith.extui %14 : vector<2x32xi1> to vector<2x32xi32>
    %16 = arith.sitofp %15 : vector<2x32xi32> to vector<2x32xf32>
    %c0_21 = arith.constant 0 : index
    %c0_22 = arith.constant 0 : index
    %17 = vector.load %arg3[%c0_21, %c0_22] : memref<2x32xf32, #tpu.memory_space<vmem>>, vector<2x32xf32>
    %c0_i32_23 = arith.constant 0 : i32
    %c251_i32 = arith.constant 251 : i32
    %18 = arith.addi %c0_i32_23, %c251_i32 : i32
    %c1_i32 = arith.constant 1 : i32
    %19:6 = scf.for %arg14 = %c0_i32_23 to %18 step %c1_i32 iter_args(%arg15 = %12, %arg16 = %12, %arg17 = %12, %arg18 = %12, %arg19 = %17, %arg20 = %16) -> (vector<2x32xf32>, vector<2x32xf32>, vector<2x32xf32>, vector<2x32xf32>, vector<2x32xf32>, vector<2x32xf32>)  : i32 {
      %20 = vector.shape_cast %arg19 : vector<2x32xf32> to vector<2x1x32xf32>
      %21 = vector.broadcast %20 : vector<2x1x32xf32> to vector<2x2x32xf32>
      %22 = arith.mulf %21, %0 : vector<2x2x32xf32>
      %cst_25 = arith.constant dense<0.000000e+00> : vector<2x2xf32>
      %23 = vector.multi_reduction <add>, %22, %cst_25 [2] : vector<2x2x32xf32> to vector<2x2xf32>
      %cst_26 = arith.constant dense<0xFF800000> : vector<2xf32>
      %24 = vector.multi_reduction <maximumf>, %23, %cst_26 [1] : vector<2x2xf32> to vector<2xf32>
      %25 = vector.shape_cast %24 : vector<2xf32> to vector<2x1xf32>
      %26 = vector.broadcast %25 : vector<2x1xf32> to vector<2x2xf32>
      %27 = arith.subf %23, %26 : vector<2x2xf32>
      %28 = math.exp %27 : vector<2x2xf32>
      %29 = arith.mulf %28, %2 : vector<2x2xf32>
      %cst_27 = arith.constant dense<0.000000e+00> : vector<2xf32>
      %30 = vector.multi_reduction <add>, %29, %cst_27 [1] : vector<2x2xf32> to vector<2xf32>
      %31 = vector.shape_cast %30 : vector<2xf32> to vector<2x1xf32>
      %32 = tpu.reciprocal %31 {approx = true} : vector<2x1xf32> -> vector<2x1xf32>
      %33 = vector.broadcast %32 : vector<2x1xf32> to vector<2x2xf32>
      %34 = arith.mulf %29, %33 : vector<2x2xf32>
      %35 = arith.index_cast %arg14 : i32 to index
      %c0_28 = arith.constant 0 : index
      %c0_29 = arith.constant 0 : index
      %36 = vector.load %arg13[%35, %c0_28, %c0_29] : memref<251x2x2xf32, #tpu.memory_space<vmem>>, vector<1x2x2xf32>
      %37 = vector.shape_cast %36 : vector<1x2x2xf32> to vector<2x2xf32>
      %38 = vector.shape_cast %34 : vector<2x2xf32> to vector<1x2x2xf32>
      tpu.vector_store %arg13[%35, %c0_28, %c0_29], %38 {strides = array<i32>} : memref<251x2x2xf32, #tpu.memory_space<vmem>>, vector<1x2x2xf32>,
      %39 = vector.shape_cast %34 : vector<2x2xf32> to vector<2x2x1xf32>
      %40 = vector.broadcast %39 : vector<2x2x1xf32> to vector<2x2x32xf32>
      %41 = arith.mulf %40, %1 : vector<2x2x32xf32>
      %cst_30 = arith.constant dense<0.000000e+00> : vector<2x32xf32>
      %42 = vector.multi_reduction <add>, %41, %cst_30 [1] : vector<2x2x32xf32> to vector<2x32xf32>
      %cst_31 = arith.constant dense<0.000000e+00> : vector<2x32xf32>
      %43 = tpu.matmul %arg20, %3, %cst_31 {dimension_numbers = #tpu.dot_dimension_numbers<[1], [0], [0], [1], [0, 0, 1, 1], [], []>} : vector<2x32xf32>, vector<32x32xf32>, vector<2x32xf32> -> vector<2x32xf32>
      %44 = tpu.concatenate %43, %42, %arg15 in 1 : vector<2x32xf32>, vector<2x32xf32>, vector<2x32xf32> -> vector<2x96xf32>
      %cst_32 = arith.constant dense<0.000000e+00> : vector<2x128xf32>
      %45 = tpu.matmul %44, %5, %cst_32 {dimension_numbers = #tpu.dot_dimension_numbers<[1], [0], [0], [1], [0, 0, 1, 1], [], []>} : vector<2x96xf32>, vector<96x128xf32>, vector<2x128xf32> -> vector<2x128xf32>
      %46 = vector.broadcast %6 : vector<1x128xf32> to vector<2x128xf32>
      %47 = arith.addf %45, %46 : vector<2x128xf32>
      %48 = vector.extract_strided_slice %47 {offsets = [0, 0], sizes = [2, 32], strides = [1, 1]} : vector<2x128xf32> to vector<2x32xf32>
      %49 = arith.negf %48 : vector<2x32xf32>
      %50 = math.exp %49 : vector<2x32xf32>
      %cst_33 = arith.constant 1.000000e+00 : f32
      %51 = vector.broadcast %cst_33 : f32 to vector<2x32xf32>
      %52 = arith.addf %51, %50 : vector<2x32xf32>
      %53 = arith.divf %51, %52 : vector<2x32xf32>
      %54 = vector.extract_strided_slice %47 {offsets = [0, 32], sizes = [2, 32], strides = [1, 1]} : vector<2x128xf32> to vector<2x32xf32>
      %55 = arith.negf %54 : vector<2x32xf32>
      %56 = math.exp %55 : vector<2x32xf32>
      %cst_34 = arith.constant 1.000000e+00 : f32
      %57 = vector.broadcast %cst_34 : f32 to vector<2x32xf32>
      %58 = arith.addf %57, %56 : vector<2x32xf32>
      %59 = arith.divf %57, %58 : vector<2x32xf32>
      %60 = vector.extract_strided_slice %47 {offsets = [0, 64], sizes = [2, 32], strides = [1, 1]} : vector<2x128xf32> to vector<2x32xf32>
      %61 = math.tanh %60 : vector<2x32xf32>
      %62 = vector.extract_strided_slice %47 {offsets = [0, 96], sizes = [2, 32], strides = [1, 1]} : vector<2x128xf32> to vector<2x32xf32>
      %63 = arith.negf %62 : vector<2x32xf32>
      %64 = math.exp %63 : vector<2x32xf32>
      %cst_35 = arith.constant 1.000000e+00 : f32
      %65 = vector.broadcast %cst_35 : f32 to vector<2x32xf32>
      %66 = arith.addf %65, %64 : vector<2x32xf32>
      %67 = arith.divf %65, %66 : vector<2x32xf32>
      %68 = arith.mulf %59, %arg16 : vector<2x32xf32>
      %69 = arith.mulf %53, %61 : vector<2x32xf32>
      %70 = arith.addf %68, %69 : vector<2x32xf32>
      %71 = math.tanh %70 : vector<2x32xf32>
      %72 = arith.mulf %67, %71 : vector<2x32xf32>
      %73 = tpu.concatenate %72, %arg17 in 1 : vector<2x32xf32>, vector<2x32xf32> -> vector<2x64xf32>
      %cst_36 = arith.constant dense<0.000000e+00> : vector<2x128xf32>
      %74 = tpu.matmul %73, %7, %cst_36 {dimension_numbers = #tpu.dot_dimension_numbers<[1], [0], [0], [1], [0, 0, 1, 1], [], []>} : vector<2x64xf32>, vector<64x128xf32>, vector<2x128xf32> -> vector<2x128xf32>
      %75 = vector.broadcast %8 : vector<1x128xf32> to vector<2x128xf32>
      %76 = arith.addf %74, %75 : vector<2x128xf32>
      %77 = vector.extract_strided_slice %76 {offsets = [0, 0], sizes = [2, 32], strides = [1, 1]} : vector<2x128xf32> to vector<2x32xf32>
      %78 = arith.negf %77 : vector<2x32xf32>
      %79 = math.exp %78 : vector<2x32xf32>
      %cst_37 = arith.constant 1.000000e+00 : f32
      %80 = vector.broadcast %cst_37 : f32 to vector<2x32xf32>
      %81 = arith.addf %80, %79 : vector<2x32xf32>
      %82 = arith.divf %80, %81 : vector<2x32xf32>
      %83 = vector.extract_strided_slice %76 {offsets = [0, 32], sizes = [2, 32], strides = [1, 1]} : vector<2x128xf32> to vector<2x32xf32>
      %84 = arith.negf %83 : vector<2x32xf32>
      %85 = math.exp %84 : vector<2x32xf32>
      %cst_38 = arith.constant 1.000000e+00 : f32
      %86 = vector.broadcast %cst_38 : f32 to vector<2x32xf32>
      %87 = arith.addf %86, %85 : vector<2x32xf32>
      %88 = arith.divf %86, %87 : vector<2x32xf32>
      %89 = vector.extract_strided_slice %76 {offsets = [0, 64], sizes = [2, 32], strides = [1, 1]} : vector<2x128xf32> to vector<2x32xf32>
      %90 = math.tanh %89 : vector<2x32xf32>
      %91 = vector.extract_strided_slice %76 {offsets = [0, 96], sizes = [2, 32], strides = [1, 1]} : vector<2x128xf32> to vector<2x32xf32>
      %92 = arith.negf %91 : vector<2x32xf32>
      %93 = math.exp %92 : vector<2x32xf32>
      %cst_39 = arith.constant 1.000000e+00 : f32
      %94 = vector.broadcast %cst_39 : f32 to vector<2x32xf32>
      %95 = arith.addf %94, %93 : vector<2x32xf32>
      %96 = arith.divf %94, %95 : vector<2x32xf32>
      %97 = arith.mulf %88, %arg18 : vector<2x32xf32>
      %98 = arith.mulf %82, %90 : vector<2x32xf32>
      %99 = arith.addf %97, %98 : vector<2x32xf32>
      %100 = math.tanh %99 : vector<2x32xf32>
      %101 = arith.mulf %96, %100 : vector<2x32xf32>
      %cst_40 = arith.constant dense<0.000000e+00> : vector<2x32xf32>
      %102 = tpu.matmul %101, %4, %cst_40 {dimension_numbers = #tpu.dot_dimension_numbers<[1], [0], [0], [1], [0, 0, 1, 1], [], []>} : vector<2x32xf32>, vector<32x32xf32>, vector<2x32xf32> -> vector<2x32xf32>
      %103 = vector.broadcast %9 : vector<1x32xf32> to vector<2x32xf32>
      %104 = arith.addf %102, %103 : vector<2x32xf32>
      %105 = arith.index_cast %arg14 : i32 to index
      %c0_41 = arith.constant 0 : index
      %c0_42 = arith.constant 0 : index
      %106 = vector.load %arg12[%105, %c0_41, %c0_42] : memref<251x2x32xf32, #tpu.memory_space<vmem>>, vector<1x2x32xf32>
      %107 = vector.shape_cast %106 : vector<1x2x32xf32> to vector<2x32xf32>
      %108 = vector.shape_cast %104 : vector<2x32xf32> to vector<1x2x32xf32>
      tpu.vector_store %arg12[%105, %c0_41, %c0_42], %108 {strides = array<i32>} : memref<251x2x32xf32, #tpu.memory_space<vmem>>, vector<1x2x32xf32>,
      %109 = arith.index_cast %arg14 : i32 to index
      %c0_43 = arith.constant 0 : index
      %c0_44 = arith.constant 0 : index
      %110 = vector.load %arg11[%109, %c0_43, %c0_44] : memref<251x2x32xf32, #tpu.memory_space<vmem>>, vector<1x2x32xf32>
      %111 = vector.shape_cast %110 : vector<1x2x32xf32> to vector<2x32xf32>
      %112 = arith.addf %104, %111 : vector<2x32xf32>
      %cst_45 = arith.constant dense<0xFF800000> : vector<2xf32>
      %113 = vector.multi_reduction <maximumf>, %112, %cst_45 [1] : vector<2x32xf32> to vector<2xf32>
      %114 = vector.shape_cast %113 : vector<2xf32> to vector<2x1xf32>
      %115 = vector.broadcast %114 : vector<2x1xf32> to vector<2x32xf32>
      %116 = arith.cmpf oeq, %112, %115 : vector<2x32xf32>
      %cst_46 = arith.constant 3.200000e+01 : f32
      %117 = vector.broadcast %cst_46 : f32 to vector<2x32xf32>
      %118 = arith.select %116, %11, %117 : vector<2x32xi1>, vector<2x32xf32>
      %cst_47 = arith.constant dense<0x7F800000> : vector<2xf32>
      %119 = vector.multi_reduction <minimumf>, %118, %cst_47 [1] : vector<2x32xf32> to vector<2xf32>
      %120 = vector.shape_cast %119 : vector<2xf32> to vector<2x1xf32>
      %121 = vector.broadcast %120 : vector<2x1xf32> to vector<2x32xf32>
      %122 = arith.cmpf oeq, %11, %121 : vector<2x32xf32>
      %123 = arith.extui %122 : vector<2x32xi1> to vector<2x32xi32>
      %124 = arith.sitofp %123 : vector<2x32xi32> to vector<2x32xf32>
      scf.yield %72, %70, %101, %99, %101, %124 : vector<2x32xf32>, vector<2x32xf32>, vector<2x32xf32>, vector<2x32xf32>, vector<2x32xf32>, vector<2x32xf32>
    }
    %c251_i32_24 = arith.constant 251 : i32
    return
  }
}

</mosaic_0001>

<bundles_post_ra>
// kernel: seq2seq_forward.9
= control target key start
LH: loop header
LB: loop body
LE: loop exit
PB: predicated region body
PF: predicated region fallthrough
CT: control target
= control target key end

     0   :  { %v819_v0 = vmov 0.0|0.0   ;;  %vm820_vm0 = vmmov 0   ;;  %v821_v8 = vmov 0.0   ;;  %vm47_vm1 = vcmask 523264   ;;  %s822_s21 = smov 64   ;;  %s823_s22 = smov 32   ;;  %s1008_s2 = inlined_call_operand.vmem [shape: f32[64,128], index: 2, kind: input, shape index: {}]   ;;  %s1009_s1 = inlined_call_operand.vmem [shape: f32[64,128], index: 1, kind: input, shape index: {}]   ;;  %s1010_s3 = inlined_call_operand.vmem [shape: f32[32,128], index: 3, kind: input, shape index: {}]   ;;  %s1011_s0 = inlined_call_operand.vmem [shape: f32[2,2,64], index: 0, kind: input, shape index: {}]   ;;  %s1012_s4 = inlined_call_operand.vmem [shape: f32[1,128], index: 4, kind: input, shape index: {}]   ;;  %s1013_s5 = inlined_call_operand.vmem [shape: f32[2,2,16], index: 5, kind: output, shape index: {0}]   ;;  %s1014_s6 = inlined_call_operand.vmem [shape: f32[2,2,16], index: 6, kind: output, shape index: {1}]   ;;  %s1015_s7 = inlined_call_operand.vmem [shape: f32[2,32], index: 7, kind: output, shape index: {2}]  }
   0x1   :  { %737 = vmatprep.subr.bf16.mxu0 %v819_v0  ;;  %v31_v1 = vld [vmem:[%s1008_s2] sm:$0xff]  ;;  %v32_v2 = vld [vmem:[%s1008_s2 + $0x8] sm:$0xff]  ;;  %749 = vmatprep.subr.bf16.mxu1 %v819_v0  ;;  %v33_v6 = vld [vmem:[%s1008_s2 + $0x10] sm:$0xff]  ;;  %vm304_vm2 = vcmask 123904   ;;  %vm194_vm3 = vcmask 261120   ;;  %s824_s27 = smov 16  }
   0x2   :  { %v23_v3 = vld [vmem:[%s1009_s1] sm:$0xff]  ;;  %v738_v4 = vpack.c.bf16 %v32_v2, %v31_v1  ;;  %v24_v5 = vld [vmem:[%s1009_s1 + $0x8] sm:$0xff]  ;;  %v34_v7 = vld [vmem:[%s1008_s2 + $0x18] sm:$0xff]  ;;  %655 = vmatprep.mubr.msk.f32.mxu0 %vm820_vm0, %v821_v8  ;;  %674 = vmatprep.mubr.msk.f32.mxu1 %vm820_vm0, %v821_v8  ;;  %vm567_vm4 = vcmask 254976  }
   0x3   :  { %v750_v9 = vpack.c.bf16 %v24_v5, %v23_v3  ;;  %v25_v10 = vld [vmem:[%s1009_s1 + $0x10] sm:$0xff]  ;;  %v26_v11 = vld [vmem:[%s1009_s1 + $0x18] sm:$0xff]  ;;  %v741_v12 = vpack.c.bf16 %v34_v7, %v33_v6  ;;  %v35_v14 = vld [vmem:[%s1008_s2 + $0x20] sm:$0xff] }
   0x4   :  { %739 = vmatpush3.bf16.msra.mxu0 %v738_v4  ;;  %v753_v13 = vpack.c.bf16 %v26_v11, %v25_v10  ;;  %v36_v15 = vld [vmem:[%s1008_s2 + $0x28] sm:$0xff]  ;;  %v27_v16 = vld [vmem:[%s1009_s1 + $0x20] sm:$0xff]  ;;  %v37_v20 = vld [vmem:[%s1008_s2 + $0x30] sm:$0xff] }
   0x5   :  { %751 = vmatpush3.bf16.msra.mxu1 %v750_v9  ;;  %740 = vmatprep.subr.bf16.mxu0 %v819_v0  ;;  %v28_v17 = vld [vmem:[%s1009_s1 + $0x28] sm:$0xff]  ;;  %v744_v18 = vpack.c.bf16 %v36_v15, %v35_v14  ;;  %v38_v21 = vld [vmem:[%s1008_s2 + $0x38] sm:$0xff]  ;;  %v29_v22 = vld [vmem:[%s1009_s1 + $0x30] sm:$0xff] }
   0x6   :  { %752 = vmatprep.subr.bf16.mxu1 %v819_v0  ;;  %v756_v19 = vpack.c.bf16 %v28_v17, %v27_v16  ;;  %v30_v23 = vld [vmem:[%s1009_s1 + $0x38] sm:$0xff]  ;;  %v747_v24 = vpack.c.bf16 %v38_v21, %v37_v20  ;;  %v39_v26 = vld [vmem:[%s1010_s3] sm:$0xff]  ;;  %v40_v27 = vld [vmem:[%s1010_s3 + $0x8] sm:$0xff] }
   0x7   :  { %v759_v25 = vpack.c.bf16 %v30_v23, %v29_v22  ;;  %v581_v28 = vld [vmem:[%s1011_s0 + $0x2] sm:$0x3]  ;;  %v934_v29 = vpack.c.bf16 %v40_v27, %v39_v26  ;;  %v44_v30 = vld [vmem:[%s1011_s0] sm:$0x3]  ;;  %v41_v31 = vld [vmem:[%s1010_s3 + $0x10] sm:$0xff] }
   0x8   :  { %742 = vmatpush3.bf16.msra.mxu0 %v741_v12  ;;  %v42_v32 = vld [vmem:[%s1010_s3 + $0x18] sm:$0xff]  ;;  %v584_v39 = vld [vmem:[%s1012_s4] ss:$0 sm:$0xff]  ;;  %v587_v55 = vld [vmem:[%s1011_s0 + $0x2] sm:$0x3] }
   0x9   :  { %754 = vmatpush3.bf16.msra.mxu1 %v753_v13  ;;  %743 = vmatprep.subr.bf16.mxu0 %v819_v0  ;;  %v765_v33 = vpack.c.bf16 %v42_v32, %v41_v31  ;;  %v312_v54 = vld [vmem:[%s1011_s0] sm:$0x3] }
   0xa   :  { %755 = vmatprep.subr.bf16.mxu1 %v819_v0 }
   0xc   :  { %745 = vmatpush3.bf16.msra.mxu0 %v744_v18 }
   0xd   :  { %757 = vmatpush3.bf16.msra.mxu1 %v756_v19  ;;  %746 = vmatprep.subr.bf16.mxu0 %v819_v0 }
   0xe   :  { %758 = vmatprep.subr.bf16.mxu1 %v819_v0 }
  0x10   :  { %748 = vmatpush3.bf16.msra.mxu0 %v747_v24 }
  0x11   :  { %760 = vmatpush3.bf16.msra.mxu1 %v759_v25  ;;  %761 = vmatprep.subr.bf16.mxu0 %v819_v0 }
  0x12   :  { %767 = vmatprep.subr.bf16.mxu1 %v819_v0 }
  0x13   :  { %656 = vmatmul.mubr.msk.f32.vlgmr.msra.gmra.mrb[0].mxu0 %vm47_vm1, %v581_v28 }
  0x14   :  { %675 = vmatmul.mubr.msk.f32.vlgmr.msra.gmra.mrb[0].mxu1 %vm47_vm1, %v44_v30  ;;  %763 = vmatpush3.bf16.msra.mxu0 %v934_v29 }
  0x15   :  { %764 = vmatprep.subr.bf16.mxu0 %v819_v0  ;;  %685 = vmatprep.mubr.msk.f32.mxu0 %vm820_vm0, %v821_v8 }
  0x16   :  { %769 = vmatpush3.bf16.msra.mxu1 %v738_v4  ;;  %704 = vmatprep.mubr.msk.f32.mxu1 %vm820_vm0, %v821_v8 }
  0x17   :  { %770 = vmatprep.subr.bf16.mxu1 %v819_v0 }
  0x18   :  { %766 = vmatpush3.bf16.msra.mxu0 %v765_v33 }
  0x19   :  { %779 = vmatprep.subr.bf16.mxu0 %v819_v0 }
  0x1a   :  { %772 = vmatpush3.bf16.msra.mxu1 %v741_v12 }
  0x1b   :  { %686 = vmatmul.mubr.f32.vlgmr.msra.gmra.mrb[2].mxu0 %v821_v8  ;;  %773 = vmatprep.subr.bf16.mxu1 %v819_v0 }
  0x1c   :  { %781 = vmatpush3.bf16.msra.mxu0 %v750_v9  ;;  %723 = vmatprep.mubr.msk.f32.mxu0 %vm820_vm0, %v821_v8 }
  0x1d   :  { %782 = vmatprep.subr.bf16.mxu0 %v819_v0 }
  0x1e   :  { %775 = vmatpush3.bf16.msra.mxu1 %v744_v18 }
  0x1f   :  { %776 = vmatprep.subr.bf16.mxu1 %v819_v0 }
  0x20   :  { %784 = vmatpush3.bf16.msra.mxu0 %v753_v13 }
  0x21   :  { %785 = vmatprep.subr.bf16.mxu0 %v819_v0 }
  0x22   :  { %778 = vmatpush3.bf16.msra.mxu1 %v747_v24 }
  0x23   :  { %791 = vmatprep.subr.bf16.mxu1 %v819_v0 }
  0x24   :  { %787 = vmatpush3.bf16.msra.mxu0 %v756_v19 }
  0x25   :  { %788 = vmatprep.subr.bf16.mxu0 %v819_v0  ;;  %705 = vmatmul.mubr.msk.f32.vlgmr.msra.gmra.mrb[2].mxu1 %vm47_vm1, %v312_v54 }
  0x26   :  { %793 = vmatpush3.bf16.msra.mxu1 %v934_v29  ;;  %734 = vmatprep.mubr.msk.f32.mxu1 %vm820_vm0, %v821_v8 }
  0x27   :  { %794 = vmatprep.subr.bf16.mxu1 %v819_v0 }
  0x28   :  { %790 = vmatpush3.bf16.msra.mxu0 %v759_v25 }
  0x2a   :  { %796 = vmatpush3.bf16.msra.mxu1 %v765_v33 }
  0x2b   :  { %724 = vmatmul.mubr.msk.f32.vlgmr.msra.gmra.mrb[4].mxu0 %vm47_vm1, %v587_v55 }
  0xe6   :  { %v117_v34 = vpop.f32.mrb[0].mxu0 }
  0xe7   :  { %v657_v35 = vpop.f32.mrb[1].mxu0  ;;  %v190_v36 = vpop.f32.mrb[0].mxu1 }
  0xe8   :  { %v191_v37 = vadd.f32 %v190_v36, %v117_v34  ;;  %v676_v38 = vpop.f32.mrb[1].mxu1 }
  0xee   :  { %v264_v40 = vpop.f32.mrb[2].mxu0 }
  0xef   :  { %v268_v41 = vadd.f32 %v264_v40, %v191_v37  ;;  %v687_v42 = vpop.f32.mrb[3].mxu0 }
  0xf1   :  { %v275_v43 = vadd.f32 %v584_v39, %v268_v41 }
  0xf3   :  { %803 = vtanh.f32 %v275_v43  ;;  %v585_v45 = vmul.f32 -1.442695, %v275_v43 }
  0xf5   :  { %805 = vpow2.f32 %v585_v45 }
  0xf8   :  { %v382_v59 = vpop.f32.mrb[2].mxu1 }
  0xf9   :  { %v706_v61 = vpop.f32.mrb[3].mxu1 }
  0xfd   :  { %v804_v44 = vpop.eup %803 }
  0xfe   :  { %285 = vrot.lane.b32.xlu0 %v804_v44, %s822_s21  ;;  %v455_v60 = vpop.f32.mrb[4].mxu0 }
  0xff   :  { %v806_v46 = vpop.eup %805  ;;  %v456_v62 = vadd.f32 %v455_v60, %v382_v59  ;;  %v725_v63 = vpop.f32.mrb[5].mxu0 }
 0x100   :  { %v279_v47 = vadd.f32 1.0, %v806_v46 }
 0x102   :  { %807 = vrcp.f32 %v279_v47 }
 0x10c   :  { %v808_v48 = vpop.eup %807 }
 0x10d   :  { %v283_v51 = vmul.f32 0.0, %v808_v48 }
 0x170   :  { %v286_v49 = vpop.permute.xlu0 %285 }
 0x171   :  { %v288_v50 = vmul.f32 %v808_v48, %v286_v49 }
 0x173   :  { %290 = vrot.lane.b32.xlu0 %v288_v50, %s823_s22 }
 0x1e5   :  { %v291_v52 = vpop.permute.xlu0 %290 }
 0x1e6   :  { %v293_v53 = vadd.f32 %v291_v52, %v283_v51 }
 0x1e8   :  { %809 = vtanh.f32 %v293_v53 }
 0x1f2   :  { %v810_v56 = vpop.eup %809 }
 0x1f3   :  { %296 = vrot.lane.b32.xlu1 %v810_v56, %s822_s21 }
 0x265   :  { %v297_v57 = vpop.permute.xlu1 %296 }
 0x266   :  { %v299_v58 = vmul.f32 %v808_v48, %v297_v57 }
 0x268   :  { %301 = vrot.lane.b32.xlu1 %v299_v58, %s823_s22 }
 0x2da   :  { %v302_v1 = vpop.permute.xlu1 %301 }
 0x2db   :  { %305 = vst.msk [vmem:[%s1013_s5] sm:$0x3] %vm304_vm2, %v302_v1  ;;  %735 = vmatmul.mubr.msk.f32.vlgmr.msra.gmra.mrb[4].mxu1 %vm194_vm3, %v302_v1 }
 0x3ae   :  { %v527_v0 = vpop.f32.mrb[4].mxu1 }
 0x3af   :  { %v531_v2 = vadd.f32 %v527_v0, %v456_v62  ;;  %v736_v3 = vpop.f32.mrb[5].mxu1 }
 0x3b1   :  { %v532_v4 = vadd.f32 %v584_v39, %v531_v2 }
 0x3b3   :  { %811 = vtanh.f32 %v532_v4  ;;  %v591_v6 = vmul.f32 -1.442695, %v532_v4 }
 0x3b5   :  { %813 = vpow2.f32 %v591_v6 }
 0x3bd   :  { %v812_v5 = vpop.eup %811 }
 0x3be   :  { %542 = vrot.lane.b32.xlu0 %v812_v5, %s822_s21 }
 0x3bf   :  { %v814_v7 = vpop.eup %813 }
 0x3c0   :  { %v536_v8 = vadd.f32 1.0, %v814_v7 }
 0x3c2   :  { %815 = vrcp.f32 %v536_v8 }
 0x3cc   :  { %v816_v9 = vpop.eup %815 }
 0x3cd   :  { %v540_v12 = vmul.f32 %v816_v9, %v293_v53 }
 0x430   :  { %v543_v10 = vpop.permute.xlu0 %542 }
 0x431   :  { %v545_v11 = vmul.f32 %v816_v9, %v543_v10 }
 0x433   :  { %547 = vrot.lane.b32.xlu1 %v545_v11, %s823_s22 }
 0x437   :  { %306 = vrot.lane.b32.xlu1 %v299_v58, %s824_s27 }
 0x4a5   :  { %v548_v13 = vpop.permute.xlu1 %547 }
 0x4a6   :  { %v550_v14 = vadd.f32 %v548_v13, %v540_v12 }
 0x4a8   :  { %817 = vtanh.f32 %v550_v14 }
 0x4a9   :  { %v307_v15 = vpop.permute.xlu1 %306 }
 0x4aa   :  { %586 = vst.msk [vmem:[%s1014_s6 + $0x2] sm:$0x3] %vm304_vm2, %v307_v15 }
 0x4b2   :  { %v818_v16 = vpop.eup %817 }
 0x4b3   :  { %553 = vrot.lane.b32.xlu0 %v818_v16, %s822_s21 }
 0x525   :  { %v554_v17 = vpop.permute.xlu0 %553 }
 0x526   :  { %v556_v18 = vmul.f32 %v816_v9, %v554_v17 }
 0x528   :  { %563 = vrot.lane.b32.xlu1 %v556_v18, %s824_s27  ;;  %558 = vrot.lane.b32.xlu0 %v556_v18, %s823_s22 }
 0x59a   :  { %v564_v19 = vpop.permute.xlu1 %563  ;;  %v559_v20 = vpop.permute.xlu0 %558 }
 0x59b   :  { %566 = vst.msk [vmem:[%s1014_s6] sm:$0x3] %vm304_vm2, %v564_v19  ;;  %592 = vst.msk [vmem:[%s1013_s5 + $0x2] sm:$0x3] %vm304_vm2, %v559_v20 }
 0x59c   :  { %568 = vst.msk [vmem:[%s1015_s7] sm:$0x3] %vm567_vm4, %v559_v20 }

// kernel: seq2seq_forward.8
= control target key start
LH: loop header
LB: loop body
LE: loop exit
PB: predicated region body
PF: predicated region fallthrough
CT: control target
= control target key end

     0   :  { %v1607_v3 = vmov 0.0|0.0   ;;  %vm1608_vm0 = vmmov 0   ;;  %v1609_v11 = vmov 0.0   ;;  %s1951_s0 = inlined_call_operand.vmem [shape: f32[4,2,64], index: 0, kind: input, shape index: {}]   ;;  %s1952_s1 = inlined_call_operand.vmem [shape: f32[64,128], index: 1, kind: input, shape index: {}]   ;;  %s1953_s2 = inlined_call_operand.vmem [shape: f32[64,128], index: 2, kind: input, shape index: {}]   ;;  %s1954_s3 = inlined_call_operand.vmem [shape: f32[32,128], index: 3, kind: input, shape index: {}]   ;;  %s1955_s4 = inlined_call_operand.vmem [shape: f32[1,128], index: 4, kind: input, shape index: {}]   ;;  %s1956_s5 = inlined_call_operand.vmem [shape: f32[4,2,16], index: 5, kind: output, shape index: {0}]   ;;  %s1957_s6 = inlined_call_operand.vmem [shape: f32[4,2,16], index: 6, kind: output, shape index: {1}]   ;;  %s1958_s7 = inlined_call_operand.hbm [shape: f32[2,32], index: 7, kind: output, shape index: {2}]  }
   0x1   :  { %v32_v0 = vld [vmem:[%s1953_s2] sm:$0xff]  ;;  %v33_v1 = vld [vmem:[%s1953_s2 + $0x8] sm:$0xff]  ;;  %1424 = vmatprep.subr.bf16.mxu0 %v1607_v3  ;;  %1436 = vmatprep.subr.bf16.mxu1 %v1607_v3  ;;  %v34_v6 = vld [vmem:[%s1953_s2 + $0x10] sm:$0xff] }
   0x2   :  { %v24_v2 = vld [vmem:[%s1952_s1] sm:$0xff]  ;;  %v1664_v4 = vpack.c.bf16 %v33_v1, %v32_v0  ;;  %v25_v5 = vld [vmem:[%s1952_s1 + $0x8] sm:$0xff]  ;;  %v35_v7 = vld [vmem:[%s1953_s2 + $0x18] sm:$0xff]  ;;  %1244 = vmatprep.mubr.msk.f32.mxu0 %vm1608_vm0, %v1609_v11  ;;  %1263 = vmatprep.mubr.msk.f32.mxu1 %vm1608_vm0, %v1609_v11 }
   0x3   :  { %v1676_v8 = vpack.c.bf16 %v25_v5, %v24_v2  ;;  %v26_v9 = vld [vmem:[%s1952_s1 + $0x10] sm:$0xff]  ;;  %v27_v10 = vld [vmem:[%s1952_s1 + $0x18] sm:$0xff]  ;;  %v1689_v12 = vpack.c.bf16 %v35_v7, %v34_v6  ;;  %v36_v14 = vld [vmem:[%s1953_s2 + $0x20] sm:$0xff] }
   0x4   :  { %1426 = vmatpush3.bf16.msra.mxu0 %v1664_v4  ;;  %v1693_v13 = vpack.c.bf16 %v27_v10, %v26_v9  ;;  %v37_v15 = vld [vmem:[%s1953_s2 + $0x28] sm:$0xff]  ;;  %v28_v16 = vld [vmem:[%s1952_s1 + $0x20] sm:$0xff] }
   0x5   :  { %1438 = vmatpush3.bf16.msra.mxu1 %v1676_v8  ;;  %1427 = vmatprep.subr.bf16.mxu0 %v1607_v3  ;;  %v29_v17 = vld [vmem:[%s1952_s1 + $0x28] sm:$0xff]  ;;  %v1709_v18 = vpack.c.bf16 %v37_v15, %v36_v14 }
   0x6   :  { %1439 = vmatprep.subr.bf16.mxu1 %v1607_v3 }
   0x8   :  { %1429 = vmatpush3.bf16.msra.mxu0 %v1689_v12 }
   0x9   :  { %13 = vsyncpa [#allocation3], 0  ;;  %1441 = vmatpush3.bf16.msra.mxu1 %v1693_v13  ;;  %1430 = vmatprep.subr.bf16.mxu0 %v1607_v3  ;;  %v1713_v19 = vpack.c.bf16 %v29_v17, %v28_v16  ;;  %v38_v20 = vld [vmem:[%s1953_s2 + $0x30] sm:$0xff]  ;;  %v39_v21 = vld [vmem:[%s1953_s2 + $0x38] sm:$0xff]  ;;  %vm48_vm1 = vcmask 523264   ;;  %s1610_s21 = smov 64  }
   0xa   :  { %1442 = vmatprep.subr.bf16.mxu1 %v1607_v3  ;;  %v30_v22 = vld [vmem:[%s1952_s1 + $0x30] sm:$0xff]  ;;  %v31_v23 = vld [vmem:[%s1952_s1 + $0x38] sm:$0xff]  ;;  %v1729_v24 = vpack.c.bf16 %v39_v21, %v38_v20  ;;  %v40_v26 = vld [vmem:[%s1954_s3] sm:$0xff]  ;;  %vm305_vm2 = vcmask 123904   ;;  %vm195_vm3 = vcmask 261120   ;;  %s1612_s14 = smov 16  }
   0xb   :  { %v1733_v25 = vpack.c.bf16 %v31_v23, %v30_v22  ;;  %v41_v27 = vld [vmem:[%s1954_s3 + $0x8] sm:$0xff]  ;;  %v1108_v28 = vld [vmem:[%s1951_s0 + $0x6] sm:$0x3]  ;;  %v45_v30 = vld [vmem:[%s1951_s0] sm:$0x3]  ;;  %s1613_s20 = smov [#allocation2]  }
   0xc   :  { %1432 = vmatpush3.bf16.msra.mxu0 %v1709_v18  ;;  %v1746_v29 = vpack.c.bf16 %v41_v27, %v40_v26  ;;  %v42_v31 = vld [vmem:[%s1954_s3 + $0x10] sm:$0xff]  ;;  %v43_v32 = vld [vmem:[%s1954_s3 + $0x18] sm:$0xff]  ;;  %v1794_v39 = vld [vmem:[%s1955_s4] ss:$0 sm:$0xff]  ;;  %s1611_s4 = smov 32   ;;  %vm1084_vm4 = vcmask 254976  }
   0xd   :  { %1444 = vmatpush3.bf16.msra.mxu1 %v1713_v19  ;;  %1433 = vmatprep.subr.bf16.mxu0 %v1607_v3  ;;  %v1763_v33 = vpack.c.bf16 %v43_v32, %v42_v31  ;;  %v1115_v54 = vld [vmem:[%s1951_s0 + $0x4] sm:$0x3]  ;;  %v1114_v55 = vld [vmem:[%s1951_s0 + $0x2] sm:$0x3] }
   0xe   :  { %1445 = vmatprep.subr.bf16.mxu1 %v1607_v3  ;;  %v1123_v23 = vld [vmem:[%s1951_s0 + $0x2] sm:$0x3]  ;;  %v1122_v26 = vld [vmem:[%s1951_s0 + $0x4] sm:$0x3] }
  0x10   :  { %1435 = vmatpush3.bf16.msra.mxu0 %v1729_v24 }
  0x11   :  { %1447 = vmatpush3.bf16.msra.mxu1 %v1733_v25  ;;  %1448 = vmatprep.subr.bf16.mxu0 %v1607_v3 }
  0x12   :  { %1454 = vmatprep.subr.bf16.mxu1 %v1607_v3 }
  0x13   :  { %1245 = vmatmul.mubr.msk.f32.vlgmr.msra.gmra.mrb[0].mxu0 %vm48_vm1, %v1108_v28 }
  0x14   :  { %1264 = vmatmul.mubr.msk.f32.vlgmr.msra.gmra.mrb[0].mxu1 %vm48_vm1, %v45_v30  ;;  %1450 = vmatpush3.bf16.msra.mxu0 %v1746_v29 }
  0x15   :  { %1451 = vmatprep.subr.bf16.mxu0 %v1607_v3  ;;  %1274 = vmatprep.mubr.msk.f32.mxu0 %vm1608_vm0, %v1609_v11 }
  0x16   :  { %1456 = vmatpush3.bf16.msra.mxu1 %v1664_v4  ;;  %1293 = vmatprep.mubr.msk.f32.mxu1 %vm1608_vm0, %v1609_v11 }
  0x17   :  { %1457 = vmatprep.subr.bf16.mxu1 %v1607_v3 }
  0x18   :  { %1453 = vmatpush3.bf16.msra.mxu0 %v1763_v33 }
  0x19   :  { %1466 = vmatprep.subr.bf16.mxu0 %v1607_v3 }
  0x1a   :  { %1459 = vmatpush3.bf16.msra.mxu1 %v1689_v12 }
  0x1b   :  { %1275 = vmatmul.mubr.f32.vlgmr.msra.gmra.mrb[2].mxu0 %v1609_v11  ;;  %1460 = vmatprep.subr.bf16.mxu1 %v1607_v3 }
  0x1c   :  { %1468 = vmatpush3.bf16.msra.mxu0 %v1676_v8  ;;  %1312 = vmatprep.mubr.msk.f32.mxu0 %vm1608_vm0, %v1609_v11 }
  0x1d   :  { %1469 = vmatprep.subr.bf16.mxu0 %v1607_v3 }
  0x1e   :  { %1462 = vmatpush3.bf16.msra.mxu1 %v1709_v18 }
  0x1f   :  { %1463 = vmatprep.subr.bf16.mxu1 %v1607_v3 }
  0x20   :  { %1471 = vmatpush3.bf16.msra.mxu0 %v1693_v13 }
  0x21   :  { %1472 = vmatprep.subr.bf16.mxu0 %v1607_v3 }
  0x22   :  { %1465 = vmatpush3.bf16.msra.mxu1 %v1729_v24 }
  0x23   :  { %1478 = vmatprep.subr.bf16.mxu1 %v1607_v3 }
  0x24   :  { %1474 = vmatpush3.bf16.msra.mxu0 %v1713_v19 }
  0x25   :  { %1475 = vmatprep.subr.bf16.mxu0 %v1607_v3  ;;  %1294 = vmatmul.mubr.msk.f32.vlgmr.msra.gmra.mrb[2].mxu1 %vm48_vm1, %v1115_v54 }
  0x26   :  { %1480 = vmatpush3.bf16.msra.mxu1 %v1746_v29  ;;  %1323 = vmatprep.mubr.msk.f32.mxu1 %vm1608_vm0, %v1609_v11 }
  0x27   :  { %1481 = vmatprep.subr.bf16.mxu1 %v1607_v3 }
  0x28   :  { %1477 = vmatpush3.bf16.msra.mxu0 %v1733_v25 }
  0x29   :  { %1484 = vmatprep.subr.bf16.mxu0 %v1607_v3 }
  0x2a   :  { %1483 = vmatpush3.bf16.msra.mxu1 %v1763_v33 }
  0x2b   :  { %1313 = vmatmul.mubr.msk.f32.vlgmr.msra.gmra.mrb[4].mxu0 %vm48_vm1, %v1114_v55  ;;  %1496 = vmatprep.subr.bf16.mxu1 %v1607_v3 }
  0x2c   :  { %1486 = vmatpush3.bf16.msra.mxu0 %v1664_v4  ;;  %1342 = vmatprep.mubr.msk.f32.mxu0 %vm1608_vm0, %v1609_v11 }
  0x2d   :  { %1487 = vmatprep.subr.bf16.mxu0 %v1607_v3 }
  0x30   :  { %1489 = vmatpush3.bf16.msra.mxu0 %v1689_v12 }
  0x31   :  { %1490 = vmatprep.subr.bf16.mxu0 %v1607_v3 }
  0x34   :  { %1492 = vmatpush3.bf16.msra.mxu0 %v1709_v18 }
  0x35   :  { %1493 = vmatprep.subr.bf16.mxu0 %v1607_v3 }
  0x38   :  { %1495 = vmatpush3.bf16.msra.mxu0 %v1729_v24 }
  0x39   :  { %1508 = vmatprep.subr.bf16.mxu0 %v1607_v3 }
  0x3b   :  { %1343 = vmatmul.mubr.msk.f32.vlgmr.msra.gmra.mrb[6].mxu0 %vm48_vm1, %v1123_v23 }
  0x3c   :  { %1510 = vmatpush3.bf16.msra.mxu0 %v1746_v29  ;;  %1372 = vmatprep.mubr.msk.f32.mxu0 %vm1608_vm0, %v1609_v11 }
  0x3d   :  { %1511 = vmatprep.subr.bf16.mxu0 %v1607_v3 }
  0x40   :  { %1513 = vmatpush3.bf16.msra.mxu0 %v1763_v33 }
  0x41   :  { %1526 = vmatprep.subr.bf16.mxu0 %v1607_v3 }
  0xe6   :  { %v118_v34 = vpop.f32.mrb[0].mxu0 }
  0xe7   :  { %v1246_v35 = vpop.f32.mrb[1].mxu0  ;;  %v191_v36 = vpop.f32.mrb[0].mxu1 }
  0xe8   :  { %v192_v37 = vadd.f32 %v191_v36, %v118_v34  ;;  %v1265_v38 = vpop.f32.mrb[1].mxu1 }
  0xee   :  { %v265_v40 = vpop.f32.mrb[2].mxu0 }
  0xef   :  { %v269_v41 = vadd.f32 %v265_v40, %v192_v37  ;;  %v1276_v42 = vpop.f32.mrb[3].mxu0 }
  0xf1   :  { %v276_v43 = vadd.f32 %v1794_v39, %v269_v41 }
  0xf3   :  { %1551 = vtanh.f32 %v276_v43  ;;  %v1112_v45 = vmul.f32 -1.442695, %v276_v43 }
  0xf5   :  { %1553 = vpow2.f32 %v1112_v45  ;;  %v829_v45 = vld [vmem:[%s1951_s0] sm:$0x3] }
  0xf8   :  { %v385_v59 = vpop.f32.mrb[2].mxu1 }
  0xf9   :  { %v1295_v61 = vpop.f32.mrb[3].mxu1 }
  0xfd   :  { %v1552_v44 = vpop.eup %1551 }
  0xfe   :  { %286 = vrot.lane.b32.xlu0 %v1552_v44, %s1610_s21  ;;  %v458_v60 = vpop.f32.mrb[4].mxu0 }
  0xff   :  { %v1554_v46 = vpop.eup %1553  ;;  %v459_v62 = vadd.f32 %v458_v60, %v385_v59  ;;  %v1314_v63 = vpop.f32.mrb[5].mxu0 }
 0x100   :  { %v280_v47 = vadd.f32 1.0, %v1554_v46  ;;  %v1130_v46 = vld [vmem:[%s1951_s0 + $0x6] sm:$0x3] }
 0x102   :  { %1555 = vrcp.f32 %v280_v47 }
 0x10c   :  { %v1556_v48 = vpop.eup %1555 }
 0x10d   :  { %v284_v51 = vmul.f32 0.0, %v1556_v48 }
 0x170   :  { %v287_v49 = vpop.permute.xlu0 %286 }
 0x171   :  { %v289_v50 = vmul.f32 %v1556_v48, %v287_v49 }
 0x173   :  { %291 = vrot.lane.b32.xlu0 %v289_v50, %s1611_s4 }
 0x1e5   :  { %v292_v52 = vpop.permute.xlu0 %291 }
 0x1e6   :  { %v294_v53 = vadd.f32 %v292_v52, %v284_v51 }
 0x1e8   :  { %1557 = vtanh.f32 %v294_v53 }
 0x1f2   :  { %v1558_v56 = vpop.eup %1557 }
 0x1f3   :  { %297 = vrot.lane.b32.xlu1 %v1558_v56, %s1610_s21 }
 0x265   :  { %v298_v57 = vpop.permute.xlu1 %297 }
 0x266   :  { %v1824_v58 = vmul.f32 %v1556_v48, %v298_v57 }
 0x268   :  { %302 = vrot.lane.b32.xlu1 %v1824_v58, %s1611_s4 }
 0x2da   :  { %v303_v0 = vpop.permute.xlu1 %302 }
 0x2db   :  { %306 = vst.msk [vmem:[%s1956_s5] sm:$0x3] %vm305_vm2, %v303_v0  ;;  %1324 = vmatmul.mubr.msk.f32.vlgmr.msra.gmra.mrb[4].mxu1 %vm195_vm3, %v303_v0 }
 0x2dc   :  { %1498 = vmatpush3.bf16.msra.mxu1 %v1676_v8  ;;  %1361 = vmatprep.mubr.msk.f32.mxu1 %vm1608_vm0, %v1609_v11 }
 0x2dd   :  { %1499 = vmatprep.subr.bf16.mxu1 %v1607_v3 }
 0x2e0   :  { %1501 = vmatpush3.bf16.msra.mxu1 %v1693_v13 }
 0x2e1   :  { %1502 = vmatprep.subr.bf16.mxu1 %v1607_v3 }
 0x2e4   :  { %1504 = vmatpush3.bf16.msra.mxu1 %v1713_v19 }
 0x2e5   :  { %1505 = vmatprep.subr.bf16.mxu1 %v1607_v3 }
 0x2e8   :  { %1507 = vmatpush3.bf16.msra.mxu1 %v1733_v25 }
 0x2e9   :  { %1514 = vmatprep.subr.bf16.mxu1 %v1607_v3 }
 0x2eb   :  { %1362 = vmatmul.mubr.msk.f32.vlgmr.msra.gmra.mrb[6].mxu1 %vm48_vm1, %v1122_v26 }
 0x2ec   :  { %1516 = vmatpush3.bf16.msra.mxu1 %v1664_v4  ;;  %1391 = vmatprep.mubr.msk.f32.mxu1 %vm1608_vm0, %v1609_v11 }
 0x2ed   :  { %1517 = vmatprep.subr.bf16.mxu1 %v1607_v3 }
 0x2f0   :  { %1519 = vmatpush3.bf16.msra.mxu1 %v1689_v12  ;;  %v642_v12 = vpop.f32.mrb[6].mxu0 }
 0x2f1   :  { %1520 = vmatprep.subr.bf16.mxu1 %v1607_v3  ;;  %v1344_v31 = vpop.f32.mrb[7].mxu0 }
 0x2f4   :  { %1522 = vmatpush3.bf16.msra.mxu1 %v1709_v18 }
 0x2f5   :  { %1523 = vmatprep.subr.bf16.mxu1 %v1607_v3 }
 0x2f8   :  { %1525 = vmatpush3.bf16.msra.mxu1 %v1729_v24 }
 0x2f9   :  { %1538 = vmatprep.subr.bf16.mxu1 %v1607_v3 }
 0x2fb   :  { %1392 = vmatmul.mubr.msk.f32.vlgmr.msra.gmra.mrb[8].mxu1 %vm48_vm1, %v829_v45 }
 0x2fc   :  { %1540 = vmatpush3.bf16.msra.mxu1 %v1746_v29  ;;  %1421 = vmatprep.mubr.msk.f32.mxu1 %vm1608_vm0, %v1609_v11 }
 0x2fd   :  { %1541 = vmatprep.subr.bf16.mxu1 %v1607_v3 }
 0x300   :  { %1543 = vmatpush3.bf16.msra.mxu1 %v1763_v33 }
 0x3ae   :  { %v530_v1 = vpop.f32.mrb[4].mxu1 }
 0x3af   :  { %v534_v2 = vadd.f32 %v530_v1, %v459_v62  ;;  %v1325_v5 = vpop.f32.mrb[5].mxu1 }
 0x3b1   :  { %v535_v6 = vadd.f32 %v1794_v39, %v534_v2 }
 0x3b3   :  { %1559 = vtanh.f32 %v535_v6  ;;  %v1119_v9 = vmul.f32 -1.442695, %v535_v6 }
 0x3b5   :  { %1561 = vpow2.f32 %v1119_v9 }
 0x3bd   :  { %v1560_v7 = vpop.eup %1559 }
 0x3be   :  { %545 = vrot.lane.b32.xlu0 %v1560_v7, %s1610_s21  ;;  %v715_v30 = vpop.f32.mrb[6].mxu1 }
 0x3bf   :  { %v1562_v10 = vpop.eup %1561  ;;  %v716_v32 = vadd.f32 %v715_v30, %v642_v12  ;;  %v1363_v34 = vpop.f32.mrb[7].mxu1 }
 0x3c0   :  { %v539_v14 = vadd.f32 1.0, %v1562_v10 }
 0x3c2   :  { %1563 = vrcp.f32 %v539_v14 }
 0x3cc   :  { %v1564_v15 = vpop.eup %1563 }
 0x3cd   :  { %v543_v20 = vmul.f32 %v1564_v15, %v294_v53 }
 0x3ce   :  { %v899_v50 = vpop.f32.mrb[8].mxu1 }
 0x3cf   :  { %v1393_v52 = vpop.f32.mrb[9].mxu1 }
 0x430   :  { %v546_v16 = vpop.permute.xlu0 %545 }
 0x431   :  { %v548_v17 = vmul.f32 %v1564_v15, %v546_v16 }
 0x433   :  { %550 = vrot.lane.b32.xlu1 %v548_v17, %s1611_s4 }
 0x4a5   :  { %v551_v21 = vpop.permute.xlu1 %550 }
 0x4a6   :  { %v553_v22 = vadd.f32 %v551_v21, %v543_v20 }
 0x4a8   :  { %1565 = vtanh.f32 %v553_v22 }
 0x4b2   :  { %v1566_v27 = vpop.eup %1565 }
 0x4b3   :  { %556 = vrot.lane.b32.xlu0 %v1566_v27, %s1610_s21 }
 0x525   :  { %v557_v4 = vpop.permute.xlu0 %556 }
 0x526   :  { %v1871_v28 = vmul.f32 %v1564_v15, %v557_v4 }
 0x528   :  { %561 = vrot.lane.b32.xlu1 %v1871_v28, %s1611_s4 }
 0x59a   :  { %v562_v35 = vpop.permute.xlu1 %561 }
 0x59b   :  { %1120 = vst.msk [vmem:[%s1956_s5 + $0x2] sm:$0x3] %vm305_vm2, %v562_v35  ;;  %1373 = vmatmul.mubr.msk.f32.vlgmr.msra.gmra.mrb[8].mxu0 %vm195_vm3, %v562_v35 }
 0x59c   :  { %1528 = vmatpush3.bf16.msra.mxu0 %v1676_v8  ;;  %1410 = vmatprep.mubr.msk.f32.mxu0 %vm1608_vm0, %v1609_v11 }
 0x59d   :  { %1529 = vmatprep.subr.bf16.mxu0 %v1607_v3 }
 0x5a0   :  { %1531 = vmatpush3.bf16.msra.mxu0 %v1693_v13 }
 0x5a1   :  { %1532 = vmatprep.subr.bf16.mxu0 %v1607_v3 }
 0x5a4   :  { %1534 = vmatpush3.bf16.msra.mxu0 %v1713_v19 }
 0x5a5   :  { %1535 = vmatprep.subr.bf16.mxu0 %v1607_v3 }
 0x5a8   :  { %1537 = vmatpush3.bf16.msra.mxu0 %v1733_v25 }
 0x5ab   :  { %1411 = vmatmul.mubr.msk.f32.vlgmr.msra.gmra.mrb[10].mxu0 %vm48_vm1, %v1130_v46 }
 0x66e   :  { %v787_v18 = vpop.f32.mrb[8].mxu0 }
 0x66f   :  { %v791_v24 = vadd.f32 %v787_v18, %v716_v32  ;;  %v1374_v36 = vpop.f32.mrb[9].mxu0 }
 0x671   :  { %v792_v8 = vadd.f32 %v1794_v39, %v791_v24 }
 0x673   :  { %1567 = vtanh.f32 %v792_v8  ;;  %v1127_v38 = vmul.f32 -1.442695, %v792_v8 }
 0x675   :  { %1569 = vpow2.f32 %v1127_v38 }
 0x67d   :  { %v1568_v37 = vpop.eup %1567 }
 0x67e   :  { %802 = vrot.lane.b32.xlu0 %v1568_v37, %s1610_s21  ;;  %v972_v51 = vpop.f32.mrb[10].mxu0 }
 0x67f   :  { %v1570_v13 = vpop.eup %1569  ;;  %v973_v53 = vadd.f32 %v972_v51, %v899_v50  ;;  %v1412_v54 = vpop.f32.mrb[11].mxu0 }
 0x680   :  { %v796_v40 = vadd.f32 1.0, %v1570_v13 }
 0x682   :  { %1571 = vrcp.f32 %v796_v40 }
 0x68c   :  { %v1572_v41 = vpop.eup %1571 }
 0x68d   :  { %v800_v25 = vmul.f32 %v1572_v41, %v553_v22 }
 0x6f0   :  { %v803_v19 = vpop.permute.xlu0 %802 }
 0x6f1   :  { %v805_v42 = vmul.f32 %v1572_v41, %v803_v19 }
 0x6f3   :  { %807 = vrot.lane.b32.xlu1 %v805_v42, %s1611_s4 }
 0x765   :  { %v808_v43 = vpop.permute.xlu1 %807 }
 0x766   :  { %v810_v44 = vadd.f32 %v808_v43, %v800_v25 }
 0x768   :  { %1573 = vtanh.f32 %v810_v44 }
 0x772   :  { %v1574_v47 = vpop.eup %1573 }
 0x773   :  { %813 = vrot.lane.b32.xlu0 %v1574_v47, %s1610_s21 }
 0x7e5   :  { %v814_v48 = vpop.permute.xlu0 %813 }
 0x7e6   :  { %v816_v49 = vmul.f32 %v1572_v41, %v814_v48 }
 0x7e8   :  { %818 = vrot.lane.b32.xlu1 %v816_v49, %s1611_s4 }
 0x85a   :  { %v819_v29 = vpop.permute.xlu1 %818 }
 0x85b   :  { %1128 = vst.msk [vmem:[%s1956_s5 + $0x4] sm:$0x3] %vm305_vm2, %v819_v29  ;;  %1422 = vmatmul.mubr.msk.f32.vlgmr.msra.gmra.mrb[10].mxu1 %vm195_vm3, %v819_v29 }
 0x92e   :  { %v1044_v3 = vpop.f32.mrb[10].mxu1 }
 0x92f   :  { %v1048_v11 = vadd.f32 %v1044_v3, %v973_v53  ;;  %v1423_v33 = vpop.f32.mrb[11].mxu1 }
 0x931   :  { %v1049_v55 = vadd.f32 %v1794_v39, %v1048_v11 }
 0x933   :  { %1575 = vtanh.f32 %v1049_v55  ;;  %v1134_v57 = vmul.f32 -1.442695, %v1049_v55 }
 0x935   :  { %1577 = vpow2.f32 %v1134_v57 }
 0x93d   :  { %v1576_v56 = vpop.eup %1575 }
 0x93e   :  { %1059 = vrot.lane.b32.xlu0 %v1576_v56, %s1610_s21 }
 0x93f   :  { %v1578_v59 = vpop.eup %1577 }
 0x940   :  { %v1053_v60 = vadd.f32 1.0, %v1578_v59 }
 0x942   :  { %1579 = vrcp.f32 %v1053_v60 }
 0x94c   :  { %v1580_v61 = vpop.eup %1579 }
 0x94d   :  { %v1057_v0 = vmul.f32 %v1580_v61, %v810_v44 }
 0x9b0   :  { %v1060_v62 = vpop.permute.xlu0 %1059 }
 0x9b1   :  { %v1062_v63 = vmul.f32 %v1580_v61, %v1060_v62 }
 0x9b3   :  { %1064 = vrot.lane.b32.xlu1 %v1062_v63, %s1611_s4 }
 0x9b7   :  { %566 = vrot.lane.b32.xlu1 %v1871_v28, %s1612_s14 }
 0xa25   :  { %v1065_v1 = vpop.permute.xlu1 %1064 }
 0xa26   :  { %v1067_v39 = vadd.f32 %v1065_v1, %v1057_v0 }
 0xa28   :  { %1581 = vtanh.f32 %v1067_v39 }
 0xa29   :  { %v567_v2 = vpop.permute.xlu1 %566 }
 0xa2a   :  { %1121 = vst.msk [vmem:[%s1957_s6 + $0x4] sm:$0x3] %vm305_vm2, %v567_v2 }
 0xa32   :  { %v1582_v5 = vpop.eup %1581 }
 0xa33   :  { %1070 = vrot.lane.b32.xlu0 %v1582_v5, %s1610_s21  ;;  %s1096_s21 = sshll.u32 %s1613_s20, 4  ;;  %s1097_s21 = int_to_ptr.vmem [resolvable:$true] %s1096_s21 }
 0xa34   :  { %s1583_s23 = scalar_lea.vmem %s1097_s21, 32  ;;  %p1588_p1 = scmp.lt.s32.totalorder %s1097_s21, %s1097_s21 }
 0xa35   :  { %p1584_p0 = scmp.ne.s32.totalorder %s1097_s21, %s1583_s23  ;;  %p1589_p2 = scmp.lt.s32.totalorder %s1583_s23, %s1583_s23 }
 0xa37   :  { %307 = vrot.lane.b32.xlu0 %v1824_v58, %s1612_s14  ;;  %p1590_p3 = por %p1589_p2, %p1588_p1 }
 0xa39   :  { %p1591_p4 = pnand %p1590_p3, %p1584_p0 }
 0xa3b   :  { %823 = vrot.lane.b32.xlu0 %v816_v49, %s1612_s14 }
 0xaa5   :  { %v1071_v6 = vpop.permute.xlu0 %1070 }
 0xaa6   :  { %v1073_v7 = vmul.f32 %v1580_v61, %v1071_v6 }
 0xaa8   :  { %1075 = vrot.lane.b32.xlu1 %v1073_v7, %s1611_s4 }
 0xaa9   :  { %v308_v9 = vpop.permute.xlu0 %307 }
 0xaaa   :  { %1113 = vst.msk [vmem:[%s1957_s6 + $0x6] sm:$0x3] %vm305_vm2, %v308_v9 }
 0xaac   :  { %1080 = vrot.lane.b32.xlu1 %v1073_v7, %s1612_s14 }
 0xaad   :  { %v824_v10 = vpop.permute.xlu0 %823 }
 0xaae   :  { %1129 = vst.msk [vmem:[%s1957_s6 + $0x2] sm:$0x3] %vm305_vm2, %v824_v10 }
 0xb1a   :  { %v1076_v58 = vpop.permute.xlu1 %1075 }
 0xb1b   :  { %1135 = vst.msk [vmem:[%s1956_s5 + $0x6] sm:$0x3] %vm305_vm2, %v1076_v58 }
 0xb1c   :  { %1085 = vst.msk [vmem:[#allocation2] sm:$0x3] %vm1084_vm4, %v1076_v58 }
 0xb1d   :  { %1594 = shalt.err (!%p1591_p4)
}
 0xb1e   :  { %s1595_s26 = scalar_lea.hbm %s1958_s7, 32 }
 0xb1f   :  { %p1596_p5 = scmp.ne.s32.totalorder %s1958_s7, %s1595_s26  ;;  %p1599_p6 = scmp.lt.u32.totalorder %s1595_s26, %s1958_s7 }
 0xb21   :  { %p1601_p7 = pnand %p1599_p6, %p1596_p5 }
 0xb23   :  { %1604 = shalt.err (!%p1601_p7)
}
 0xb24   :  { %1099 = dma.vmem_to_hbm [thread:$0]  %s1097_s21, 32, %s1958_s7, [#allocation3]   ;;  %v1081_v14 = vpop.permute.xlu1 %1080 }
 0xb25   :  { %1083 = vst.msk [vmem:[%s1957_s6] sm:$0x3] %vm305_vm2, %v1081_v14 }
 0xb26   :  { %1605 = dma.done.wait [#allocation3], 32  }
 0xb27   :  { %1606 = vsyncadd [#allocation3], 4294967264 }
 0xb28   :  { %1107 = vsyncpa [#allocation3], 1 }

// kernel: seq2seq_forward.7
= control target key start
LH: loop header
LB: loop body
LE: loop exit
PB: predicated region body
PF: predicated region fallthrough
CT: control target
= control target key end

     0   :  { %v3111_v3 = vmov 0.0|0.0   ;;  %vm3112_vm0 = vmmov 0   ;;  %v3113_v11 = vmov 0.0   ;;  %s3663_s0 = inlined_call_operand.vmem [shape: f32[8,2,64], index: 0, kind: input, shape index: {}]   ;;  %s3664_s1 = inlined_call_operand.vmem [shape: f32[64,128], index: 1, kind: input, shape index: {}]   ;;  %s3665_s2 = inlined_call_operand.vmem [shape: f32[64,128], index: 2, kind: input, shape index: {}]   ;;  %s3666_s3 = inlined_call_operand.vmem [shape: f32[32,128], index: 3, kind: input, shape index: {}]   ;;  %s3667_s4 = inlined_call_operand.vmem [shape: f32[1,128], index: 4, kind: input, shape index: {}]   ;;  %s3668_s5 = inlined_call_operand.vmem [shape: f32[8,2,16], index: 5, kind: output, shape index: {0}]   ;;  %s3669_s6 = inlined_call_operand.vmem [shape: f32[8,2,16], index: 6, kind: output, shape index: {1}]   ;;  %s3670_s7 = inlined_call_operand.hbm [shape: f32[2,32], index: 7, kind: output, shape index: {2}]  }
   0x1   :  { %v32_v0 = vld [vmem:[%s3665_s2] sm:$0xff]  ;;  %v33_v1 = vld [vmem:[%s3665_s2 + $0x8] sm:$0xff]  ;;  %2776 = vmatprep.subr.bf16.mxu0 %v3111_v3  ;;  %2788 = vmatprep.subr.bf16.mxu1 %v3111_v3  ;;  %v34_v6 = vld [vmem:[%s3665_s2 + $0x10] sm:$0xff] }
   0x2   :  { %v24_v2 = vld [vmem:[%s3664_s1] sm:$0xff]  ;;  %v3168_v4 = vpack.c.bf16 %v33_v1, %v32_v0  ;;  %v25_v5 = vld [vmem:[%s3664_s1 + $0x8] sm:$0xff]  ;;  %v35_v7 = vld [vmem:[%s3665_s2 + $0x18] sm:$0xff]  ;;  %2400 = vmatprep.mubr.msk.f32.mxu0 %vm3112_vm0, %v3113_v11  ;;  %2419 = vmatprep.mubr.msk.f32.mxu1 %vm3112_vm0, %v3113_v11 }
   0x3   :  { %v3180_v8 = vpack.c.bf16 %v25_v5, %v24_v2  ;;  %v26_v9 = vld [vmem:[%s3664_s1 + $0x10] sm:$0xff]  ;;  %v27_v10 = vld [vmem:[%s3664_s1 + $0x18] sm:$0xff]  ;;  %v3193_v12 = vpack.c.bf16 %v35_v7, %v34_v6  ;;  %v36_v14 = vld [vmem:[%s3665_s2 + $0x20] sm:$0xff] }
   0x4   :  { %2778 = vmatpush3.bf16.msra.mxu0 %v3168_v4  ;;  %v3197_v13 = vpack.c.bf16 %v27_v10, %v26_v9  ;;  %v37_v15 = vld [vmem:[%s3665_s2 + $0x28] sm:$0xff]  ;;  %v28_v16 = vld [vmem:[%s3664_s1 + $0x20] sm:$0xff] }
   0x5   :  { %2790 = vmatpush3.bf16.msra.mxu1 %v3180_v8  ;;  %2779 = vmatprep.subr.bf16.mxu0 %v3111_v3  ;;  %v29_v17 = vld [vmem:[%s3664_s1 + $0x28] sm:$0xff]  ;;  %v3213_v18 = vpack.c.bf16 %v37_v15, %v36_v14 }
   0x6   :  { %2791 = vmatprep.subr.bf16.mxu1 %v3111_v3 }
   0x8   :  { %2781 = vmatpush3.bf16.msra.mxu0 %v3193_v12 }
   0x9   :  { %13 = vsyncpa [#allocation3], 0  ;;  %2793 = vmatpush3.bf16.msra.mxu1 %v3197_v13  ;;  %2782 = vmatprep.subr.bf16.mxu0 %v3111_v3  ;;  %v3217_v19 = vpack.c.bf16 %v29_v17, %v28_v16  ;;  %v38_v20 = vld [vmem:[%s3665_s2 + $0x30] sm:$0xff]  ;;  %v39_v21 = vld [vmem:[%s3665_s2 + $0x38] sm:$0xff]  ;;  %vm48_vm1 = vcmask 523264   ;;  %s3114_s21 = smov 64  }
   0xa   :  { %2794 = vmatprep.subr.bf16.mxu1 %v3111_v3  ;;  %v30_v22 = vld [vmem:[%s3664_s1 + $0x30] sm:$0xff]  ;;  %v31_v23 = vld [vmem:[%s3664_s1 + $0x38] sm:$0xff]  ;;  %v3233_v24 = vpack.c.bf16 %v39_v21, %v38_v20  ;;  %v40_v26 = vld [vmem:[%s3666_s3] sm:$0xff]  ;;  %vm305_vm2 = vcmask 123904   ;;  %vm195_vm3 = vcmask 261120   ;;  %s3116_s13 = smov 16  }
   0xb   :  { %v3237_v25 = vpack.c.bf16 %v31_v23, %v30_v22  ;;  %v41_v27 = vld [vmem:[%s3666_s3 + $0x8] sm:$0xff]  ;;  %v45_v30 = vld [vmem:[%s3663_s0] sm:$0x3]  ;;  %v42_v31 = vld [vmem:[%s3666_s3 + $0x10] sm:$0xff]  ;;  %s3117_s26 = smov [#allocation2]   ;;  %vm2116_vm4 = vcmask 254976  }
   0xc   :  { %2784 = vmatpush3.bf16.msra.mxu0 %v3213_v18  ;;  %v2140_v28 = vld [vmem:[%s3663_s0 + $0xe] sm:$0x3]  ;;  %v3250_v29 = vpack.c.bf16 %v41_v27, %v40_v26  ;;  %v43_v32 = vld [vmem:[%s3666_s3 + $0x18] sm:$0xff]  ;;  %v3298_v39 = vld [vmem:[%s3667_s4] ss:$0 sm:$0xff]  ;;  %s3115_s4 = smov 32  }
   0xd   :  { %2796 = vmatpush3.bf16.msra.mxu1 %v3217_v19  ;;  %2785 = vmatprep.subr.bf16.mxu0 %v3111_v3  ;;  %v3267_v33 = vpack.c.bf16 %v43_v32, %v42_v31  ;;  %v2147_v54 = vld [vmem:[%s3663_s0 + $0xc] sm:$0x3]  ;;  %v2146_v55 = vld [vmem:[%s3663_s0 + $0x2] sm:$0x3]  ;;  %v2155_v23 = vld [vmem:[%s3663_s0 + $0xa] sm:$0x3] }
   0xe   :  { %2797 = vmatprep.subr.bf16.mxu1 %v3111_v3  ;;  %v2154_v26 = vld [vmem:[%s3663_s0 + $0x4] sm:$0x3]  ;;  %s2128_s27 = sshll.u32 %s3117_s26, 4  ;;  %s2129_s27 = int_to_ptr.vmem [resolvable:$true] %s2128_s27 }
   0xf   :  { %s3087_s30 = scalar_lea.vmem %s2129_s27, 32  ;;  %p3092_p1 = scmp.lt.s32.totalorder %s2129_s27, %s2129_s27 }
  0x10   :  { %2787 = vmatpush3.bf16.msra.mxu0 %v3233_v24  ;;  %p3088_p0 = scmp.ne.s32.totalorder %s2129_s27, %s3087_s30  ;;  %p3093_p2 = scmp.lt.s32.totalorder %s3087_s30, %s3087_s30 }
  0x11   :  { %2799 = vmatpush3.bf16.msra.mxu1 %v3237_v25  ;;  %2800 = vmatprep.subr.bf16.mxu0 %v3111_v3 }
  0x12   :  { %2806 = vmatprep.subr.bf16.mxu1 %v3111_v3  ;;  %p3094_p3 = por %p3093_p2, %p3092_p1 }
  0x13   :  { %2401 = vmatmul.mubr.msk.f32.vlgmr.msra.gmra.mrb[0].mxu0 %vm48_vm1, %v2140_v28 }
  0x14   :  { %2420 = vmatmul.mubr.msk.f32.vlgmr.msra.gmra.mrb[0].mxu1 %vm48_vm1, %v45_v30  ;;  %2802 = vmatpush3.bf16.msra.mxu0 %v3250_v29  ;;  %p3095_p4 = pnand %p3094_p3, %p3088_p0 }
  0x15   :  { %2803 = vmatprep.subr.bf16.mxu0 %v3111_v3  ;;  %2430 = vmatprep.mubr.msk.f32.mxu0 %vm3112_vm0, %v3113_v11 }
  0x16   :  { %2808 = vmatpush3.bf16.msra.mxu1 %v3168_v4  ;;  %2449 = vmatprep.mubr.msk.f32.mxu1 %vm3112_vm0, %v3113_v11 }
  0x17   :  { %2809 = vmatprep.subr.bf16.mxu1 %v3111_v3 }
  0x18   :  { %2805 = vmatpush3.bf16.msra.mxu0 %v3267_v33 }
  0x19   :  { %2818 = vmatprep.subr.bf16.mxu0 %v3111_v3 }
  0x1a   :  { %2811 = vmatpush3.bf16.msra.mxu1 %v3193_v12 }
  0x1b   :  { %2431 = vmatmul.mubr.f32.vlgmr.msra.gmra.mrb[2].mxu0 %v3113_v11  ;;  %2812 = vmatprep.subr.bf16.mxu1 %v3111_v3 }
  0x1c   :  { %2820 = vmatpush3.bf16.msra.mxu0 %v3180_v8  ;;  %2468 = vmatprep.mubr.msk.f32.mxu0 %vm3112_vm0, %v3113_v11 }
  0x1d   :  { %2821 = vmatprep.subr.bf16.mxu0 %v3111_v3 }
  0x1e   :  { %2814 = vmatpush3.bf16.msra.mxu1 %v3213_v18 }
  0x1f   :  { %2815 = vmatprep.subr.bf16.mxu1 %v3111_v3 }
  0x20   :  { %2823 = vmatpush3.bf16.msra.mxu0 %v3197_v13 }
  0x21   :  { %2824 = vmatprep.subr.bf16.mxu0 %v3111_v3 }
  0x22   :  { %2817 = vmatpush3.bf16.msra.mxu1 %v3233_v24 }
  0x23   :  { %2830 = vmatprep.subr.bf16.mxu1 %v3111_v3 }
  0x24   :  { %2826 = vmatpush3.bf16.msra.mxu0 %v3217_v19 }
  0x25   :  { %2827 = vmatprep.subr.bf16.mxu0 %v3111_v3  ;;  %2450 = vmatmul.mubr.msk.f32.vlgmr.msra.gmra.mrb[2].mxu1 %vm48_vm1, %v2147_v54  ;;  %v2162_v54 = vld [vmem:[%s3663_s0 + $0x6] sm:$0x3] }
  0x26   :  { %2832 = vmatpush3.bf16.msra.mxu1 %v3250_v29  ;;  %2479 = vmatprep.mubr.msk.f32.mxu1 %vm3112_vm0, %v3113_v11 }
  0x27   :  { %2833 = vmatprep.subr.bf16.mxu1 %v3111_v3 }
  0x28   :  { %2829 = vmatpush3.bf16.msra.mxu0 %v3237_v25 }
  0x29   :  { %2836 = vmatprep.subr.bf16.mxu0 %v3111_v3 }
  0x2a   :  { %2835 = vmatpush3.bf16.msra.mxu1 %v3267_v33 }
  0x2b   :  { %2469 = vmatmul.mubr.msk.f32.vlgmr.msra.gmra.mrb[4].mxu0 %vm48_vm1, %v2146_v55  ;;  %2848 = vmatprep.subr.bf16.mxu1 %v3111_v3 }
  0x2c   :  { %2838 = vmatpush3.bf16.msra.mxu0 %v3168_v4  ;;  %2498 = vmatprep.mubr.msk.f32.mxu0 %vm3112_vm0, %v3113_v11 }
  0x2d   :  { %2839 = vmatprep.subr.bf16.mxu0 %v3111_v3 }
  0x30   :  { %2841 = vmatpush3.bf16.msra.mxu0 %v3193_v12 }
  0x31   :  { %2842 = vmatprep.subr.bf16.mxu0 %v3111_v3 }
  0x34   :  { %2844 = vmatpush3.bf16.msra.mxu0 %v3213_v18 }
  0x35   :  { %2845 = vmatprep.subr.bf16.mxu0 %v3111_v3 }
  0x38   :  { %2847 = vmatpush3.bf16.msra.mxu0 %v3233_v24 }
  0x39   :  { %2860 = vmatprep.subr.bf16.mxu0 %v3111_v3 }
  0x3b   :  { %2499 = vmatmul.mubr.msk.f32.vlgmr.msra.gmra.mrb[6].mxu0 %vm48_vm1, %v2155_v23  ;;  %v2171_v23 = vld [vmem:[%s3663_s0 + $0x6] sm:$0x3] }
  0x3c   :  { %2862 = vmatpush3.bf16.msra.mxu0 %v3250_v29  ;;  %2528 = vmatprep.mubr.msk.f32.mxu0 %vm3112_vm0, %v3113_v11 }
  0x3d   :  { %2863 = vmatprep.subr.bf16.mxu0 %v3111_v3 }
  0x40   :  { %2865 = vmatpush3.bf16.msra.mxu0 %v3267_v33 }
  0x41   :  { %2878 = vmatprep.subr.bf16.mxu0 %v3111_v3 }
  0xe6   :  { %v118_v34 = vpop.f32.mrb[0].mxu0 }
  0xe7   :  { %v2402_v35 = vpop.f32.mrb[1].mxu0  ;;  %v191_v36 = vpop.f32.mrb[0].mxu1 }
  0xe8   :  { %v192_v37 = vadd.f32 %v191_v36, %v118_v34  ;;  %v2421_v38 = vpop.f32.mrb[1].mxu1 }
  0xee   :  { %v265_v40 = vpop.f32.mrb[2].mxu0 }
  0xef   :  { %v269_v41 = vadd.f32 %v265_v40, %v192_v37  ;;  %v2432_v42 = vpop.f32.mrb[3].mxu0 }
  0xf1   :  { %v276_v43 = vadd.f32 %v3298_v39, %v269_v41 }
  0xf3   :  { %3023 = vtanh.f32 %v276_v43  ;;  %v2144_v45 = vmul.f32 -1.442695, %v276_v43 }
  0xf5   :  { %3025 = vpow2.f32 %v2144_v45 }
  0xf8   :  { %v385_v59 = vpop.f32.mrb[2].mxu1 }
  0xf9   :  { %v2451_v61 = vpop.f32.mrb[3].mxu1 }
  0xfd   :  { %v3024_v44 = vpop.eup %3023 }
  0xfe   :  { %286 = vrot.lane.b32.xlu0 %v3024_v44, %s3114_s21  ;;  %v458_v60 = vpop.f32.mrb[4].mxu0 }
  0xff   :  { %v3026_v46 = vpop.eup %3025  ;;  %v459_v62 = vadd.f32 %v458_v60, %v385_v59  ;;  %v2470_v63 = vpop.f32.mrb[5].mxu0 }
 0x100   :  { %v280_v47 = vadd.f32 1.0, %v3026_v46 }
 0x102   :  { %3027 = vrcp.f32 %v280_v47 }
 0x10c   :  { %v3028_v48 = vpop.eup %3027 }
 0x10d   :  { %v284_v51 = vmul.f32 0.0, %v3028_v48 }
 0x10e   :  { %v644_v31 = vpop.f32.mrb[6].mxu0 }
 0x10f   :  { %v2500_v34 = vpop.f32.mrb[7].mxu0 }
 0x170   :  { %v287_v49 = vpop.permute.xlu0 %286 }
 0x171   :  { %v289_v50 = vmul.f32 %v3028_v48, %v287_v49 }
 0x173   :  { %291 = vrot.lane.b32.xlu0 %v289_v50, %s3115_s4 }
 0x1e5   :  { %v292_v52 = vpop.permute.xlu0 %291 }
 0x1e6   :  { %v294_v53 = vadd.f32 %v292_v52, %v284_v51 }
 0x1e8   :  { %3029 = vtanh.f32 %v294_v53 }
 0x1f2   :  { %v3030_v56 = vpop.eup %3029 }
 0x1f3   :  { %297 = vrot.lane.b32.xlu1 %v3030_v56, %s3114_s21 }
 0x265   :  { %v298_v57 = vpop.permute.xlu1 %297 }
 0x266   :  { %v3328_v58 = vmul.f32 %v3028_v48, %v298_v57 }
 0x268   :  { %302 = vrot.lane.b32.xlu1 %v3328_v58, %s3115_s4 }
 0x2da   :  { %v303_v0 = vpop.permute.xlu1 %302 }
 0x2db   :  { %306 = vst.msk [vmem:[%s3668_s5] sm:$0x3] %vm305_vm2, %v303_v0  ;;  %2480 = vmatmul.mubr.msk.f32.vlgmr.msra.gmra.mrb[4].mxu1 %vm195_vm3, %v303_v0 }
 0x2dc   :  { %2850 = vmatpush3.bf16.msra.mxu1 %v3180_v8  ;;  %2517 = vmatprep.mubr.msk.f32.mxu1 %vm3112_vm0, %v3113_v11 }
 0x2dd   :  { %2851 = vmatprep.subr.bf16.mxu1 %v3111_v3 }
 0x2e0   :  { %2853 = vmatpush3.bf16.msra.mxu1 %v3197_v13 }
 0x2e1   :  { %2854 = vmatprep.subr.bf16.mxu1 %v3111_v3 }
 0x2e4   :  { %2856 = vmatpush3.bf16.msra.mxu1 %v3217_v19 }
 0x2e5   :  { %2857 = vmatprep.subr.bf16.mxu1 %v3111_v3 }
 0x2e8   :  { %2859 = vmatpush3.bf16.msra.mxu1 %v3237_v25 }
 0x2e9   :  { %2866 = vmatprep.subr.bf16.mxu1 %v3111_v3 }
 0x2eb   :  { %2518 = vmatmul.mubr.msk.f32.vlgmr.msra.gmra.mrb[6].mxu1 %vm48_vm1, %v2154_v26  ;;  %v2170_v26 = vld [vmem:[%s3663_s0 + $0x8] sm:$0x3] }
 0x2ec   :  { %2868 = vmatpush3.bf16.msra.mxu1 %v3168_v4  ;;  %2547 = vmatprep.mubr.msk.f32.mxu1 %vm3112_vm0, %v3113_v11 }
 0x2ed   :  { %2869 = vmatprep.subr.bf16.mxu1 %v3111_v3 }
 0x2f0   :  { %2871 = vmatpush3.bf16.msra.mxu1 %v3193_v12 }
 0x2f1   :  { %2872 = vmatprep.subr.bf16.mxu1 %v3111_v3 }
 0x2f4   :  { %2874 = vmatpush3.bf16.msra.mxu1 %v3213_v18 }
 0x2f5   :  { %2875 = vmatprep.subr.bf16.mxu1 %v3111_v3 }
 0x2f8   :  { %2877 = vmatpush3.bf16.msra.mxu1 %v3233_v24 }
 0x2f9   :  { %2890 = vmatprep.subr.bf16.mxu1 %v3111_v3 }
 0x3ae   :  { %v530_v1 = vpop.f32.mrb[4].mxu1 }
 0x3af   :  { %v534_v2 = vadd.f32 %v530_v1, %v459_v62  ;;  %v2481_v5 = vpop.f32.mrb[5].mxu1 }
 0x3b1   :  { %v535_v6 = vadd.f32 %v3298_v39, %v534_v2 }
 0x3b3   :  { %3031 = vtanh.f32 %v535_v6  ;;  %v2151_v9 = vmul.f32 -1.442695, %v535_v6 }
 0x3b5   :  { %3033 = vpow2.f32 %v2151_v9 }
 0x3bd   :  { %v3032_v7 = vpop.eup %3031 }
 0x3be   :  { %545 = vrot.lane.b32.xlu0 %v3032_v7, %s3114_s21  ;;  %v717_v32 = vpop.f32.mrb[6].mxu1 }
 0x3bf   :  { %v3034_v10 = vpop.eup %3033  ;;  %v718_v35 = vadd.f32 %v717_v32, %v644_v31  ;;  %v2519_v36 = vpop.f32.mrb[7].mxu1 }
 0x3c0   :  { %v539_v14 = vadd.f32 1.0, %v3034_v10 }
 0x3c2   :  { %3035 = vrcp.f32 %v539_v14 }
 0x3cc   :  { %v3036_v15 = vpop.eup %3035 }
 0x3cd   :  { %v543_v20 = vmul.f32 %v3036_v15, %v294_v53  ;;  %v2163_v53 = vld [vmem:[%s3663_s0 + $0x8] sm:$0x3] }
 0x3ce   :  { %2548 = vmatmul.mubr.msk.f32.vlgmr.msra.gmra.mrb[8].mxu1 %vm48_vm1, %v2163_v53 }
 0x3cf   :  { %2892 = vmatpush3.bf16.msra.mxu1 %v3250_v29  ;;  %2577 = vmatprep.mubr.msk.f32.mxu1 %vm3112_vm0, %v3113_v11 }
 0x3d0   :  { %2893 = vmatprep.subr.bf16.mxu1 %v3111_v3 }
 0x3d3   :  { %2895 = vmatpush3.bf16.msra.mxu1 %v3267_v33 }
 0x3d4   :  { %2908 = vmatprep.subr.bf16.mxu1 %v3111_v3 }
 0x430   :  { %v546_v16 = vpop.permute.xlu0 %545 }
 0x431   :  { %v548_v17 = vmul.f32 %v3036_v15, %v546_v16 }
 0x433   :  { %550 = vrot.lane.b32.xlu1 %v548_v17, %s3115_s4 }
 0x4a1   :  { %v903_v59 = vpop.f32.mrb[8].mxu1 }
 0x4a2   :  { %v2549_v61 = vpop.f32.mrb[9].mxu1 }
 0x4a5   :  { %v551_v21 = vpop.permute.xlu1 %550 }
 0x4a6   :  { %v553_v22 = vadd.f32 %v551_v21, %v543_v20 }
 0x4a8   :  { %3037 = vtanh.f32 %v553_v22 }
 0x4b2   :  { %v3038_v27 = vpop.eup %3037 }
 0x4b3   :  { %556 = vrot.lane.b32.xlu0 %v3038_v27, %s3114_s21 }
 0x525   :  { %v557_v28 = vpop.permute.xlu0 %556 }
 0x526   :  { %v3375_v30 = vmul.f32 %v3036_v15, %v557_v28 }
 0x528   :  { %561 = vrot.lane.b32.xlu1 %v3375_v30, %s3115_s4 }
 0x59a   :  { %v562_v37 = vpop.permute.xlu1 %561 }
 0x59b   :  { %2152 = vst.msk [vmem:[%s3668_s5 + $0x2] sm:$0x3] %vm305_vm2, %v562_v37  ;;  %2529 = vmatmul.mubr.msk.f32.vlgmr.msra.gmra.mrb[8].mxu0 %vm195_vm3, %v562_v37 }
 0x59c   :  { %2880 = vmatpush3.bf16.msra.mxu0 %v3180_v8  ;;  %2566 = vmatprep.mubr.msk.f32.mxu0 %vm3112_vm0, %v3113_v11 }
 0x59d   :  { %2881 = vmatprep.subr.bf16.mxu0 %v3111_v3 }
 0x5a0   :  { %2883 = vmatpush3.bf16.msra.mxu0 %v3197_v13 }
 0x5a1   :  { %2884 = vmatprep.subr.bf16.mxu0 %v3111_v3 }
 0x5a4   :  { %2886 = vmatpush3.bf16.msra.mxu0 %v3217_v19 }
 0x5a5   :  { %2887 = vmatprep.subr.bf16.mxu0 %v3111_v3 }
 0x5a8   :  { %2889 = vmatpush3.bf16.msra.mxu0 %v3237_v25 }
 0x5a9   :  { %2896 = vmatprep.subr.bf16.mxu0 %v3111_v3 }
 0x5ab   :  { %2567 = vmatmul.mubr.msk.f32.vlgmr.msra.gmra.mrb[10].mxu0 %vm48_vm1, %v2162_v54  ;;  %v2179_v54 = vld [vmem:[%s3663_s0 + $0x4] sm:$0x3] }
 0x5ac   :  { %2898 = vmatpush3.bf16.msra.mxu0 %v3168_v4  ;;  %2596 = vmatprep.mubr.msk.f32.mxu0 %vm3112_vm0, %v3113_v11 }
 0x5ad   :  { %2899 = vmatprep.subr.bf16.mxu0 %v3111_v3 }
 0x5b0   :  { %2901 = vmatpush3.bf16.msra.mxu0 %v3193_v12 }
 0x5b1   :  { %2902 = vmatprep.subr.bf16.mxu0 %v3111_v3 }
 0x5b4   :  { %2904 = vmatpush3.bf16.msra.mxu0 %v3213_v18 }
 0x5b5   :  { %2905 = vmatprep.subr.bf16.mxu0 %v3111_v3 }
 0x5b8   :  { %2907 = vmatpush3.bf16.msra.mxu0 %v3233_v24 }
 0x5b9   :  { %2920 = vmatprep.subr.bf16.mxu0 %v3111_v3 }
 0x5bb   :  { %2597 = vmatmul.mubr.msk.f32.vlgmr.msra.gmra.mrb[12].mxu0 %vm48_vm1, %v2171_v23 }
 0x5bc   :  { %2922 = vmatpush3.bf16.msra.mxu0 %v3250_v29  ;;  %2626 = vmatprep.mubr.msk.f32.mxu0 %vm3112_vm0, %v3113_v11 }
 0x5bd   :  { %2923 = vmatprep.subr.bf16.mxu0 %v3111_v3 }
 0x5c0   :  { %2925 = vmatpush3.bf16.msra.mxu0 %v3267_v33 }
 0x5c1   :  { %2938 = vmatprep.subr.bf16.mxu0 %v3111_v3 }
 0x66e   :  { %v789_v38 = vpop.f32.mrb[8].mxu0 }
 0x66f   :  { %v793_v40 = vadd.f32 %v789_v38, %v718_v35  ;;  %v2530_v41 = vpop.f32.mrb[9].mxu0 }
 0x671   :  { %v794_v42 = vadd.f32 %v3298_v39, %v793_v40 }
 0x673   :  { %3039 = vtanh.f32 %v794_v42  ;;  %v2159_v44 = vmul.f32 -1.442695, %v794_v42 }
 0x675   :  { %3041 = vpow2.f32 %v2159_v44 }
 0x67d   :  { %v3040_v43 = vpop.eup %3039 }
 0x67e   :  { %804 = vrot.lane.b32.xlu0 %v3040_v43, %s3114_s21  ;;  %v976_v60 = vpop.f32.mrb[10].mxu0 }
 0x67f   :  { %v3042_v45 = vpop.eup %3041  ;;  %v977_v62 = vadd.f32 %v976_v60, %v903_v59  ;;  %v2568_v63 = vpop.f32.mrb[11].mxu0 }
 0x680   :  { %v798_v46 = vadd.f32 1.0, %v3042_v45 }
 0x682   :  { %3043 = vrcp.f32 %v798_v46 }
 0x68c   :  { %v3044_v47 = vpop.eup %3043 }
 0x68d   :  { %v802_v50 = vmul.f32 %v3044_v47, %v553_v22 }
 0x68e   :  { %v1160_v32 = vpop.f32.mrb[12].mxu0 }
 0x68f   :  { %v2598_v35 = vpop.f32.mrb[13].mxu0 }
 0x6f0   :  { %v805_v48 = vpop.permute.xlu0 %804 }
 0x6f1   :  { %v807_v49 = vmul.f32 %v3044_v47, %v805_v48 }
 0x6f3   :  { %809 = vrot.lane.b32.xlu1 %v807_v49, %s3115_s4 }
 0x765   :  { %v810_v51 = vpop.permute.xlu1 %809 }
 0x766   :  { %v812_v52 = vadd.f32 %v810_v51, %v802_v50 }
 0x768   :  { %3045 = vtanh.f32 %v812_v52 }
 0x772   :  { %v3046_v55 = vpop.eup %3045 }
 0x773   :  { %815 = vrot.lane.b32.xlu0 %v3046_v55, %s3114_s21  ;;  %v2178_v55 = vld [vmem:[%s3663_s0 + $0xa] sm:$0x3] }
 0x7e5   :  { %v816_v56 = vpop.permute.xlu0 %815 }
 0x7e6   :  { %v3422_v57 = vmul.f32 %v3044_v47, %v816_v56 }
 0x7e8   :  { %820 = vrot.lane.b32.xlu1 %v3422_v57, %s3115_s4 }
 0x85a   :  { %v821_v0 = vpop.permute.xlu1 %820 }
 0x85b   :  { %2160 = vst.msk [vmem:[%s3668_s5 + $0x4] sm:$0x3] %vm305_vm2, %v821_v0  ;;  %2578 = vmatmul.mubr.msk.f32.vlgmr.msra.gmra.mrb[10].mxu1 %vm195_vm3, %v821_v0 }
 0x85c   :  { %2910 = vmatpush3.bf16.msra.mxu1 %v3180_v8  ;;  %2615 = vmatprep.mubr.msk.f32.mxu1 %vm3112_vm0, %v3113_v11 }
 0x85d   :  { %2911 = vmatprep.subr.bf16.mxu1 %v3111_v3 }
 0x860   :  { %2913 = vmatpush3.bf16.msra.mxu1 %v3197_v13 }
 0x861   :  { %2914 = vmatprep.subr.bf16.mxu1 %v3111_v3 }
 0x864   :  { %2916 = vmatpush3.bf16.msra.mxu1 %v3217_v19 }
 0x865   :  { %2917 = vmatprep.subr.bf16.mxu1 %v3111_v3 }
 0x868   :  { %2919 = vmatpush3.bf16.msra.mxu1 %v3237_v25 }
 0x869   :  { %2926 = vmatprep.subr.bf16.mxu1 %v3111_v3 }
 0x86b   :  { %2616 = vmatmul.mubr.msk.f32.vlgmr.msra.gmra.mrb[12].mxu1 %vm48_vm1, %v2170_v26 }
 0x86c   :  { %2928 = vmatpush3.bf16.msra.mxu1 %v3168_v4  ;;  %2645 = vmatprep.mubr.msk.f32.mxu1 %vm3112_vm0, %v3113_v11 }
 0x86d   :  { %2929 = vmatprep.subr.bf16.mxu1 %v3111_v3 }
 0x870   :  { %2931 = vmatpush3.bf16.msra.mxu1 %v3193_v12 }
 0x871   :  { %2932 = vmatprep.subr.bf16.mxu1 %v3111_v3 }
 0x874   :  { %2934 = vmatpush3.bf16.msra.mxu1 %v3213_v18 }
 0x875   :  { %2935 = vmatprep.subr.bf16.mxu1 %v3111_v3 }
 0x878   :  { %2937 = vmatpush3.bf16.msra.mxu1 %v3233_v24 }
 0x879   :  { %2950 = vmatprep.subr.bf16.mxu1 %v3111_v3 }
 0x87b   :  { %2646 = vmatmul.mubr.msk.f32.vlgmr.msra.gmra.mrb[14].mxu1 %vm48_vm1, %v2179_v54 }
 0x87c   :  { %2952 = vmatpush3.bf16.msra.mxu1 %v3250_v29  ;;  %2675 = vmatprep.mubr.msk.f32.mxu1 %vm3112_vm0, %v3113_v11 }
 0x87d   :  { %2953 = vmatprep.subr.bf16.mxu1 %v3111_v3 }
 0x880   :  { %2955 = vmatpush3.bf16.msra.mxu1 %v3267_v33 }
 0x881   :  { %2968 = vmatprep.subr.bf16.mxu1 %v3111_v3 }
 0x92e   :  { %v1048_v1 = vpop.f32.mrb[10].mxu1 }
 0x92f   :  { %v1052_v2 = vadd.f32 %v1048_v1, %v977_v62  ;;  %v2579_v5 = vpop.f32.mrb[11].mxu1 }
 0x931   :  { %v1053_v6 = vadd.f32 %v3298_v39, %v1052_v2 }
 0x933   :  { %3047 = vtanh.f32 %v1053_v6  ;;  %v2167_v9 = vmul.f32 -1.442695, %v1053_v6 }
 0x935   :  { %3049 = vpow2.f32 %v2167_v9 }
 0x93d   :  { %v3048_v7 = vpop.eup %3047 }
 0x93e   :  { %1063 = vrot.lane.b32.xlu0 %v3048_v7, %s3114_s21  ;;  %v1233_v34 = vpop.f32.mrb[12].mxu1 }
 0x93f   :  { %v3050_v10 = vpop.eup %3049  ;;  %v1234_v36 = vadd.f32 %v1233_v34, %v1160_v32  ;;  %v2617_v37 = vpop.f32.mrb[13].mxu1 }
 0x940   :  { %v1057_v14 = vadd.f32 1.0, %v3050_v10 }
 0x942   :  { %3051 = vrcp.f32 %v1057_v14 }
 0x94c   :  { %v3052_v15 = vpop.eup %3051 }
 0x94d   :  { %v1061_v20 = vmul.f32 %v3052_v15, %v812_v52 }
 0x94e   :  { %v1417_v61 = vpop.f32.mrb[14].mxu1 }
 0x94f   :  { %v2647_v63 = vpop.f32.mrb[15].mxu1 }
 0x9b0   :  { %v1064_v16 = vpop.permute.xlu0 %1063 }
 0x9b1   :  { %v1066_v17 = vmul.f32 %v3052_v15, %v1064_v16 }
 0x9b3   :  { %1068 = vrot.lane.b32.xlu1 %v1066_v17, %s3115_s4 }
 0xa25   :  { %v1069_v21 = vpop.permute.xlu1 %1068 }
 0xa26   :  { %v1071_v22 = vadd.f32 %v1069_v21, %v1061_v20 }
 0xa28   :  { %3053 = vtanh.f32 %v1071_v22 }
 0xa32   :  { %v3054_v27 = vpop.eup %3053 }
 0xa33   :  { %1074 = vrot.lane.b32.xlu0 %v3054_v27, %s3114_s21  ;;  %v2187_v27 = vld [vmem:[%s3663_s0 + $0x2] sm:$0x3] }
 0xaa5   :  { %v1075_v28 = vpop.permute.xlu0 %1074 }
 0xaa6   :  { %v3469_v31 = vmul.f32 %v3052_v15, %v1075_v28  ;;  %v2186_v28 = vld [vmem:[%s3663_s0 + $0xc] sm:$0x3] }
 0xaa8   :  { %1079 = vrot.lane.b32.xlu1 %v3469_v31, %s3115_s4 }
 0xb1a   :  { %v1080_v38 = vpop.permute.xlu1 %1079 }
 0xb1b   :  { %2168 = vst.msk [vmem:[%s3668_s5 + $0x6] sm:$0x3] %vm305_vm2, %v1080_v38  ;;  %2627 = vmatmul.mubr.msk.f32.vlgmr.msra.gmra.mrb[14].mxu0 %vm195_vm3, %v1080_v38 }
 0xb1c   :  { %2940 = vmatpush3.bf16.msra.mxu0 %v3180_v8  ;;  %2664 = vmatprep.mubr.msk.f32.mxu0 %vm3112_vm0, %v3113_v11 }
 0xb1d   :  { %2941 = vmatprep.subr.bf16.mxu0 %v3111_v3 }
 0xb20   :  { %2943 = vmatpush3.bf16.msra.mxu0 %v3197_v13 }
 0xb21   :  { %2944 = vmatprep.subr.bf16.mxu0 %v3111_v3 }
 0xb24   :  { %2946 = vmatpush3.bf16.msra.mxu0 %v3217_v19 }
 0xb25   :  { %2947 = vmatprep.subr.bf16.mxu0 %v3111_v3 }
 0xb28   :  { %2949 = vmatpush3.bf16.msra.mxu0 %v3237_v25 }
 0xb29   :  { %2956 = vmatprep.subr.bf16.mxu0 %v3111_v3 }
 0xb2b   :  { %2665 = vmatmul.mubr.msk.f32.vlgmr.msra.gmra.mrb[16].mxu0 %vm48_vm1, %v2178_v55 }
 0xb2c   :  { %2958 = vmatpush3.bf16.msra.mxu0 %v3168_v4  ;;  %2694 = vmatprep.mubr.msk.f32.mxu0 %vm3112_vm0, %v3113_v11 }
 0xb2d   :  { %2959 = vmatprep.subr.bf16.mxu0 %v3111_v3 }
 0xb30   :  { %2961 = vmatpush3.bf16.msra.mxu0 %v3193_v12 }
 0xb31   :  { %2962 = vmatprep.subr.bf16.mxu0 %v3111_v3 }
 0xb34   :  { %2964 = vmatpush3.bf16.msra.mxu0 %v3213_v18 }
 0xb35   :  { %2965 = vmatprep.subr.bf16.mxu0 %v3111_v3 }
 0xb38   :  { %2967 = vmatpush3.bf16.msra.mxu0 %v3233_v24 }
 0xb39   :  { %2980 = vmatprep.subr.bf16.mxu0 %v3111_v3 }
 0xb3b   :  { %2695 = vmatmul.mubr.msk.f32.vlgmr.msra.gmra.mrb[18].mxu0 %vm48_vm1, %v2187_v27 }
 0xb3c   :  { %2982 = vmatpush3.bf16.msra.mxu0 %v3250_v29  ;;  %2724 = vmatprep.mubr.msk.f32.mxu0 %vm3112_vm0, %v3113_v11 }
 0xb3d   :  { %2983 = vmatprep.subr.bf16.mxu0 %v3111_v3 }
 0xb40   :  { %2985 = vmatpush3.bf16.msra.mxu0 %v3267_v33 }
 0xb41   :  { %2998 = vmatprep.subr.bf16.mxu0 %v3111_v3 }
 0xbee   :  { %v1305_v40 = vpop.f32.mrb[14].mxu0 }
 0xbef   :  { %v1309_v41 = vadd.f32 %v1305_v40, %v1234_v36  ;;  %v2628_v42 = vpop.f32.mrb[15].mxu0 }
 0xbf1   :  { %v1310_v43 = vadd.f32 %v3298_v39, %v1309_v41 }
 0xbf3   :  { %3055 = vtanh.f32 %v1310_v43  ;;  %v2175_v45 = vmul.f32 -1.442695, %v1310_v43 }
 0xbf5   :  { %3057 = vpow2.f32 %v2175_v45 }
 0xbfd   :  { %v3056_v44 = vpop.eup %3055 }
 0xbfe   :  { %1320 = vrot.lane.b32.xlu0 %v3056_v44, %s3114_s21  ;;  %v1490_v62 = vpop.f32.mrb[16].mxu0 }
 0xbff   :  { %v3058_v46 = vpop.eup %3057  ;;  %v1491_v0 = vadd.f32 %v1490_v62, %v1417_v61  ;;  %v2666_v1 = vpop.f32.mrb[17].mxu0 }
 0xc00   :  { %v1314_v47 = vadd.f32 1.0, %v3058_v46 }
 0xc02   :  { %3059 = vrcp.f32 %v1314_v47 }
 0xc0c   :  { %v3060_v48 = vpop.eup %3059 }
 0xc0d   :  { %v1318_v51 = vmul.f32 %v3060_v48, %v1071_v22 }
 0xc70   :  { %v1321_v49 = vpop.permute.xlu0 %1320 }
 0xc71   :  { %v1323_v50 = vmul.f32 %v3060_v48, %v1321_v49  ;;  %v1861_v49 = vld [vmem:[%s3663_s0] sm:$0x3] }
 0xc73   :  { %1325 = vrot.lane.b32.xlu1 %v1323_v50, %s3115_s4  ;;  %v2194_v50 = vld [vmem:[%s3663_s0 + $0xe] sm:$0x3] }
 0xce5   :  { %v1326_v52 = vpop.permute.xlu1 %1325 }
 0xce6   :  { %v1328_v53 = vadd.f32 %v1326_v52, %v1318_v51 }
 0xce8   :  { %3061 = vtanh.f32 %v1328_v53 }
 0xcf2   :  { %v3062_v56 = vpop.eup %3061 }
 0xcf3   :  { %1331 = vrot.lane.b32.xlu0 %v3062_v56, %s3114_s21 }
 0xd65   :  { %v1332_v59 = vpop.permute.xlu0 %1331 }
 0xd66   :  { %v3516_v60 = vmul.f32 %v3060_v48, %v1332_v59 }
 0xd68   :  { %1336 = vrot.lane.b32.xlu1 %v3516_v60, %s3115_s4 }
 0xdda   :  { %v1337_v2 = vpop.permute.xlu1 %1336 }
 0xddb   :  { %2176 = vst.msk [vmem:[%s3668_s5 + $0x8] sm:$0x3] %vm305_vm2, %v1337_v2  ;;  %2676 = vmatmul.mubr.msk.f32.vlgmr.msra.gmra.mrb[16].mxu1 %vm195_vm3, %v1337_v2 }
 0xddc   :  { %2970 = vmatpush3.bf16.msra.mxu1 %v3180_v8  ;;  %2713 = vmatprep.mubr.msk.f32.mxu1 %vm3112_vm0, %v3113_v11 }
 0xddd   :  { %2971 = vmatprep.subr.bf16.mxu1 %v3111_v3 }
 0xde0   :  { %2973 = vmatpush3.bf16.msra.mxu1 %v3197_v13 }
 0xde1   :  { %2974 = vmatprep.subr.bf16.mxu1 %v3111_v3 }
 0xde4   :  { %2976 = vmatpush3.bf16.msra.mxu1 %v3217_v19 }
 0xde5   :  { %2977 = vmatprep.subr.bf16.mxu1 %v3111_v3 }
 0xde8   :  { %2979 = vmatpush3.bf16.msra.mxu1 %v3237_v25 }
 0xde9   :  { %2986 = vmatprep.subr.bf16.mxu1 %v3111_v3 }
 0xdeb   :  { %2714 = vmatmul.mubr.msk.f32.vlgmr.msra.gmra.mrb[18].mxu1 %vm48_vm1, %v2186_v28 }
 0xdec   :  { %2988 = vmatpush3.bf16.msra.mxu1 %v3168_v4  ;;  %2743 = vmatprep.mubr.msk.f32.mxu1 %vm3112_vm0, %v3113_v11 }
 0xded   :  { %2989 = vmatprep.subr.bf16.mxu1 %v3111_v3 }
 0xdf0   :  { %2991 = vmatpush3.bf16.msra.mxu1 %v3193_v12  ;;  %v1674_v12 = vpop.f32.mrb[18].mxu0 }
 0xdf1   :  { %2992 = vmatprep.subr.bf16.mxu1 %v3111_v3  ;;  %v2696_v36 = vpop.f32.mrb[19].mxu0 }
 0xdf4   :  { %2994 = vmatpush3.bf16.msra.mxu1 %v3213_v18 }
 0xdf5   :  { %2995 = vmatprep.subr.bf16.mxu1 %v3111_v3 }
 0xdf8   :  { %2997 = vmatpush3.bf16.msra.mxu1 %v3233_v24 }
 0xdf9   :  { %3010 = vmatprep.subr.bf16.mxu1 %v3111_v3 }
 0xdfb   :  { %2744 = vmatmul.mubr.msk.f32.vlgmr.msra.gmra.mrb[20].mxu1 %vm48_vm1, %v1861_v49 }
 0xdfc   :  { %3012 = vmatpush3.bf16.msra.mxu1 %v3250_v29  ;;  %2773 = vmatprep.mubr.msk.f32.mxu1 %vm3112_vm0, %v3113_v11 }
 0xdfd   :  { %3013 = vmatprep.subr.bf16.mxu1 %v3111_v3 }
 0xe00   :  { %3015 = vmatpush3.bf16.msra.mxu1 %v3267_v33 }
 0xeae   :  { %v1562_v5 = vpop.f32.mrb[16].mxu1 }
 0xeaf   :  { %v1566_v6 = vadd.f32 %v1562_v5, %v1491_v0  ;;  %v2677_v7 = vpop.f32.mrb[17].mxu1 }
 0xeb1   :  { %v1567_v9 = vadd.f32 %v3298_v39, %v1566_v6 }
 0xeb3   :  { %3063 = vtanh.f32 %v1567_v9  ;;  %v2183_v14 = vmul.f32 -1.442695, %v1567_v9 }
 0xeb5   :  { %3065 = vpow2.f32 %v2183_v14 }
 0xebd   :  { %v3064_v10 = vpop.eup %3063 }
 0xebe   :  { %1577 = vrot.lane.b32.xlu0 %v3064_v10, %s3114_s21  ;;  %v1747_v35 = vpop.f32.mrb[18].mxu1 }
 0xebf   :  { %v3066_v15 = vpop.eup %3065  ;;  %v1748_v37 = vadd.f32 %v1747_v35, %v1674_v12  ;;  %v2715_v38 = vpop.f32.mrb[19].mxu1 }
 0xec0   :  { %v1571_v16 = vadd.f32 1.0, %v3066_v15 }
 0xec2   :  { %3067 = vrcp.f32 %v1571_v16 }
 0xecc   :  { %v3068_v17 = vpop.eup %3067 }
 0xecd   :  { %v1575_v22 = vmul.f32 %v3068_v17, %v1328_v53 }
 0xece   :  { %v1931_v54 = vpop.f32.mrb[20].mxu1 }
 0xecf   :  { %v2745_v56 = vpop.f32.mrb[21].mxu1 }
 0xf30   :  { %v1578_v20 = vpop.permute.xlu0 %1577 }
 0xf31   :  { %v1580_v21 = vmul.f32 %v3068_v17, %v1578_v20 }
 0xf33   :  { %1582 = vrot.lane.b32.xlu1 %v1580_v21, %s3115_s4 }
 0xfa5   :  { %v1583_v23 = vpop.permute.xlu1 %1582 }
 0xfa6   :  { %v1585_v26 = vadd.f32 %v1583_v23, %v1575_v22 }
 0xfa8   :  { %3069 = vtanh.f32 %v1585_v26 }
 0xfb2   :  { %v3070_v32 = vpop.eup %3069 }
 0xfb3   :  { %1588 = vrot.lane.b32.xlu0 %v3070_v32, %s3114_s21 }
0x1025   :  { %v1589_v4 = vpop.permute.xlu0 %1588 }
0x1026   :  { %v3563_v34 = vmul.f32 %v3068_v17, %v1589_v4 }
0x1028   :  { %1593 = vrot.lane.b32.xlu1 %v3563_v34, %s3115_s4 }
0x109a   :  { %v1594_v40 = vpop.permute.xlu1 %1593 }
0x109b   :  { %2184 = vst.msk [vmem:[%s3668_s5 + $0xa] sm:$0x3] %vm305_vm2, %v1594_v40  ;;  %2725 = vmatmul.mubr.msk.f32.vlgmr.msra.gmra.mrb[20].mxu0 %vm195_vm3, %v1594_v40 }
0x109c   :  { %3000 = vmatpush3.bf16.msra.mxu0 %v3180_v8  ;;  %2762 = vmatprep.mubr.msk.f32.mxu0 %vm3112_vm0, %v3113_v11 }
0x109d   :  { %3001 = vmatprep.subr.bf16.mxu0 %v3111_v3 }
0x10a0   :  { %3003 = vmatpush3.bf16.msra.mxu0 %v3197_v13 }
0x10a1   :  { %3004 = vmatprep.subr.bf16.mxu0 %v3111_v3 }
0x10a4   :  { %3006 = vmatpush3.bf16.msra.mxu0 %v3217_v19 }
0x10a5   :  { %3007 = vmatprep.subr.bf16.mxu0 %v3111_v3 }
0x10a8   :  { %3009 = vmatpush3.bf16.msra.mxu0 %v3237_v25 }
0x10ab   :  { %2763 = vmatmul.mubr.msk.f32.vlgmr.msra.gmra.mrb[22].mxu0 %vm48_vm1, %v2194_v50 }
0x116e   :  { %v1819_v18 = vpop.f32.mrb[20].mxu0 }
0x116f   :  { %v1823_v24 = vadd.f32 %v1819_v18, %v1748_v37  ;;  %v2726_v41 = vpop.f32.mrb[21].mxu0 }
0x1171   :  { %v1824_v8 = vadd.f32 %v3298_v39, %v1823_v24 }
0x1173   :  { %3071 = vtanh.f32 %v1824_v8  ;;  %v2191_v43 = vmul.f32 -1.442695, %v1824_v8 }
0x1175   :  { %3073 = vpow2.f32 %v2191_v43 }
0x117d   :  { %v3072_v42 = vpop.eup %3071 }
0x117e   :  { %1834 = vrot.lane.b32.xlu0 %v3072_v42, %s3114_s21  ;;  %v2004_v55 = vpop.f32.mrb[22].mxu0 }
0x117f   :  { %v3074_v13 = vpop.eup %3073  ;;  %v2005_v59 = vadd.f32 %v2004_v55, %v1931_v54  ;;  %v2764_v61 = vpop.f32.mrb[23].mxu0 }
0x1180   :  { %v1828_v44 = vadd.f32 1.0, %v3074_v13 }
0x1182   :  { %3075 = vrcp.f32 %v1828_v44 }
0x118c   :  { %v3076_v45 = vpop.eup %3075 }
0x118d   :  { %v1832_v25 = vmul.f32 %v3076_v45, %v1585_v26 }
0x11f0   :  { %v1835_v19 = vpop.permute.xlu0 %1834 }
0x11f1   :  { %v1837_v46 = vmul.f32 %v3076_v45, %v1835_v19 }
0x11f3   :  { %1839 = vrot.lane.b32.xlu1 %v1837_v46, %s3115_s4 }
0x1265   :  { %v1840_v47 = vpop.permute.xlu1 %1839 }
0x1266   :  { %v1842_v48 = vadd.f32 %v1840_v47, %v1832_v25 }
0x1268   :  { %3077 = vtanh.f32 %v1842_v48 }
0x1272   :  { %v3078_v51 = vpop.eup %3077 }
0x1273   :  { %1845 = vrot.lane.b32.xlu0 %v3078_v51, %s3114_s21 }
0x12e5   :  { %v1846_v52 = vpop.permute.xlu0 %1845 }
0x12e6   :  { %v1848_v53 = vmul.f32 %v3076_v45, %v1846_v52 }
0x12e8   :  { %1850 = vrot.lane.b32.xlu1 %v1848_v53, %s3115_s4 }
0x135a   :  { %v1851_v29 = vpop.permute.xlu1 %1850 }
0x135b   :  { %2192 = vst.msk [vmem:[%s3668_s5 + $0xc] sm:$0x3] %vm305_vm2, %v1851_v29  ;;  %2774 = vmatmul.mubr.msk.f32.vlgmr.msra.gmra.mrb[22].mxu1 %vm195_vm3, %v1851_v29 }
0x142e   :  { %v2076_v3 = vpop.f32.mrb[22].mxu1 }
0x142f   :  { %v2080_v11 = vadd.f32 %v2076_v3, %v2005_v59  ;;  %v2775_v33 = vpop.f32.mrb[23].mxu1 }
0x1431   :  { %v2081_v62 = vadd.f32 %v3298_v39, %v2080_v11 }
0x1433   :  { %3079 = vtanh.f32 %v2081_v62  ;;  %v2198_v0 = vmul.f32 -1.442695, %v2081_v62 }
0x1435   :  { %3081 = vpow2.f32 %v2198_v0 }
0x143d   :  { %v3080_v63 = vpop.eup %3079 }
0x143e   :  { %2091 = vrot.lane.b32.xlu0 %v3080_v63, %s3114_s21 }
0x143f   :  { %v3082_v1 = vpop.eup %3081 }
0x1440   :  { %v2085_v2 = vadd.f32 1.0, %v3082_v1 }
0x1442   :  { %3083 = vrcp.f32 %v2085_v2 }
0x144c   :  { %v3084_v5 = vpop.eup %3083 }
0x144d   :  { %v2089_v39 = vmul.f32 %v3084_v5, %v1842_v48 }
0x14b0   :  { %v2092_v6 = vpop.permute.xlu0 %2091 }
0x14b1   :  { %v2094_v7 = vmul.f32 %v3084_v5, %v2092_v6 }
0x14b3   :  { %2096 = vrot.lane.b32.xlu1 %v2094_v7, %s3115_s4 }
0x14b7   :  { %566 = vrot.lane.b32.xlu1 %v3375_v30, %s3116_s13 }
0x14bb   :  { %1084 = vrot.lane.b32.xlu1 %v3469_v31, %s3116_s13 }
0x14bf   :  { %1598 = vrot.lane.b32.xlu1 %v3563_v34, %s3116_s13 }
0x1525   :  { %v2097_v9 = vpop.permute.xlu1 %2096 }
0x1526   :  { %v2099_v10 = vadd.f32 %v2097_v9, %v2089_v39 }
0x1528   :  { %3085 = vtanh.f32 %v2099_v10 }
0x1529   :  { %v567_v14 = vpop.permute.xlu1 %566 }
0x152a   :  { %2153 = vst.msk [vmem:[%s3669_s6 + $0xc] sm:$0x3] %vm305_vm2, %v567_v14 }
0x152d   :  { %v1085_v15 = vpop.permute.xlu1 %1084 }
0x152e   :  { %2169 = vst.msk [vmem:[%s3669_s6 + $0x8] sm:$0x3] %vm305_vm2, %v1085_v15 }
0x1531   :  { %v1599_v30 = vpop.permute.xlu1 %1598 }
0x1532   :  { %v3086_v31 = vpop.eup %3085  ;;  %2185 = vst.msk [vmem:[%s3669_s6 + $0x4] sm:$0x3] %vm305_vm2, %v1599_v30 }
0x1533   :  { %2102 = vrot.lane.b32.xlu0 %v3086_v31, %s3114_s21 }
0x1537   :  { %307 = vrot.lane.b32.xlu0 %v3328_v58, %s3116_s13 }
0x153b   :  { %825 = vrot.lane.b32.xlu0 %v3422_v57, %s3116_s13 }
0x153f   :  { %1341 = vrot.lane.b32.xlu0 %v3516_v60, %s3116_s13 }
0x1543   :  { %1855 = vrot.lane.b32.xlu0 %v1848_v53, %s3116_s13 }
0x15a5   :  { %v2103_v16 = vpop.permute.xlu0 %2102 }
0x15a6   :  { %v2105_v17 = vmul.f32 %v3084_v5, %v2103_v16 }
0x15a8   :  { %2107 = vrot.lane.b32.xlu1 %v2105_v17, %s3115_s4 }
0x15a9   :  { %v308_v20 = vpop.permute.xlu0 %307 }
0x15aa   :  { %2145 = vst.msk [vmem:[%s3669_s6 + $0xe] sm:$0x3] %vm305_vm2, %v308_v20 }
0x15ac   :  { %2112 = vrot.lane.b32.xlu1 %v2105_v17, %s3116_s13 }
0x15ad   :  { %v826_v21 = vpop.permute.xlu0 %825 }
0x15ae   :  { %2161 = vst.msk [vmem:[%s3669_s6 + $0xa] sm:$0x3] %vm305_vm2, %v826_v21 }
0x15b1   :  { %v1342_v58 = vpop.permute.xlu0 %1341 }
0x15b2   :  { %2177 = vst.msk [vmem:[%s3669_s6 + $0x6] sm:$0x3] %vm305_vm2, %v1342_v58 }
0x15b5   :  { %v1856_v57 = vpop.permute.xlu0 %1855 }
0x15b6   :  { %2193 = vst.msk [vmem:[%s3669_s6 + $0x2] sm:$0x3] %vm305_vm2, %v1856_v57 }
0x161a   :  { %v2108_v60 = vpop.permute.xlu1 %2107 }
0x161b   :  { %2199 = vst.msk [vmem:[%s3668_s5 + $0xe] sm:$0x3] %vm305_vm2, %v2108_v60 }
0x161c   :  { %2117 = vst.msk [vmem:[#allocation2] sm:$0x3] %vm2116_vm4, %v2108_v60 }
0x161d   :  { %3098 = shalt.err (!%p3095_p4)
}
0x161e   :  { %s3099_s2 = scalar_lea.hbm %s3670_s7, 32 }
0x161f   :  { %p3100_p5 = scmp.ne.s32.totalorder %s3670_s7, %s3099_s2  ;;  %p3103_p6 = scmp.lt.u32.totalorder %s3099_s2, %s3670_s7 }
0x1621   :  { %p3105_p7 = pnand %p3103_p6, %p3100_p5 }
0x1623   :  { %3108 = shalt.err (!%p3105_p7)
}
0x1624   :  { %2131 = dma.vmem_to_hbm [thread:$0]  %s2129_s27, 32, %s3670_s7, [#allocation3]   ;;  %v2113_v22 = vpop.permute.xlu1 %2112 }
0x1625   :  { %2115 = vst.msk [vmem:[%s3669_s6] sm:$0x3] %vm305_vm2, %v2113_v22 }
0x1626   :  { %3109 = dma.done.wait [#allocation3], 32  }
0x1627   :  { %3110 = vsyncadd [#allocation3], 4294967264 }
0x1628   :  { %2139 = vsyncpa [#allocation3], 1 }

// kernel: seq2seq_forward.10
= control target key start
LH: loop header
LB: loop body
LE: loop exit
PB: predicated region body
PF: predicated region fallthrough
CT: control target
= control target key end

     0   :  { %v143_v0 = vmov 0.0|0.0   ;;  %vm144_vm0 = vmmov 0   ;;  %v145_v4 = vmov 0.0   ;;  %vm26_vm1 = vcmask 261120   ;;  %s187_s1 = inlined_call_operand.vmem [shape: f32[32,64], index: 1, kind: input, shape index: {}]   ;;  %s188_s0 = inlined_call_operand.vmem [shape: f32[4,32], index: 0, kind: input, shape index: {}]   ;;  %s189_s2 = inlined_call_operand.vmem [shape: f32[1,64], index: 2, kind: input, shape index: {}]   ;;  %s190_s3 = inlined_call_operand.vmem [shape: f32[4,64], index: 3, kind: output, shape index: {}]  }
   0x1   :  { %132 = vmatprep.subr.bf16.mxu0 %v143_v0  ;;  %v15_v1 = vld [vmem:[%s187_s1] sm:$0xff]  ;;  %v16_v2 = vld [vmem:[%s187_s1 + $0x8] sm:$0xff]  ;;  %v17_v3 = vld [vmem:[%s187_s1 + $0x10] sm:$0xff]  ;;  %129 = vmatprep.mubr.msk.f32.mxu0 %vm144_vm0, %v145_v4  ;;  %vm107_vm3 = vcmask 519168  }
   0x2   :  { %v133_v5 = vpack.c.bf16 %v16_v2, %v15_v1  ;;  %v18_v6 = vld [vmem:[%s187_s1 + $0x18] sm:$0xff]  ;;  %v14_v8 = vld [vmem:[%s188_s0] sm:$0xf] }
   0x3   :  { %v136_v7 = vpack.c.bf16 %v18_v6, %v17_v3  ;;  %v113_v9 = vld [vmem:[%s189_s2] ss:$0 sm:$0xff] }
   0x4   :  { %134 = vmatpush3.bf16.msra.mxu0 %v133_v5 }
   0x5   :  { %135 = vmatprep.subr.bf16.mxu0 %v143_v0 }
   0x8   :  { %137 = vmatpush3.bf16.msra.mxu0 %v136_v7 }
   0xb   :  { %130 = vmatmul.mubr.msk.f32.vlgmr.msra.gmra.mrb[0].mxu0 %vm26_vm1, %v14_v8 }
  0xde   :  { %v96_v10 = vpop.f32.mrb[0].mxu0 }
  0xdf   :  { %v97_v11 = vadd.f32 %v113_v9, %v96_v10  ;;  %v131_v12 = vpop.f32.mrb[1].mxu0 }
  0xe1   :  { %v101_v13 = vmul.f32 1.442695, %v97_v11  ;;  %vm100_vm2 = vcmp.gt.f32.partialorder %v97_v11, 0.0 }
  0xe3   :  { %141 = vpow2.f32 %v101_v13 }
  0xed   :  { %v142_v14 = vpop.eup %141 }
  0xee   :  { %v115_v15 = vadd.f32 -1.0, %v142_v14 }
  0xf0   :  { %v104_v16 = vmul.f32 1.6732632, %v115_v15 }
  0xf2   :  { %v105_v17 = vsel %vm100_vm2, %v97_v11, %v104_v16 }
  0xf3   :  { %v106_v18 = vmul.f32 1.050701, %v105_v17 }
  0xf5   :  { %108 = vst.msk [vmem:[%s190_s3] sm:$0xf] %vm107_vm3, %v106_v18 }

// kernel: seq2seq_forward.6
= control target key start
LH: loop header
LB: loop body
LE: loop exit
PB: predicated region body
PF: predicated region fallthrough
CT: control target
= control target key end

     0   :  { %v5636_v3 = vmov 0.0|0.0   ;;  %vm5637_vm0 = vmmov 0   ;;  %v5638_v11 = vmov 0.0   ;;  %s6549_s0 = inlined_call_operand.vmem [shape: f32[16,2,40], index: 0, kind: input, shape index: {}]   ;;  %s6550_s1 = inlined_call_operand.vmem [shape: f32[40,128], index: 1, kind: input, shape index: {}]   ;;  %s6551_s2 = inlined_call_operand.vmem [shape: f32[40,128], index: 2, kind: input, shape index: {}]   ;;  %s6552_s3 = inlined_call_operand.vmem [shape: f32[32,128], index: 3, kind: input, shape index: {}]   ;;  %s6553_s4 = inlined_call_operand.vmem [shape: f32[1,128], index: 4, kind: input, shape index: {}]   ;;  %s6554_s5 = inlined_call_operand.vmem [shape: f32[16,2,16], index: 5, kind: output, shape index: {0}]   ;;  %s6555_s6 = inlined_call_operand.vmem [shape: f32[16,2,16], index: 6, kind: output, shape index: {1}]   ;;  %s6556_s7 = inlined_call_operand.hbm [shape: f32[2,32], index: 7, kind: output, shape index: {2}]  }
   0x1   :  { %v29_v0 = vld [vmem:[%s6551_s2] sm:$0xff]  ;;  %v30_v1 = vld [vmem:[%s6551_s2 + $0x8] sm:$0xff]  ;;  %5186 = vmatprep.subr.bf16.mxu0 %v5636_v3  ;;  %5192 = vmatprep.subr.bf16.mxu1 %v5636_v3  ;;  %v31_v6 = vld [vmem:[%s6551_s2 + $0x10] sm:$0xff] }
   0x2   :  { %v24_v2 = vld [vmem:[%s6550_s1] sm:$0xff]  ;;  %v5693_v4 = vpack.c.bf16 %v30_v1, %v29_v0  ;;  %v25_v5 = vld [vmem:[%s6550_s1 + $0x8] sm:$0xff]  ;;  %v32_v7 = vld [vmem:[%s6551_s2 + $0x18] sm:$0xff]  ;;  %4604 = vmatprep.mubr.msk.f32.mxu0 %vm5637_vm0, %v5638_v11  ;;  %4617 = vmatprep.mubr.msk.f32.mxu1 %vm5637_vm0, %v5638_v11 }
   0x3   :  { %v5705_v8 = vpack.c.bf16 %v25_v5, %v24_v2  ;;  %v26_v9 = vld [vmem:[%s6550_s1 + $0x10] sm:$0xff]  ;;  %v27_v10 = vld [vmem:[%s6550_s1 + $0x18] sm:$0xff]  ;;  %v5718_v12 = vpack.c.bf16 %v32_v7, %v31_v6 }
   0x4   :  { %5188 = vmatpush3.bf16.msra.mxu0 %v5693_v4  ;;  %v5722_v13 = vpack.c.bf16 %v27_v10, %v26_v9 }
   0x5   :  { %5194 = vmatpush3.bf16.msra.mxu1 %v5705_v8  ;;  %5189 = vmatprep.subr.bf16.mxu0 %v5636_v3 }
   0x6   :  { %5195 = vmatprep.subr.bf16.mxu1 %v5636_v3 }
   0x7   :  { %13 = vsyncpa [#allocation3], 0  ;;  %v34_v14 = vld [vmem:[%s6552_s3] sm:$0xff]  ;;  %v35_v15 = vld [vmem:[%s6552_s3 + $0x8] sm:$0xff]  ;;  %vm42_vm1 = vcmask 326656   ;;  %s5639_s11 = smov 64  }
   0x8   :  { %5191 = vmatpush3.bf16.msra.mxu0 %v5718_v12  ;;  %v5737_v16 = vld [vmem:[%s6551_s2 + $0x20] sm:$0xff]  ;;  %v4198_v17 = vld [vmem:[%s6549_s0 + $0x1e] sm:$0x3]  ;;  %v5751_v20 = vpack.c.bf16 %v35_v15, %v34_v14  ;;  %v36_v21 = vld [vmem:[%s6552_s3 + $0x10] sm:$0xff]  ;;  %s5640_s12 = smov 32   ;;  %vm299_vm2 = vcmask 123904  }
   0x9   :  { %5197 = vmatpush3.bf16.msra.mxu1 %v5722_v13  ;;  %4602 = vmatprep.subr.mxu0 %v5638_v11  ;;  %v5746_v18 = vld [vmem:[%s6550_s1 + $0x20] sm:$0xff]  ;;  %v37_v22 = vld [vmem:[%s6552_s3 + $0x18] sm:$0xff]  ;;  %vm189_vm3 = vcmask 261120   ;;  %s5641_s14 = smov 16   ;;  %s5642_s17 = smov [#allocation2]   ;;  %vm4174_vm4 = vcmask 254976  }
   0xa   :  { %4615 = vmatprep.subr.mxu1 %v5638_v11  ;;  %v39_v19 = vld [vmem:[%s6549_s0] sm:$0x3]  ;;  %v5765_v23 = vpack.c.bf16 %v37_v22, %v36_v21  ;;  %v4205_v44 = vld [vmem:[%s6549_s0 + $0x1c] sm:$0x3]  ;;  %v4204_v45 = vld [vmem:[%s6549_s0 + $0x2] sm:$0x3] }
   0xb   :  { %v5793_v29 = vld [vmem:[%s6553_s4] ss:$0 sm:$0xff]  ;;  %v4213_v7 = vld [vmem:[%s6549_s0 + $0x1a] sm:$0x3]  ;;  %v4212_v9 = vld [vmem:[%s6549_s0 + $0x4] sm:$0x3] }
   0xc   :  { %4603 = vmatpush3.msra.mxu0 %v5737_v16  ;;  %s4186_s18 = sshll.u32 %s5642_s17, 4  ;;  %s4187_s18 = int_to_ptr.vmem [resolvable:$true] %s4186_s18 }
   0xd   :  { %4605 = vmatmul.mubr.msk.f32.vlgmr.msra.gmra.mrb[0].mxu0 %vm42_vm1, %v4198_v17  ;;  %4616 = vmatpush3.msra.mxu1 %v5746_v18  ;;  %s5612_s21 = scalar_lea.vmem %s4187_s18, 32  ;;  %p5617_p1 = scmp.lt.s32.totalorder %s4187_s18, %s4187_s18 }
   0xe   :  { %5198 = vmatprep.subr.bf16.mxu0 %v5636_v3  ;;  %4618 = vmatmul.mubr.msk.f32.vlgmr.msra.gmra.mrb[0].mxu1 %vm42_vm1, %v39_v19  ;;  %p5613_p0 = scmp.ne.s32.totalorder %s4187_s18, %s5612_s21  ;;  %p5618_p2 = scmp.lt.s32.totalorder %s5612_s21, %s5612_s21 }
   0xf   :  { %5200 = vmatpush3.bf16.msra.mxu0 %v5751_v20  ;;  %4628 = vmatprep.mubr.msk.f32.mxu0 %vm5637_vm0, %v5638_v11 }
  0x10   :  { %5201 = vmatprep.subr.bf16.mxu0 %v5636_v3  ;;  %5204 = vmatprep.subr.bf16.mxu1 %v5636_v3  ;;  %p5619_p3 = por %p5618_p2, %p5617_p1 }
  0x11   :  { %5206 = vmatpush3.bf16.msra.mxu1 %v5693_v4  ;;  %4641 = vmatprep.mubr.msk.f32.mxu1 %vm5637_vm0, %v5638_v11 }
  0x12   :  { %5207 = vmatprep.subr.bf16.mxu1 %v5636_v3  ;;  %p5620_p4 = pnand %p5619_p3, %p5613_p0 }
  0x13   :  { %5203 = vmatpush3.bf16.msra.mxu0 %v5765_v23 }
  0x14   :  { %5210 = vmatprep.subr.bf16.mxu0 %v5636_v3 }
  0x15   :  { %5209 = vmatpush3.bf16.msra.mxu1 %v5718_v12 }
  0x16   :  { %4629 = vmatmul.mubr.f32.vlgmr.msra.gmra.mrb[2].mxu0 %v5638_v11  ;;  %4639 = vmatprep.subr.mxu1 %v5638_v11 }
  0x17   :  { %5212 = vmatpush3.bf16.msra.mxu0 %v5705_v8  ;;  %4654 = vmatprep.mubr.msk.f32.mxu0 %vm5637_vm0, %v5638_v11 }
  0x18   :  { %5213 = vmatprep.subr.bf16.mxu0 %v5636_v3 }
  0x19   :  { %4640 = vmatpush3.msra.mxu1 %v5737_v16 }
  0x1a   :  { %5216 = vmatprep.subr.bf16.mxu1 %v5636_v3  ;;  %4642 = vmatmul.mubr.msk.f32.vlgmr.msra.gmra.mrb[2].mxu1 %vm42_vm1, %v4205_v44 }
  0x1b   :  { %5215 = vmatpush3.bf16.msra.mxu0 %v5722_v13  ;;  %5218 = vmatpush3.bf16.msra.mxu1 %v5751_v20 }
  0x1c   :  { %4652 = vmatprep.subr.mxu0 %v5638_v11  ;;  %4665 = vmatprep.mubr.msk.f32.mxu1 %vm5637_vm0, %v5638_v11 }
  0x1d   :  { %5219 = vmatprep.subr.bf16.mxu1 %v5636_v3 }
  0x1f   :  { %4653 = vmatpush3.msra.mxu0 %v5746_v18  ;;  %5221 = vmatpush3.bf16.msra.mxu1 %v5765_v23 }
  0x20   :  { %5222 = vmatprep.subr.bf16.mxu0 %v5636_v3  ;;  %4655 = vmatmul.mubr.msk.f32.vlgmr.msra.gmra.mrb[4].mxu0 %vm42_vm1, %v4204_v45 }
  0x21   :  { %5224 = vmatpush3.bf16.msra.mxu0 %v5693_v4  ;;  %4678 = vmatprep.mubr.msk.f32.mxu0 %vm5637_vm0, %v5638_v11 }
  0x22   :  { %5225 = vmatprep.subr.bf16.mxu0 %v5636_v3  ;;  %5228 = vmatprep.subr.bf16.mxu1 %v5636_v3 }
  0x25   :  { %5227 = vmatpush3.bf16.msra.mxu0 %v5718_v12 }
  0x26   :  { %4676 = vmatprep.subr.mxu0 %v5638_v11 }
  0x29   :  { %4677 = vmatpush3.msra.mxu0 %v5737_v16 }
  0x2a   :  { %5234 = vmatprep.subr.bf16.mxu0 %v5636_v3  ;;  %4679 = vmatmul.mubr.msk.f32.vlgmr.msra.gmra.mrb[6].mxu0 %vm42_vm1, %v4213_v7 }
  0x2b   :  { %5236 = vmatpush3.bf16.msra.mxu0 %v5751_v20  ;;  %4702 = vmatprep.mubr.msk.f32.mxu0 %vm5637_vm0, %v5638_v11 }
  0x2c   :  { %5237 = vmatprep.subr.bf16.mxu0 %v5636_v3 }
  0x2f   :  { %5239 = vmatpush3.bf16.msra.mxu0 %v5765_v23 }
  0x30   :  { %5246 = vmatprep.subr.bf16.mxu0 %v5636_v3 }
  0xe0   :  { %v112_v24 = vpop.f32.mrb[0].mxu0 }
  0xe1   :  { %v4606_v25 = vpop.f32.mrb[1].mxu0  ;;  %v185_v26 = vpop.f32.mrb[0].mxu1 }
  0xe2   :  { %v186_v27 = vadd.f32 %v185_v26, %v112_v24  ;;  %v4619_v28 = vpop.f32.mrb[1].mxu1 }
  0xe9   :  { %v259_v30 = vpop.f32.mrb[2].mxu0 }
  0xea   :  { %v263_v31 = vadd.f32 %v259_v30, %v186_v27  ;;  %v4630_v32 = vpop.f32.mrb[3].mxu0 }
  0xec   :  { %v270_v33 = vadd.f32 %v5793_v29, %v263_v31 }
  0xed   :  { %v379_v49 = vpop.f32.mrb[2].mxu1 }
  0xee   :  { %5481 = vtanh.f32 %v270_v33  ;;  %v4202_v35 = vmul.f32 -1.442695, %v270_v33  ;;  %v4643_v51 = vpop.f32.mrb[3].mxu1 }
  0xf0   :  { %5483 = vpow2.f32 %v4202_v35 }
  0xf3   :  { %v452_v50 = vpop.f32.mrb[4].mxu0 }
  0xf4   :  { %v453_v52 = vadd.f32 %v452_v50, %v379_v49  ;;  %v4656_v53 = vpop.f32.mrb[5].mxu0 }
  0xf8   :  { %v5482_v34 = vpop.eup %5481 }
  0xf9   :  { %280 = vrot.lane.b32.xlu0 %v5482_v34, %s5639_s11 }
  0xfa   :  { %v5484_v36 = vpop.eup %5483 }
  0xfb   :  { %v274_v37 = vadd.f32 1.0, %v5484_v36 }
  0xfd   :  { %5485 = vrcp.f32 %v274_v37  ;;  %v638_v17 = vpop.f32.mrb[6].mxu0 }
  0xfe   :  { %v4680_v21 = vpop.f32.mrb[7].mxu0 }
 0x107   :  { %v5486_v38 = vpop.eup %5485 }
 0x108   :  { %v278_v41 = vmul.f32 0.0, %v5486_v38 }
 0x16b   :  { %v281_v39 = vpop.permute.xlu0 %280 }
 0x16c   :  { %v283_v40 = vmul.f32 %v5486_v38, %v281_v39 }
 0x16e   :  { %285 = vrot.lane.b32.xlu0 %v283_v40, %s5640_s12 }
 0x1e0   :  { %v286_v42 = vpop.permute.xlu0 %285 }
 0x1e1   :  { %v288_v43 = vadd.f32 %v286_v42, %v278_v41  ;;  %v4221_v41 = vld [vmem:[%s6549_s0 + $0x18] sm:$0x3]  ;;  %v4220_v42 = vld [vmem:[%s6549_s0 + $0x6] sm:$0x3] }
 0x1e3   :  { %5487 = vtanh.f32 %v288_v43 }
 0x1ed   :  { %v5488_v46 = vpop.eup %5487 }
 0x1ee   :  { %291 = vrot.lane.b32.xlu1 %v5488_v46, %s5639_s11 }
 0x260   :  { %v292_v47 = vpop.permute.xlu1 %291 }
 0x261   :  { %v5821_v48 = vmul.f32 %v5486_v38, %v292_v47 }
 0x263   :  { %296 = vrot.lane.b32.xlu1 %v5821_v48, %s5640_s12 }
 0x2d5   :  { %v297_v54 = vpop.permute.xlu1 %296 }
 0x2d6   :  { %300 = vst.msk [vmem:[%s6554_s5] sm:$0x3] %vm299_vm2, %v297_v54  ;;  %4666 = vmatmul.mubr.msk.f32.vlgmr.msra.gmra.mrb[4].mxu1 %vm189_vm3, %v297_v54 }
 0x2d7   :  { %5230 = vmatpush3.bf16.msra.mxu1 %v5705_v8  ;;  %4691 = vmatprep.mubr.msk.f32.mxu1 %vm5637_vm0, %v5638_v11 }
 0x2d8   :  { %5231 = vmatprep.subr.bf16.mxu1 %v5636_v3 }
 0x2db   :  { %5233 = vmatpush3.bf16.msra.mxu1 %v5722_v13 }
 0x2dc   :  { %4689 = vmatprep.subr.mxu1 %v5638_v11 }
 0x2df   :  { %4690 = vmatpush3.msra.mxu1 %v5746_v18 }
 0x2e0   :  { %5240 = vmatprep.subr.bf16.mxu1 %v5636_v3  ;;  %4692 = vmatmul.mubr.msk.f32.vlgmr.msra.gmra.mrb[6].mxu1 %vm42_vm1, %v4212_v9 }
 0x2e1   :  { %5242 = vmatpush3.bf16.msra.mxu1 %v5693_v4  ;;  %4715 = vmatprep.mubr.msk.f32.mxu1 %vm5637_vm0, %v5638_v11 }
 0x2e2   :  { %5243 = vmatprep.subr.bf16.mxu1 %v5636_v3 }
 0x2e5   :  { %5245 = vmatpush3.bf16.msra.mxu1 %v5718_v12 }
 0x2e6   :  { %4713 = vmatprep.subr.mxu1 %v5638_v11 }
 0x2e9   :  { %4714 = vmatpush3.msra.mxu1 %v5737_v16 }
 0x2ea   :  { %5252 = vmatprep.subr.bf16.mxu1 %v5636_v3  ;;  %4716 = vmatmul.mubr.msk.f32.vlgmr.msra.gmra.mrb[8].mxu1 %vm42_vm1, %v4221_v41  ;;  %v4236_v41 = vld [vmem:[%s6549_s0 + $0xa] sm:$0x3] }
 0x2eb   :  { %5254 = vmatpush3.bf16.msra.mxu1 %v5751_v20  ;;  %4739 = vmatprep.mubr.msk.f32.mxu1 %vm5637_vm0, %v5638_v11 }
 0x2ec   :  { %5255 = vmatprep.subr.bf16.mxu1 %v5636_v3 }
 0x2ef   :  { %5257 = vmatpush3.bf16.msra.mxu1 %v5765_v23 }
 0x2f0   :  { %5264 = vmatprep.subr.bf16.mxu1 %v5636_v3 }
 0x3a9   :  { %v524_v55 = vpop.f32.mrb[4].mxu1 }
 0x3aa   :  { %v528_v56 = vadd.f32 %v524_v55, %v453_v52  ;;  %v4667_v57 = vpop.f32.mrb[5].mxu1 }
 0x3ac   :  { %v529_v58 = vadd.f32 %v5793_v29, %v528_v56 }
 0x3ae   :  { %5489 = vtanh.f32 %v529_v58  ;;  %v4209_v60 = vmul.f32 -1.442695, %v529_v58 }
 0x3b0   :  { %5491 = vpow2.f32 %v4209_v60 }
 0x3b3   :  { %v711_v19 = vpop.f32.mrb[6].mxu1 }
 0x3b4   :  { %v712_v22 = vadd.f32 %v711_v19, %v638_v17  ;;  %v4693_v24 = vpop.f32.mrb[7].mxu1 }
 0x3b8   :  { %v5490_v59 = vpop.eup %5489 }
 0x3b9   :  { %539 = vrot.lane.b32.xlu0 %v5490_v59, %s5639_s11 }
 0x3ba   :  { %v5492_v61 = vpop.eup %5491 }
 0x3bb   :  { %v533_v62 = vadd.f32 1.0, %v5492_v61 }
 0x3bd   :  { %5493 = vrcp.f32 %v533_v62  ;;  %v897_v46 = vpop.f32.mrb[8].mxu1 }
 0x3be   :  { %v4717_v49 = vpop.f32.mrb[9].mxu1 }
 0x3c7   :  { %v5494_v63 = vpop.eup %5493 }
 0x3c8   :  { %v537_v2 = vmul.f32 %v5494_v63, %v288_v43 }
 0x42b   :  { %v540_v0 = vpop.permute.xlu0 %539 }
 0x42c   :  { %v542_v1 = vmul.f32 %v5494_v63, %v540_v0 }
 0x42e   :  { %544 = vrot.lane.b32.xlu1 %v542_v1, %s5640_s12 }
 0x4a0   :  { %v545_v5 = vpop.permute.xlu1 %544 }
 0x4a1   :  { %v547_v6 = vadd.f32 %v545_v5, %v537_v2  ;;  %v4229_v5 = vld [vmem:[%s6549_s0 + $0x16] sm:$0x3] }
 0x4a3   :  { %5495 = vtanh.f32 %v547_v6 }
 0x4ad   :  { %v5496_v10 = vpop.eup %5495 }
 0x4ae   :  { %550 = vrot.lane.b32.xlu0 %v5496_v10, %s5639_s11 }
 0x520   :  { %v551_v14 = vpop.permute.xlu0 %550 }
 0x521   :  { %v5864_v15 = vmul.f32 %v5494_v63, %v551_v14 }
 0x523   :  { %555 = vrot.lane.b32.xlu1 %v5864_v15, %s5640_s12 }
 0x595   :  { %v556_v25 = vpop.permute.xlu1 %555 }
 0x596   :  { %4210 = vst.msk [vmem:[%s6554_s5 + $0x2] sm:$0x3] %vm299_vm2, %v556_v25  ;;  %4703 = vmatmul.mubr.msk.f32.vlgmr.msra.gmra.mrb[8].mxu0 %vm189_vm3, %v556_v25 }
 0x597   :  { %5248 = vmatpush3.bf16.msra.mxu0 %v5705_v8  ;;  %4728 = vmatprep.mubr.msk.f32.mxu0 %vm5637_vm0, %v5638_v11 }
 0x598   :  { %5249 = vmatprep.subr.bf16.mxu0 %v5636_v3 }
 0x59b   :  { %5251 = vmatpush3.bf16.msra.mxu0 %v5722_v13 }
 0x59c   :  { %4726 = vmatprep.subr.mxu0 %v5638_v11 }
 0x59f   :  { %4727 = vmatpush3.msra.mxu0 %v5746_v18 }
 0x5a0   :  { %5258 = vmatprep.subr.bf16.mxu0 %v5636_v3  ;;  %4729 = vmatmul.mubr.msk.f32.vlgmr.msra.gmra.mrb[10].mxu0 %vm42_vm1, %v4220_v42 }
 0x5a1   :  { %5260 = vmatpush3.bf16.msra.mxu0 %v5693_v4  ;;  %4752 = vmatprep.mubr.msk.f32.mxu0 %vm5637_vm0, %v5638_v11 }
 0x5a2   :  { %5261 = vmatprep.subr.bf16.mxu0 %v5636_v3 }
 0x5a5   :  { %5263 = vmatpush3.bf16.msra.mxu0 %v5718_v12 }
 0x5a6   :  { %4750 = vmatprep.subr.mxu0 %v5638_v11 }
 0x5a9   :  { %4751 = vmatpush3.msra.mxu0 %v5737_v16 }
 0x5aa   :  { %5270 = vmatprep.subr.bf16.mxu0 %v5636_v3  ;;  %4753 = vmatmul.mubr.msk.f32.vlgmr.msra.gmra.mrb[12].mxu0 %vm42_vm1, %v4229_v5  ;;  %v4245_v5 = vld [vmem:[%s6549_s0 + $0x12] sm:$0x3] }
 0x5ab   :  { %5272 = vmatpush3.bf16.msra.mxu0 %v5751_v20  ;;  %4776 = vmatprep.mubr.msk.f32.mxu0 %vm5637_vm0, %v5638_v11 }
 0x5ac   :  { %5273 = vmatprep.subr.bf16.mxu0 %v5636_v3 }
 0x5af   :  { %5275 = vmatpush3.bf16.msra.mxu0 %v5765_v23 }
 0x5b0   :  { %5282 = vmatprep.subr.bf16.mxu0 %v5636_v3 }
 0x669   :  { %v783_v26 = vpop.f32.mrb[8].mxu0 }
 0x66a   :  { %v787_v27 = vadd.f32 %v783_v26, %v712_v22  ;;  %v4704_v28 = vpop.f32.mrb[9].mxu0 }
 0x66c   :  { %v788_v30 = vadd.f32 %v5793_v29, %v787_v27 }
 0x66e   :  { %5497 = vtanh.f32 %v788_v30  ;;  %v4217_v32 = vmul.f32 -1.442695, %v788_v30 }
 0x670   :  { %5499 = vpow2.f32 %v4217_v32 }
 0x673   :  { %v970_v47 = vpop.f32.mrb[10].mxu0 }
 0x674   :  { %v971_v50 = vadd.f32 %v970_v47, %v897_v46  ;;  %v4730_v51 = vpop.f32.mrb[11].mxu0 }
 0x678   :  { %v5498_v31 = vpop.eup %5497 }
 0x679   :  { %798 = vrot.lane.b32.xlu0 %v5498_v31, %s5639_s11 }
 0x67a   :  { %v5500_v33 = vpop.eup %5499 }
 0x67b   :  { %v792_v34 = vadd.f32 1.0, %v5500_v33 }
 0x67d   :  { %5501 = vrcp.f32 %v792_v34  ;;  %v1156_v14 = vpop.f32.mrb[12].mxu0 }
 0x67e   :  { %v4754_v19 = vpop.f32.mrb[13].mxu0 }
 0x687   :  { %v5502_v35 = vpop.eup %5501 }
 0x688   :  { %v796_v38 = vmul.f32 %v5502_v35, %v547_v6  ;;  %v4228_v6 = vld [vmem:[%s6549_s0 + $0x8] sm:$0x3] }
 0x6eb   :  { %v799_v36 = vpop.permute.xlu0 %798 }
 0x6ec   :  { %v801_v37 = vmul.f32 %v5502_v35, %v799_v36 }
 0x6ee   :  { %803 = vrot.lane.b32.xlu1 %v801_v37, %s5640_s12 }
 0x760   :  { %v804_v39 = vpop.permute.xlu1 %803 }
 0x761   :  { %v806_v40 = vadd.f32 %v804_v39, %v796_v38 }
 0x763   :  { %5503 = vtanh.f32 %v806_v40 }
 0x76d   :  { %v5504_v43 = vpop.eup %5503 }
 0x76e   :  { %809 = vrot.lane.b32.xlu0 %v5504_v43, %s5639_s11 }
 0x7e0   :  { %v810_v44 = vpop.permute.xlu0 %809 }
 0x7e1   :  { %v5907_v45 = vmul.f32 %v5502_v35, %v810_v44 }
 0x7e3   :  { %814 = vrot.lane.b32.xlu1 %v5907_v45, %s5640_s12 }
 0x855   :  { %v815_v52 = vpop.permute.xlu1 %814 }
 0x856   :  { %4218 = vst.msk [vmem:[%s6554_s5 + $0x4] sm:$0x3] %vm299_vm2, %v815_v52  ;;  %4740 = vmatmul.mubr.msk.f32.vlgmr.msra.gmra.mrb[10].mxu1 %vm189_vm3, %v815_v52 }
 0x857   :  { %5266 = vmatpush3.bf16.msra.mxu1 %v5705_v8  ;;  %4765 = vmatprep.mubr.msk.f32.mxu1 %vm5637_vm0, %v5638_v11 }
 0x858   :  { %5267 = vmatprep.subr.bf16.mxu1 %v5636_v3 }
 0x85b   :  { %5269 = vmatpush3.bf16.msra.mxu1 %v5722_v13 }
 0x85c   :  { %4763 = vmatprep.subr.mxu1 %v5638_v11 }
 0x85f   :  { %4764 = vmatpush3.msra.mxu1 %v5746_v18 }
 0x860   :  { %5276 = vmatprep.subr.bf16.mxu1 %v5636_v3  ;;  %4766 = vmatmul.mubr.msk.f32.vlgmr.msra.gmra.mrb[12].mxu1 %vm42_vm1, %v4228_v6  ;;  %v4244_v6 = vld [vmem:[%s6549_s0 + $0xc] sm:$0x3] }
 0x861   :  { %5278 = vmatpush3.bf16.msra.mxu1 %v5693_v4  ;;  %4789 = vmatprep.mubr.msk.f32.mxu1 %vm5637_vm0, %v5638_v11 }
 0x862   :  { %5279 = vmatprep.subr.bf16.mxu1 %v5636_v3 }
 0x865   :  { %5281 = vmatpush3.bf16.msra.mxu1 %v5718_v12 }
 0x866   :  { %4787 = vmatprep.subr.mxu1 %v5638_v11 }
 0x869   :  { %4788 = vmatpush3.msra.mxu1 %v5737_v16 }
 0x86a   :  { %5288 = vmatprep.subr.bf16.mxu1 %v5636_v3 }
 0x929   :  { %v1042_v53 = vpop.f32.mrb[10].mxu1 }
 0x92a   :  { %v1046_v54 = vadd.f32 %v1042_v53, %v971_v50  ;;  %v4741_v55 = vpop.f32.mrb[11].mxu1 }
 0x92c   :  { %v1047_v56 = vadd.f32 %v5793_v29, %v1046_v54 }
 0x92e   :  { %5505 = vtanh.f32 %v1047_v56  ;;  %v4225_v58 = vmul.f32 -1.442695, %v1047_v56 }
 0x930   :  { %5507 = vpow2.f32 %v4225_v58 }
 0x933   :  { %v1229_v17 = vpop.f32.mrb[12].mxu1 }
 0x934   :  { %v1230_v21 = vadd.f32 %v1229_v17, %v1156_v14  ;;  %v4767_v22 = vpop.f32.mrb[13].mxu1 }
 0x938   :  { %v5506_v57 = vpop.eup %5505 }
 0x939   :  { %1057 = vrot.lane.b32.xlu0 %v5506_v57, %s5639_s11 }
 0x93a   :  { %v5508_v59 = vpop.eup %5507 }
 0x93b   :  { %v1051_v60 = vadd.f32 1.0, %v5508_v59 }
 0x93d   :  { %5509 = vrcp.f32 %v1051_v60 }
 0x947   :  { %v5510_v61 = vpop.eup %5509 }
 0x948   :  { %v1055_v0 = vmul.f32 %v5510_v61, %v806_v40  ;;  %v4237_v40 = vld [vmem:[%s6549_s0 + $0x14] sm:$0x3] }
 0x949   :  { %4790 = vmatmul.mubr.msk.f32.vlgmr.msra.gmra.mrb[14].mxu1 %vm42_vm1, %v4237_v40 }
 0x94a   :  { %5290 = vmatpush3.bf16.msra.mxu1 %v5751_v20  ;;  %4813 = vmatprep.mubr.msk.f32.mxu1 %vm5637_vm0, %v5638_v11 }
 0x94b   :  { %5291 = vmatprep.subr.bf16.mxu1 %v5636_v3 }
 0x94e   :  { %5293 = vmatpush3.bf16.msra.mxu1 %v5765_v23 }
 0x94f   :  { %5300 = vmatprep.subr.bf16.mxu1 %v5636_v3 }
 0x9ab   :  { %v1058_v62 = vpop.permute.xlu0 %1057 }
 0x9ac   :  { %v1060_v63 = vmul.f32 %v5510_v61, %v1058_v62 }
 0x9ae   :  { %1062 = vrot.lane.b32.xlu1 %v1060_v63, %s5640_s12 }
 0xa1c   :  { %v1415_v46 = vpop.f32.mrb[14].mxu1 }
 0xa1d   :  { %v4791_v49 = vpop.f32.mrb[15].mxu1 }
 0xa20   :  { %v1063_v1 = vpop.permute.xlu1 %1062 }
 0xa21   :  { %v1065_v2 = vadd.f32 %v1063_v1, %v1055_v0 }
 0xa23   :  { %5511 = vtanh.f32 %v1065_v2 }
 0xa2d   :  { %v5512_v7 = vpop.eup %5511 }
 0xa2e   :  { %1068 = vrot.lane.b32.xlu0 %v5512_v7, %s5639_s11 }
 0xaa0   :  { %v1069_v9 = vpop.permute.xlu0 %1068 }
 0xaa1   :  { %v5950_v10 = vmul.f32 %v5510_v61, %v1069_v9 }
 0xaa3   :  { %1073 = vrot.lane.b32.xlu1 %v5950_v10, %s5640_s12 }
 0xb15   :  { %v1074_v24 = vpop.permute.xlu1 %1073 }
 0xb16   :  { %4226 = vst.msk [vmem:[%s6554_s5 + $0x6] sm:$0x3] %vm299_vm2, %v1074_v24  ;;  %4777 = vmatmul.mubr.msk.f32.vlgmr.msra.gmra.mrb[14].mxu0 %vm189_vm3, %v1074_v24 }
 0xb17   :  { %5284 = vmatpush3.bf16.msra.mxu0 %v5705_v8  ;;  %4802 = vmatprep.mubr.msk.f32.mxu0 %vm5637_vm0, %v5638_v11 }
 0xb18   :  { %5285 = vmatprep.subr.bf16.mxu0 %v5636_v3 }
 0xb1b   :  { %5287 = vmatpush3.bf16.msra.mxu0 %v5722_v13 }
 0xb1c   :  { %4800 = vmatprep.subr.mxu0 %v5638_v11 }
 0xb1f   :  { %4801 = vmatpush3.msra.mxu0 %v5746_v18 }
 0xb20   :  { %5294 = vmatprep.subr.bf16.mxu0 %v5636_v3  ;;  %4803 = vmatmul.mubr.msk.f32.vlgmr.msra.gmra.mrb[16].mxu0 %vm42_vm1, %v4236_v41  ;;  %v4253_v41 = vld [vmem:[%s6549_s0 + $0x10] sm:$0x3] }
 0xb21   :  { %5296 = vmatpush3.bf16.msra.mxu0 %v5693_v4  ;;  %4826 = vmatprep.mubr.msk.f32.mxu0 %vm5637_vm0, %v5638_v11 }
 0xb22   :  { %5297 = vmatprep.subr.bf16.mxu0 %v5636_v3 }
 0xb25   :  { %5299 = vmatpush3.bf16.msra.mxu0 %v5718_v12 }
 0xb26   :  { %4824 = vmatprep.subr.mxu0 %v5638_v11 }
 0xb29   :  { %4825 = vmatpush3.msra.mxu0 %v5737_v16 }
 0xb2a   :  { %5306 = vmatprep.subr.bf16.mxu0 %v5636_v3  ;;  %4827 = vmatmul.mubr.msk.f32.vlgmr.msra.gmra.mrb[18].mxu0 %vm42_vm1, %v4245_v5 }
 0xb2b   :  { %5308 = vmatpush3.bf16.msra.mxu0 %v5751_v20  ;;  %4850 = vmatprep.mubr.msk.f32.mxu0 %vm5637_vm0, %v5638_v11 }
 0xb2c   :  { %5309 = vmatprep.subr.bf16.mxu0 %v5636_v3 }
 0xb2f   :  { %5311 = vmatpush3.bf16.msra.mxu0 %v5765_v23 }
 0xb30   :  { %5318 = vmatprep.subr.bf16.mxu0 %v5636_v3 }
 0xbe9   :  { %v1301_v25 = vpop.f32.mrb[14].mxu0 }
 0xbea   :  { %v1305_v26 = vadd.f32 %v1301_v25, %v1230_v21  ;;  %v4778_v27 = vpop.f32.mrb[15].mxu0 }
 0xbec   :  { %v1306_v28 = vadd.f32 %v5793_v29, %v1305_v26 }
 0xbee   :  { %5513 = vtanh.f32 %v1306_v28  ;;  %v4233_v31 = vmul.f32 -1.442695, %v1306_v28 }
 0xbf0   :  { %5515 = vpow2.f32 %v4233_v31 }
 0xbf3   :  { %v1488_v47 = vpop.f32.mrb[16].mxu0 }
 0xbf4   :  { %v1489_v50 = vadd.f32 %v1488_v47, %v1415_v46  ;;  %v4804_v51 = vpop.f32.mrb[17].mxu0 }
 0xbf8   :  { %v5514_v30 = vpop.eup %5513 }
 0xbf9   :  { %1316 = vrot.lane.b32.xlu0 %v5514_v30, %s5639_s11 }
 0xbfa   :  { %v5516_v32 = vpop.eup %5515 }
 0xbfb   :  { %v1310_v33 = vadd.f32 1.0, %v5516_v32 }
 0xbfd   :  { %5517 = vrcp.f32 %v1310_v33  ;;  %v1674_v17 = vpop.f32.mrb[18].mxu0 }
 0xbfe   :  { %v4828_v21 = vpop.f32.mrb[19].mxu0 }
 0xc07   :  { %v5518_v34 = vpop.eup %5517 }
 0xc08   :  { %v1314_v37 = vmul.f32 %v5518_v34, %v1065_v2 }
 0xc6b   :  { %v1317_v35 = vpop.permute.xlu0 %1316 }
 0xc6c   :  { %v1319_v36 = vmul.f32 %v5518_v34, %v1317_v35 }
 0xc6e   :  { %1321 = vrot.lane.b32.xlu1 %v1319_v36, %s5640_s12 }
 0xce0   :  { %v1322_v38 = vpop.permute.xlu1 %1321 }
 0xce1   :  { %v1324_v39 = vadd.f32 %v1322_v38, %v1314_v37 }
 0xce3   :  { %5519 = vtanh.f32 %v1324_v39 }
 0xced   :  { %v5520_v42 = vpop.eup %5519 }
 0xcee   :  { %1327 = vrot.lane.b32.xlu0 %v5520_v42, %s5639_s11  ;;  %v4252_v42 = vld [vmem:[%s6549_s0 + $0xe] sm:$0x3] }
 0xd60   :  { %v1328_v43 = vpop.permute.xlu0 %1327 }
 0xd61   :  { %v5993_v44 = vmul.f32 %v5518_v34, %v1328_v43 }
 0xd63   :  { %1332 = vrot.lane.b32.xlu1 %v5993_v44, %s5640_s12 }
 0xdd5   :  { %v1333_v52 = vpop.permute.xlu1 %1332 }
 0xdd6   :  { %4234 = vst.msk [vmem:[%s6554_s5 + $0x8] sm:$0x3] %vm299_vm2, %v1333_v52  ;;  %4814 = vmatmul.mubr.msk.f32.vlgmr.msra.gmra.mrb[16].mxu1 %vm189_vm3, %v1333_v52 }
 0xdd7   :  { %5302 = vmatpush3.bf16.msra.mxu1 %v5705_v8  ;;  %4839 = vmatprep.mubr.msk.f32.mxu1 %vm5637_vm0, %v5638_v11 }
 0xdd8   :  { %5303 = vmatprep.subr.bf16.mxu1 %v5636_v3 }
 0xddb   :  { %5305 = vmatpush3.bf16.msra.mxu1 %v5722_v13 }
 0xddc   :  { %4837 = vmatprep.subr.mxu1 %v5638_v11 }
 0xddf   :  { %4838 = vmatpush3.msra.mxu1 %v5746_v18 }
 0xde0   :  { %5312 = vmatprep.subr.bf16.mxu1 %v5636_v3  ;;  %4840 = vmatmul.mubr.msk.f32.vlgmr.msra.gmra.mrb[18].mxu1 %vm42_vm1, %v4244_v6 }
 0xde1   :  { %5314 = vmatpush3.bf16.msra.mxu1 %v5693_v4  ;;  %4863 = vmatprep.mubr.msk.f32.mxu1 %vm5637_vm0, %v5638_v11 }
 0xde2   :  { %5315 = vmatprep.subr.bf16.mxu1 %v5636_v3 }
 0xde5   :  { %5317 = vmatpush3.bf16.msra.mxu1 %v5718_v12 }
 0xde6   :  { %4861 = vmatprep.subr.mxu1 %v5638_v11 }
 0xde9   :  { %4862 = vmatpush3.msra.mxu1 %v5737_v16 }
 0xdea   :  { %5324 = vmatprep.subr.bf16.mxu1 %v5636_v3  ;;  %4864 = vmatmul.mubr.msk.f32.vlgmr.msra.gmra.mrb[20].mxu1 %vm42_vm1, %v4253_v41 }
 0xdeb   :  { %5326 = vmatpush3.bf16.msra.mxu1 %v5751_v20  ;;  %4887 = vmatprep.mubr.msk.f32.mxu1 %vm5637_vm0, %v5638_v11 }
 0xdec   :  { %5327 = vmatprep.subr.bf16.mxu1 %v5636_v3 }
 0xdef   :  { %5329 = vmatpush3.bf16.msra.mxu1 %v5765_v23 }
 0xdf0   :  { %5336 = vmatprep.subr.bf16.mxu1 %v5636_v3 }
 0xea9   :  { %v1560_v53 = vpop.f32.mrb[16].mxu1 }
 0xeaa   :  { %v1564_v54 = vadd.f32 %v1560_v53, %v1489_v50  ;;  %v4815_v55 = vpop.f32.mrb[17].mxu1 }
 0xeac   :  { %v1565_v56 = vadd.f32 %v5793_v29, %v1564_v54 }
 0xeae   :  { %5521 = vtanh.f32 %v1565_v56  ;;  %v4241_v58 = vmul.f32 -1.442695, %v1565_v56 }
 0xeb0   :  { %5523 = vpow2.f32 %v4241_v58 }
 0xeb3   :  { %v1747_v19 = vpop.f32.mrb[18].mxu1 }
 0xeb4   :  { %v1748_v22 = vadd.f32 %v1747_v19, %v1674_v17  ;;  %v4841_v24 = vpop.f32.mrb[19].mxu1 }
 0xeb8   :  { %v5522_v57 = vpop.eup %5521 }
 0xeb9   :  { %1575 = vrot.lane.b32.xlu0 %v5522_v57, %s5639_s11 }
 0xeba   :  { %v5524_v59 = vpop.eup %5523 }
 0xebb   :  { %v1569_v60 = vadd.f32 1.0, %v5524_v59 }
 0xebd   :  { %5525 = vrcp.f32 %v1569_v60  ;;  %v1933_v49 = vpop.f32.mrb[20].mxu1 }
 0xebe   :  { %v4865_v51 = vpop.f32.mrb[21].mxu1 }
 0xec7   :  { %v5526_v61 = vpop.eup %5525 }
 0xec8   :  { %v1573_v0 = vmul.f32 %v5526_v61, %v1324_v39 }
 0xf2b   :  { %v1576_v62 = vpop.permute.xlu0 %1575 }
 0xf2c   :  { %v1578_v63 = vmul.f32 %v5526_v61, %v1576_v62 }
 0xf2e   :  { %1580 = vrot.lane.b32.xlu1 %v1578_v63, %s5640_s12 }
 0xfa0   :  { %v1581_v1 = vpop.permute.xlu1 %1580 }
 0xfa1   :  { %v1583_v2 = vadd.f32 %v1581_v1, %v1573_v0 }
 0xfa3   :  { %5527 = vtanh.f32 %v1583_v2 }
 0xfad   :  { %v5528_v7 = vpop.eup %5527 }
 0xfae   :  { %1586 = vrot.lane.b32.xlu0 %v5528_v7, %s5639_s11  ;;  %v4261_v7 = vld [vmem:[%s6549_s0 + $0xe] sm:$0x3] }
0x1020   :  { %v1587_v9 = vpop.permute.xlu0 %1586 }
0x1021   :  { %v6036_v14 = vmul.f32 %v5526_v61, %v1587_v9  ;;  %v4260_v9 = vld [vmem:[%s6549_s0 + $0x10] sm:$0x3] }
0x1023   :  { %1591 = vrot.lane.b32.xlu1 %v6036_v14, %s5640_s12 }
0x1095   :  { %v1592_v25 = vpop.permute.xlu1 %1591 }
0x1096   :  { %4242 = vst.msk [vmem:[%s6554_s5 + $0xa] sm:$0x3] %vm299_vm2, %v1592_v25  ;;  %4851 = vmatmul.mubr.msk.f32.vlgmr.msra.gmra.mrb[20].mxu0 %vm189_vm3, %v1592_v25 }
0x1097   :  { %5320 = vmatpush3.bf16.msra.mxu0 %v5705_v8  ;;  %4876 = vmatprep.mubr.msk.f32.mxu0 %vm5637_vm0, %v5638_v11 }
0x1098   :  { %5321 = vmatprep.subr.bf16.mxu0 %v5636_v3 }
0x109b   :  { %5323 = vmatpush3.bf16.msra.mxu0 %v5722_v13 }
0x109c   :  { %4874 = vmatprep.subr.mxu0 %v5638_v11 }
0x109f   :  { %4875 = vmatpush3.msra.mxu0 %v5746_v18 }
0x10a0   :  { %5330 = vmatprep.subr.bf16.mxu0 %v5636_v3  ;;  %4877 = vmatmul.mubr.msk.f32.vlgmr.msra.gmra.mrb[22].mxu0 %vm42_vm1, %v4252_v42  ;;  %v4268_v42 = vld [vmem:[%s6549_s0 + $0x12] sm:$0x3] }
0x10a1   :  { %5332 = vmatpush3.bf16.msra.mxu0 %v5693_v4  ;;  %4900 = vmatprep.mubr.msk.f32.mxu0 %vm5637_vm0, %v5638_v11 }
0x10a2   :  { %5333 = vmatprep.subr.bf16.mxu0 %v5636_v3 }
0x10a5   :  { %5335 = vmatpush3.bf16.msra.mxu0 %v5718_v12 }
0x10a6   :  { %4898 = vmatprep.subr.mxu0 %v5638_v11 }
0x10a9   :  { %4899 = vmatpush3.msra.mxu0 %v5737_v16 }
0x10aa   :  { %5342 = vmatprep.subr.bf16.mxu0 %v5636_v3  ;;  %4901 = vmatmul.mubr.msk.f32.vlgmr.msra.gmra.mrb[24].mxu0 %vm42_vm1, %v4261_v7 }
0x10ab   :  { %5344 = vmatpush3.bf16.msra.mxu0 %v5751_v20  ;;  %4924 = vmatprep.mubr.msk.f32.mxu0 %vm5637_vm0, %v5638_v11 }
0x10ac   :  { %5345 = vmatprep.subr.bf16.mxu0 %v5636_v3 }
0x10af   :  { %5347 = vmatpush3.bf16.msra.mxu0 %v5765_v23 }
0x10b0   :  { %5354 = vmatprep.subr.bf16.mxu0 %v5636_v3 }
0x1169   :  { %v1819_v26 = vpop.f32.mrb[20].mxu0 }
0x116a   :  { %v1823_v27 = vadd.f32 %v1819_v26, %v1748_v22  ;;  %v4852_v28 = vpop.f32.mrb[21].mxu0 }
0x116c   :  { %v1824_v30 = vadd.f32 %v5793_v29, %v1823_v27 }
0x116e   :  { %5529 = vtanh.f32 %v1824_v30  ;;  %v4249_v32 = vmul.f32 -1.442695, %v1824_v30 }
0x1170   :  { %5531 = vpow2.f32 %v4249_v32 }
0x1173   :  { %v2006_v50 = vpop.f32.mrb[22].mxu0 }
0x1174   :  { %v2007_v52 = vadd.f32 %v2006_v50, %v1933_v49  ;;  %v4878_v53 = vpop.f32.mrb[23].mxu0 }
0x1178   :  { %v5530_v31 = vpop.eup %5529 }
0x1179   :  { %1834 = vrot.lane.b32.xlu0 %v5530_v31, %s5639_s11 }
0x117a   :  { %v5532_v33 = vpop.eup %5531 }
0x117b   :  { %v1828_v34 = vadd.f32 1.0, %v5532_v33 }
0x117d   :  { %5533 = vrcp.f32 %v1828_v34  ;;  %v2190_v22 = vpop.f32.mrb[24].mxu0 }
0x117e   :  { %v4902_v25 = vpop.f32.mrb[25].mxu0 }
0x1187   :  { %v5534_v35 = vpop.eup %5533 }
0x1188   :  { %v1832_v38 = vmul.f32 %v5534_v35, %v1583_v2 }
0x11eb   :  { %v1835_v36 = vpop.permute.xlu0 %1834 }
0x11ec   :  { %v1837_v37 = vmul.f32 %v5534_v35, %v1835_v36 }
0x11ee   :  { %1839 = vrot.lane.b32.xlu1 %v1837_v37, %s5640_s12 }
0x1260   :  { %v1840_v39 = vpop.permute.xlu1 %1839 }
0x1261   :  { %v1842_v40 = vadd.f32 %v1840_v39, %v1832_v38 }
0x1263   :  { %5535 = vtanh.f32 %v1842_v40 }
0x126d   :  { %v5536_v43 = vpop.eup %5535 }
0x126e   :  { %1845 = vrot.lane.b32.xlu0 %v5536_v43, %s5639_s11 }
0x12e0   :  { %v1846_v46 = vpop.permute.xlu0 %1845 }
0x12e1   :  { %v6079_v47 = vmul.f32 %v5534_v35, %v1846_v46  ;;  %v6166_v46 = vld [vmem:[%s6551_s2 + $0x20] sm:$0xff] }
0x12e3   :  { %1850 = vrot.lane.b32.xlu1 %v6079_v47, %s5640_s12 }
0x1355   :  { %v1851_v54 = vpop.permute.xlu1 %1850 }
0x1356   :  { %4250 = vst.msk [vmem:[%s6554_s5 + $0xc] sm:$0x3] %vm299_vm2, %v1851_v54  ;;  %4888 = vmatmul.mubr.msk.f32.vlgmr.msra.gmra.mrb[22].mxu1 %vm189_vm3, %v1851_v54 }
0x1357   :  { %5338 = vmatpush3.bf16.msra.mxu1 %v5705_v8  ;;  %4913 = vmatprep.mubr.msk.f32.mxu1 %vm5637_vm0, %v5638_v11 }
0x1358   :  { %5339 = vmatprep.subr.bf16.mxu1 %v5636_v3 }
0x135b   :  { %5341 = vmatpush3.bf16.msra.mxu1 %v5722_v13 }
0x135c   :  { %4911 = vmatprep.subr.mxu1 %v5638_v11 }
0x135f   :  { %4912 = vmatpush3.msra.mxu1 %v5746_v18 }
0x1360   :  { %5348 = vmatprep.subr.bf16.mxu1 %v5636_v3  ;;  %4914 = vmatmul.mubr.msk.f32.vlgmr.msra.gmra.mrb[24].mxu1 %vm42_vm1, %v4260_v9 }
0x1361   :  { %5350 = vmatpush3.bf16.msra.mxu1 %v5693_v4  ;;  %4937 = vmatprep.mubr.msk.f32.mxu1 %vm5637_vm0, %v5638_v11 }
0x1362   :  { %5351 = vmatprep.subr.bf16.mxu1 %v5636_v3 }
0x1365   :  { %5353 = vmatpush3.bf16.msra.mxu1 %v5718_v12 }
0x1366   :  { %4935 = vmatprep.subr.mxu1 %v5638_v11 }
0x1369   :  { %4936 = vmatpush3.msra.mxu1 %v5737_v16 }
0x136a   :  { %5360 = vmatprep.subr.bf16.mxu1 %v5636_v3 }
0x1429   :  { %v2078_v55 = vpop.f32.mrb[22].mxu1 }
0x142a   :  { %v2082_v56 = vadd.f32 %v2078_v55, %v2007_v52  ;;  %v4889_v57 = vpop.f32.mrb[23].mxu1 }
0x142b   :  { %v6188_v57 = vld [vmem:[%s6550_s1 + $0x20] sm:$0xff] }
0x142c   :  { %v2083_v58 = vadd.f32 %v5793_v29, %v2082_v56 }
0x142e   :  { %5537 = vtanh.f32 %v2083_v58  ;;  %v4257_v60 = vmul.f32 -1.442695, %v2083_v58 }
0x1430   :  { %5539 = vpow2.f32 %v4257_v60 }
0x1433   :  { %v2263_v24 = vpop.f32.mrb[24].mxu1 }
0x1434   :  { %v2264_v26 = vadd.f32 %v2263_v24, %v2190_v22  ;;  %v4915_v27 = vpop.f32.mrb[25].mxu1  ;;  %v4277_v22 = vld [vmem:[%s6549_s0 + $0xa] sm:$0x3]  ;;  %v4276_v24 = vld [vmem:[%s6549_s0 + $0x14] sm:$0x3] }
0x1438   :  { %v5538_v59 = vpop.eup %5537 }
0x1439   :  { %2093 = vrot.lane.b32.xlu0 %v5538_v59, %s5639_s11 }
0x143a   :  { %v5540_v61 = vpop.eup %5539 }
0x143b   :  { %v2087_v62 = vadd.f32 1.0, %v5540_v61  ;;  %v6195_v61 = vld [vmem:[%s6553_s4] ss:$0 sm:$0xff] }
0x143d   :  { %5541 = vrcp.f32 %v2087_v62 }
0x1447   :  { %v5542_v63 = vpop.eup %5541 }
0x1448   :  { %v2091_v2 = vmul.f32 %v5542_v63, %v1842_v40 }
0x14ab   :  { %v2094_v0 = vpop.permute.xlu0 %2093 }
0x14ac   :  { %v2096_v1 = vmul.f32 %v5542_v63, %v2094_v0 }
0x14ae   :  { %2098 = vrot.lane.b32.xlu1 %v2096_v1, %s5640_s12 }
0x1520   :  { %v2099_v5 = vpop.permute.xlu1 %2098 }
0x1521   :  { %v2101_v6 = vadd.f32 %v2099_v5, %v2091_v2 }
0x1523   :  { %5543 = vtanh.f32 %v2101_v6 }
0x152d   :  { %v5544_v17 = vpop.eup %5543 }
0x152e   :  { %2104 = vrot.lane.b32.xlu0 %v5544_v17, %s5639_s11 }
0x15a0   :  { %v2105_v19 = vpop.permute.xlu0 %2104 }
0x15a1   :  { %v6122_v21 = vmul.f32 %v5542_v63, %v2105_v19 }
0x15a3   :  { %2109 = vrot.lane.b32.xlu1 %v6122_v21, %s5640_s12 }
0x1615   :  { %v2110_v28 = vpop.permute.xlu1 %2109 }
0x1616   :  { %4258 = vst.msk [vmem:[%s6554_s5 + $0xe] sm:$0x3] %vm299_vm2, %v2110_v28  ;;  %4925 = vmatmul.mubr.msk.f32.vlgmr.msra.gmra.mrb[26].mxu0 %vm189_vm3, %v2110_v28 }
0x1617   :  { %5356 = vmatpush3.bf16.msra.mxu0 %v5705_v8  ;;  %4950 = vmatprep.mubr.msk.f32.mxu0 %vm5637_vm0, %v5638_v11 }
0x1618   :  { %5357 = vmatprep.subr.bf16.mxu0 %v5636_v3 }
0x161b   :  { %5359 = vmatpush3.bf16.msra.mxu0 %v5722_v13 }
0x161c   :  { %4948 = vmatprep.subr.mxu0 %v5638_v11 }
0x161f   :  { %4949 = vmatpush3.msra.mxu0 %v5746_v18 }
0x1620   :  { %5366 = vmatprep.subr.bf16.mxu0 %v5636_v3  ;;  %4951 = vmatmul.mubr.msk.f32.vlgmr.msra.gmra.mrb[28].mxu0 %vm42_vm1, %v4268_v42 }
0x1621   :  { %5368 = vmatpush3.bf16.msra.mxu0 %v5693_v4  ;;  %4974 = vmatprep.mubr.msk.f32.mxu0 %vm5637_vm0, %v5638_v11 }
0x1622   :  { %5369 = vmatprep.subr.bf16.mxu0 %v5636_v3 }
0x1625   :  { %5371 = vmatpush3.bf16.msra.mxu0 %v5718_v12 }
0x1626   :  { %4972 = vmatprep.subr.mxu0 %v5638_v11 }
0x1629   :  { %4973 = vmatpush3.msra.mxu0 %v6166_v46 }
0x162a   :  { %5378 = vmatprep.subr.bf16.mxu0 %v5636_v3  ;;  %4975 = vmatmul.mubr.msk.f32.vlgmr.msra.gmra.mrb[30].mxu0 %vm42_vm1, %v4277_v22 }
0x162b   :  { %5380 = vmatpush3.bf16.msra.mxu0 %v5751_v20  ;;  %4998 = vmatprep.mubr.msk.f32.mxu0 %vm5637_vm0, %v5638_v11 }
0x162c   :  { %5381 = vmatprep.subr.bf16.mxu0 %v5636_v3 }
0x162f   :  { %5383 = vmatpush3.bf16.msra.mxu0 %v5765_v23 }
0x1630   :  { %5390 = vmatprep.subr.bf16.mxu0 %v5636_v3 }
0x16e9   :  { %v2335_v16 = vpop.f32.mrb[26].mxu0 }
0x16ea   :  { %v2339_v30 = vadd.f32 %v2335_v16, %v2264_v26  ;;  %v4926_v31 = vpop.f32.mrb[27].mxu0 }
0x16ec   :  { %v2340_v32 = vadd.f32 %v5793_v29, %v2339_v30  ;;  %v4269_v29 = vld [vmem:[%s6549_s0 + $0xc] sm:$0x3] }
0x16ed   :  { %4938 = vmatmul.mubr.msk.f32.vlgmr.msra.gmra.mrb[26].mxu1 %vm42_vm1, %v4269_v29 }
0x16ee   :  { %5545 = vtanh.f32 %v2340_v32  ;;  %v4265_v34 = vmul.f32 -1.442695, %v2340_v32  ;;  %5362 = vmatpush3.bf16.msra.mxu1 %v5751_v20  ;;  %4961 = vmatprep.mubr.msk.f32.mxu1 %vm5637_vm0, %v5638_v11 }
0x16ef   :  { %5363 = vmatprep.subr.bf16.mxu1 %v5636_v3 }
0x16f0   :  { %5547 = vpow2.f32 %v4265_v34 }
0x16f2   :  { %5365 = vmatpush3.bf16.msra.mxu1 %v5765_v23 }
0x16f3   :  { %5372 = vmatprep.subr.bf16.mxu1 %v5636_v3  ;;  %v2520_v52 = vpop.f32.mrb[28].mxu0 }
0x16f4   :  { %v4952_v55 = vpop.f32.mrb[29].mxu0 }
0x16f8   :  { %v5546_v33 = vpop.eup %5545 }
0x16f9   :  { %2350 = vrot.lane.b32.xlu0 %v5546_v33, %s5639_s11 }
0x16fa   :  { %v5548_v35 = vpop.eup %5547 }
0x16fb   :  { %v2344_v36 = vadd.f32 1.0, %v5548_v35 }
0x16fd   :  { %5549 = vrcp.f32 %v2344_v36  ;;  %v2704_v28 = vpop.f32.mrb[30].mxu0 }
0x16fe   :  { %v4976_v30 = vpop.f32.mrb[31].mxu0 }
0x16ff   :  { %v4293_v30 = vld [vmem:[%s6549_s0 + $0x6] sm:$0x3] }
0x1707   :  { %v5550_v37 = vpop.eup %5549 }
0x1708   :  { %v2348_v18 = vmul.f32 %v5550_v37, %v2101_v6 }
0x176b   :  { %v2351_v38 = vpop.permute.xlu0 %2350 }
0x176c   :  { %v2353_v39 = vmul.f32 %v5550_v37, %v2351_v38 }
0x176e   :  { %2355 = vrot.lane.b32.xlu1 %v2353_v39, %s5640_s12 }
0x17c0   :  { %v2447_v51 = vpop.f32.mrb[26].mxu1 }
0x17c1   :  { %v4939_v53 = vpop.f32.mrb[27].mxu1  ;;  %v2521_v54 = vadd.f32 %v2520_v52, %v2447_v51  ;;  %v4285_v52 = vld [vmem:[%s6549_s0 + $0x8] sm:$0x3] }
0x17c2   :  { %v4284_v53 = vld [vmem:[%s6549_s0 + $0x16] sm:$0x3] }
0x17e0   :  { %v2356_v40 = vpop.permute.xlu1 %2355 }
0x17e1   :  { %v2358_v41 = vadd.f32 %v2356_v40, %v2348_v18 }
0x17e3   :  { %5551 = vtanh.f32 %v2358_v41 }
0x17ed   :  { %v5552_v43 = vpop.eup %5551 }
0x17ee   :  { %2361 = vrot.lane.b32.xlu0 %v5552_v43, %s5639_s11 }
0x1860   :  { %v2362_v49 = vpop.permute.xlu0 %2361 }
0x1861   :  { %v6170_v50 = vmul.f32 %v5550_v37, %v2362_v49 }
0x1863   :  { %2366 = vrot.lane.b32.xlu1 %v6170_v50, %s5640_s12 }
0x18d5   :  { %v2367_v56 = vpop.permute.xlu1 %2366 }
0x18d6   :  { %4266 = vst.msk [vmem:[%s6554_s5 + $0x10] sm:$0x3] %vm299_vm2, %v2367_v56  ;;  %4962 = vmatmul.mubr.msk.f32.vlgmr.msra.gmra.mrb[28].mxu1 %vm189_vm3, %v2367_v56 }
0x18d7   :  { %5374 = vmatpush3.bf16.msra.mxu1 %v5705_v8  ;;  %4987 = vmatprep.mubr.msk.f32.mxu1 %vm5637_vm0, %v5638_v11 }
0x18d8   :  { %5375 = vmatprep.subr.bf16.mxu1 %v5636_v3 }
0x18db   :  { %5377 = vmatpush3.bf16.msra.mxu1 %v5722_v13 }
0x18dc   :  { %4985 = vmatprep.subr.mxu1 %v5638_v11 }
0x18df   :  { %4986 = vmatpush3.msra.mxu1 %v6188_v57 }
0x18e0   :  { %5384 = vmatprep.subr.bf16.mxu1 %v5636_v3  ;;  %4988 = vmatmul.mubr.msk.f32.vlgmr.msra.gmra.mrb[30].mxu1 %vm42_vm1, %v4276_v24 }
0x18e1   :  { %5386 = vmatpush3.bf16.msra.mxu1 %v5693_v4  ;;  %5011 = vmatprep.mubr.msk.f32.mxu1 %vm5637_vm0, %v5638_v11 }
0x18e2   :  { %5387 = vmatprep.subr.bf16.mxu1 %v5636_v3 }
0x18e5   :  { %5389 = vmatpush3.bf16.msra.mxu1 %v5718_v12 }
0x18e6   :  { %5009 = vmatprep.subr.mxu1 %v5638_v11 }
0x18e9   :  { %5010 = vmatpush3.msra.mxu1 %v6166_v46 }
0x18ea   :  { %5396 = vmatprep.subr.bf16.mxu1 %v5636_v3  ;;  %5012 = vmatmul.mubr.msk.f32.vlgmr.msra.gmra.mrb[32].mxu1 %vm42_vm1, %v4285_v52 }
0x18eb   :  { %5398 = vmatpush3.bf16.msra.mxu1 %v5751_v20  ;;  %5035 = vmatprep.mubr.msk.f32.mxu1 %vm5637_vm0, %v5638_v11 }
0x18ec   :  { %5399 = vmatprep.subr.bf16.mxu1 %v5636_v3 }
0x18ef   :  { %5401 = vmatpush3.bf16.msra.mxu1 %v5765_v23 }
0x18f0   :  { %5408 = vmatprep.subr.bf16.mxu1 %v5636_v3 }
0x19a9   :  { %v2592_v58 = vpop.f32.mrb[28].mxu1 }
0x19aa   :  { %v2596_v59 = vadd.f32 %v2592_v58, %v2521_v54  ;;  %v4963_v60 = vpop.f32.mrb[29].mxu1 }
0x19ac   :  { %v2597_v62 = vadd.f32 %v6195_v61, %v2596_v59 }
0x19ae   :  { %5553 = vtanh.f32 %v2597_v62  ;;  %v4273_v0 = vmul.f32 -1.442695, %v2597_v62 }
0x19b0   :  { %5555 = vpow2.f32 %v4273_v0 }
0x19b3   :  { %v2777_v16 = vpop.f32.mrb[30].mxu1 }
0x19b4   :  { %v2778_v31 = vadd.f32 %v2777_v16, %v2704_v28  ;;  %v4989_v32 = vpop.f32.mrb[31].mxu1 }
0x19b8   :  { %v5554_v63 = vpop.eup %5553 }
0x19b9   :  { %2607 = vrot.lane.b32.xlu0 %v5554_v63, %s5639_s11 }
0x19ba   :  { %v5556_v1 = vpop.eup %5555 }
0x19bb   :  { %v2601_v2 = vadd.f32 1.0, %v5556_v1 }
0x19bd   :  { %5557 = vrcp.f32 %v2601_v2  ;;  %v2961_v58 = vpop.f32.mrb[32].mxu1 }
0x19be   :  { %v5013_v60 = vpop.f32.mrb[33].mxu1 }
0x19c7   :  { %v5558_v5 = vpop.eup %5557 }
0x19c8   :  { %v2605_v9 = vmul.f32 %v5558_v5, %v2358_v41 }
0x1a2b   :  { %v2608_v6 = vpop.permute.xlu0 %2607 }
0x1a2c   :  { %v2610_v7 = vmul.f32 %v5558_v5, %v2608_v6 }
0x1a2e   :  { %2612 = vrot.lane.b32.xlu1 %v2610_v7, %s5640_s12 }
0x1aa0   :  { %v2613_v17 = vpop.permute.xlu1 %2612 }
0x1aa1   :  { %v2615_v19 = vadd.f32 %v2613_v17, %v2605_v9 }
0x1aa3   :  { %5559 = vtanh.f32 %v2615_v19 }
0x1aad   :  { %v5560_v25 = vpop.eup %5559 }
0x1aae   :  { %2618 = vrot.lane.b32.xlu0 %v5560_v25, %s5639_s11 }
0x1b20   :  { %v2619_v26 = vpop.permute.xlu0 %2618 }
0x1b21   :  { %v6223_v27 = vmul.f32 %v5558_v5, %v2619_v26 }
0x1b23   :  { %2623 = vrot.lane.b32.xlu1 %v6223_v27, %s5640_s12 }
0x1b95   :  { %v2624_v33 = vpop.permute.xlu1 %2623 }
0x1b96   :  { %4274 = vst.msk [vmem:[%s6554_s5 + $0x12] sm:$0x3] %vm299_vm2, %v2624_v33  ;;  %4999 = vmatmul.mubr.msk.f32.vlgmr.msra.gmra.mrb[32].mxu0 %vm189_vm3, %v2624_v33 }
0x1b97   :  { %5392 = vmatpush3.bf16.msra.mxu0 %v5705_v8  ;;  %5024 = vmatprep.mubr.msk.f32.mxu0 %vm5637_vm0, %v5638_v11 }
0x1b98   :  { %5393 = vmatprep.subr.bf16.mxu0 %v5636_v3 }
0x1b9b   :  { %5395 = vmatpush3.bf16.msra.mxu0 %v5722_v13 }
0x1b9c   :  { %5022 = vmatprep.subr.mxu0 %v5638_v11 }
0x1b9f   :  { %5023 = vmatpush3.msra.mxu0 %v6188_v57 }
0x1ba0   :  { %5402 = vmatprep.subr.bf16.mxu0 %v5636_v3  ;;  %5025 = vmatmul.mubr.msk.f32.vlgmr.msra.gmra.mrb[34].mxu0 %vm42_vm1, %v4284_v53 }
0x1ba1   :  { %5404 = vmatpush3.bf16.msra.mxu0 %v5693_v4  ;;  %5048 = vmatprep.mubr.msk.f32.mxu0 %vm5637_vm0, %v5638_v11 }
0x1ba2   :  { %5405 = vmatprep.subr.bf16.mxu0 %v5636_v3 }
0x1ba5   :  { %5407 = vmatpush3.bf16.msra.mxu0 %v5718_v12 }
0x1ba6   :  { %5046 = vmatprep.subr.mxu0 %v5638_v11 }
0x1ba9   :  { %5047 = vmatpush3.msra.mxu0 %v6166_v46 }
0x1baa   :  { %5414 = vmatprep.subr.bf16.mxu0 %v5636_v3  ;;  %5049 = vmatmul.mubr.msk.f32.vlgmr.msra.gmra.mrb[36].mxu0 %vm42_vm1, %v4293_v30 }
0x1bab   :  { %5416 = vmatpush3.bf16.msra.mxu0 %v5751_v20  ;;  %5072 = vmatprep.mubr.msk.f32.mxu0 %vm5637_vm0, %v5638_v11 }
0x1bac   :  { %5417 = vmatprep.subr.bf16.mxu0 %v5636_v3 }
0x1baf   :  { %5419 = vmatpush3.bf16.msra.mxu0 %v5765_v23 }
0x1bb0   :  { %5426 = vmatprep.subr.bf16.mxu0 %v5636_v3 }
0x1c69   :  { %v2849_v34 = vpop.f32.mrb[32].mxu0 }
0x1c6a   :  { %v2853_v35 = vadd.f32 %v2849_v34, %v2778_v31  ;;  %v5000_v36 = vpop.f32.mrb[33].mxu0  ;;  %v4292_v31 = vld [vmem:[%s6549_s0 + $0x18] sm:$0x3] }
0x1c6c   :  { %v2854_v37 = vadd.f32 %v6195_v61, %v2853_v35 }
0x1c6e   :  { %5561 = vtanh.f32 %v2854_v37  ;;  %v4281_v39 = vmul.f32 -1.442695, %v2854_v37 }
0x1c70   :  { %5563 = vpow2.f32 %v4281_v39 }
0x1c73   :  { %v3034_v59 = vpop.f32.mrb[34].mxu0 }
0x1c74   :  { %v3035_v62 = vadd.f32 %v3034_v59, %v2961_v58  ;;  %v5026_v63 = vpop.f32.mrb[35].mxu0 }
0x1c75   :  { %v4300_v63 = vld [vmem:[%s6549_s0 + $0x1a] sm:$0x3] }
0x1c78   :  { %v5562_v38 = vpop.eup %5561 }
0x1c79   :  { %2864 = vrot.lane.b32.xlu0 %v5562_v38, %s5639_s11 }
0x1c7a   :  { %v5564_v18 = vpop.eup %5563 }
0x1c7b   :  { %v2858_v40 = vadd.f32 1.0, %v5564_v18 }
0x1c7d   :  { %5565 = vrcp.f32 %v2858_v40  ;;  %v3218_v35 = vpop.f32.mrb[36].mxu0 }
0x1c7e   :  { %v5050_v37 = vpop.f32.mrb[37].mxu0 }
0x1c87   :  { %v5566_v41 = vpop.eup %5565 }
0x1c88   :  { %v2862_v43 = vmul.f32 %v5566_v41, %v2615_v19 }
0x1ceb   :  { %v2865_v29 = vpop.permute.xlu0 %2864 }
0x1cec   :  { %v2867_v42 = vmul.f32 %v5566_v41, %v2865_v29 }
0x1cee   :  { %2869 = vrot.lane.b32.xlu1 %v2867_v42, %s5640_s12 }
0x1d60   :  { %v2870_v49 = vpop.permute.xlu1 %2869 }
0x1d61   :  { %v2872_v51 = vadd.f32 %v2870_v49, %v2862_v43 }
0x1d63   :  { %5567 = vtanh.f32 %v2872_v51 }
0x1d6d   :  { %v5568_v54 = vpop.eup %5567 }
0x1d6e   :  { %2875 = vrot.lane.b32.xlu0 %v5568_v54, %s5639_s11 }
0x1de0   :  { %v2876_v55 = vpop.permute.xlu0 %2875 }
0x1de1   :  { %v6266_v56 = vmul.f32 %v5566_v41, %v2876_v55 }
0x1de3   :  { %2880 = vrot.lane.b32.xlu1 %v6266_v56, %s5640_s12 }
0x1e55   :  { %v2881_v0 = vpop.permute.xlu1 %2880 }
0x1e56   :  { %4282 = vst.msk [vmem:[%s6554_s5 + $0x14] sm:$0x3] %vm299_vm2, %v2881_v0  ;;  %5036 = vmatmul.mubr.msk.f32.vlgmr.msra.gmra.mrb[34].mxu1 %vm189_vm3, %v2881_v0 }
0x1e57   :  { %5410 = vmatpush3.bf16.msra.mxu1 %v5705_v8  ;;  %5061 = vmatprep.mubr.msk.f32.mxu1 %vm5637_vm0, %v5638_v11 }
0x1e58   :  { %5411 = vmatprep.subr.bf16.mxu1 %v5636_v3 }
0x1e5b   :  { %5413 = vmatpush3.bf16.msra.mxu1 %v5722_v13 }
0x1e5c   :  { %5059 = vmatprep.subr.mxu1 %v5638_v11 }
0x1e5f   :  { %5060 = vmatpush3.msra.mxu1 %v6188_v57 }
0x1e60   :  { %5420 = vmatprep.subr.bf16.mxu1 %v5636_v3  ;;  %5062 = vmatmul.mubr.msk.f32.vlgmr.msra.gmra.mrb[36].mxu1 %vm42_vm1, %v4292_v31 }
0x1e61   :  { %5422 = vmatpush3.bf16.msra.mxu1 %v5693_v4  ;;  %5085 = vmatprep.mubr.msk.f32.mxu1 %vm5637_vm0, %v5638_v11 }
0x1e62   :  { %5423 = vmatprep.subr.bf16.mxu1 %v5636_v3 }
0x1e65   :  { %5425 = vmatpush3.bf16.msra.mxu1 %v5718_v12 }
0x1e66   :  { %5083 = vmatprep.subr.mxu1 %v5638_v11 }
0x1e69   :  { %5084 = vmatpush3.msra.mxu1 %v6166_v46 }
0x1e6a   :  { %5432 = vmatprep.subr.bf16.mxu1 %v5636_v3 }
0x1f29   :  { %v3106_v1 = vpop.f32.mrb[34].mxu1 }
0x1f2a   :  { %v3110_v2 = vadd.f32 %v3106_v1, %v3035_v62  ;;  %v5037_v5 = vpop.f32.mrb[35].mxu1  ;;  %v4301_v62 = vld [vmem:[%s6549_s0 + $0x4] sm:$0x3] }
0x1f2b   :  { %5086 = vmatmul.mubr.msk.f32.vlgmr.msra.gmra.mrb[38].mxu1 %vm42_vm1, %v4301_v62 }
0x1f2c   :  { %v3111_v6 = vadd.f32 %v6195_v61, %v3110_v2  ;;  %5434 = vmatpush3.bf16.msra.mxu1 %v5751_v20  ;;  %5109 = vmatprep.mubr.msk.f32.mxu1 %vm5637_vm0, %v5638_v11 }
0x1f2d   :  { %5435 = vmatprep.subr.bf16.mxu1 %v5636_v3 }
0x1f2e   :  { %5569 = vtanh.f32 %v3111_v6  ;;  %v4289_v9 = vmul.f32 -1.442695, %v3111_v6 }
0x1f30   :  { %5571 = vpow2.f32 %v4289_v9  ;;  %5437 = vmatpush3.bf16.msra.mxu1 %v5765_v23 }
0x1f31   :  { %5444 = vmatprep.subr.bf16.mxu1 %v5636_v3 }
0x1f33   :  { %v3291_v36 = vpop.f32.mrb[36].mxu1 }
0x1f34   :  { %v3292_v38 = vadd.f32 %v3291_v36, %v3218_v35  ;;  %v5063_v39 = vpop.f32.mrb[37].mxu1 }
0x1f35   :  { %v4309_v39 = vld [vmem:[%s6549_s0 + $0x2] sm:$0x3] }
0x1f38   :  { %v5570_v7 = vpop.eup %5569 }
0x1f39   :  { %3121 = vrot.lane.b32.xlu0 %v5570_v7, %s5639_s11 }
0x1f3a   :  { %v5572_v17 = vpop.eup %5571 }
0x1f3b   :  { %v3115_v19 = vadd.f32 1.0, %v5572_v17 }
0x1f3d   :  { %5573 = vrcp.f32 %v3115_v19 }
0x1f47   :  { %v5574_v22 = vpop.eup %5573 }
0x1f48   :  { %v3119_v26 = vmul.f32 %v5574_v22, %v2872_v51 }
0x1fab   :  { %v3122_v24 = vpop.permute.xlu0 %3121 }
0x1fac   :  { %v3124_v25 = vmul.f32 %v5574_v22, %v3122_v24 }
0x1fae   :  { %3126 = vrot.lane.b32.xlu1 %v3124_v25, %s5640_s12 }
0x1ffe   :  { %v3475_v5 = vpop.f32.mrb[38].mxu1 }
0x1fff   :  { %v5087_v7 = vpop.f32.mrb[39].mxu1 }
0x2020   :  { %v3127_v28 = vpop.permute.xlu1 %3126 }
0x2021   :  { %v3129_v16 = vadd.f32 %v3127_v28, %v3119_v26 }
0x2023   :  { %5575 = vtanh.f32 %v3129_v16 }
0x202d   :  { %v5576_v32 = vpop.eup %5575 }
0x202e   :  { %3132 = vrot.lane.b32.xlu0 %v5576_v32, %s5639_s11 }
0x20a0   :  { %v3133_v33 = vpop.permute.xlu0 %3132 }
0x20a1   :  { %v6309_v34 = vmul.f32 %v5574_v22, %v3133_v33 }
0x20a3   :  { %3137 = vrot.lane.b32.xlu1 %v6309_v34, %s5640_s12 }
0x2115   :  { %v3138_v18 = vpop.permute.xlu1 %3137 }
0x2116   :  { %4290 = vst.msk [vmem:[%s6554_s5 + $0x16] sm:$0x3] %vm299_vm2, %v3138_v18  ;;  %5073 = vmatmul.mubr.msk.f32.vlgmr.msra.gmra.mrb[38].mxu0 %vm189_vm3, %v3138_v18  ;;  %v4308_v18 = vld [vmem:[%s6549_s0 + $0x1c] sm:$0x3] }
0x2117   :  { %5428 = vmatpush3.bf16.msra.mxu0 %v5705_v8  ;;  %5098 = vmatprep.mubr.msk.f32.mxu0 %vm5637_vm0, %v5638_v11 }
0x2118   :  { %5429 = vmatprep.subr.bf16.mxu0 %v5636_v3 }
0x211b   :  { %5431 = vmatpush3.bf16.msra.mxu0 %v5722_v13 }
0x211c   :  { %5096 = vmatprep.subr.mxu0 %v5638_v11 }
0x211f   :  { %5097 = vmatpush3.msra.mxu0 %v6188_v57 }
0x2120   :  { %5438 = vmatprep.subr.bf16.mxu0 %v5636_v3  ;;  %5099 = vmatmul.mubr.msk.f32.vlgmr.msra.gmra.mrb[40].mxu0 %vm42_vm1, %v4300_v63 }
0x2121   :  { %5440 = vmatpush3.bf16.msra.mxu0 %v5693_v4  ;;  %5122 = vmatprep.mubr.msk.f32.mxu0 %vm5637_vm0, %v5638_v11 }
0x2122   :  { %5441 = vmatprep.subr.bf16.mxu0 %v5636_v3 }
0x2125   :  { %5443 = vmatpush3.bf16.msra.mxu0 %v5718_v12 }
0x2126   :  { %5120 = vmatprep.subr.mxu0 %v5638_v11 }
0x2129   :  { %5121 = vmatpush3.msra.mxu0 %v6166_v46 }
0x212a   :  { %5450 = vmatprep.subr.bf16.mxu0 %v5636_v3  ;;  %5123 = vmatmul.mubr.msk.f32.vlgmr.msra.gmra.mrb[42].mxu0 %vm42_vm1, %v4309_v39 }
0x212b   :  { %5452 = vmatpush3.bf16.msra.mxu0 %v5751_v20  ;;  %5146 = vmatprep.mubr.msk.f32.mxu0 %vm5637_vm0, %v5638_v11 }
0x212c   :  { %5453 = vmatprep.subr.bf16.mxu0 %v5636_v3 }
0x212f   :  { %5455 = vmatpush3.bf16.msra.mxu0 %v5765_v23 }
0x2130   :  { %5462 = vmatprep.subr.bf16.mxu0 %v5636_v3 }
0x21e9   :  { %v3363_v40 = vpop.f32.mrb[38].mxu0 }
0x21ea   :  { %v3367_v41 = vadd.f32 %v3363_v40, %v3292_v38  ;;  %v5074_v29 = vpop.f32.mrb[39].mxu0 }
0x21ec   :  { %v3368_v42 = vadd.f32 %v6195_v61, %v3367_v41 }
0x21ee   :  { %5577 = vtanh.f32 %v3368_v42  ;;  %v4297_v49 = vmul.f32 -1.442695, %v3368_v42 }
0x21f0   :  { %5579 = vpow2.f32 %v4297_v49 }
0x21f3   :  { %v3548_v6 = vpop.f32.mrb[40].mxu0 }
0x21f4   :  { %v3549_v9 = vadd.f32 %v3548_v6, %v3475_v5  ;;  %v5100_v17 = vpop.f32.mrb[41].mxu0  ;;  %v4316_v5 = vld [vmem:[%s6549_s0 + $0x1e] sm:$0x3] }
0x21f8   :  { %v5578_v43 = vpop.eup %5577 }
0x21f9   :  { %3378 = vrot.lane.b32.xlu0 %v5578_v43, %s5639_s11 }
0x21fa   :  { %v5580_v51 = vpop.eup %5579 }
0x21fb   :  { %v3372_v52 = vadd.f32 1.0, %v5580_v51 }
0x21fd   :  { %5581 = vrcp.f32 %v3372_v52  ;;  %v3732_v29 = vpop.f32.mrb[42].mxu0 }
0x21fe   :  { %v5124_v43 = vpop.f32.mrb[43].mxu0 }
0x2207   :  { %v5582_v53 = vpop.eup %5581 }
0x2208   :  { %v3376_v58 = vmul.f32 %v5582_v53, %v3129_v16 }
0x226b   :  { %v3379_v54 = vpop.permute.xlu0 %3378 }
0x226c   :  { %v3381_v55 = vmul.f32 %v5582_v53, %v3379_v54 }
0x226e   :  { %3383 = vrot.lane.b32.xlu1 %v3381_v55, %s5640_s12 }
0x22e0   :  { %v3384_v59 = vpop.permute.xlu1 %3383 }
0x22e1   :  { %v3386_v60 = vadd.f32 %v3384_v59, %v3376_v58 }
0x22e3   :  { %5583 = vtanh.f32 %v3386_v60 }
0x22ed   :  { %v5584_v0 = vpop.eup %5583 }
0x22ee   :  { %3389 = vrot.lane.b32.xlu0 %v5584_v0, %s5639_s11 }
0x2360   :  { %v3390_v1 = vpop.permute.xlu0 %3389 }
0x2361   :  { %v6352_v2 = vmul.f32 %v5582_v53, %v3390_v1  ;;  %v3919_v1 = vld [vmem:[%s6549_s0] sm:$0x3] }
0x2363   :  { %3394 = vrot.lane.b32.xlu1 %v6352_v2, %s5640_s12 }
0x23d5   :  { %v3395_v19 = vpop.permute.xlu1 %3394 }
0x23d6   :  { %4298 = vst.msk [vmem:[%s6554_s5 + $0x18] sm:$0x3] %vm299_vm2, %v3395_v19  ;;  %5110 = vmatmul.mubr.msk.f32.vlgmr.msra.gmra.mrb[40].mxu1 %vm189_vm3, %v3395_v19 }
0x23d7   :  { %5446 = vmatpush3.bf16.msra.mxu1 %v5705_v8  ;;  %5135 = vmatprep.mubr.msk.f32.mxu1 %vm5637_vm0, %v5638_v11 }
0x23d8   :  { %5447 = vmatprep.subr.bf16.mxu1 %v5636_v3 }
0x23db   :  { %5449 = vmatpush3.bf16.msra.mxu1 %v5722_v13 }
0x23dc   :  { %5133 = vmatprep.subr.mxu1 %v5638_v11 }
0x23df   :  { %5134 = vmatpush3.msra.mxu1 %v6188_v57 }
0x23e0   :  { %5456 = vmatprep.subr.bf16.mxu1 %v5636_v3  ;;  %5136 = vmatmul.mubr.msk.f32.vlgmr.msra.gmra.mrb[42].mxu1 %vm42_vm1, %v4308_v18 }
0x23e1   :  { %5458 = vmatpush3.bf16.msra.mxu1 %v5693_v4  ;;  %5159 = vmatprep.mubr.msk.f32.mxu1 %vm5637_vm0, %v5638_v11 }
0x23e2   :  { %5459 = vmatprep.subr.bf16.mxu1 %v5636_v3 }
0x23e5   :  { %5461 = vmatpush3.bf16.msra.mxu1 %v5718_v12 }
0x23e6   :  { %5157 = vmatprep.subr.mxu1 %v5638_v11 }
0x23e9   :  { %5158 = vmatpush3.msra.mxu1 %v6166_v46 }
0x23ea   :  { %5468 = vmatprep.subr.bf16.mxu1 %v5636_v3  ;;  %5160 = vmatmul.mubr.msk.f32.vlgmr.msra.gmra.mrb[44].mxu1 %vm42_vm1, %v3919_v1 }
0x23eb   :  { %5470 = vmatpush3.bf16.msra.mxu1 %v5751_v20  ;;  %5183 = vmatprep.mubr.msk.f32.mxu1 %vm5637_vm0, %v5638_v11 }
0x23ec   :  { %5471 = vmatprep.subr.bf16.mxu1 %v5636_v3 }
0x23ef   :  { %5473 = vmatpush3.bf16.msra.mxu1 %v5765_v23 }
0x24a9   :  { %v3620_v22 = vpop.f32.mrb[40].mxu1 }
0x24aa   :  { %v3624_v24 = vadd.f32 %v3620_v22, %v3549_v9  ;;  %v5111_v25 = vpop.f32.mrb[41].mxu1 }
0x24ac   :  { %v3625_v26 = vadd.f32 %v6195_v61, %v3624_v24 }
0x24ae   :  { %5585 = vtanh.f32 %v3625_v26  ;;  %v4305_v16 = vmul.f32 -1.442695, %v3625_v26 }
0x24b0   :  { %5587 = vpow2.f32 %v4305_v16 }
0x24b3   :  { %v3805_v42 = vpop.f32.mrb[42].mxu1 }
0x24b4   :  { %v3806_v49 = vadd.f32 %v3805_v42, %v3732_v29  ;;  %v5137_v12 = vpop.f32.mrb[43].mxu1 }
0x24b8   :  { %v5586_v28 = vpop.eup %5585 }
0x24b9   :  { %3635 = vrot.lane.b32.xlu0 %v5586_v28, %s5639_s11 }
0x24ba   :  { %v5588_v30 = vpop.eup %5587 }
0x24bb   :  { %v3629_v31 = vadd.f32 1.0, %v5588_v30 }
0x24bd   :  { %5589 = vrcp.f32 %v3629_v31  ;;  %v3989_v17 = vpop.f32.mrb[44].mxu1 }
0x24be   :  { %v5161_v22 = vpop.f32.mrb[45].mxu1 }
0x24c7   :  { %v5590_v32 = vpop.eup %5589 }
0x24c8   :  { %v3633_v36 = vmul.f32 %v5590_v32, %v3386_v60 }
0x252b   :  { %v3636_v33 = vpop.permute.xlu0 %3635 }
0x252c   :  { %v3638_v35 = vmul.f32 %v5590_v32, %v3636_v33 }
0x252e   :  { %3640 = vrot.lane.b32.xlu1 %v3638_v35, %s5640_s12 }
0x25a0   :  { %v3641_v37 = vpop.permute.xlu1 %3640 }
0x25a1   :  { %v3643_v38 = vadd.f32 %v3641_v37, %v3633_v36 }
0x25a3   :  { %5591 = vtanh.f32 %v3643_v38 }
0x25ad   :  { %v5592_v40 = vpop.eup %5591 }
0x25ae   :  { %3646 = vrot.lane.b32.xlu0 %v5592_v40, %s5639_s11 }
0x2620   :  { %v3647_v4 = vpop.permute.xlu0 %3646 }
0x2621   :  { %v6395_v41 = vmul.f32 %v5590_v32, %v3647_v4 }
0x2623   :  { %3651 = vrot.lane.b32.xlu1 %v6395_v41, %s5640_s12 }
0x2695   :  { %v3652_v51 = vpop.permute.xlu1 %3651 }
0x2696   :  { %4306 = vst.msk [vmem:[%s6554_s5 + $0x1a] sm:$0x3] %vm299_vm2, %v3652_v51  ;;  %5147 = vmatmul.mubr.msk.f32.vlgmr.msra.gmra.mrb[44].mxu0 %vm189_vm3, %v3652_v51 }
0x2697   :  { %5464 = vmatpush3.bf16.msra.mxu0 %v5705_v8  ;;  %5172 = vmatprep.mubr.msk.f32.mxu0 %vm5637_vm0, %v5638_v11 }
0x2698   :  { %5465 = vmatprep.subr.bf16.mxu0 %v5636_v3 }
0x269b   :  { %5467 = vmatpush3.bf16.msra.mxu0 %v5722_v13 }
0x269c   :  { %5170 = vmatprep.subr.mxu0 %v5638_v11 }
0x269f   :  { %5171 = vmatpush3.msra.mxu0 %v6188_v57 }
0x26a0   :  { %5173 = vmatmul.mubr.msk.f32.vlgmr.msra.gmra.mrb[46].mxu0 %vm42_vm1, %v4316_v5 }
0x2769   :  { %v3877_v46 = vpop.f32.mrb[44].mxu0 }
0x276a   :  { %v3881_v52 = vadd.f32 %v3877_v46, %v3806_v49  ;;  %v5148_v53 = vpop.f32.mrb[45].mxu0 }
0x276c   :  { %v3882_v54 = vadd.f32 %v6195_v61, %v3881_v52 }
0x276e   :  { %5593 = vtanh.f32 %v3882_v54  ;;  %v4313_v8 = vmul.f32 -1.442695, %v3882_v54 }
0x2770   :  { %5595 = vpow2.f32 %v4313_v8 }
0x2773   :  { %v4062_v19 = vpop.f32.mrb[46].mxu0 }
0x2774   :  { %v4063_v24 = vadd.f32 %v4062_v19, %v3989_v17  ;;  %v5174_v25 = vpop.f32.mrb[47].mxu0 }
0x2778   :  { %v5594_v55 = vpop.eup %5593 }
0x2779   :  { %3892 = vrot.lane.b32.xlu0 %v5594_v55, %s5639_s11 }
0x277a   :  { %v5596_v58 = vpop.eup %5595 }
0x277b   :  { %v3886_v59 = vadd.f32 1.0, %v5596_v58 }
0x277d   :  { %5597 = vrcp.f32 %v3886_v59 }
0x2787   :  { %v5598_v60 = vpop.eup %5597 }
0x2788   :  { %v3890_v57 = vmul.f32 %v5598_v60, %v3643_v38 }
0x27eb   :  { %v3893_v13 = vpop.permute.xlu0 %3892 }
0x27ec   :  { %v3895_v62 = vmul.f32 %v5598_v60, %v3893_v13 }
0x27ee   :  { %3897 = vrot.lane.b32.xlu1 %v3895_v62, %s5640_s12 }
0x2860   :  { %v3898_v63 = vpop.permute.xlu1 %3897 }
0x2861   :  { %v3900_v0 = vadd.f32 %v3898_v63, %v3890_v57 }
0x2863   :  { %5599 = vtanh.f32 %v3900_v0 }
0x286d   :  { %v5600_v6 = vpop.eup %5599 }
0x286e   :  { %3903 = vrot.lane.b32.xlu0 %v5600_v6, %s5639_s11 }
0x28e0   :  { %v3904_v7 = vpop.permute.xlu0 %3903 }
0x28e1   :  { %v3906_v9 = vmul.f32 %v5598_v60, %v3904_v7 }
0x28e3   :  { %3908 = vrot.lane.b32.xlu1 %v3906_v9, %s5640_s12 }
0x2955   :  { %v3909_v20 = vpop.permute.xlu1 %3908 }
0x2956   :  { %4314 = vst.msk [vmem:[%s6554_s5 + $0x1c] sm:$0x3] %vm299_vm2, %v3909_v20  ;;  %5184 = vmatmul.mubr.msk.f32.vlgmr.msra.gmra.mrb[46].mxu1 %vm189_vm3, %v3909_v20 }
0x2a29   :  { %v4134_v3 = vpop.f32.mrb[46].mxu1 }
0x2a2a   :  { %v4138_v11 = vadd.f32 %v4134_v3, %v4063_v24  ;;  %v5185_v23 = vpop.f32.mrb[47].mxu1 }
0x2a2c   :  { %v4139_v26 = vadd.f32 %v6195_v61, %v4138_v11 }
0x2a2e   :  { %5601 = vtanh.f32 %v4139_v26  ;;  %v4320_v16 = vmul.f32 -1.442695, %v4139_v26 }
0x2a30   :  { %5603 = vpow2.f32 %v4320_v16 }
0x2a38   :  { %v5602_v28 = vpop.eup %5601 }
0x2a39   :  { %4149 = vrot.lane.b32.xlu0 %v5602_v28, %s5639_s11 }
0x2a3a   :  { %v5604_v30 = vpop.eup %5603 }
0x2a3b   :  { %v4143_v31 = vadd.f32 1.0, %v5604_v30 }
0x2a3d   :  { %5605 = vrcp.f32 %v4143_v31 }
0x2a47   :  { %v5606_v32 = vpop.eup %5605 }
0x2a48   :  { %v4147_v61 = vmul.f32 %v5606_v32, %v3900_v0 }
0x2aab   :  { %v4150_v33 = vpop.permute.xlu0 %4149 }
0x2aac   :  { %v4152_v35 = vmul.f32 %v5606_v32, %v4150_v33 }
0x2aae   :  { %4154 = vrot.lane.b32.xlu1 %v4152_v35, %s5640_s12 }
0x2ab2   :  { %560 = vrot.lane.b32.xlu1 %v5864_v15, %s5641_s14 }
0x2ab6   :  { %1078 = vrot.lane.b32.xlu1 %v5950_v10, %s5641_s14 }
0x2aba   :  { %1596 = vrot.lane.b32.xlu1 %v6036_v14, %s5641_s14 }
0x2abe   :  { %2114 = vrot.lane.b32.xlu1 %v6122_v21, %s5641_s14 }
0x2ac2   :  { %2628 = vrot.lane.b32.xlu1 %v6223_v27, %s5641_s14 }
0x2ac6   :  { %3142 = vrot.lane.b32.xlu1 %v6309_v34, %s5641_s14 }
0x2aca   :  { %3656 = vrot.lane.b32.xlu1 %v6395_v41, %s5641_s14 }
0x2b20   :  { %v4155_v15 = vpop.permute.xlu1 %4154 }
0x2b21   :  { %v4157_v36 = vadd.f32 %v4155_v15, %v4147_v61 }
0x2b23   :  { %5607 = vtanh.f32 %v4157_v36 }
0x2b24   :  { %v561_v10 = vpop.permute.xlu1 %560 }
0x2b25   :  { %4211 = vst.msk [vmem:[%s6555_s6 + $0x1c] sm:$0x3] %vm299_vm2, %v561_v10 }
0x2b28   :  { %v1079_v14 = vpop.permute.xlu1 %1078 }
0x2b29   :  { %4227 = vst.msk [vmem:[%s6555_s6 + $0x18] sm:$0x3] %vm299_vm2, %v1079_v14 }
0x2b2c   :  { %v1597_v21 = vpop.permute.xlu1 %1596 }
0x2b2d   :  { %v5608_v27 = vpop.eup %5607  ;;  %4243 = vst.msk [vmem:[%s6555_s6 + $0x14] sm:$0x3] %vm299_vm2, %v1597_v21 }
0x2b2e   :  { %4160 = vrot.lane.b32.xlu0 %v5608_v27, %s5639_s11 }
0x2b30   :  { %v2115_v34 = vpop.permute.xlu1 %2114 }
0x2b31   :  { %4259 = vst.msk [vmem:[%s6555_s6 + $0x10] sm:$0x3] %vm299_vm2, %v2115_v34 }
0x2b32   :  { %301 = vrot.lane.b32.xlu0 %v5821_v48, %s5641_s14 }
0x2b34   :  { %v2629_v37 = vpop.permute.xlu1 %2628 }
0x2b35   :  { %4275 = vst.msk [vmem:[%s6555_s6 + $0xc] sm:$0x3] %vm299_vm2, %v2629_v37 }
0x2b36   :  { %819 = vrot.lane.b32.xlu0 %v5907_v45, %s5641_s14 }
0x2b38   :  { %v3143_v38 = vpop.permute.xlu1 %3142 }
0x2b39   :  { %4291 = vst.msk [vmem:[%s6555_s6 + $0x8] sm:$0x3] %vm299_vm2, %v3143_v38 }
0x2b3a   :  { %1337 = vrot.lane.b32.xlu0 %v5993_v44, %s5641_s14 }
0x2b3c   :  { %v3657_v39 = vpop.permute.xlu1 %3656 }
0x2b3d   :  { %4307 = vst.msk [vmem:[%s6555_s6 + $0x4] sm:$0x3] %vm299_vm2, %v3657_v39 }
0x2b3e   :  { %1855 = vrot.lane.b32.xlu0 %v6079_v47, %s5641_s14 }
0x2b42   :  { %2371 = vrot.lane.b32.xlu0 %v6170_v50, %s5641_s14 }
0x2b46   :  { %2885 = vrot.lane.b32.xlu0 %v6266_v56, %s5641_s14 }
0x2b4a   :  { %3399 = vrot.lane.b32.xlu0 %v6352_v2, %s5641_s14 }
0x2b4e   :  { %3913 = vrot.lane.b32.xlu0 %v3906_v9, %s5641_s14 }
0x2ba0   :  { %v4161_v48 = vpop.permute.xlu0 %4160 }
0x2ba1   :  { %v4163_v45 = vmul.f32 %v5606_v32, %v4161_v48 }
0x2ba3   :  { %4165 = vrot.lane.b32.xlu1 %v4163_v45, %s5640_s12 }
0x2ba4   :  { %v302_v44 = vpop.permute.xlu0 %301 }
0x2ba5   :  { %4203 = vst.msk [vmem:[%s6555_s6 + $0x1e] sm:$0x3] %vm299_vm2, %v302_v44 }
0x2ba7   :  { %4170 = vrot.lane.b32.xlu1 %v4163_v45, %s5641_s14 }
0x2ba8   :  { %v820_v47 = vpop.permute.xlu0 %819 }
0x2ba9   :  { %4219 = vst.msk [vmem:[%s6555_s6 + $0x1a] sm:$0x3] %vm299_vm2, %v820_v47 }
0x2bac   :  { %v1338_v50 = vpop.permute.xlu0 %1337 }
0x2bad   :  { %4235 = vst.msk [vmem:[%s6555_s6 + $0x16] sm:$0x3] %vm299_vm2, %v1338_v50 }
0x2bb0   :  { %v1856_v56 = vpop.permute.xlu0 %1855 }
0x2bb1   :  { %4251 = vst.msk [vmem:[%s6555_s6 + $0x12] sm:$0x3] %vm299_vm2, %v1856_v56 }
0x2bb4   :  { %v2372_v2 = vpop.permute.xlu0 %2371 }
0x2bb5   :  { %4267 = vst.msk [vmem:[%s6555_s6 + $0xe] sm:$0x3] %vm299_vm2, %v2372_v2 }
0x2bb8   :  { %v2886_v18 = vpop.permute.xlu0 %2885 }
0x2bb9   :  { %4283 = vst.msk [vmem:[%s6555_s6 + $0xa] sm:$0x3] %vm299_vm2, %v2886_v18 }
0x2bbc   :  { %v3400_v40 = vpop.permute.xlu0 %3399 }
0x2bbd   :  { %4299 = vst.msk [vmem:[%s6555_s6 + $0x6] sm:$0x3] %vm299_vm2, %v3400_v40 }
0x2bc0   :  { %v3914_v4 = vpop.permute.xlu0 %3913 }
0x2bc1   :  { %4315 = vst.msk [vmem:[%s6555_s6 + $0x2] sm:$0x3] %vm299_vm2, %v3914_v4 }
0x2c15   :  { %v4166_v41 = vpop.permute.xlu1 %4165 }
0x2c16   :  { %4321 = vst.msk [vmem:[%s6554_s5 + $0x1e] sm:$0x3] %vm299_vm2, %v4166_v41 }
0x2c17   :  { %4175 = vst.msk [vmem:[#allocation2] sm:$0x3] %vm4174_vm4, %v4166_v41 }
0x2c18   :  { %5623 = shalt.err (!%p5620_p4)
}
0x2c19   :  { %s5624_s2 = scalar_lea.hbm %s6556_s7, 32 }
0x2c1a   :  { %p5625_p5 = scmp.ne.s32.totalorder %s6556_s7, %s5624_s2  ;;  %p5628_p6 = scmp.lt.u32.totalorder %s5624_s2, %s6556_s7 }
0x2c1c   :  { %p5630_p7 = pnand %p5628_p6, %p5625_p5 }
0x2c1e   :  { %5633 = shalt.err (!%p5630_p7)
}
0x2c1f   :  { %4189 = dma.vmem_to_hbm [thread:$0]  %s4187_s18, 32, %s6556_s7, [#allocation3]   ;;  %v4171_v29 = vpop.permute.xlu1 %4170 }
0x2c20   :  { %4173 = vst.msk [vmem:[%s6555_s6] sm:$0x3] %vm299_vm2, %v4171_v29 }
0x2c21   :  { %5634 = dma.done.wait [#allocation3], 32  }
0x2c22   :  { %5635 = vsyncadd [#allocation3], 4294967264 }
0x2c23   :  { %4197 = vsyncpa [#allocation3], 1 }

// kernel: seq2seq_forward.11
= control target key start
LH: loop header
LB: loop body
LE: loop exit
PB: predicated region body
PF: predicated region fallthrough
CT: control target
= control target key end

     0   :  { %v1473_v0 = vlaneseq  ;;  %v1004_v18 = vmov 0.0   ;;  %v1275_v42 = vmov 0.0   ;;  %v1277_v43 = vmov 0.0   ;;  %s1459_s0 = inlined_call_operand.vmem [shape: f32[2,2,32], index: 0, kind: input, shape index: {}]   ;;  %s1460_s1 = inlined_call_operand.vmem [shape: f32[2,2,32], index: 1, kind: input, shape index: {}]   ;;  %s1461_s2 = inlined_call_operand.vmem [shape: f32[2,2], index: 2, kind: input, shape index: {}]   ;;  %s1462_s4 = inlined_call_operand.vmem [shape: f32[32,32], index: 4, kind: input, shape index: {}]   ;;  %s1463_s11 = inlined_call_operand.vmem [shape: f32[251,2,32], index: 11, kind: input, shape index: {}]   ;;  %s1464_s12 = inlined_call_operand.vmem [shape: f32[251,2,32], index: 12, kind: output, shape index: {0}]   ;;  %s1465_s13 = inlined_call_operand.vmem [shape: f32[251,2,2], index: 13, kind: output, shape index: {1}]   ;;  %s1466_s5 = inlined_call_operand.vmem [shape: f32[32,32], index: 5, kind: input, shape index: {}]   ;;  %s1467_s6 = inlined_call_operand.vmem [shape: f32[96,128], index: 6, kind: input, shape index: {}]   ;;  %s1468_s7 = inlined_call_operand.vmem [shape: f32[1,128], index: 7, kind: input, shape index: {}]   ;;  %s1469_s8 = inlined_call_operand.vmem [shape: f32[64,128], index: 8, kind: input, shape index: {}]   ;;  %s1470_s9 = inlined_call_operand.vmem [shape: f32[1,128], index: 9, kind: input, shape index: {}]   ;;  %s1471_s10 = inlined_call_operand.vmem [shape: f32[1,32], index: 10, kind: input, shape index: {}]   ;;  %s1472_s3 = inlined_call_operand.vmem [shape: f32[2,32], index: 3, kind: input, shape index: {}]  }
   0x1   :  { %v1086_v1 = vld [vmem:[%s1459_s0] sm:$0x3]  ;;  %v1091_v2 = vld [vmem:[%s1459_s0 + $0x2] sm:$0x3]  ;;  %v1119_v8 = vld [vmem:[%s1462_s4 + $0x8] sm:$0xff]  ;;  %v1279_v44 = vmov 0.0  }
   0x2   :  { %v1096_v3 = vld [vmem:[%s1460_s1] sm:$0x3]  ;;  %v1101_v4 = vld [vmem:[%s1460_s1 + $0x2] sm:$0x3]  ;;  %v1114_v7 = vand.u32 127, %v1473_v0  ;;  %v1124_v9 = vld [vmem:[%s1462_s4 + $0x10] sm:$0xff] }
   0x3   :  { %v1106_v5 = vld [vmem:[%s1461_s2] sm:$0x3]  ;;  %v1129_v10 = vld [vmem:[%s1462_s4 + $0x18] sm:$0xff]  ;;  %v1139_v12 = vld [vmem:[%s1466_s5 + $0x8] sm:$0xff]  ;;  %v1281_v45 = vmov 0.0  }
   0x4   :  { %v1111_v6 = vld [vmem:[%s1462_s4] sm:$0xff]  ;;  %v1144_v13 = vld [vmem:[%s1466_s5 + $0x10] sm:$0xff]  ;;  %v81_v14 = vcvt.s32.f32 %v1114_v7  ;;  %vm82_vm0 = vcmp.eq.s32.totalorder %v1114_v7, 0  ;;  %v1151_v15 = vld [vmem:[%s1466_s5 + $0x18] sm:$0xff] }
   0x5   :  { %v1134_v11 = vld [vmem:[%s1466_s5] sm:$0xff]  ;;  %v1161_v17 = vld [vmem:[%s1467_s6 + $0x8] sm:$0xff]  ;;  %v705_v19 = vsel %vm82_vm0, 1.0, %v1004_v18   ;;  %v1166_v20 = vld [vmem:[%s1467_s6 + $0x10] sm:$0xff] }
   0x6   :  { %v1156_v16 = vld [vmem:[%s1467_s6] sm:$0xff]  ;;  %v1171_v21 = vld [vmem:[%s1467_s6 + $0x18] sm:$0xff]  ;;  %v1181_v23 = vld [vmem:[%s1467_s6 + $0x28] sm:$0xff] }
   0x7   :  { %v1176_v22 = vld [vmem:[%s1467_s6 + $0x20] sm:$0xff]  ;;  %v1186_v24 = vld [vmem:[%s1467_s6 + $0x30] sm:$0xff]  ;;  %v1191_v25 = vld [vmem:[%s1467_s6 + $0x38] sm:$0xff] }
   0x8   :  { %v1196_v26 = vld [vmem:[%s1467_s6 + $0x40] sm:$0xff]  ;;  %v1201_v27 = vld [vmem:[%s1467_s6 + $0x48] sm:$0xff]  ;;  %v1206_v28 = vld [vmem:[%s1467_s6 + $0x50] sm:$0xff] }
   0x9   :  { %v1211_v29 = vld [vmem:[%s1467_s6 + $0x58] sm:$0xff]  ;;  %v1216_v30 = vld [vmem:[%s1468_s7] ss:$0 sm:$0xff]  ;;  %v1226_v32 = vld [vmem:[%s1469_s8 + $0x8] sm:$0xff] }
   0xa   :  { %v1221_v31 = vld [vmem:[%s1469_s8] sm:$0xff]  ;;  %v1231_v33 = vld [vmem:[%s1469_s8 + $0x10] sm:$0xff]  ;;  %v1236_v34 = vld [vmem:[%s1469_s8 + $0x18] sm:$0xff] }
   0xb   :  { %v1241_v35 = vld [vmem:[%s1469_s8 + $0x20] sm:$0xff]  ;;  %v1246_v36 = vld [vmem:[%s1469_s8 + $0x28] sm:$0xff]  ;;  %v1251_v37 = vld [vmem:[%s1469_s8 + $0x30] sm:$0xff] }
   0xc   :  { %v1256_v38 = vld [vmem:[%s1469_s8 + $0x38] sm:$0xff]  ;;  %v1261_v39 = vld [vmem:[%s1470_s9] ss:$0 sm:$0xff]  ;;  %s1283_s8 = smov 0  }
   0xd   :  { %v1266_v40 = vld [vmem:[%s1471_s10] ss:$0 sm:$0xff] }
   0xe   :  { %v85_v41 = vld [vmem:[%s1472_s3] sm:$0x3]  }
   0xf LB: > { %v1005_v46 = vmov 1966171168   ;;  %v1474_v0 = vlaneseq  ;;  %vm133_vm1 = vcmask 254976   ;;  %vm150_vm2 = vcmask 1041409   ;;  %s1367_s3 = sshll.u32 %s1002_s8, 1  ;;  %s1010_s16 = smov 32   ;;  %s1002_s8 = sphi %s1283_s8, %s91_s8   ;;  %v998_v45 = vphi %v1281_v45, %v457_v45   ;;  %v994_v44 = vphi %v1279_v44, %v1391_v44   ;;  %v990_v43 = vphi %v1277_v43, %v569_v43   ;;  %v986_v42 = vphi %v1275_v42, %v563_v42   ;;  %v982_v41 = vphi %v85_v41, %v578_v41   ;;  %v978_v19 = vphi %v705_v19, %v716_v19  }
  0x10   : > { %v100_v47 = vunpack.c.l.s4 %v1005_v46  ;;  %vm153_vm3 = vcmask 9216   ;;  %vm1008_vm4 = vmmov 0   ;;  %vm267_vm5 = vcmask 261120   ;;  %s247_s15 = scalar_lea.vmem %s1465_s13, %s1367_s3  ;;  %s1011_s17 = smov 96  }
  0x11   : > { %v103_v48 = vshrl.u32 %v1474_v0, 7  ;;  %vm352_vm6 = vcmask 523264   ;;  %vm360_vm7 = vcmask 785408   ;;  %s1012_s18 = smov 64   ;;  %s653_s0 = scalar_lea.vmem %s1463_s11, %s1367_s3 }
  0x12   : > { %v101_v49 = vunpack.c.0.s8 %v100_v47  ;;  %s651_s1 = scalar_lea.vmem %s1464_s12, %s1367_s3  ;;  %s91_s8 = sadd.s32 1, %s1002_s8  }
  0x13   : > { %v1305_v52 = vsub.s32 0, %v103_v48  ;;  %v1313_v62 = vsub.s32 1, %v103_v48  ;;  %p88_p0 = scmp.ge.s32.totalorder %s91_s8, 251  }
  0x14   : > { %v104_v50 = vsub.s32 %v101_v49, %v103_v48 }
  0x15   : > { %v185_v63 = vrot.slane %v1106_v5, %v1313_v62 }
  0x16   : > { %v105_v51 = vrot.slane %v982_v41, %v104_v50  ;;  %v1318_v41 = vsub.s32 %v1114_v7, %v103_v48 }
  0x18   : > { %v113_v53 = vrot.slane %v105_v51, %v104_v50  ;;  %v106_v54 = vcombine.high %v105_v51, %v105_v51 }
  0x1a   : > { %v124_v55 = vrot.slane %v113_v53, %v1305_v52  ;;  %v120_v56 = vrot.slane %v106_v54, %v104_v50  ;;  %v178_v53 = vrot.slane %v1106_v5, %v1305_v52  ;;  %v1006_v54 = vmov 0  }
  0x1b   : > { %924 = vset.pattern.permute.xlu1 %v1006_v54  ;;  %925 = vset.pattern.permute.xlu0 %v1006_v54 }
  0x1c   : > { %v131_v57 = vmul.f32 %v124_v55, %v1086_v1  ;;  %v128_v58 = vrot.slane %v120_v56, %v1305_v52 }
  0x1e   : > { %v134_v59 = vsel %vm133_vm1, %v131_v57, 0.0  ;;  %v132_v60 = vmul.f32 %v128_v58, %v1091_v2 }
  0x1f   : > { %135 = vadd.xlane.f32.xlu0 %v134_v59 }
  0x20   : > { %v137_v61 = vsel %vm133_vm1, %v132_v60, 0.0 }
  0x23   : > { %138 = vadd.xlane.f32.xlu0 %v137_v61 }
  0x39   : > { %187 = vbcast.lane.b32.xlu0 %v185_v63, 256 }
  0xac   : > { %v136_v18 = vpop.xlane.xlu0 %135 }
  0xad   : > { %v145_v47 = vrot.slane %v136_v18, %v1318_v41 }
  0xb0   : > { %v139_v46 = vpop.xlane.xlu0 %138 }
  0xb1   : > { %v149_v49 = vrot.slane %v139_v46, %v1318_v41 }
  0xb3   : > { %v151_v50 = vsel %vm150_vm2, %v149_v49, %v145_v47 }
  0xb4   : > { %v154_v51 = vsel %vm153_vm3, %v151_v50, -inf  ;;  %v188_v50 = vpop.permute.xlu0 %187 }
  0xb5   : > { %155 = vmax.xlane.f32.xlu1 %v154_v51 }
  0xc6   : > { %180 = vbcast.lane.b32.xlu1 %v178_v53, 256 }
 0x142   : > { %v156_v48 = vpop.xlane.xlu1 %155 }
 0x143   : > { %v161_v55 = vrot.slane %v156_v48, %v1305_v52  ;;  %v165_v56 = vrot.slane %v156_v48, %v1313_v62 }
 0x145   : > { %v168_v57 = vsub.f32 %v136_v18, %v161_v55  ;;  %v169_v58 = vsub.f32 %v139_v46, %v165_v56  ;;  %v818_v55 = vpack.c.bf16 %v1119_v8, %v1111_v6  ;;  %v1007_v56 = vmov 0.0|0.0  }
 0x146   : > { %v181_v61 = vpop.permute.xlu1 %180  ;;  %817 = vmatprep.subr.bf16.mxu0 %v1007_v56  ;;  %823 = vmatprep.subr.bf16.mxu1 %v1007_v56 }
 0x147   : > { %v170_v59 = vmul.f32 1.442695, %v168_v57  ;;  %v172_v60 = vmul.f32 1.442695, %v169_v58  ;;  %819 = vmatpush3.bf16.msra.mxu0 %v818_v55  ;;  %v821_v57 = vpack.c.bf16 %v1129_v10, %v1124_v9  ;;  %v1009_v58 = vmov 0.0  }
 0x148   : > { %757 = vmatprep.mubr.msk.f32.mxu0 %vm1008_vm4, %v1009_v58  ;;  %820 = vmatprep.subr.bf16.mxu0 %v1007_v56 }
 0x149   : > { %926 = vpow2.f32 %v170_v59  ;;  %784 = vmatprep.mubr.msk.f32.mxu1 %vm1008_vm4, %v1009_v58 }
 0x14a   : > { %928 = vpow2.f32 %v172_v60 }
 0x14b   : > { %822 = vmatpush3.bf16.msra.mxu0 %v821_v57 }
 0x14c   : > { %841 = vmatprep.subr.bf16.mxu0 %v1007_v56 }
 0x14e   : > { %758 = vmatmul.mubr.msk.f32.vlgmr.msra.gmra.mrb[0].mxu0 %vm267_vm5, %v978_v19  ;;  %v827_v19 = vpack.c.bf16 %v1171_v21, %v1166_v20 }
 0x14f   : > { %803 = vmatprep.mubr.msk.f32.mxu0 %vm1008_vm4, %v1009_v58 }
 0x153   : > { %v927_v63 = vpop.eup %926 }
 0x154   : > { %v191_v47 = vmul.f32 %v927_v63, %v181_v61  ;;  %v929_v49 = vpop.eup %928 }
 0x155   : > { %v192_v51 = vmul.f32 %v929_v49, %v188_v50  ;;  %v824_v50 = vpack.c.bf16 %v1161_v17, %v1156_v16 }
 0x156   : > { %196 = vperm.xlu1 %924, %v191_v47  }
 0x157   : > { %825 = vmatpush3.bf16.msra.mxu1 %v824_v50 }
 0x158   : > { %826 = vmatprep.subr.bf16.mxu1 %v1007_v56 }
 0x15a   : > { %199 = vperm.xlu1 %924, %v192_v51  }
 0x15b   : > { %828 = vmatpush3.bf16.msra.mxu1 %v827_v19  ;;  %v839_v19 = vpack.c.bf16 %v1211_v29, %v1206_v28 }
 0x15c   : > { %829 = vmatprep.subr.bf16.mxu1 %v1007_v56 }
 0x1d5   : > { %v197_v53 = vpop.permute.xlu1 %196 }
 0x1d6   : > { %v204_v0 = vrot.slane %v197_v53, %v1318_v41 }
 0x1d9   : > { %v200_v54 = vpop.permute.xlu1 %199 }
 0x1da   : > { %v208_v48 = vrot.slane %v200_v54, %v1318_v41 }
 0x1dc   : > { %v209_v18 = vsel %vm150_vm2, %v208_v48, %v204_v0 }
 0x1dd   : > { %v211_v46 = vsel %vm153_vm3, %v209_v18, 0.0 }
 0x1de   : > { %212 = vadd.xlane.f32.xlu1 %v211_v46 }
 0x1ef   : > { %463 = vrot.lane.b32.xlu1 %v990_v43, %s1012_s18  ;;  %v851_v43 = vpack.c.bf16 %v1256_v38, %v1251_v37 }
 0x26b   : > { %v213_v0 = vpop.xlane.xlu1 %212 }
 0x26c   : > { %930 = vrcp.f32 %v213_v0 }
 0x276   : > { %v931_v59 = vpop.eup %930 }
 0x277   : > { %v219_v60 = vrot.slane %v931_v59, %v1305_v52  ;;  %v223_v63 = vrot.slane %v931_v59, %v1313_v62  ;;  %v830_v52 = vpack.c.bf16 %v1181_v23, %v1176_v22  ;;  %v833_v62 = vpack.c.bf16 %v1191_v25, %v1186_v24 }
 0x279   : > { %v226_v61 = vmul.f32 %v219_v60, %v191_v47  ;;  %v227_v49 = vmul.f32 %v223_v63, %v192_v51  ;;  %831 = vmatpush3.bf16.msra.mxu1 %v830_v52  ;;  %v836_v47 = vpack.c.bf16 %v1201_v27, %v1196_v26 }
 0x27a   : > { %832 = vmatprep.subr.bf16.mxu1 %v1007_v56 }
 0x27b   : > { %231 = vperm.xlu0 %925, %v226_v61   ;;  %v337_v61 = vpop.f32.mrb[0].mxu0 }
 0x27c   : > { %v759_v50 = vpop.f32.mrb[1].mxu0 }
 0x27d   : > { %834 = vmatpush3.bf16.msra.mxu1 %v833_v62 }
 0x27e   : > { %835 = vmatprep.subr.bf16.mxu1 %v1007_v56 }
 0x27f   : > { %234 = vperm.xlu0 %925, %v227_v49  }
 0x281   : > { %837 = vmatpush3.bf16.msra.mxu1 %v836_v47 }
 0x282   : > { %838 = vmatprep.subr.bf16.mxu1 %v1007_v56 }
 0x285   : > { %840 = vmatpush3.bf16.msra.mxu1 %v839_v19 }
 0x2fa   : > { %v232_v51 = vpop.permute.xlu0 %231 }
 0x2fb   : > { %v251_v53 = vmul.f32 %v232_v51, %v1096_v3  ;;  %v239_v46 = vrot.slane %v232_v51, %v1318_v41 }
 0x2fd   : > { %v253_v54 = vsel %vm133_vm1, %v251_v53, 0.0 }
 0x2fe   : > { %v254_v48 = vrot.slane %v253_v54, 4  ;;  %v235_v18 = vpop.permute.xlu0 %234 }
 0x2ff   : > { %v243_v55 = vrot.slane %v235_v18, %v1318_v41  ;;  %v252_v57 = vmul.f32 %v235_v18, %v1101_v4 }
 0x300   : > { %v255_v0 = vadd.f32 %v254_v48, %v253_v54 }
 0x301   : > { %v244_v59 = vsel %vm150_vm2, %v243_v55, %v239_v46  ;;  %v260_v60 = vsel %vm133_vm1, %v252_v57, 0.0 }
 0x302   : > { %v256_v63 = vrot.slane %v255_v0, 2  ;;  %v261_v49 = vrot.slane %v260_v60, 4  ;;  %248 = vst.msk [vmem:[%s247_s15] sm:$0x3] %vm153_vm3, %v244_v59 }
 0x304   : > { %v257_v41 = vadd.f32 %v256_v63, %v255_v0  ;;  %v262_v52 = vadd.f32 %v261_v49, %v260_v60 }
 0x306   : > { %v263_v62 = vrot.slane %v262_v52, 2  ;;  %v258_v51 = vrot.slane %v257_v41, 1 }
 0x308   : > { %v264_v47 = vadd.f32 %v263_v62, %v262_v52  ;;  %v259_v54 = vadd.f32 %v258_v51, %v257_v41  ;;  %v842_v51 = vpack.c.bf16 %v1226_v32, %v1221_v31 }
 0x30a   : > { %v265_v53 = vrot.slane %v264_v47, 1  ;;  %843 = vmatpush3.bf16.msra.mxu0 %v842_v51  ;;  %v854_v51 = vpack.c.bf16 %v1139_v12, %v1134_v11 }
 0x30b   : > { %844 = vmatprep.subr.bf16.mxu0 %v1007_v56 }
 0x30c   : > { %v266_v48 = vadd.f32 %v265_v53, %v264_v47  ;;  %v845_v53 = vpack.c.bf16 %v1236_v34, %v1231_v33 }
 0x30e   : > { %v343_v18 = vsel %vm150_vm2, %v266_v48, %v259_v54  ;;  %846 = vmatpush3.bf16.msra.mxu0 %v845_v53  ;;  %v848_v54 = vpack.c.bf16 %v1246_v36, %v1241_v35  ;;  %v857_v53 = vpack.c.bf16 %v1151_v15, %v1144_v13 }
 0x30f   : > { %344 = vrot.lane.b32.xlu0 %v343_v18, %s1010_s16  ;;  %847 = vmatprep.subr.bf16.mxu0 %v1007_v56 }
 0x312   : > { %849 = vmatpush3.bf16.msra.mxu0 %v848_v54 }
 0x313   : > { %348 = vrot.lane.b32.xlu0 %v998_v45, %s1011_s17  ;;  %850 = vmatprep.subr.bf16.mxu0 %v1007_v56 }
 0x316   : > { %852 = vmatpush3.bf16.msra.mxu0 %v851_v43 }
 0x317   : > { %853 = vmatprep.subr.bf16.mxu0 %v1007_v56 }
 0x381   : > { %v345_v46 = vpop.permute.xlu0 %344 }
 0x382   : > { %v351_v55 = vsel %vm267_vm5, %v337_v61, %v345_v46  ;;  %v464_v46 = vpop.permute.xlu1 %463 }
 0x385   : > { %v349_v57 = vpop.permute.xlu0 %348 }
 0x386   : > { %v353_v0 = vsel %vm352_vm6, %v351_v55, %v349_v57 }
 0x387   : > { %785 = vmatmul.mubr.msk.f32.vlgmr.msra.gmra.mrb[0].mxu1 %vm360_vm7, %v353_v0 }
 0x45a   : > { %v430_v59 = vpop.f32.mrb[0].mxu1 }
 0x45b   : > { %v431_v60 = vadd.f32 %v1216_v30, %v430_v59  ;;  %v786_v63 = vpop.f32.mrb[1].mxu1 }
 0x45d   : > { %932 = vtanh.f32 %v431_v60  ;;  %v710_v50 = vmul.f32 -1.442695, %v431_v60 }
 0x45f   : > { %934 = vpow2.f32 %v710_v50 }
 0x467   : > { %v933_v49 = vpop.eup %932 }
 0x468   : > { %443 = vrot.lane.b32.xlu0 %v933_v49, %s1012_s18 }
 0x469   : > { %v935_v45 = vpop.eup %934 }
 0x46a   : > { %v437_v19 = vadd.f32 1.0, %v935_v45 }
 0x46c   : > { %936 = vrcp.f32 %v437_v19 }
 0x476   : > { %v937_v41 = vpop.eup %936 }
 0x477   : > { %v441_v62 = vmul.f32 %v994_v44, %v937_v41 }
 0x4da   : > { %v444_v61 = vpop.permute.xlu0 %443 }
 0x4db   : > { %v446_v52 = vmul.f32 %v937_v41, %v444_v61 }
 0x4dd   : > { %448 = vrot.lane.b32.xlu0 %v446_v52, %s1010_s16 }
 0x54f   : > { %v449_v47 = vpop.permute.xlu0 %448 }
 0x550   : > { %v1391_v44 = vadd.f32 %v449_v47, %v441_v62  }
 0x552   : > { %938 = vtanh.f32 %v1391_v44 }
 0x55c   : > { %v939_v48 = vpop.eup %938 }
 0x55d   : > { %454 = vrot.lane.b32.xlu0 %v939_v48, %s1012_s18 }
 0x5cf   : > { %v455_v18 = vpop.permute.xlu0 %454 }
 0x5d0   : > { %v457_v45 = vmul.f32 %v937_v41, %v455_v18  }
 0x5d2   : > { %459 = vrot.lane.b32.xlu0 %v457_v45, %s1010_s16 }
 0x644   : > { %v460_v55 = vpop.permute.xlu0 %459 }
 0x645   : > { %v466_v57 = vsel %vm267_vm5, %v460_v55, %v464_v46 }
 0x646   : > { %804 = vmatmul.mubr.msk.f32.vlgmr.msra.gmra.mrb[2].mxu0 %vm352_vm6, %v466_v57 }
 0x647   : > { %814 = vmatprep.mubr.msk.f32.mxu0 %vm1008_vm4, %v1009_v58  ;;  %855 = vmatpush3.bf16.msra.mxu0 %v854_v51 }
 0x648   : > { %856 = vmatprep.subr.bf16.mxu0 %v1007_v56  ;;  %v654_v56 = vld [vmem:[%s653_s0] sm:$0x3] }
 0x64b   : > { %858 = vmatpush3.bf16.msra.mxu0 %v857_v53 }
 0x719   : > { %v542_v0 = vpop.f32.mrb[2].mxu0 }
 0x71a   : > { %v543_v59 = vadd.f32 %v1261_v39, %v542_v0  ;;  %v805_v60 = vpop.f32.mrb[3].mxu0 }
 0x71c   : > { %940 = vtanh.f32 %v543_v59  ;;  %v713_v49 = vmul.f32 -1.442695, %v543_v59 }
 0x71e   : > { %942 = vpow2.f32 %v713_v49 }
 0x726   : > { %v941_v63 = vpop.eup %940 }
 0x727   : > { %555 = vrot.lane.b32.xlu0 %v941_v63, %s1012_s18 }
 0x728   : > { %v943_v50 = vpop.eup %942 }
 0x729   : > { %v549_v19 = vadd.f32 1.0, %v943_v50 }
 0x72b   : > { %944 = vrcp.f32 %v549_v19 }
 0x735   : > { %v945_v41 = vpop.eup %944 }
 0x736   : > { %v553_v62 = vmul.f32 %v986_v42, %v945_v41 }
 0x799   : > { %v556_v61 = vpop.permute.xlu0 %555 }
 0x79a   : > { %v558_v52 = vmul.f32 %v945_v41, %v556_v61 }
 0x79c   : > { %560 = vrot.lane.b32.xlu0 %v558_v52, %s1010_s16 }
 0x80e   : > { %v561_v47 = vpop.permute.xlu0 %560 }
 0x80f   : > { %v563_v42 = vadd.f32 %v561_v47, %v553_v62  }
 0x811   : > { %946 = vtanh.f32 %v563_v42 }
 0x81b   : > { %v947_v54 = vpop.eup %946 }
 0x81c   : > { %566 = vrot.lane.b32.xlu0 %v947_v54, %s1012_s18 }
 0x88e   : > { %v567_v48 = vpop.permute.xlu0 %566 }
 0x88f   : > { %v569_v43 = vmul.f32 %v945_v41, %v567_v48  }
 0x891   : > { %577 = vrot.lane.b32.xlu0 %v569_v43, %s1010_s16 }
 0x903   : > { %v578_v41 = vpop.permute.xlu0 %577  }
 0x904   : > { %815 = vmatmul.mubr.msk.f32.vlgmr.msra.gmra.mrb[4].mxu0 %vm267_vm5, %v578_v41 }
 0x9d7   : > { %v647_v18 = vpop.f32.mrb[4].mxu0 }
 0x9d8   : > { %v648_v46 = vadd.f32 %v1266_v40, %v647_v18  ;;  %v816_v55 = vpop.f32.mrb[5].mxu0 }
 0x9da   : > { %652 = vst.msk [vmem:[%s651_s1] sm:$0x3] %vm133_vm1, %v648_v46  ;;  %v655_v57 = vadd.f32 %v654_v56, %v648_v46 }
 0x9dc   : > { %v656_v0 = vsel %vm133_vm1, %v655_v57, -inf }
 0x9dd   : > { %657 = vmax.xlane.f32.xlu0 %v656_v0 }
 0xa6a   : > { %v658_v59 = vpop.xlane.xlu0 %657 }
 0xa6b   : > { %vm659_vm8 = vcmp.eq.f32.partialorder %v655_v57, %v658_v59 }
 0xa6c   : > { %v660_v60 = vsel %vm659_vm8, %v81_v14, 32.0 }
 0xa6d   : > { %v661_v63 = vsel %vm133_vm1, %v660_v60, inf }
 0xa6e   : > { %662 = vmin.xlane.f32.xlu1 %v661_v63 }
 0xaf7   :  { %90 = sbr.rel (!%p88_p0) target bundleno = 15 (0xf), region = 86 }
 0xafb   : > { %v663_v49 = vpop.xlane.xlu1 %662 }
 0xafc   : > { %vm664_vm9 = vcmp.eq.f32.partialorder %v81_v14, %v663_v49 }
 0xafd   : > { %v716_v19 = vsel %vm664_vm9, 1.0, %v1009_v58  }

</bundles_post_ra>
